<compile_context>
chip_gen: v7x
topology: tpu7x:2x2x1
jax: 0.10.0
libtpu: 0.0.40
codegen_flags: <defaults>
</compile_context>

<pallas_src>
import jax
import jax.numpy as jnp
from jax import lax
from jax.experimental import pallas as pl
from jax.experimental.pallas import tpu as pltpu


_UNROLL_T = 16       # fully unroll the wavefront when T <= this
_FORI_UNROLL = 8     # partial unroll of the steady-state fori_loop
_BF16 = jnp.bfloat16


def _vmem_limit_bytes():
  # Default scoped VMEM is ~16 MiB (v5e) / ~32 MiB (v6e/v7x), far below
  # physical; raise it with headroom so larger fused B*T tiles fit.
  try:
    return int(pltpu.get_tpu_info().vmem_capacity_bytes * 3 // 4)
  except Exception:  # pylint: disable=broad-except
    return 64 * 1024 * 1024


def _lstm_cell(g, h_prev, c_prev, m, hn):
  """One LSTM cell. g: (Bt, 4*hn) pre-activations, gate order [i | f | o | g]."""
  sg = jax.nn.sigmoid(g[:, :3 * hn])          # one contiguous sigmoid slab
  i_g = sg[:, 0 * hn:1 * hn]
  f_g = sg[:, 1 * hn:2 * hn]
  o_g = sg[:, 2 * hn:3 * hn]
  c_new = f_g * c_prev + i_g * jnp.tanh(g[:, 3 * hn:])
  h_new = o_g * jnp.tanh(c_new)
  keep = m > 0.0                              # single vsel instead of 2 blends
  h_out = m * h_new                           # packed-seq: zero output past len
  return (h_out,
          jnp.where(keep, h_new, h_prev),     # freeze state past length
          jnp.where(keep, c_new, c_prev))


# ----------------------------------------------------------------------------
# Fused kernel: encoder LSTM stack -> MLP -> decoder LSTM stack (one batch tile)
# ----------------------------------------------------------------------------
def _make_fused_kernel(n_layers):
  L = n_layers

  def kernel(*refs):
    it = iter(refs)
    # ---- inputs ----
    x_ref    = next(it)                        # (T, Bt, Din)
    mask_ref = next(it)                        # (T, Bt, 1)  1.0 while t < len[b]
    h0e_ref  = next(it)                        # (L, Bt, H)
    c0e_ref  = next(it)                        # (L, Bt, H)
    h0d_ref  = next(it)                        # (L, Bt, D)
    c0d_ref  = next(it)                        # (L, Bt, D)
    enc_w = [(next(it), next(it), next(it)) for _ in range(L)]
    dec_w = [(next(it), next(it), next(it)) for _ in range(L)]
    w1t, bm1, w2t, bm2, w3t, bm3, w4t, bm4 = [next(it) for _ in range(8)]
    # ---- outputs ----
    y_ref   = next(it)                         # (T, Bt, D)
    hTd_ref = next(it)                         # (L, Bt, D)
    cTd_ref = next(it)                         # (L, Bt, D)
    # ---- VMEM scratch (per batch tile) ----
    gates_e = next(it)                         # (T, Bt, 4H) hoisted enc-l0 gates
    enc_seq = next(it)                         # (T, Bt, H)  top-encoder output
    gates_d = next(it)                         # (T, Bt, 4D) hoisted dec-l0 gates

    T  = x_ref.shape[0]
    Bt = x_ref.shape[1]
    Din = x_ref.shape[2]
    H  = h0e_ref.shape[2]
    D  = h0d_ref.shape[2]

    def hoist_layer0(x2d_f32, wih_ref, b_ref, gates_ref, hn):
      # One big (T*Bt, K) @ (K, 4*hn) MXU matmul + bias for the whole sequence.
      g = jnp.dot(x2d_f32.astype(_BF16), wih_ref[...],
                  preferred_element_type=jnp.float32) + b_ref[...]
      gates_ref[...] = g.reshape(T, Bt, 4 * hn)

    def run_stack(layer_w, gates0_ref, h_init, c_init, out_ref, hn):
      """Wavefronted L-layer masked LSTM over T steps.

      Layer l at time t and layer l+1 at time t-1 run in the same sweep; their
      recurrent matmuls are independent, so the serial depth is T+L-1 cells
      instead of L*T.  Packed-sequence semantics: outputs zeroed and (h, c)
      frozen past each length (valid for lengths >= 1, asserted in wrapper).
      """
      whh = [w[1][...] for w in layer_w]                   # (hn,4hn) bf16
      wih = [None] + [w[0][...] for w in layer_w[1:]]      # (hn,4hn) bf16
      bb  = [None] + [w[2][...] for w in layer_w[1:]]      # (1,4hn)  f32

      def cell(l, t, x_in, h_prev, c_prev):
        if l == 0:
          g = gates0_ref[t] + jnp.dot(h_prev.astype(_BF16), whh[0],
                                      preferred_element_type=jnp.float32)
        else:
          g = (jnp.dot(x_in.astype(_BF16), wih[l],
                       preferred_element_type=jnp.float32)
               + jnp.dot(h_prev.astype(_BF16), whh[l],
                         preferred_element_type=jnp.float32)
               + bb[l])
        return _lstm_cell(g, h_prev, c_prev, mask_ref[t], hn)

      def sweep(s, h, c, handoff):
        # One wavefront step.  For python-int s the ramp bounds are applied;
        # for a traced s (steady-state fori) every layer is known-valid.
        new_handoff = list(handoff)
        for l in range(L):
          t = s - l
          if isinstance(s, int) and not (0 <= t < T):
            continue
          x_in = handoff[l - 1] if l else None
          h_out, h[l], c[l] = cell(l, t, x_in, h[l], c[l])
          new_handoff[l] = h_out
          if l == L - 1:
            out_ref[t] = h_out
        return h, c, new_handoff

      h = [h_init[l] for l in range(L)]
      c = [c_init[l] for l in range(L)]
      handoff = [jnp.zeros((Bt, hn), jnp.float32)] * L     # never read invalid

      if T <= _UNROLL_T:
        for s in range(T + L - 1):
          h, c, handoff = sweep(s, h, c, handoff)
      else:
        for s in range(L - 1):                             # ramp-up
          h, c, handoff = sweep(s, h, c, handoff)

        def body(s, carry):
          hh, cc, ho = (list(u) for u in carry)
          hh, cc, ho = sweep(s, hh, cc, ho)
          return tuple(hh), tuple(cc), tuple(ho)

        carry = lax.fori_loop(L - 1, T, body,
                              (tuple(h), tuple(c), tuple(handoff)),
                              unroll=_FORI_UNROLL)
        h, c, handoff = (list(u) for u in carry)
        for s in range(T, T + L - 1):                      # ramp-down
          h, c, handoff = sweep(s, h, c, handoff)
      return h, c

    # ------------------- encoder LSTM stack -------------------
    x2 = x_ref[...].reshape(T * Bt, Din)                   # f32 reshape (no-op)
    hoist_layer0(x2, enc_w[0][0], enc_w[0][2], gates_e, H)
    run_stack(enc_w, gates_e,
              [h0e_ref[l] for l in range(L)],
              [c0e_ref[l] for l in range(L)],
              enc_seq, H)
    # encoder final states are not returned (forward() returns hidden1 as-is)

    # ------------------- bottleneck MLP (eval mode) -------------------
    # relu -> L1(H,2E) -> relu -> L2(2E,E) -> relu -> L3(E,2E) -> relu
    #      -> L4(2E,H) -> relu    (dropouts are identity in eval mode),
    # fused directly into the decoder layer-0 input projection.
    z = jnp.maximum(enc_seq[...].reshape(T * Bt, H), 0.0)
    for wt, bt in ((w1t, bm1), (w2t, bm2), (w3t, bm3), (w4t, bm4)):
      z = jnp.maximum(
          jnp.dot(z.astype(_BF16), wt[...],
                  preferred_element_type=jnp.float32) + bt[...], 0.0)
    hoist_layer0(z, dec_w[0][0], dec_w[0][2], gates_d, D)

    # ------------------- decoder LSTM stack -------------------
    h_fin, c_fin = run_stack(dec_w, gates_d,
                             [h0d_ref[l] for l in range(L)],
                             [c0d_ref[l] for l in range(L)],
                             y_ref, D)
    for l in range(L):
      hTd_ref[l] = h_fin[l]
      cTd_ref[l] = c_fin[l]

  return kernel


def _fused_forward(params, x_tm, mask_tm, h1, c1, h2, c2, n_layers, b_tile):
  T, b_pad, din = x_tm.shape
  L, _, H = h1.shape
  D = h2.shape[2]
  Bt = b_tile
  assert b_pad % Bt == 0

  flat = []
  for w in params["enc_lstm"]:
    flat += list(w)
  for w in params["dec_lstm"]:
    flat += list(w)
  mp = params["mlp"]
  flat += [mp["w1t"], mp["b1"], mp["w2t"], mp["b2"],
           mp["w3t"], mp["b3"], mp["w4t"], mp["b4"]]

  bmap = lambda i: (0, i, 0)     # tile the batch axis
  wmap = lambda i: (0, 0)        # weights resident across grid steps
  in_specs = ([pl.BlockSpec((T, Bt, din), bmap),
               pl.BlockSpec((T, Bt, 1), bmap),
               pl.BlockSpec((L, Bt, H), bmap),
               pl.BlockSpec((L, Bt, H), bmap),
               pl.BlockSpec((L, Bt, D), bmap),
               pl.BlockSpec((L, Bt, D), bmap)]
              + [pl.BlockSpec(w.shape, wmap) for w in flat])
  out_specs = (pl.BlockSpec((T, Bt, D), bmap),
               pl.BlockSpec((L, Bt, D), bmap),
               pl.BlockSpec((L, Bt, D), bmap))

  return pl.pallas_call(
      _make_fused_kernel(n_layers),
      out_shape=(jax.ShapeDtypeStruct((T, b_pad, D), jnp.float32),
                 jax.ShapeDtypeStruct((L, b_pad, D), jnp.float32),
                 jax.ShapeDtypeStruct((L, b_pad, D), jnp.float32)),
      grid=(b_pad // Bt,),
      in_specs=in_specs,
      out_specs=out_specs,
      scratch_shapes=[
          pltpu.VMEM((T, Bt, 4 * H), jnp.float32),   # hoisted encoder-l0 gates
          pltpu.VMEM((T, Bt, H), jnp.float32),       # top encoder layer output
          pltpu.VMEM((T, Bt, 4 * D), jnp.float32),   # hoisted decoder-l0 gates
      ],
      compiler_params=pltpu.CompilerParams(
          dimension_semantics=("parallel",),
          vmem_limit_bytes=_vmem_limit_bytes()),
  )(x_tm, mask_tm, h1, c1, h2, c2, *flat)


# ----------------------------------------------------------------------------
# Parameter init (deterministic, mirrors the PyTorch module shapes)
# ----------------------------------------------------------------------------
def init_params(key, input_dim, hidden_dim, encoder_dim, n_layers):
  """LSTM weights stored transposed (bf16) with gate rows reordered from
  PyTorch's [i, f, g, o] to [i, f, o, g]; b_ih + b_hh pre-summed (f32);
  MLP weights transposed (bf16), biases f32."""
  def unif(k, shape, scale):
    return jax.random.uniform(k, shape, jnp.float32, -scale, scale)

  def reorder_gates(w, h):
    # rows [i | f | g | o]  ->  [i | f | o | g]
    return jnp.concatenate([w[:2 * h], w[3 * h:4 * h], w[2 * h:3 * h]], axis=0)

  keys = iter(jax.random.split(key, 8 * n_layers + 8))
  params = {"enc_lstm": [], "dec_lstm": []}

  def make_lstm(hid, din0, store):
    k = hid ** -0.5
    for l in range(n_layers):
      din = din0 if l == 0 else hid
      w_ih = unif(next(keys), (4 * hid, din), k)
      w_hh = unif(next(keys), (4 * hid, hid), k)
      b_ih = unif(next(keys), (4 * hid,), k)
      b_hh = unif(next(keys), (4 * hid,), k)
      store.append((
          reorder_gates(w_ih, hid).T.astype(_BF16),           # (din, 4*hid)
          reorder_gates(w_hh, hid).T.astype(_BF16),           # (hid, 4*hid)
          reorder_gates((b_ih + b_hh)[:, None], hid).T,       # (1,   4*hid) f32
      ))

  make_lstm(hidden_dim, input_dim, params["enc_lstm"])   # nn.LSTM(in, H, L)
  make_lstm(input_dim, hidden_dim, params["dec_lstm"])   # nn.LSTM(H, in, L)

  e = encoder_dim
  def lin(k_w, k_b, fan_in, fan_out):
    s = fan_in ** -0.5
    return (unif(k_w, (fan_out, fan_in), s).T.astype(_BF16),
            unif(k_b, (fan_out,), s)[None, :])

  w1t, b1 = lin(next(keys), next(keys), hidden_dim, 2 * e)
  w2t, b2 = lin(next(keys), next(keys), 2 * e, e)
  w3t, b3 = lin(next(keys), next(keys), e, 2 * e)
  w4t, b4 = lin(next(keys), next(keys), 2 * e, hidden_dim)
  params["mlp"] = dict(w1t=w1t, b1=b1, w2t=w2t, b2=b2,
                       w3t=w3t, b3=b3, w4t=w4t, b4=b4)
  return params


# ----------------------------------------------------------------------------
# Forward pass (== VecRnnAE.forward, eval mode)
# ----------------------------------------------------------------------------
def vec_rnn_ae_forward(params, x, x_lengths, hidden1, hidden2,
                       hidden_dim, n_layers, t_bucket=8):
  lengths_py = [int(v) for v in x_lengths]
  assert min(lengths_py) >= 1, "pack_padded_sequence requires all lengths >= 1"
  assert hidden1[0].shape[2] == hidden_dim
  B, _, din = x.shape

  # pad_packed_sequence truncates to max length; bucket T so different max
  # lengths reuse a cached kernel (masked steps past the real max are inert).
  T = max(lengths_py)
  T_pad = -(-T // t_bucket) * t_bucket
  x = x[:, :T, :]
  if T_pad > T:
    x = jnp.pad(x, ((0, 0), (0, T_pad - T), (0, 0)))

  # batch padding: multiple of 8 sublanes; beyond 128 rows we tile at 128 and
  # run a parallel grid over batch tiles (megacore + MXU feeding).
  B8 = max(8, -(-B // 8) * 8)
  Bt = min(B8, 128)
  B_pad = -(-B8 // Bt) * Bt
  pad_b = B_pad - B

  lengths = jnp.asarray(lengths_py, jnp.int32)
  if pad_b:
    x = jnp.pad(x, ((0, pad_b), (0, 0), (0, 0)))
    lengths = jnp.pad(lengths, (0, pad_b))        # mask==0 -> padded rows inert
  mask = (jnp.arange(T_pad)[None, :] < lengths[:, None]).astype(jnp.float32)

  # time-major 3-D layout (T, B_pad, feat): batch axis is tileable by the grid.
  x_tm = jnp.transpose(x, (1, 0, 2))
  mask_tm = jnp.transpose(mask, (1, 0))[:, :, None]

  h1, c1 = hidden1
  h2, c2 = hidden2
  if pad_b:
    # NOTE: padded batch rows keep mask==0 and zero-padded h0/c0; any nonzero
    # init there would surface in hTd/cTd before the [:B] slice below.
    pad3 = ((0, 0), (0, pad_b), (0, 0))
    h1, c1, h2, c2 = (jnp.pad(a, pad3) for a in (h1, c1, h2, c2))

  y_tm, hTd, cTd = _fused_forward(params, x_tm, mask_tm, h1, c1, h2, c2,
                                  n_layers, Bt)

  lstm_dec = jnp.transpose(y_tm, (1, 0, 2))[:B, :T]
  hidden2_out = (hTd[:, :B], cTd[:, :B])
  # PyTorch's forward returns the *input* hidden1 unchanged.
  return lstm_dec, hidden1, hidden2_out


# ----------------------------------------------------------------------------
# Pure-JAX (non-Pallas) reference for correctness checking (same bf16 casts)
# ----------------------------------------------------------------------------
def _reference_forward(params, x, x_lengths, hidden1, hidden2,
                       hidden_dim, n_layers):
  lengths_py = [int(v) for v in x_lengths]
  B = x.shape[0]
  T = max(lengths_py)
  x = x[:, :T, :]
  lengths = jnp.asarray(lengths_py, jnp.int32)
  mask = (jnp.arange(T)[None, :] < lengths[:, None]).astype(jnp.float32)

  def lstm_stack(seq, h0, c0, layer_params, hn):
    inp = seq
    h_fins, c_fins = [], []
    for l, (wih, whh, b) in enumerate(layer_params):
      h, c = h0[l], c0[l]
      ys = []
      for t in range(T):
        g = (jnp.dot(inp[:, t].astype(_BF16), wih,
                     preferred_element_type=jnp.float32)
             + jnp.dot(h.astype(_BF16), whh,
                       preferred_element_type=jnp.float32) + b)
        sg = jax.nn.sigmoid(g[:, :3 * hn])
        i, f, o = sg[:, :hn], sg[:, hn:2 * hn], sg[:, 2 * hn:]
        c_new = f * c + i * jnp.tanh(g[:, 3 * hn:])
        h_new = o * jnp.tanh(c_new)
        m = mask[:, t][:, None]
        ys.append(m * h_new)
        h = jnp.where(m > 0, h_new, h)
        c = jnp.where(m > 0, c_new, c)
      inp = jnp.stack(ys, axis=1)
      h_fins.append(h)
      c_fins.append(c)
    return inp, jnp.stack(h_fins), jnp.stack(c_fins)

  enc_seq, _, _ = lstm_stack(x, hidden1[0], hidden1[1],
                             params["enc_lstm"], hidden_dim)
  mp = params["mlp"]
  z = jnp.maximum(enc_seq.reshape(B * T, hidden_dim), 0.0)
  for wt, bt in ((mp["w1t"], mp["b1"]), (mp["w2t"], mp["b2"]),
                 (mp["w3t"], mp["b3"]), (mp["w4t"], mp["b4"])):
    z = jnp.maximum(jnp.dot(z.astype(_BF16), wt,
                            preferred_element_type=jnp.float32) + bt, 0.0)
  dec_in = z.reshape(B, T, hidden_dim)
  d = hidden2[0].shape[2]
  dec_seq, hT, cT = lstm_stack(dec_in, hidden2[0], hidden2[1],
                               params["dec_lstm"], d)
  return dec_seq, hidden1, (hT, cT)


# ----------------------------------------------------------------------------
if __name__ == "__main__":
  INPUT_DIM = 8
  HIDDEN_DIM = 32
  ENCODER_DIM = 16
  N_LAYERS = 2
  B, T = 2, 8

  key = jax.random.PRNGKey(0)
  k_param, k_x = jax.random.split(key)
  params = init_params(k_param, INPUT_DIM, HIDDEN_DIM, ENCODER_DIM, N_LAYERS)

  x = jax.random.normal(k_x, (B, T, INPUT_DIM), jnp.float32)
  x_lengths = [8, 5]                                   # variable-length batch

  # init_hidden()
  hidden1 = (jnp.zeros((N_LAYERS, B, HIDDEN_DIM), jnp.float32),
             jnp.zeros((N_LAYERS, B, HIDDEN_DIM), jnp.float32))
  hidden2 = (jnp.zeros((N_LAYERS, B, INPUT_DIM), jnp.float32),
             jnp.zeros((N_LAYERS, B, INPUT_DIM), jnp.float32))

  lstm_dec, h1_out, h2_out = vec_rnn_ae_forward(
      params, x, x_lengths, hidden1, hidden2, HIDDEN_DIM, N_LAYERS)
  jax.block_until_ready((lstm_dec, h1_out, h2_out))

  assert lstm_dec.shape == (B, max(x_lengths), INPUT_DIM)
  assert h1_out[0].shape == (N_LAYERS, B, HIDDEN_DIM)
  assert h2_out[0].shape == (N_LAYERS, B, INPUT_DIM)

  # cross-check the fused Pallas kernel against a pure-JAX reference that uses
  # the same bf16 weight/activation quantization (so the tolerance can be tight
  # and only covers accumulation-order / transcendental differences).
  ref_dec, _, (ref_h2, ref_c2) = _reference_forward(
      params, x, x_lengths, hidden1, hidden2, HIDDEN_DIM, N_LAYERS)
  assert jnp.allclose(lstm_dec, ref_dec, rtol=5e-3, atol=5e-3), "output mismatch"
  assert jnp.allclose(h2_out[0], ref_h2, rtol=5e-3, atol=5e-3), "h2 mismatch"
  assert jnp.allclose(h2_out[1], ref_c2, rtol=5e-3, atol=5e-3), "c2 mismatch"

  print("KERNEL_OK")
</pallas_src>

<mosaic_0001>
module attributes {stable_mosaic.version = 11 : i64} {
  func.func @kernel(%arg0: i32, %arg1: memref<8x8x8xf32, #tpu.memory_space<vmem>>, %arg2: memref<8x8x1xf32, #tpu.memory_space<vmem>>, %arg3: memref<2x8x32xf32, #tpu.memory_space<vmem>>, %arg4: memref<2x8x32xf32, #tpu.memory_space<vmem>>, %arg5: memref<2x8x8xf32, #tpu.memory_space<vmem>>, %arg6: memref<2x8x8xf32, #tpu.memory_space<vmem>>, %arg7: memref<8x128xbf16, #tpu.memory_space<vmem>>, %arg8: memref<32x128xbf16, #tpu.memory_space<vmem>>, %arg9: memref<1x128xf32, #tpu.memory_space<vmem>>, %arg10: memref<32x128xbf16, #tpu.memory_space<vmem>>, %arg11: memref<32x128xbf16, #tpu.memory_space<vmem>>, %arg12: memref<1x128xf32, #tpu.memory_space<vmem>>, %arg13: memref<32x32xbf16, #tpu.memory_space<vmem>>, %arg14: memref<8x32xbf16, #tpu.memory_space<vmem>>, %arg15: memref<1x32xf32, #tpu.memory_space<vmem>>, %arg16: memref<8x32xbf16, #tpu.memory_space<vmem>>, %arg17: memref<8x32xbf16, #tpu.memory_space<vmem>>, %arg18: memref<1x32xf32, #tpu.memory_space<vmem>>, %arg19: memref<32x32xbf16, #tpu.memory_space<vmem>>, %arg20: memref<1x32xf32, #tpu.memory_space<vmem>>, %arg21: memref<32x16xbf16, #tpu.memory_space<vmem>>, %arg22: memref<1x16xf32, #tpu.memory_space<vmem>>, %arg23: memref<16x32xbf16, #tpu.memory_space<vmem>>, %arg24: memref<1x32xf32, #tpu.memory_space<vmem>>, %arg25: memref<32x32xbf16, #tpu.memory_space<vmem>>, %arg26: memref<1x32xf32, #tpu.memory_space<vmem>>, %arg27: memref<8x8x8xf32, #tpu.memory_space<vmem>>, %arg28: memref<2x8x8xf32, #tpu.memory_space<vmem>>, %arg29: memref<2x8x8xf32, #tpu.memory_space<vmem>>, %arg30: memref<8x8x128xf32, #tpu.memory_space<vmem>>, %arg31: memref<8x8x32xf32, #tpu.memory_space<vmem>>, %arg32: memref<8x8x32xf32, #tpu.memory_space<vmem>>) attributes {dimension_semantics = [#tpu.dimension_semantics<parallel>], iteration_bounds = array<i64: 1>, scalar_prefetch = 0 : i64, scratch_operands = 3 : i64, tpu.core_type = #tpu.core_type<tc>, window_params = [{transform_indices = @transform_0, window_bounds = array<i64: 8, 8, 8>}, {transform_indices = @transform_1, window_bounds = array<i64: 8, 8, 1>}, {transform_indices = @transform_2, window_bounds = array<i64: 2, 8, 32>}, {transform_indices = @transform_3, window_bounds = array<i64: 2, 8, 32>}, {transform_indices = @transform_4, window_bounds = array<i64: 2, 8, 8>}, {transform_indices = @transform_5, window_bounds = array<i64: 2, 8, 8>}, {pipeline_mode = #tpu.pipeline_mode<synchronous>, transform_indices = @transform_6, window_bounds = array<i64: 8, 128>}, {pipeline_mode = #tpu.pipeline_mode<synchronous>, transform_indices = @transform_7, window_bounds = array<i64: 32, 128>}, {pipeline_mode = #tpu.pipeline_mode<synchronous>, transform_indices = @transform_8, window_bounds = array<i64: 1, 128>}, {pipeline_mode = #tpu.pipeline_mode<synchronous>, transform_indices = @transform_9, window_bounds = array<i64: 32, 128>}, {pipeline_mode = #tpu.pipeline_mode<synchronous>, transform_indices = @transform_10, window_bounds = array<i64: 32, 128>}, {pipeline_mode = #tpu.pipeline_mode<synchronous>, transform_indices = @transform_11, window_bounds = array<i64: 1, 128>}, {pipeline_mode = #tpu.pipeline_mode<synchronous>, transform_indices = @transform_12, window_bounds = array<i64: 32, 32>}, {pipeline_mode = #tpu.pipeline_mode<synchronous>, transform_indices = @transform_13, window_bounds = array<i64: 8, 32>}, {pipeline_mode = #tpu.pipeline_mode<synchronous>, transform_indices = @transform_14, window_bounds = array<i64: 1, 32>}, {pipeline_mode = #tpu.pipeline_mode<synchronous>, transform_indices = @transform_15, window_bounds = array<i64: 8, 32>}, {pipeline_mode = #tpu.pipeline_mode<synchronous>, transform_indices = @transform_16, window_bounds = array<i64: 8, 32>}, {pipeline_mode = #tpu.pipeline_mode<synchronous>, transform_indices = @transform_17, window_bounds = array<i64: 1, 32>}, {pipeline_mode = #tpu.pipeline_mode<synchronous>, transform_indices = @transform_18, window_bounds = array<i64: 32, 32>}, {pipeline_mode = #tpu.pipeline_mode<synchronous>, transform_indices = @transform_19, window_bounds = array<i64: 1, 32>}, {pipeline_mode = #tpu.pipeline_mode<synchronous>, transform_indices = @transform_20, window_bounds = array<i64: 32, 16>}, {pipeline_mode = #tpu.pipeline_mode<synchronous>, transform_indices = @transform_21, window_bounds = array<i64: 1, 16>}, {pipeline_mode = #tpu.pipeline_mode<synchronous>, transform_indices = @transform_22, window_bounds = array<i64: 16, 32>}, {pipeline_mode = #tpu.pipeline_mode<synchronous>, transform_indices = @transform_23, window_bounds = array<i64: 1, 32>}, {pipeline_mode = #tpu.pipeline_mode<synchronous>, transform_indices = @transform_24, window_bounds = array<i64: 32, 32>}, {pipeline_mode = #tpu.pipeline_mode<synchronous>, transform_indices = @transform_25, window_bounds = array<i64: 1, 32>}, {transform_indices = @transform_26, window_bounds = array<i64: 8, 8, 8>}, {transform_indices = @transform_27, window_bounds = array<i64: 2, 8, 8>}, {transform_indices = @transform_28, window_bounds = array<i64: 2, 8, 8>}]} {
    %c0 = arith.constant 0 : index
    %c0_0 = arith.constant 0 : index
    %c0_1 = arith.constant 0 : index
    %0 = vector.load %arg1[%c0, %c0_0, %c0_1] : memref<8x8x8xf32, #tpu.memory_space<vmem>>, vector<8x8x8xf32>
    %1 = vector.shape_cast %0 : vector<8x8x8xf32> to vector<64x8xf32>
    %2 = arith.truncf %1 : vector<64x8xf32> to vector<64x8xbf16>
    %c0_2 = arith.constant 0 : index
    %c0_3 = arith.constant 0 : index
    %3 = vector.load %arg7[%c0_2, %c0_3] : memref<8x128xbf16, #tpu.memory_space<vmem>>, vector<8x128xbf16>
    %cst = arith.constant dense<0.000000e+00> : vector<64x128xf32>
    %4 = tpu.matmul %2, %3, %cst {dimension_numbers = #tpu.dot_dimension_numbers<[1], [0], [0], [1], [0, 0, 1, 1], [], []>} : vector<64x8xbf16>, vector<8x128xbf16>, vector<64x128xf32> -> vector<64x128xf32>
    %c0_4 = arith.constant 0 : index
    %c0_5 = arith.constant 0 : index
    %5 = vector.load %arg9[%c0_4, %c0_5] : memref<1x128xf32, #tpu.memory_space<vmem>>, vector<1x128xf32>
    %6 = vector.broadcast %5 : vector<1x128xf32> to vector<64x128xf32>
    %7 = arith.addf %4, %6 : vector<64x128xf32>
    %8 = vector.shape_cast %7 : vector<64x128xf32> to vector<8x8x128xf32>
    %c0_6 = arith.constant 0 : index
    %c0_7 = arith.constant 0 : index
    %c0_8 = arith.constant 0 : index
    %9 = vector.load %arg30[%c0_6, %c0_7, %c0_8] : memref<8x8x128xf32, #tpu.memory_space<vmem>>, vector<8x8x128xf32>
    tpu.vector_store %arg30[%c0_6, %c0_7, %c0_8], %8 {strides = array<i32>} : memref<8x8x128xf32, #tpu.memory_space<vmem>>, vector<8x8x128xf32>,
    %c0_9 = arith.constant 0 : index
    %c0_10 = arith.constant 0 : index
    %c0_11 = arith.constant 0 : index
    %10 = vector.load %arg3[%c0_9, %c0_10, %c0_11] : memref<2x8x32xf32, #tpu.memory_space<vmem>>, vector<1x8x32xf32>
    %11 = vector.shape_cast %10 : vector<1x8x32xf32> to vector<8x32xf32>
    %c1 = arith.constant 1 : index
    %c0_12 = arith.constant 0 : index
    %c0_13 = arith.constant 0 : index
    %12 = vector.load %arg3[%c1, %c0_12, %c0_13] : memref<2x8x32xf32, #tpu.memory_space<vmem>>, vector<1x8x32xf32>
    %13 = vector.shape_cast %12 : vector<1x8x32xf32> to vector<8x32xf32>
    %c0_14 = arith.constant 0 : index
    %c0_15 = arith.constant 0 : index
    %c0_16 = arith.constant 0 : index
    %14 = vector.load %arg4[%c0_14, %c0_15, %c0_16] : memref<2x8x32xf32, #tpu.memory_space<vmem>>, vector<1x8x32xf32>
    %15 = vector.shape_cast %14 : vector<1x8x32xf32> to vector<8x32xf32>
    %c1_17 = arith.constant 1 : index
    %c0_18 = arith.constant 0 : index
    %c0_19 = arith.constant 0 : index
    %16 = vector.load %arg4[%c1_17, %c0_18, %c0_19] : memref<2x8x32xf32, #tpu.memory_space<vmem>>, vector<1x8x32xf32>
    %17 = vector.shape_cast %16 : vector<1x8x32xf32> to vector<8x32xf32>
    %c0_20 = arith.constant 0 : index
    %c0_21 = arith.constant 0 : index
    %18 = vector.load %arg8[%c0_20, %c0_21] : memref<32x128xbf16, #tpu.memory_space<vmem>>, vector<32x128xbf16>
    %c0_22 = arith.constant 0 : index
    %c0_23 = arith.constant 0 : index
    %19 = vector.load %arg11[%c0_22, %c0_23] : memref<32x128xbf16, #tpu.memory_space<vmem>>, vector<32x128xbf16>
    %c0_24 = arith.constant 0 : index
    %c0_25 = arith.constant 0 : index
    %20 = vector.load %arg10[%c0_24, %c0_25] : memref<32x128xbf16, #tpu.memory_space<vmem>>, vector<32x128xbf16>
    %c0_26 = arith.constant 0 : index
    %c0_27 = arith.constant 0 : index
    %21 = vector.load %arg12[%c0_26, %c0_27] : memref<1x128xf32, #tpu.memory_space<vmem>>, vector<1x128xf32>
    %c0_28 = arith.constant 0 : index
    %c0_29 = arith.constant 0 : index
    %c0_30 = arith.constant 0 : index
    %22 = vector.load %arg30[%c0_28, %c0_29, %c0_30] : memref<8x8x128xf32, #tpu.memory_space<vmem>>, vector<1x8x128xf32>
    %23 = vector.shape_cast %22 : vector<1x8x128xf32> to vector<8x128xf32>
    %24 = arith.truncf %11 : vector<8x32xf32> to vector<8x32xbf16>
    %cst_31 = arith.constant dense<0.000000e+00> : vector<8x128xf32>
    %25 = tpu.matmul %24, %18, %cst_31 {dimension_numbers = #tpu.dot_dimension_numbers<[1], [0], [0], [1], [0, 0, 1, 1], [], []>} : vector<8x32xbf16>, vector<32x128xbf16>, vector<8x128xf32> -> vector<8x128xf32>
    %26 = arith.addf %23, %25 : vector<8x128xf32>
    %c0_32 = arith.constant 0 : index
    %c0_33 = arith.constant 0 : index
    %c0_34 = arith.constant 0 : index
    %27 = vector.load %arg2[%c0_32, %c0_33, %c0_34] : memref<8x8x1xf32, #tpu.memory_space<vmem>>, vector<1x8x1xf32>
    %28 = vector.shape_cast %27 : vector<1x8x1xf32> to vector<8x1xf32>
    %29 = vector.extract_strided_slice %26 {offsets = [0, 0], sizes = [8, 96], strides = [1, 1]} : vector<8x128xf32> to vector<8x96xf32>
    %30 = arith.negf %29 : vector<8x96xf32>
    %31 = math.exp %30 : vector<8x96xf32>
    %cst_35 = arith.constant 1.000000e+00 : f32
    %32 = vector.broadcast %cst_35 : f32 to vector<8x96xf32>
    %33 = arith.addf %32, %31 : vector<8x96xf32>
    %34 = arith.divf %32, %33 : vector<8x96xf32>
    %35 = vector.extract_strided_slice %34 {offsets = [0, 0], sizes = [8, 32], strides = [1, 1]} : vector<8x96xf32> to vector<8x32xf32>
    %36 = vector.extract_strided_slice %34 {offsets = [0, 32], sizes = [8, 32], strides = [1, 1]} : vector<8x96xf32> to vector<8x32xf32>
    %37 = vector.extract_strided_slice %34 {offsets = [0, 64], sizes = [8, 32], strides = [1, 1]} : vector<8x96xf32> to vector<8x32xf32>
    %38 = arith.mulf %36, %15 : vector<8x32xf32>
    %39 = vector.extract_strided_slice %26 {offsets = [0, 96], sizes = [8, 32], strides = [1, 1]} : vector<8x128xf32> to vector<8x32xf32>
    %40 = math.tanh %39 : vector<8x32xf32>
    %41 = arith.mulf %35, %40 : vector<8x32xf32>
    %42 = arith.addf %38, %41 : vector<8x32xf32>
    %43 = math.tanh %42 : vector<8x32xf32>
    %44 = arith.mulf %37, %43 : vector<8x32xf32>
    %cst_36 = arith.constant 0.000000e+00 : f32
    %45 = vector.broadcast %cst_36 : f32 to vector<8x1xf32>
    %46 = arith.cmpf ogt, %28, %45 : vector<8x1xf32>
    %47 = vector.broadcast %28 : vector<8x1xf32> to vector<8x32xf32>
    %48 = arith.mulf %47, %44 : vector<8x32xf32>
    %49 = vector.shape_cast %46 : vector<8x1xi1> to vector<8x1xi1>
    %50 = vector.broadcast %49 : vector<8x1xi1> to vector<8x32xi1>
    %51 = arith.select %50, %44, %11 : vector<8x32xi1>, vector<8x32xf32>
    %52 = vector.shape_cast %46 : vector<8x1xi1> to vector<8x1xi1>
    %53 = vector.broadcast %52 : vector<8x1xi1> to vector<8x32xi1>
    %54 = arith.select %53, %42, %15 : vector<8x32xi1>, vector<8x32xf32>
    %c1_37 = arith.constant 1 : index
    %c0_38 = arith.constant 0 : index
    %c0_39 = arith.constant 0 : index
    %55 = vector.load %arg30[%c1_37, %c0_38, %c0_39] : memref<8x8x128xf32, #tpu.memory_space<vmem>>, vector<1x8x128xf32>
    %56 = vector.shape_cast %55 : vector<1x8x128xf32> to vector<8x128xf32>
    %57 = arith.truncf %51 : vector<8x32xf32> to vector<8x32xbf16>
    %cst_40 = arith.constant dense<0.000000e+00> : vector<8x128xf32>
    %58 = tpu.matmul %57, %18, %cst_40 {dimension_numbers = #tpu.dot_dimension_numbers<[1], [0], [0], [1], [0, 0, 1, 1], [], []>} : vector<8x32xbf16>, vector<32x128xbf16>, vector<8x128xf32> -> vector<8x128xf32>
    %59 = arith.addf %56, %58 : vector<8x128xf32>
    %c1_41 = arith.constant 1 : index
    %c0_42 = arith.constant 0 : index
    %c0_43 = arith.constant 0 : index
    %60 = vector.load %arg2[%c1_41, %c0_42, %c0_43] : memref<8x8x1xf32, #tpu.memory_space<vmem>>, vector<1x8x1xf32>
    %61 = vector.shape_cast %60 : vector<1x8x1xf32> to vector<8x1xf32>
    %62 = vector.extract_strided_slice %59 {offsets = [0, 0], sizes = [8, 96], strides = [1, 1]} : vector<8x128xf32> to vector<8x96xf32>
    %63 = arith.negf %62 : vector<8x96xf32>
    %64 = math.exp %63 : vector<8x96xf32>
    %cst_44 = arith.constant 1.000000e+00 : f32
    %65 = vector.broadcast %cst_44 : f32 to vector<8x96xf32>
    %66 = arith.addf %65, %64 : vector<8x96xf32>
    %67 = arith.divf %65, %66 : vector<8x96xf32>
    %68 = vector.extract_strided_slice %67 {offsets = [0, 0], sizes = [8, 32], strides = [1, 1]} : vector<8x96xf32> to vector<8x32xf32>
    %69 = vector.extract_strided_slice %67 {offsets = [0, 32], sizes = [8, 32], strides = [1, 1]} : vector<8x96xf32> to vector<8x32xf32>
    %70 = vector.extract_strided_slice %67 {offsets = [0, 64], sizes = [8, 32], strides = [1, 1]} : vector<8x96xf32> to vector<8x32xf32>
    %71 = arith.mulf %69, %54 : vector<8x32xf32>
    %72 = vector.extract_strided_slice %59 {offsets = [0, 96], sizes = [8, 32], strides = [1, 1]} : vector<8x128xf32> to vector<8x32xf32>
    %73 = math.tanh %72 : vector<8x32xf32>
    %74 = arith.mulf %68, %73 : vector<8x32xf32>
    %75 = arith.addf %71, %74 : vector<8x32xf32>
    %76 = math.tanh %75 : vector<8x32xf32>
    %77 = arith.mulf %70, %76 : vector<8x32xf32>
    %cst_45 = arith.constant 0.000000e+00 : f32
    %78 = vector.broadcast %cst_45 : f32 to vector<8x1xf32>
    %79 = arith.cmpf ogt, %61, %78 : vector<8x1xf32>
    %80 = vector.broadcast %61 : vector<8x1xf32> to vector<8x32xf32>
    %81 = arith.mulf %80, %77 : vector<8x32xf32>
    %82 = vector.shape_cast %79 : vector<8x1xi1> to vector<8x1xi1>
    %83 = vector.broadcast %82 : vector<8x1xi1> to vector<8x32xi1>
    %84 = arith.select %83, %77, %51 : vector<8x32xi1>, vector<8x32xf32>
    %85 = vector.shape_cast %79 : vector<8x1xi1> to vector<8x1xi1>
    %86 = vector.broadcast %85 : vector<8x1xi1> to vector<8x32xi1>
    %87 = arith.select %86, %75, %54 : vector<8x32xi1>, vector<8x32xf32>
    %88 = arith.truncf %48 : vector<8x32xf32> to vector<8x32xbf16>
    %cst_46 = arith.constant dense<0.000000e+00> : vector<8x128xf32>
    %89 = tpu.matmul %88, %20, %cst_46 {dimension_numbers = #tpu.dot_dimension_numbers<[1], [0], [0], [1], [0, 0, 1, 1], [], []>} : vector<8x32xbf16>, vector<32x128xbf16>, vector<8x128xf32> -> vector<8x128xf32>
    %90 = arith.truncf %13 : vector<8x32xf32> to vector<8x32xbf16>
    %cst_47 = arith.constant dense<0.000000e+00> : vector<8x128xf32>
    %91 = tpu.matmul %90, %19, %cst_47 {dimension_numbers = #tpu.dot_dimension_numbers<[1], [0], [0], [1], [0, 0, 1, 1], [], []>} : vector<8x32xbf16>, vector<32x128xbf16>, vector<8x128xf32> -> vector<8x128xf32>
    %92 = arith.addf %89, %91 : vector<8x128xf32>
    %93 = vector.broadcast %21 : vector<1x128xf32> to vector<8x128xf32>
    %94 = arith.addf %92, %93 : vector<8x128xf32>
    %c0_48 = arith.constant 0 : index
    %c0_49 = arith.constant 0 : index
    %c0_50 = arith.constant 0 : index
    %95 = vector.load %arg2[%c0_48, %c0_49, %c0_50] : memref<8x8x1xf32, #tpu.memory_space<vmem>>, vector<1x8x1xf32>
    %96 = vector.shape_cast %95 : vector<1x8x1xf32> to vector<8x1xf32>
    %97 = vector.extract_strided_slice %94 {offsets = [0, 0], sizes = [8, 96], strides = [1, 1]} : vector<8x128xf32> to vector<8x96xf32>
    %98 = arith.negf %97 : vector<8x96xf32>
    %99 = math.exp %98 : vector<8x96xf32>
    %cst_51 = arith.constant 1.000000e+00 : f32
    %100 = vector.broadcast %cst_51 : f32 to vector<8x96xf32>
    %101 = arith.addf %100, %99 : vector<8x96xf32>
    %102 = arith.divf %100, %101 : vector<8x96xf32>
    %103 = vector.extract_strided_slice %102 {offsets = [0, 0], sizes = [8, 32], strides = [1, 1]} : vector<8x96xf32> to vector<8x32xf32>
    %104 = vector.extract_strided_slice %102 {offsets = [0, 32], sizes = [8, 32], strides = [1, 1]} : vector<8x96xf32> to vector<8x32xf32>
    %105 = vector.extract_strided_slice %102 {offsets = [0, 64], sizes = [8, 32], strides = [1, 1]} : vector<8x96xf32> to vector<8x32xf32>
    %106 = arith.mulf %104, %17 : vector<8x32xf32>
    %107 = vector.extract_strided_slice %94 {offsets = [0, 96], sizes = [8, 32], strides = [1, 1]} : vector<8x128xf32> to vector<8x32xf32>
    %108 = math.tanh %107 : vector<8x32xf32>
    %109 = arith.mulf %103, %108 : vector<8x32xf32>
    %110 = arith.addf %106, %109 : vector<8x32xf32>
    %111 = math.tanh %110 : vector<8x32xf32>
    %112 = arith.mulf %105, %111 : vector<8x32xf32>
    %cst_52 = arith.constant 0.000000e+00 : f32
    %113 = vector.broadcast %cst_52 : f32 to vector<8x1xf32>
    %114 = arith.cmpf ogt, %96, %113 : vector<8x1xf32>
    %115 = vector.broadcast %96 : vector<8x1xf32> to vector<8x32xf32>
    %116 = arith.mulf %115, %112 : vector<8x32xf32>
    %117 = vector.shape_cast %114 : vector<8x1xi1> to vector<8x1xi1>
    %118 = vector.broadcast %117 : vector<8x1xi1> to vector<8x32xi1>
    %119 = arith.select %118, %112, %13 : vector<8x32xi1>, vector<8x32xf32>
    %120 = vector.shape_cast %114 : vector<8x1xi1> to vector<8x1xi1>
    %121 = vector.broadcast %120 : vector<8x1xi1> to vector<8x32xi1>
    %122 = arith.select %121, %110, %17 : vector<8x32xi1>, vector<8x32xf32>
    %c0_53 = arith.constant 0 : index
    %c0_54 = arith.constant 0 : index
    %c0_55 = arith.constant 0 : index
    %123 = vector.load %arg31[%c0_53, %c0_54, %c0_55] : memref<8x8x32xf32, #tpu.memory_space<vmem>>, vector<1x8x32xf32>
    %124 = vector.shape_cast %123 : vector<1x8x32xf32> to vector<8x32xf32>
    %125 = vector.shape_cast %116 : vector<8x32xf32> to vector<1x8x32xf32>
    tpu.vector_store %arg31[%c0_53, %c0_54, %c0_55], %125 {strides = array<i32>} : memref<8x8x32xf32, #tpu.memory_space<vmem>>, vector<1x8x32xf32>,
    %c2 = arith.constant 2 : index
    %c0_56 = arith.constant 0 : index
    %c0_57 = arith.constant 0 : index
    %126 = vector.load %arg30[%c2, %c0_56, %c0_57] : memref<8x8x128xf32, #tpu.memory_space<vmem>>, vector<1x8x128xf32>
    %127 = vector.shape_cast %126 : vector<1x8x128xf32> to vector<8x128xf32>
    %128 = arith.truncf %84 : vector<8x32xf32> to vector<8x32xbf16>
    %cst_58 = arith.constant dense<0.000000e+00> : vector<8x128xf32>
    %129 = tpu.matmul %128, %18, %cst_58 {dimension_numbers = #tpu.dot_dimension_numbers<[1], [0], [0], [1], [0, 0, 1, 1], [], []>} : vector<8x32xbf16>, vector<32x128xbf16>, vector<8x128xf32> -> vector<8x128xf32>
    %130 = arith.addf %127, %129 : vector<8x128xf32>
    %c2_59 = arith.constant 2 : index
    %c0_60 = arith.constant 0 : index
    %c0_61 = arith.constant 0 : index
    %131 = vector.load %arg2[%c2_59, %c0_60, %c0_61] : memref<8x8x1xf32, #tpu.memory_space<vmem>>, vector<1x8x1xf32>
    %132 = vector.shape_cast %131 : vector<1x8x1xf32> to vector<8x1xf32>
    %133 = vector.extract_strided_slice %130 {offsets = [0, 0], sizes = [8, 96], strides = [1, 1]} : vector<8x128xf32> to vector<8x96xf32>
    %134 = arith.negf %133 : vector<8x96xf32>
    %135 = math.exp %134 : vector<8x96xf32>
    %cst_62 = arith.constant 1.000000e+00 : f32
    %136 = vector.broadcast %cst_62 : f32 to vector<8x96xf32>
    %137 = arith.addf %136, %135 : vector<8x96xf32>
    %138 = arith.divf %136, %137 : vector<8x96xf32>
    %139 = vector.extract_strided_slice %138 {offsets = [0, 0], sizes = [8, 32], strides = [1, 1]} : vector<8x96xf32> to vector<8x32xf32>
    %140 = vector.extract_strided_slice %138 {offsets = [0, 32], sizes = [8, 32], strides = [1, 1]} : vector<8x96xf32> to vector<8x32xf32>
    %141 = vector.extract_strided_slice %138 {offsets = [0, 64], sizes = [8, 32], strides = [1, 1]} : vector<8x96xf32> to vector<8x32xf32>
    %142 = arith.mulf %140, %87 : vector<8x32xf32>
    %143 = vector.extract_strided_slice %130 {offsets = [0, 96], sizes = [8, 32], strides = [1, 1]} : vector<8x128xf32> to vector<8x32xf32>
    %144 = math.tanh %143 : vector<8x32xf32>
    %145 = arith.mulf %139, %144 : vector<8x32xf32>
    %146 = arith.addf %142, %145 : vector<8x32xf32>
    %147 = math.tanh %146 : vector<8x32xf32>
    %148 = arith.mulf %141, %147 : vector<8x32xf32>
    %cst_63 = arith.constant 0.000000e+00 : f32
    %149 = vector.broadcast %cst_63 : f32 to vector<8x1xf32>
    %150 = arith.cmpf ogt, %132, %149 : vector<8x1xf32>
    %151 = vector.broadcast %132 : vector<8x1xf32> to vector<8x32xf32>
    %152 = arith.mulf %151, %148 : vector<8x32xf32>
    %153 = vector.shape_cast %150 : vector<8x1xi1> to vector<8x1xi1>
    %154 = vector.broadcast %153 : vector<8x1xi1> to vector<8x32xi1>
    %155 = arith.select %154, %148, %84 : vector<8x32xi1>, vector<8x32xf32>
    %156 = vector.shape_cast %150 : vector<8x1xi1> to vector<8x1xi1>
    %157 = vector.broadcast %156 : vector<8x1xi1> to vector<8x32xi1>
    %158 = arith.select %157, %146, %87 : vector<8x32xi1>, vector<8x32xf32>
    %159 = arith.truncf %81 : vector<8x32xf32> to vector<8x32xbf16>
    %cst_64 = arith.constant dense<0.000000e+00> : vector<8x128xf32>
    %160 = tpu.matmul %159, %20, %cst_64 {dimension_numbers = #tpu.dot_dimension_numbers<[1], [0], [0], [1], [0, 0, 1, 1], [], []>} : vector<8x32xbf16>, vector<32x128xbf16>, vector<8x128xf32> -> vector<8x128xf32>
    %161 = arith.truncf %119 : vector<8x32xf32> to vector<8x32xbf16>
    %cst_65 = arith.constant dense<0.000000e+00> : vector<8x128xf32>
    %162 = tpu.matmul %161, %19, %cst_65 {dimension_numbers = #tpu.dot_dimension_numbers<[1], [0], [0], [1], [0, 0, 1, 1], [], []>} : vector<8x32xbf16>, vector<32x128xbf16>, vector<8x128xf32> -> vector<8x128xf32>
    %163 = arith.addf %160, %162 : vector<8x128xf32>
    %164 = vector.broadcast %21 : vector<1x128xf32> to vector<8x128xf32>
    %165 = arith.addf %163, %164 : vector<8x128xf32>
    %c1_66 = arith.constant 1 : index
    %c0_67 = arith.constant 0 : index
    %c0_68 = arith.constant 0 : index
    %166 = vector.load %arg2[%c1_66, %c0_67, %c0_68] : memref<8x8x1xf32, #tpu.memory_space<vmem>>, vector<1x8x1xf32>
    %167 = vector.shape_cast %166 : vector<1x8x1xf32> to vector<8x1xf32>
    %168 = vector.extract_strided_slice %165 {offsets = [0, 0], sizes = [8, 96], strides = [1, 1]} : vector<8x128xf32> to vector<8x96xf32>
    %169 = arith.negf %168 : vector<8x96xf32>
    %170 = math.exp %169 : vector<8x96xf32>
    %cst_69 = arith.constant 1.000000e+00 : f32
    %171 = vector.broadcast %cst_69 : f32 to vector<8x96xf32>
    %172 = arith.addf %171, %170 : vector<8x96xf32>
    %173 = arith.divf %171, %172 : vector<8x96xf32>
    %174 = vector.extract_strided_slice %173 {offsets = [0, 0], sizes = [8, 32], strides = [1, 1]} : vector<8x96xf32> to vector<8x32xf32>
    %175 = vector.extract_strided_slice %173 {offsets = [0, 32], sizes = [8, 32], strides = [1, 1]} : vector<8x96xf32> to vector<8x32xf32>
    %176 = vector.extract_strided_slice %173 {offsets = [0, 64], sizes = [8, 32], strides = [1, 1]} : vector<8x96xf32> to vector<8x32xf32>
    %177 = arith.mulf %175, %122 : vector<8x32xf32>
    %178 = vector.extract_strided_slice %165 {offsets = [0, 96], sizes = [8, 32], strides = [1, 1]} : vector<8x128xf32> to vector<8x32xf32>
    %179 = math.tanh %178 : vector<8x32xf32>
    %180 = arith.mulf %174, %179 : vector<8x32xf32>
    %181 = arith.addf %177, %180 : vector<8x32xf32>
    %182 = math.tanh %181 : vector<8x32xf32>
    %183 = arith.mulf %176, %182 : vector<8x32xf32>
    %cst_70 = arith.constant 0.000000e+00 : f32
    %184 = vector.broadcast %cst_70 : f32 to vector<8x1xf32>
    %185 = arith.cmpf ogt, %167, %184 : vector<8x1xf32>
    %186 = vector.broadcast %167 : vector<8x1xf32> to vector<8x32xf32>
    %187 = arith.mulf %186, %183 : vector<8x32xf32>
    %188 = vector.shape_cast %185 : vector<8x1xi1> to vector<8x1xi1>
    %189 = vector.broadcast %188 : vector<8x1xi1> to vector<8x32xi1>
    %190 = arith.select %189, %183, %119 : vector<8x32xi1>, vector<8x32xf32>
    %191 = vector.shape_cast %185 : vector<8x1xi1> to vector<8x1xi1>
    %192 = vector.broadcast %191 : vector<8x1xi1> to vector<8x32xi1>
    %193 = arith.select %192, %181, %122 : vector<8x32xi1>, vector<8x32xf32>
    %c1_71 = arith.constant 1 : index
    %c0_72 = arith.constant 0 : index
    %c0_73 = arith.constant 0 : index
    %194 = vector.load %arg31[%c1_71, %c0_72, %c0_73] : memref<8x8x32xf32, #tpu.memory_space<vmem>>, vector<1x8x32xf32>
    %195 = vector.shape_cast %194 : vector<1x8x32xf32> to vector<8x32xf32>
    %196 = vector.shape_cast %187 : vector<8x32xf32> to vector<1x8x32xf32>
    tpu.vector_store %arg31[%c1_71, %c0_72, %c0_73], %196 {strides = array<i32>} : memref<8x8x32xf32, #tpu.memory_space<vmem>>, vector<1x8x32xf32>,
    %c3 = arith.constant 3 : index
    %c0_74 = arith.constant 0 : index
    %c0_75 = arith.constant 0 : index
    %197 = vector.load %arg30[%c3, %c0_74, %c0_75] : memref<8x8x128xf32, #tpu.memory_space<vmem>>, vector<1x8x128xf32>
    %198 = vector.shape_cast %197 : vector<1x8x128xf32> to vector<8x128xf32>
    %199 = arith.truncf %155 : vector<8x32xf32> to vector<8x32xbf16>
    %cst_76 = arith.constant dense<0.000000e+00> : vector<8x128xf32>
    %200 = tpu.matmul %199, %18, %cst_76 {dimension_numbers = #tpu.dot_dimension_numbers<[1], [0], [0], [1], [0, 0, 1, 1], [], []>} : vector<8x32xbf16>, vector<32x128xbf16>, vector<8x128xf32> -> vector<8x128xf32>
    %201 = arith.addf %198, %200 : vector<8x128xf32>
    %c3_77 = arith.constant 3 : index
    %c0_78 = arith.constant 0 : index
    %c0_79 = arith.constant 0 : index
    %202 = vector.load %arg2[%c3_77, %c0_78, %c0_79] : memref<8x8x1xf32, #tpu.memory_space<vmem>>, vector<1x8x1xf32>
    %203 = vector.shape_cast %202 : vector<1x8x1xf32> to vector<8x1xf32>
    %204 = vector.extract_strided_slice %201 {offsets = [0, 0], sizes = [8, 96], strides = [1, 1]} : vector<8x128xf32> to vector<8x96xf32>
    %205 = arith.negf %204 : vector<8x96xf32>
    %206 = math.exp %205 : vector<8x96xf32>
    %cst_80 = arith.constant 1.000000e+00 : f32
    %207 = vector.broadcast %cst_80 : f32 to vector<8x96xf32>
    %208 = arith.addf %207, %206 : vector<8x96xf32>
    %209 = arith.divf %207, %208 : vector<8x96xf32>
    %210 = vector.extract_strided_slice %209 {offsets = [0, 0], sizes = [8, 32], strides = [1, 1]} : vector<8x96xf32> to vector<8x32xf32>
    %211 = vector.extract_strided_slice %209 {offsets = [0, 32], sizes = [8, 32], strides = [1, 1]} : vector<8x96xf32> to vector<8x32xf32>
    %212 = vector.extract_strided_slice %209 {offsets = [0, 64], sizes = [8, 32], strides = [1, 1]} : vector<8x96xf32> to vector<8x32xf32>
    %213 = arith.mulf %211, %158 : vector<8x32xf32>
    %214 = vector.extract_strided_slice %201 {offsets = [0, 96], sizes = [8, 32], strides = [1, 1]} : vector<8x128xf32> to vector<8x32xf32>
    %215 = math.tanh %214 : vector<8x32xf32>
    %216 = arith.mulf %210, %215 : vector<8x32xf32>
    %217 = arith.addf %213, %216 : vector<8x32xf32>
    %218 = math.tanh %217 : vector<8x32xf32>
    %219 = arith.mulf %212, %218 : vector<8x32xf32>
    %cst_81 = arith.constant 0.000000e+00 : f32
    %220 = vector.broadcast %cst_81 : f32 to vector<8x1xf32>
    %221 = arith.cmpf ogt, %203, %220 : vector<8x1xf32>
    %222 = vector.broadcast %203 : vector<8x1xf32> to vector<8x32xf32>
    %223 = arith.mulf %222, %219 : vector<8x32xf32>
    %224 = vector.shape_cast %221 : vector<8x1xi1> to vector<8x1xi1>
    %225 = vector.broadcast %224 : vector<8x1xi1> to vector<8x32xi1>
    %226 = arith.select %225, %219, %155 : vector<8x32xi1>, vector<8x32xf32>
    %227 = vector.shape_cast %221 : vector<8x1xi1> to vector<8x1xi1>
    %228 = vector.broadcast %227 : vector<8x1xi1> to vector<8x32xi1>
    %229 = arith.select %228, %217, %158 : vector<8x32xi1>, vector<8x32xf32>
    %230 = arith.truncf %152 : vector<8x32xf32> to vector<8x32xbf16>
    %cst_82 = arith.constant dense<0.000000e+00> : vector<8x128xf32>
    %231 = tpu.matmul %230, %20, %cst_82 {dimension_numbers = #tpu.dot_dimension_numbers<[1], [0], [0], [1], [0, 0, 1, 1], [], []>} : vector<8x32xbf16>, vector<32x128xbf16>, vector<8x128xf32> -> vector<8x128xf32>
    %232 = arith.truncf %190 : vector<8x32xf32> to vector<8x32xbf16>
    %cst_83 = arith.constant dense<0.000000e+00> : vector<8x128xf32>
    %233 = tpu.matmul %232, %19, %cst_83 {dimension_numbers = #tpu.dot_dimension_numbers<[1], [0], [0], [1], [0, 0, 1, 1], [], []>} : vector<8x32xbf16>, vector<32x128xbf16>, vector<8x128xf32> -> vector<8x128xf32>
    %234 = arith.addf %231, %233 : vector<8x128xf32>
    %235 = vector.broadcast %21 : vector<1x128xf32> to vector<8x128xf32>
    %236 = arith.addf %234, %235 : vector<8x128xf32>
    %c2_84 = arith.constant 2 : index
    %c0_85 = arith.constant 0 : index
    %c0_86 = arith.constant 0 : index
    %237 = vector.load %arg2[%c2_84, %c0_85, %c0_86] : memref<8x8x1xf32, #tpu.memory_space<vmem>>, vector<1x8x1xf32>
    %238 = vector.shape_cast %237 : vector<1x8x1xf32> to vector<8x1xf32>
    %239 = vector.extract_strided_slice %236 {offsets = [0, 0], sizes = [8, 96], strides = [1, 1]} : vector<8x128xf32> to vector<8x96xf32>
    %240 = arith.negf %239 : vector<8x96xf32>
    %241 = math.exp %240 : vector<8x96xf32>
    %cst_87 = arith.constant 1.000000e+00 : f32
    %242 = vector.broadcast %cst_87 : f32 to vector<8x96xf32>
    %243 = arith.addf %242, %241 : vector<8x96xf32>
    %244 = arith.divf %242, %243 : vector<8x96xf32>
    %245 = vector.extract_strided_slice %244 {offsets = [0, 0], sizes = [8, 32], strides = [1, 1]} : vector<8x96xf32> to vector<8x32xf32>
    %246 = vector.extract_strided_slice %244 {offsets = [0, 32], sizes = [8, 32], strides = [1, 1]} : vector<8x96xf32> to vector<8x32xf32>
    %247 = vector.extract_strided_slice %244 {offsets = [0, 64], sizes = [8, 32], strides = [1, 1]} : vector<8x96xf32> to vector<8x32xf32>
    %248 = arith.mulf %246, %193 : vector<8x32xf32>
    %249 = vector.extract_strided_slice %236 {offsets = [0, 96], sizes = [8, 32], strides = [1, 1]} : vector<8x128xf32> to vector<8x32xf32>
    %250 = math.tanh %249 : vector<8x32xf32>
    %251 = arith.mulf %245, %250 : vector<8x32xf32>
    %252 = arith.addf %248, %251 : vector<8x32xf32>
    %253 = math.tanh %252 : vector<8x32xf32>
    %254 = arith.mulf %247, %253 : vector<8x32xf32>
    %cst_88 = arith.constant 0.000000e+00 : f32
    %255 = vector.broadcast %cst_88 : f32 to vector<8x1xf32>
    %256 = arith.cmpf ogt, %238, %255 : vector<8x1xf32>
    %257 = vector.broadcast %238 : vector<8x1xf32> to vector<8x32xf32>
    %258 = arith.mulf %257, %254 : vector<8x32xf32>
    %259 = vector.shape_cast %256 : vector<8x1xi1> to vector<8x1xi1>
    %260 = vector.broadcast %259 : vector<8x1xi1> to vector<8x32xi1>
    %261 = arith.select %260, %254, %190 : vector<8x32xi1>, vector<8x32xf32>
    %262 = vector.shape_cast %256 : vector<8x1xi1> to vector<8x1xi1>
    %263 = vector.broadcast %262 : vector<8x1xi1> to vector<8x32xi1>
    %264 = arith.select %263, %252, %193 : vector<8x32xi1>, vector<8x32xf32>
    %c2_89 = arith.constant 2 : index
    %c0_90 = arith.constant 0 : index
    %c0_91 = arith.constant 0 : index
    %265 = vector.load %arg31[%c2_89, %c0_90, %c0_91] : memref<8x8x32xf32, #tpu.memory_space<vmem>>, vector<1x8x32xf32>
    %266 = vector.shape_cast %265 : vector<1x8x32xf32> to vector<8x32xf32>
    %267 = vector.shape_cast %258 : vector<8x32xf32> to vector<1x8x32xf32>
    tpu.vector_store %arg31[%c2_89, %c0_90, %c0_91], %267 {strides = array<i32>} : memref<8x8x32xf32, #tpu.memory_space<vmem>>, vector<1x8x32xf32>,
    %c4 = arith.constant 4 : index
    %c0_92 = arith.constant 0 : index
    %c0_93 = arith.constant 0 : index
    %268 = vector.load %arg30[%c4, %c0_92, %c0_93] : memref<8x8x128xf32, #tpu.memory_space<vmem>>, vector<1x8x128xf32>
    %269 = vector.shape_cast %268 : vector<1x8x128xf32> to vector<8x128xf32>
    %270 = arith.truncf %226 : vector<8x32xf32> to vector<8x32xbf16>
    %cst_94 = arith.constant dense<0.000000e+00> : vector<8x128xf32>
    %271 = tpu.matmul %270, %18, %cst_94 {dimension_numbers = #tpu.dot_dimension_numbers<[1], [0], [0], [1], [0, 0, 1, 1], [], []>} : vector<8x32xbf16>, vector<32x128xbf16>, vector<8x128xf32> -> vector<8x128xf32>
    %272 = arith.addf %269, %271 : vector<8x128xf32>
    %c4_95 = arith.constant 4 : index
    %c0_96 = arith.constant 0 : index
    %c0_97 = arith.constant 0 : index
    %273 = vector.load %arg2[%c4_95, %c0_96, %c0_97] : memref<8x8x1xf32, #tpu.memory_space<vmem>>, vector<1x8x1xf32>
    %274 = vector.shape_cast %273 : vector<1x8x1xf32> to vector<8x1xf32>
    %275 = vector.extract_strided_slice %272 {offsets = [0, 0], sizes = [8, 96], strides = [1, 1]} : vector<8x128xf32> to vector<8x96xf32>
    %276 = arith.negf %275 : vector<8x96xf32>
    %277 = math.exp %276 : vector<8x96xf32>
    %cst_98 = arith.constant 1.000000e+00 : f32
    %278 = vector.broadcast %cst_98 : f32 to vector<8x96xf32>
    %279 = arith.addf %278, %277 : vector<8x96xf32>
    %280 = arith.divf %278, %279 : vector<8x96xf32>
    %281 = vector.extract_strided_slice %280 {offsets = [0, 0], sizes = [8, 32], strides = [1, 1]} : vector<8x96xf32> to vector<8x32xf32>
    %282 = vector.extract_strided_slice %280 {offsets = [0, 32], sizes = [8, 32], strides = [1, 1]} : vector<8x96xf32> to vector<8x32xf32>
    %283 = vector.extract_strided_slice %280 {offsets = [0, 64], sizes = [8, 32], strides = [1, 1]} : vector<8x96xf32> to vector<8x32xf32>
    %284 = arith.mulf %282, %229 : vector<8x32xf32>
    %285 = vector.extract_strided_slice %272 {offsets = [0, 96], sizes = [8, 32], strides = [1, 1]} : vector<8x128xf32> to vector<8x32xf32>
    %286 = math.tanh %285 : vector<8x32xf32>
    %287 = arith.mulf %281, %286 : vector<8x32xf32>
    %288 = arith.addf %284, %287 : vector<8x32xf32>
    %289 = math.tanh %288 : vector<8x32xf32>
    %290 = arith.mulf %283, %289 : vector<8x32xf32>
    %cst_99 = arith.constant 0.000000e+00 : f32
    %291 = vector.broadcast %cst_99 : f32 to vector<8x1xf32>
    %292 = arith.cmpf ogt, %274, %291 : vector<8x1xf32>
    %293 = vector.broadcast %274 : vector<8x1xf32> to vector<8x32xf32>
    %294 = arith.mulf %293, %290 : vector<8x32xf32>
    %295 = vector.shape_cast %292 : vector<8x1xi1> to vector<8x1xi1>
    %296 = vector.broadcast %295 : vector<8x1xi1> to vector<8x32xi1>
    %297 = arith.select %296, %290, %226 : vector<8x32xi1>, vector<8x32xf32>
    %298 = vector.shape_cast %292 : vector<8x1xi1> to vector<8x1xi1>
    %299 = vector.broadcast %298 : vector<8x1xi1> to vector<8x32xi1>
    %300 = arith.select %299, %288, %229 : vector<8x32xi1>, vector<8x32xf32>
    %301 = arith.truncf %223 : vector<8x32xf32> to vector<8x32xbf16>
    %cst_100 = arith.constant dense<0.000000e+00> : vector<8x128xf32>
    %302 = tpu.matmul %301, %20, %cst_100 {dimension_numbers = #tpu.dot_dimension_numbers<[1], [0], [0], [1], [0, 0, 1, 1], [], []>} : vector<8x32xbf16>, vector<32x128xbf16>, vector<8x128xf32> -> vector<8x128xf32>
    %303 = arith.truncf %261 : vector<8x32xf32> to vector<8x32xbf16>
    %cst_101 = arith.constant dense<0.000000e+00> : vector<8x128xf32>
    %304 = tpu.matmul %303, %19, %cst_101 {dimension_numbers = #tpu.dot_dimension_numbers<[1], [0], [0], [1], [0, 0, 1, 1], [], []>} : vector<8x32xbf16>, vector<32x128xbf16>, vector<8x128xf32> -> vector<8x128xf32>
    %305 = arith.addf %302, %304 : vector<8x128xf32>
    %306 = vector.broadcast %21 : vector<1x128xf32> to vector<8x128xf32>
    %307 = arith.addf %305, %306 : vector<8x128xf32>
    %c3_102 = arith.constant 3 : index
    %c0_103 = arith.constant 0 : index
    %c0_104 = arith.constant 0 : index
    %308 = vector.load %arg2[%c3_102, %c0_103, %c0_104] : memref<8x8x1xf32, #tpu.memory_space<vmem>>, vector<1x8x1xf32>
    %309 = vector.shape_cast %308 : vector<1x8x1xf32> to vector<8x1xf32>
    %310 = vector.extract_strided_slice %307 {offsets = [0, 0], sizes = [8, 96], strides = [1, 1]} : vector<8x128xf32> to vector<8x96xf32>
    %311 = arith.negf %310 : vector<8x96xf32>
    %312 = math.exp %311 : vector<8x96xf32>
    %cst_105 = arith.constant 1.000000e+00 : f32
    %313 = vector.broadcast %cst_105 : f32 to vector<8x96xf32>
    %314 = arith.addf %313, %312 : vector<8x96xf32>
    %315 = arith.divf %313, %314 : vector<8x96xf32>
    %316 = vector.extract_strided_slice %315 {offsets = [0, 0], sizes = [8, 32], strides = [1, 1]} : vector<8x96xf32> to vector<8x32xf32>
    %317 = vector.extract_strided_slice %315 {offsets = [0, 32], sizes = [8, 32], strides = [1, 1]} : vector<8x96xf32> to vector<8x32xf32>
    %318 = vector.extract_strided_slice %315 {offsets = [0, 64], sizes = [8, 32], strides = [1, 1]} : vector<8x96xf32> to vector<8x32xf32>
    %319 = arith.mulf %317, %264 : vector<8x32xf32>
    %320 = vector.extract_strided_slice %307 {offsets = [0, 96], sizes = [8, 32], strides = [1, 1]} : vector<8x128xf32> to vector<8x32xf32>
    %321 = math.tanh %320 : vector<8x32xf32>
    %322 = arith.mulf %316, %321 : vector<8x32xf32>
    %323 = arith.addf %319, %322 : vector<8x32xf32>
    %324 = math.tanh %323 : vector<8x32xf32>
    %325 = arith.mulf %318, %324 : vector<8x32xf32>
    %cst_106 = arith.constant 0.000000e+00 : f32
    %326 = vector.broadcast %cst_106 : f32 to vector<8x1xf32>
    %327 = arith.cmpf ogt, %309, %326 : vector<8x1xf32>
    %328 = vector.broadcast %309 : vector<8x1xf32> to vector<8x32xf32>
    %329 = arith.mulf %328, %325 : vector<8x32xf32>
    %330 = vector.shape_cast %327 : vector<8x1xi1> to vector<8x1xi1>
    %331 = vector.broadcast %330 : vector<8x1xi1> to vector<8x32xi1>
    %332 = arith.select %331, %325, %261 : vector<8x32xi1>, vector<8x32xf32>
    %333 = vector.shape_cast %327 : vector<8x1xi1> to vector<8x1xi1>
    %334 = vector.broadcast %333 : vector<8x1xi1> to vector<8x32xi1>
    %335 = arith.select %334, %323, %264 : vector<8x32xi1>, vector<8x32xf32>
    %c3_107 = arith.constant 3 : index
    %c0_108 = arith.constant 0 : index
    %c0_109 = arith.constant 0 : index
    %336 = vector.load %arg31[%c3_107, %c0_108, %c0_109] : memref<8x8x32xf32, #tpu.memory_space<vmem>>, vector<1x8x32xf32>
    %337 = vector.shape_cast %336 : vector<1x8x32xf32> to vector<8x32xf32>
    %338 = vector.shape_cast %329 : vector<8x32xf32> to vector<1x8x32xf32>
    tpu.vector_store %arg31[%c3_107, %c0_108, %c0_109], %338 {strides = array<i32>} : memref<8x8x32xf32, #tpu.memory_space<vmem>>, vector<1x8x32xf32>,
    %c5 = arith.constant 5 : index
    %c0_110 = arith.constant 0 : index
    %c0_111 = arith.constant 0 : index
    %339 = vector.load %arg30[%c5, %c0_110, %c0_111] : memref<8x8x128xf32, #tpu.memory_space<vmem>>, vector<1x8x128xf32>
    %340 = vector.shape_cast %339 : vector<1x8x128xf32> to vector<8x128xf32>
    %341 = arith.truncf %297 : vector<8x32xf32> to vector<8x32xbf16>
    %cst_112 = arith.constant dense<0.000000e+00> : vector<8x128xf32>
    %342 = tpu.matmul %341, %18, %cst_112 {dimension_numbers = #tpu.dot_dimension_numbers<[1], [0], [0], [1], [0, 0, 1, 1], [], []>} : vector<8x32xbf16>, vector<32x128xbf16>, vector<8x128xf32> -> vector<8x128xf32>
    %343 = arith.addf %340, %342 : vector<8x128xf32>
    %c5_113 = arith.constant 5 : index
    %c0_114 = arith.constant 0 : index
    %c0_115 = arith.constant 0 : index
    %344 = vector.load %arg2[%c5_113, %c0_114, %c0_115] : memref<8x8x1xf32, #tpu.memory_space<vmem>>, vector<1x8x1xf32>
    %345 = vector.shape_cast %344 : vector<1x8x1xf32> to vector<8x1xf32>
    %346 = vector.extract_strided_slice %343 {offsets = [0, 0], sizes = [8, 96], strides = [1, 1]} : vector<8x128xf32> to vector<8x96xf32>
    %347 = arith.negf %346 : vector<8x96xf32>
    %348 = math.exp %347 : vector<8x96xf32>
    %cst_116 = arith.constant 1.000000e+00 : f32
    %349 = vector.broadcast %cst_116 : f32 to vector<8x96xf32>
    %350 = arith.addf %349, %348 : vector<8x96xf32>
    %351 = arith.divf %349, %350 : vector<8x96xf32>
    %352 = vector.extract_strided_slice %351 {offsets = [0, 0], sizes = [8, 32], strides = [1, 1]} : vector<8x96xf32> to vector<8x32xf32>
    %353 = vector.extract_strided_slice %351 {offsets = [0, 32], sizes = [8, 32], strides = [1, 1]} : vector<8x96xf32> to vector<8x32xf32>
    %354 = vector.extract_strided_slice %351 {offsets = [0, 64], sizes = [8, 32], strides = [1, 1]} : vector<8x96xf32> to vector<8x32xf32>
    %355 = arith.mulf %353, %300 : vector<8x32xf32>
    %356 = vector.extract_strided_slice %343 {offsets = [0, 96], sizes = [8, 32], strides = [1, 1]} : vector<8x128xf32> to vector<8x32xf32>
    %357 = math.tanh %356 : vector<8x32xf32>
    %358 = arith.mulf %352, %357 : vector<8x32xf32>
    %359 = arith.addf %355, %358 : vector<8x32xf32>
    %360 = math.tanh %359 : vector<8x32xf32>
    %361 = arith.mulf %354, %360 : vector<8x32xf32>
    %cst_117 = arith.constant 0.000000e+00 : f32
    %362 = vector.broadcast %cst_117 : f32 to vector<8x1xf32>
    %363 = arith.cmpf ogt, %345, %362 : vector<8x1xf32>
    %364 = vector.broadcast %345 : vector<8x1xf32> to vector<8x32xf32>
    %365 = arith.mulf %364, %361 : vector<8x32xf32>
    %366 = vector.shape_cast %363 : vector<8x1xi1> to vector<8x1xi1>
    %367 = vector.broadcast %366 : vector<8x1xi1> to vector<8x32xi1>
    %368 = arith.select %367, %361, %297 : vector<8x32xi1>, vector<8x32xf32>
    %369 = vector.shape_cast %363 : vector<8x1xi1> to vector<8x1xi1>
    %370 = vector.broadcast %369 : vector<8x1xi1> to vector<8x32xi1>
    %371 = arith.select %370, %359, %300 : vector<8x32xi1>, vector<8x32xf32>
    %372 = arith.truncf %294 : vector<8x32xf32> to vector<8x32xbf16>
    %cst_118 = arith.constant dense<0.000000e+00> : vector<8x128xf32>
    %373 = tpu.matmul %372, %20, %cst_118 {dimension_numbers = #tpu.dot_dimension_numbers<[1], [0], [0], [1], [0, 0, 1, 1], [], []>} : vector<8x32xbf16>, vector<32x128xbf16>, vector<8x128xf32> -> vector<8x128xf32>
    %374 = arith.truncf %332 : vector<8x32xf32> to vector<8x32xbf16>
    %cst_119 = arith.constant dense<0.000000e+00> : vector<8x128xf32>
    %375 = tpu.matmul %374, %19, %cst_119 {dimension_numbers = #tpu.dot_dimension_numbers<[1], [0], [0], [1], [0, 0, 1, 1], [], []>} : vector<8x32xbf16>, vector<32x128xbf16>, vector<8x128xf32> -> vector<8x128xf32>
    %376 = arith.addf %373, %375 : vector<8x128xf32>
    %377 = vector.broadcast %21 : vector<1x128xf32> to vector<8x128xf32>
    %378 = arith.addf %376, %377 : vector<8x128xf32>
    %c4_120 = arith.constant 4 : index
    %c0_121 = arith.constant 0 : index
    %c0_122 = arith.constant 0 : index
    %379 = vector.load %arg2[%c4_120, %c0_121, %c0_122] : memref<8x8x1xf32, #tpu.memory_space<vmem>>, vector<1x8x1xf32>
    %380 = vector.shape_cast %379 : vector<1x8x1xf32> to vector<8x1xf32>
    %381 = vector.extract_strided_slice %378 {offsets = [0, 0], sizes = [8, 96], strides = [1, 1]} : vector<8x128xf32> to vector<8x96xf32>
    %382 = arith.negf %381 : vector<8x96xf32>
    %383 = math.exp %382 : vector<8x96xf32>
    %cst_123 = arith.constant 1.000000e+00 : f32
    %384 = vector.broadcast %cst_123 : f32 to vector<8x96xf32>
    %385 = arith.addf %384, %383 : vector<8x96xf32>
    %386 = arith.divf %384, %385 : vector<8x96xf32>
    %387 = vector.extract_strided_slice %386 {offsets = [0, 0], sizes = [8, 32], strides = [1, 1]} : vector<8x96xf32> to vector<8x32xf32>
    %388 = vector.extract_strided_slice %386 {offsets = [0, 32], sizes = [8, 32], strides = [1, 1]} : vector<8x96xf32> to vector<8x32xf32>
    %389 = vector.extract_strided_slice %386 {offsets = [0, 64], sizes = [8, 32], strides = [1, 1]} : vector<8x96xf32> to vector<8x32xf32>
    %390 = arith.mulf %388, %335 : vector<8x32xf32>
    %391 = vector.extract_strided_slice %378 {offsets = [0, 96], sizes = [8, 32], strides = [1, 1]} : vector<8x128xf32> to vector<8x32xf32>
    %392 = math.tanh %391 : vector<8x32xf32>
    %393 = arith.mulf %387, %392 : vector<8x32xf32>
    %394 = arith.addf %390, %393 : vector<8x32xf32>
    %395 = math.tanh %394 : vector<8x32xf32>
    %396 = arith.mulf %389, %395 : vector<8x32xf32>
    %cst_124 = arith.constant 0.000000e+00 : f32
    %397 = vector.broadcast %cst_124 : f32 to vector<8x1xf32>
    %398 = arith.cmpf ogt, %380, %397 : vector<8x1xf32>
    %399 = vector.broadcast %380 : vector<8x1xf32> to vector<8x32xf32>
    %400 = arith.mulf %399, %396 : vector<8x32xf32>
    %401 = vector.shape_cast %398 : vector<8x1xi1> to vector<8x1xi1>
    %402 = vector.broadcast %401 : vector<8x1xi1> to vector<8x32xi1>
    %403 = arith.select %402, %396, %332 : vector<8x32xi1>, vector<8x32xf32>
    %404 = vector.shape_cast %398 : vector<8x1xi1> to vector<8x1xi1>
    %405 = vector.broadcast %404 : vector<8x1xi1> to vector<8x32xi1>
    %406 = arith.select %405, %394, %335 : vector<8x32xi1>, vector<8x32xf32>
    %c4_125 = arith.constant 4 : index
    %c0_126 = arith.constant 0 : index
    %c0_127 = arith.constant 0 : index
    %407 = vector.load %arg31[%c4_125, %c0_126, %c0_127] : memref<8x8x32xf32, #tpu.memory_space<vmem>>, vector<1x8x32xf32>
    %408 = vector.shape_cast %407 : vector<1x8x32xf32> to vector<8x32xf32>
    %409 = vector.shape_cast %400 : vector<8x32xf32> to vector<1x8x32xf32>
    tpu.vector_store %arg31[%c4_125, %c0_126, %c0_127], %409 {strides = array<i32>} : memref<8x8x32xf32, #tpu.memory_space<vmem>>, vector<1x8x32xf32>,
    %c6 = arith.constant 6 : index
    %c0_128 = arith.constant 0 : index
    %c0_129 = arith.constant 0 : index
    %410 = vector.load %arg30[%c6, %c0_128, %c0_129] : memref<8x8x128xf32, #tpu.memory_space<vmem>>, vector<1x8x128xf32>
    %411 = vector.shape_cast %410 : vector<1x8x128xf32> to vector<8x128xf32>
    %412 = arith.truncf %368 : vector<8x32xf32> to vector<8x32xbf16>
    %cst_130 = arith.constant dense<0.000000e+00> : vector<8x128xf32>
    %413 = tpu.matmul %412, %18, %cst_130 {dimension_numbers = #tpu.dot_dimension_numbers<[1], [0], [0], [1], [0, 0, 1, 1], [], []>} : vector<8x32xbf16>, vector<32x128xbf16>, vector<8x128xf32> -> vector<8x128xf32>
    %414 = arith.addf %411, %413 : vector<8x128xf32>
    %c6_131 = arith.constant 6 : index
    %c0_132 = arith.constant 0 : index
    %c0_133 = arith.constant 0 : index
    %415 = vector.load %arg2[%c6_131, %c0_132, %c0_133] : memref<8x8x1xf32, #tpu.memory_space<vmem>>, vector<1x8x1xf32>
    %416 = vector.shape_cast %415 : vector<1x8x1xf32> to vector<8x1xf32>
    %417 = vector.extract_strided_slice %414 {offsets = [0, 0], sizes = [8, 96], strides = [1, 1]} : vector<8x128xf32> to vector<8x96xf32>
    %418 = arith.negf %417 : vector<8x96xf32>
    %419 = math.exp %418 : vector<8x96xf32>
    %cst_134 = arith.constant 1.000000e+00 : f32
    %420 = vector.broadcast %cst_134 : f32 to vector<8x96xf32>
    %421 = arith.addf %420, %419 : vector<8x96xf32>
    %422 = arith.divf %420, %421 : vector<8x96xf32>
    %423 = vector.extract_strided_slice %422 {offsets = [0, 0], sizes = [8, 32], strides = [1, 1]} : vector<8x96xf32> to vector<8x32xf32>
    %424 = vector.extract_strided_slice %422 {offsets = [0, 32], sizes = [8, 32], strides = [1, 1]} : vector<8x96xf32> to vector<8x32xf32>
    %425 = vector.extract_strided_slice %422 {offsets = [0, 64], sizes = [8, 32], strides = [1, 1]} : vector<8x96xf32> to vector<8x32xf32>
    %426 = arith.mulf %424, %371 : vector<8x32xf32>
    %427 = vector.extract_strided_slice %414 {offsets = [0, 96], sizes = [8, 32], strides = [1, 1]} : vector<8x128xf32> to vector<8x32xf32>
    %428 = math.tanh %427 : vector<8x32xf32>
    %429 = arith.mulf %423, %428 : vector<8x32xf32>
    %430 = arith.addf %426, %429 : vector<8x32xf32>
    %431 = math.tanh %430 : vector<8x32xf32>
    %432 = arith.mulf %425, %431 : vector<8x32xf32>
    %cst_135 = arith.constant 0.000000e+00 : f32
    %433 = vector.broadcast %cst_135 : f32 to vector<8x1xf32>
    %434 = arith.cmpf ogt, %416, %433 : vector<8x1xf32>
    %435 = vector.broadcast %416 : vector<8x1xf32> to vector<8x32xf32>
    %436 = arith.mulf %435, %432 : vector<8x32xf32>
    %437 = vector.shape_cast %434 : vector<8x1xi1> to vector<8x1xi1>
    %438 = vector.broadcast %437 : vector<8x1xi1> to vector<8x32xi1>
    %439 = arith.select %438, %432, %368 : vector<8x32xi1>, vector<8x32xf32>
    %440 = vector.shape_cast %434 : vector<8x1xi1> to vector<8x1xi1>
    %441 = vector.broadcast %440 : vector<8x1xi1> to vector<8x32xi1>
    %442 = arith.select %441, %430, %371 : vector<8x32xi1>, vector<8x32xf32>
    %443 = arith.truncf %365 : vector<8x32xf32> to vector<8x32xbf16>
    %cst_136 = arith.constant dense<0.000000e+00> : vector<8x128xf32>
    %444 = tpu.matmul %443, %20, %cst_136 {dimension_numbers = #tpu.dot_dimension_numbers<[1], [0], [0], [1], [0, 0, 1, 1], [], []>} : vector<8x32xbf16>, vector<32x128xbf16>, vector<8x128xf32> -> vector<8x128xf32>
    %445 = arith.truncf %403 : vector<8x32xf32> to vector<8x32xbf16>
    %cst_137 = arith.constant dense<0.000000e+00> : vector<8x128xf32>
    %446 = tpu.matmul %445, %19, %cst_137 {dimension_numbers = #tpu.dot_dimension_numbers<[1], [0], [0], [1], [0, 0, 1, 1], [], []>} : vector<8x32xbf16>, vector<32x128xbf16>, vector<8x128xf32> -> vector<8x128xf32>
    %447 = arith.addf %444, %446 : vector<8x128xf32>
    %448 = vector.broadcast %21 : vector<1x128xf32> to vector<8x128xf32>
    %449 = arith.addf %447, %448 : vector<8x128xf32>
    %c5_138 = arith.constant 5 : index
    %c0_139 = arith.constant 0 : index
    %c0_140 = arith.constant 0 : index
    %450 = vector.load %arg2[%c5_138, %c0_139, %c0_140] : memref<8x8x1xf32, #tpu.memory_space<vmem>>, vector<1x8x1xf32>
    %451 = vector.shape_cast %450 : vector<1x8x1xf32> to vector<8x1xf32>
    %452 = vector.extract_strided_slice %449 {offsets = [0, 0], sizes = [8, 96], strides = [1, 1]} : vector<8x128xf32> to vector<8x96xf32>
    %453 = arith.negf %452 : vector<8x96xf32>
    %454 = math.exp %453 : vector<8x96xf32>
    %cst_141 = arith.constant 1.000000e+00 : f32
    %455 = vector.broadcast %cst_141 : f32 to vector<8x96xf32>
    %456 = arith.addf %455, %454 : vector<8x96xf32>
    %457 = arith.divf %455, %456 : vector<8x96xf32>
    %458 = vector.extract_strided_slice %457 {offsets = [0, 0], sizes = [8, 32], strides = [1, 1]} : vector<8x96xf32> to vector<8x32xf32>
    %459 = vector.extract_strided_slice %457 {offsets = [0, 32], sizes = [8, 32], strides = [1, 1]} : vector<8x96xf32> to vector<8x32xf32>
    %460 = vector.extract_strided_slice %457 {offsets = [0, 64], sizes = [8, 32], strides = [1, 1]} : vector<8x96xf32> to vector<8x32xf32>
    %461 = arith.mulf %459, %406 : vector<8x32xf32>
    %462 = vector.extract_strided_slice %449 {offsets = [0, 96], sizes = [8, 32], strides = [1, 1]} : vector<8x128xf32> to vector<8x32xf32>
    %463 = math.tanh %462 : vector<8x32xf32>
    %464 = arith.mulf %458, %463 : vector<8x32xf32>
    %465 = arith.addf %461, %464 : vector<8x32xf32>
    %466 = math.tanh %465 : vector<8x32xf32>
    %467 = arith.mulf %460, %466 : vector<8x32xf32>
    %cst_142 = arith.constant 0.000000e+00 : f32
    %468 = vector.broadcast %cst_142 : f32 to vector<8x1xf32>
    %469 = arith.cmpf ogt, %451, %468 : vector<8x1xf32>
    %470 = vector.broadcast %451 : vector<8x1xf32> to vector<8x32xf32>
    %471 = arith.mulf %470, %467 : vector<8x32xf32>
    %472 = vector.shape_cast %469 : vector<8x1xi1> to vector<8x1xi1>
    %473 = vector.broadcast %472 : vector<8x1xi1> to vector<8x32xi1>
    %474 = arith.select %473, %467, %403 : vector<8x32xi1>, vector<8x32xf32>
    %475 = vector.shape_cast %469 : vector<8x1xi1> to vector<8x1xi1>
    %476 = vector.broadcast %475 : vector<8x1xi1> to vector<8x32xi1>
    %477 = arith.select %476, %465, %406 : vector<8x32xi1>, vector<8x32xf32>
    %c5_143 = arith.constant 5 : index
    %c0_144 = arith.constant 0 : index
    %c0_145 = arith.constant 0 : index
    %478 = vector.load %arg31[%c5_143, %c0_144, %c0_145] : memref<8x8x32xf32, #tpu.memory_space<vmem>>, vector<1x8x32xf32>
    %479 = vector.shape_cast %478 : vector<1x8x32xf32> to vector<8x32xf32>
    %480 = vector.shape_cast %471 : vector<8x32xf32> to vector<1x8x32xf32>
    tpu.vector_store %arg31[%c5_143, %c0_144, %c0_145], %480 {strides = array<i32>} : memref<8x8x32xf32, #tpu.memory_space<vmem>>, vector<1x8x32xf32>,
    %c7 = arith.constant 7 : index
    %c0_146 = arith.constant 0 : index
    %c0_147 = arith.constant 0 : index
    %481 = vector.load %arg30[%c7, %c0_146, %c0_147] : memref<8x8x128xf32, #tpu.memory_space<vmem>>, vector<1x8x128xf32>
    %482 = vector.shape_cast %481 : vector<1x8x128xf32> to vector<8x128xf32>
    %483 = arith.truncf %439 : vector<8x32xf32> to vector<8x32xbf16>
    %cst_148 = arith.constant dense<0.000000e+00> : vector<8x128xf32>
    %484 = tpu.matmul %483, %18, %cst_148 {dimension_numbers = #tpu.dot_dimension_numbers<[1], [0], [0], [1], [0, 0, 1, 1], [], []>} : vector<8x32xbf16>, vector<32x128xbf16>, vector<8x128xf32> -> vector<8x128xf32>
    %485 = arith.addf %482, %484 : vector<8x128xf32>
    %c7_149 = arith.constant 7 : index
    %c0_150 = arith.constant 0 : index
    %c0_151 = arith.constant 0 : index
    %486 = vector.load %arg2[%c7_149, %c0_150, %c0_151] : memref<8x8x1xf32, #tpu.memory_space<vmem>>, vector<1x8x1xf32>
    %487 = vector.shape_cast %486 : vector<1x8x1xf32> to vector<8x1xf32>
    %488 = vector.extract_strided_slice %485 {offsets = [0, 0], sizes = [8, 96], strides = [1, 1]} : vector<8x128xf32> to vector<8x96xf32>
    %489 = arith.negf %488 : vector<8x96xf32>
    %490 = math.exp %489 : vector<8x96xf32>
    %cst_152 = arith.constant 1.000000e+00 : f32
    %491 = vector.broadcast %cst_152 : f32 to vector<8x96xf32>
    %492 = arith.addf %491, %490 : vector<8x96xf32>
    %493 = arith.divf %491, %492 : vector<8x96xf32>
    %494 = vector.extract_strided_slice %493 {offsets = [0, 0], sizes = [8, 32], strides = [1, 1]} : vector<8x96xf32> to vector<8x32xf32>
    %495 = vector.extract_strided_slice %493 {offsets = [0, 32], sizes = [8, 32], strides = [1, 1]} : vector<8x96xf32> to vector<8x32xf32>
    %496 = vector.extract_strided_slice %493 {offsets = [0, 64], sizes = [8, 32], strides = [1, 1]} : vector<8x96xf32> to vector<8x32xf32>
    %497 = arith.mulf %495, %442 : vector<8x32xf32>
    %498 = vector.extract_strided_slice %485 {offsets = [0, 96], sizes = [8, 32], strides = [1, 1]} : vector<8x128xf32> to vector<8x32xf32>
    %499 = math.tanh %498 : vector<8x32xf32>
    %500 = arith.mulf %494, %499 : vector<8x32xf32>
    %501 = arith.addf %497, %500 : vector<8x32xf32>
    %502 = math.tanh %501 : vector<8x32xf32>
    %503 = arith.mulf %496, %502 : vector<8x32xf32>
    %504 = vector.broadcast %487 : vector<8x1xf32> to vector<8x32xf32>
    %505 = arith.mulf %504, %503 : vector<8x32xf32>
    %506 = arith.truncf %436 : vector<8x32xf32> to vector<8x32xbf16>
    %cst_153 = arith.constant dense<0.000000e+00> : vector<8x128xf32>
    %507 = tpu.matmul %506, %20, %cst_153 {dimension_numbers = #tpu.dot_dimension_numbers<[1], [0], [0], [1], [0, 0, 1, 1], [], []>} : vector<8x32xbf16>, vector<32x128xbf16>, vector<8x128xf32> -> vector<8x128xf32>
    %508 = arith.truncf %474 : vector<8x32xf32> to vector<8x32xbf16>
    %cst_154 = arith.constant dense<0.000000e+00> : vector<8x128xf32>
    %509 = tpu.matmul %508, %19, %cst_154 {dimension_numbers = #tpu.dot_dimension_numbers<[1], [0], [0], [1], [0, 0, 1, 1], [], []>} : vector<8x32xbf16>, vector<32x128xbf16>, vector<8x128xf32> -> vector<8x128xf32>
    %510 = arith.addf %507, %509 : vector<8x128xf32>
    %511 = vector.broadcast %21 : vector<1x128xf32> to vector<8x128xf32>
    %512 = arith.addf %510, %511 : vector<8x128xf32>
    %c6_155 = arith.constant 6 : index
    %c0_156 = arith.constant 0 : index
    %c0_157 = arith.constant 0 : index
    %513 = vector.load %arg2[%c6_155, %c0_156, %c0_157] : memref<8x8x1xf32, #tpu.memory_space<vmem>>, vector<1x8x1xf32>
    %514 = vector.shape_cast %513 : vector<1x8x1xf32> to vector<8x1xf32>
    %515 = vector.extract_strided_slice %512 {offsets = [0, 0], sizes = [8, 96], strides = [1, 1]} : vector<8x128xf32> to vector<8x96xf32>
    %516 = arith.negf %515 : vector<8x96xf32>
    %517 = math.exp %516 : vector<8x96xf32>
    %cst_158 = arith.constant 1.000000e+00 : f32
    %518 = vector.broadcast %cst_158 : f32 to vector<8x96xf32>
    %519 = arith.addf %518, %517 : vector<8x96xf32>
    %520 = arith.divf %518, %519 : vector<8x96xf32>
    %521 = vector.extract_strided_slice %520 {offsets = [0, 0], sizes = [8, 32], strides = [1, 1]} : vector<8x96xf32> to vector<8x32xf32>
    %522 = vector.extract_strided_slice %520 {offsets = [0, 32], sizes = [8, 32], strides = [1, 1]} : vector<8x96xf32> to vector<8x32xf32>
    %523 = vector.extract_strided_slice %520 {offsets = [0, 64], sizes = [8, 32], strides = [1, 1]} : vector<8x96xf32> to vector<8x32xf32>
    %524 = arith.mulf %522, %477 : vector<8x32xf32>
    %525 = vector.extract_strided_slice %512 {offsets = [0, 96], sizes = [8, 32], strides = [1, 1]} : vector<8x128xf32> to vector<8x32xf32>
    %526 = math.tanh %525 : vector<8x32xf32>
    %527 = arith.mulf %521, %526 : vector<8x32xf32>
    %528 = arith.addf %524, %527 : vector<8x32xf32>
    %529 = math.tanh %528 : vector<8x32xf32>
    %530 = arith.mulf %523, %529 : vector<8x32xf32>
    %cst_159 = arith.constant 0.000000e+00 : f32
    %531 = vector.broadcast %cst_159 : f32 to vector<8x1xf32>
    %532 = arith.cmpf ogt, %514, %531 : vector<8x1xf32>
    %533 = vector.broadcast %514 : vector<8x1xf32> to vector<8x32xf32>
    %534 = arith.mulf %533, %530 : vector<8x32xf32>
    %535 = vector.shape_cast %532 : vector<8x1xi1> to vector<8x1xi1>
    %536 = vector.broadcast %535 : vector<8x1xi1> to vector<8x32xi1>
    %537 = arith.select %536, %530, %474 : vector<8x32xi1>, vector<8x32xf32>
    %538 = vector.shape_cast %532 : vector<8x1xi1> to vector<8x1xi1>
    %539 = vector.broadcast %538 : vector<8x1xi1> to vector<8x32xi1>
    %540 = arith.select %539, %528, %477 : vector<8x32xi1>, vector<8x32xf32>
    %c6_160 = arith.constant 6 : index
    %c0_161 = arith.constant 0 : index
    %c0_162 = arith.constant 0 : index
    %541 = vector.load %arg31[%c6_160, %c0_161, %c0_162] : memref<8x8x32xf32, #tpu.memory_space<vmem>>, vector<1x8x32xf32>
    %542 = vector.shape_cast %541 : vector<1x8x32xf32> to vector<8x32xf32>
    %543 = vector.shape_cast %534 : vector<8x32xf32> to vector<1x8x32xf32>
    tpu.vector_store %arg31[%c6_160, %c0_161, %c0_162], %543 {strides = array<i32>} : memref<8x8x32xf32, #tpu.memory_space<vmem>>, vector<1x8x32xf32>,
    %544 = arith.truncf %505 : vector<8x32xf32> to vector<8x32xbf16>
    %cst_163 = arith.constant dense<0.000000e+00> : vector<8x128xf32>
    %545 = tpu.matmul %544, %20, %cst_163 {dimension_numbers = #tpu.dot_dimension_numbers<[1], [0], [0], [1], [0, 0, 1, 1], [], []>} : vector<8x32xbf16>, vector<32x128xbf16>, vector<8x128xf32> -> vector<8x128xf32>
    %546 = arith.truncf %537 : vector<8x32xf32> to vector<8x32xbf16>
    %cst_164 = arith.constant dense<0.000000e+00> : vector<8x128xf32>
    %547 = tpu.matmul %546, %19, %cst_164 {dimension_numbers = #tpu.dot_dimension_numbers<[1], [0], [0], [1], [0, 0, 1, 1], [], []>} : vector<8x32xbf16>, vector<32x128xbf16>, vector<8x128xf32> -> vector<8x128xf32>
    %548 = arith.addf %545, %547 : vector<8x128xf32>
    %549 = vector.broadcast %21 : vector<1x128xf32> to vector<8x128xf32>
    %550 = arith.addf %548, %549 : vector<8x128xf32>
    %c7_165 = arith.constant 7 : index
    %c0_166 = arith.constant 0 : index
    %c0_167 = arith.constant 0 : index
    %551 = vector.load %arg2[%c7_165, %c0_166, %c0_167] : memref<8x8x1xf32, #tpu.memory_space<vmem>>, vector<1x8x1xf32>
    %552 = vector.shape_cast %551 : vector<1x8x1xf32> to vector<8x1xf32>
    %553 = vector.extract_strided_slice %550 {offsets = [0, 0], sizes = [8, 96], strides = [1, 1]} : vector<8x128xf32> to vector<8x96xf32>
    %554 = arith.negf %553 : vector<8x96xf32>
    %555 = math.exp %554 : vector<8x96xf32>
    %cst_168 = arith.constant 1.000000e+00 : f32
    %556 = vector.broadcast %cst_168 : f32 to vector<8x96xf32>
    %557 = arith.addf %556, %555 : vector<8x96xf32>
    %558 = arith.divf %556, %557 : vector<8x96xf32>
    %559 = vector.extract_strided_slice %558 {offsets = [0, 0], sizes = [8, 32], strides = [1, 1]} : vector<8x96xf32> to vector<8x32xf32>
    %560 = vector.extract_strided_slice %558 {offsets = [0, 32], sizes = [8, 32], strides = [1, 1]} : vector<8x96xf32> to vector<8x32xf32>
    %561 = vector.extract_strided_slice %558 {offsets = [0, 64], sizes = [8, 32], strides = [1, 1]} : vector<8x96xf32> to vector<8x32xf32>
    %562 = arith.mulf %560, %540 : vector<8x32xf32>
    %563 = vector.extract_strided_slice %550 {offsets = [0, 96], sizes = [8, 32], strides = [1, 1]} : vector<8x128xf32> to vector<8x32xf32>
    %564 = math.tanh %563 : vector<8x32xf32>
    %565 = arith.mulf %559, %564 : vector<8x32xf32>
    %566 = arith.addf %562, %565 : vector<8x32xf32>
    %567 = math.tanh %566 : vector<8x32xf32>
    %568 = arith.mulf %561, %567 : vector<8x32xf32>
    %569 = vector.broadcast %552 : vector<8x1xf32> to vector<8x32xf32>
    %570 = arith.mulf %569, %568 : vector<8x32xf32>
    %c7_169 = arith.constant 7 : index
    %c0_170 = arith.constant 0 : index
    %c0_171 = arith.constant 0 : index
    %571 = vector.load %arg31[%c7_169, %c0_170, %c0_171] : memref<8x8x32xf32, #tpu.memory_space<vmem>>, vector<1x8x32xf32>
    %572 = vector.shape_cast %571 : vector<1x8x32xf32> to vector<8x32xf32>
    %573 = vector.shape_cast %570 : vector<8x32xf32> to vector<1x8x32xf32>
    tpu.vector_store %arg31[%c7_169, %c0_170, %c0_171], %573 {strides = array<i32>} : memref<8x8x32xf32, #tpu.memory_space<vmem>>, vector<1x8x32xf32>,
    %c0_172 = arith.constant 0 : index
    %c0_173 = arith.constant 0 : index
    %c0_174 = arith.constant 0 : index
    %574 = vector.load %arg31[%c0_172, %c0_173, %c0_174] : memref<8x8x32xf32, #tpu.memory_space<vmem>>, vector<8x8x32xf32>
    %575 = vector.shape_cast %574 : vector<8x8x32xf32> to vector<64x32xf32>
    %cst_175 = arith.constant 0.000000e+00 : f32
    %576 = vector.broadcast %cst_175 : f32 to vector<64x32xf32>
    %577 = arith.maximumf %575, %576 : vector<64x32xf32>
    %578 = arith.truncf %577 : vector<64x32xf32> to vector<64x32xbf16>
    %c0_176 = arith.constant 0 : index
    %c0_177 = arith.constant 0 : index
    %579 = vector.load %arg19[%c0_176, %c0_177] : memref<32x32xbf16, #tpu.memory_space<vmem>>, vector<32x32xbf16>
    %cst_178 = arith.constant dense<0.000000e+00> : vector<64x32xf32>
    %580 = tpu.matmul %578, %579, %cst_178 {dimension_numbers = #tpu.dot_dimension_numbers<[1], [0], [0], [1], [0, 0, 1, 1], [], []>} : vector<64x32xbf16>, vector<32x32xbf16>, vector<64x32xf32> -> vector<64x32xf32>
    %c0_179 = arith.constant 0 : index
    %c0_180 = arith.constant 0 : index
    %581 = vector.load %arg20[%c0_179, %c0_180] : memref<1x32xf32, #tpu.memory_space<vmem>>, vector<1x32xf32>
    %582 = vector.broadcast %581 : vector<1x32xf32> to vector<64x32xf32>
    %583 = arith.addf %580, %582 : vector<64x32xf32>
    %cst_181 = arith.constant 0.000000e+00 : f32
    %584 = vector.broadcast %cst_181 : f32 to vector<64x32xf32>
    %585 = arith.maximumf %583, %584 : vector<64x32xf32>
    %586 = arith.truncf %585 : vector<64x32xf32> to vector<64x32xbf16>
    %c0_182 = arith.constant 0 : index
    %c0_183 = arith.constant 0 : index
    %587 = vector.load %arg21[%c0_182, %c0_183] : memref<32x16xbf16, #tpu.memory_space<vmem>>, vector<32x16xbf16>
    %cst_184 = arith.constant dense<0.000000e+00> : vector<64x16xf32>
    %588 = tpu.matmul %586, %587, %cst_184 {dimension_numbers = #tpu.dot_dimension_numbers<[1], [0], [0], [1], [0, 0, 1, 1], [], []>} : vector<64x32xbf16>, vector<32x16xbf16>, vector<64x16xf32> -> vector<64x16xf32>
    %c0_185 = arith.constant 0 : index
    %c0_186 = arith.constant 0 : index
    %589 = vector.load %arg22[%c0_185, %c0_186] : memref<1x16xf32, #tpu.memory_space<vmem>>, vector<1x16xf32>
    %590 = vector.broadcast %589 : vector<1x16xf32> to vector<64x16xf32>
    %591 = arith.addf %588, %590 : vector<64x16xf32>
    %cst_187 = arith.constant 0.000000e+00 : f32
    %592 = vector.broadcast %cst_187 : f32 to vector<64x16xf32>
    %593 = arith.maximumf %591, %592 : vector<64x16xf32>
    %594 = arith.truncf %593 : vector<64x16xf32> to vector<64x16xbf16>
    %c0_188 = arith.constant 0 : index
    %c0_189 = arith.constant 0 : index
    %595 = vector.load %arg23[%c0_188, %c0_189] : memref<16x32xbf16, #tpu.memory_space<vmem>>, vector<16x32xbf16>
    %cst_190 = arith.constant dense<0.000000e+00> : vector<64x32xf32>
    %596 = tpu.matmul %594, %595, %cst_190 {dimension_numbers = #tpu.dot_dimension_numbers<[1], [0], [0], [1], [0, 0, 1, 1], [], []>} : vector<64x16xbf16>, vector<16x32xbf16>, vector<64x32xf32> -> vector<64x32xf32>
    %c0_191 = arith.constant 0 : index
    %c0_192 = arith.constant 0 : index
    %597 = vector.load %arg24[%c0_191, %c0_192] : memref<1x32xf32, #tpu.memory_space<vmem>>, vector<1x32xf32>
    %598 = vector.broadcast %597 : vector<1x32xf32> to vector<64x32xf32>
    %599 = arith.addf %596, %598 : vector<64x32xf32>
    %cst_193 = arith.constant 0.000000e+00 : f32
    %600 = vector.broadcast %cst_193 : f32 to vector<64x32xf32>
    %601 = arith.maximumf %599, %600 : vector<64x32xf32>
    %602 = arith.truncf %601 : vector<64x32xf32> to vector<64x32xbf16>
    %c0_194 = arith.constant 0 : index
    %c0_195 = arith.constant 0 : index
    %603 = vector.load %arg25[%c0_194, %c0_195] : memref<32x32xbf16, #tpu.memory_space<vmem>>, vector<32x32xbf16>
    %cst_196 = arith.constant dense<0.000000e+00> : vector<64x32xf32>
    %604 = tpu.matmul %602, %603, %cst_196 {dimension_numbers = #tpu.dot_dimension_numbers<[1], [0], [0], [1], [0, 0, 1, 1], [], []>} : vector<64x32xbf16>, vector<32x32xbf16>, vector<64x32xf32> -> vector<64x32xf32>
    %c0_197 = arith.constant 0 : index
    %c0_198 = arith.constant 0 : index
    %605 = vector.load %arg26[%c0_197, %c0_198] : memref<1x32xf32, #tpu.memory_space<vmem>>, vector<1x32xf32>
    %606 = vector.broadcast %605 : vector<1x32xf32> to vector<64x32xf32>
    %607 = arith.addf %604, %606 : vector<64x32xf32>
    %cst_199 = arith.constant 0.000000e+00 : f32
    %608 = vector.broadcast %cst_199 : f32 to vector<64x32xf32>
    %609 = arith.maximumf %607, %608 : vector<64x32xf32>
    %610 = arith.truncf %609 : vector<64x32xf32> to vector<64x32xbf16>
    %c0_200 = arith.constant 0 : index
    %c0_201 = arith.constant 0 : index
    %611 = vector.load %arg13[%c0_200, %c0_201] : memref<32x32xbf16, #tpu.memory_space<vmem>>, vector<32x32xbf16>
    %cst_202 = arith.constant dense<0.000000e+00> : vector<64x32xf32>
    %612 = tpu.matmul %610, %611, %cst_202 {dimension_numbers = #tpu.dot_dimension_numbers<[1], [0], [0], [1], [0, 0, 1, 1], [], []>} : vector<64x32xbf16>, vector<32x32xbf16>, vector<64x32xf32> -> vector<64x32xf32>
    %c0_203 = arith.constant 0 : index
    %c0_204 = arith.constant 0 : index
    %613 = vector.load %arg15[%c0_203, %c0_204] : memref<1x32xf32, #tpu.memory_space<vmem>>, vector<1x32xf32>
    %614 = vector.broadcast %613 : vector<1x32xf32> to vector<64x32xf32>
    %615 = arith.addf %612, %614 : vector<64x32xf32>
    %616 = vector.shape_cast %615 : vector<64x32xf32> to vector<8x8x32xf32>
    %c0_205 = arith.constant 0 : index
    %c0_206 = arith.constant 0 : index
    %c0_207 = arith.constant 0 : index
    %617 = vector.load %arg32[%c0_205, %c0_206, %c0_207] : memref<8x8x32xf32, #tpu.memory_space<vmem>>, vector<8x8x32xf32>
    tpu.vector_store %arg32[%c0_205, %c0_206, %c0_207], %616 {strides = array<i32>} : memref<8x8x32xf32, #tpu.memory_space<vmem>>, vector<8x8x32xf32>,
    %c0_208 = arith.constant 0 : index
    %c0_209 = arith.constant 0 : index
    %c0_210 = arith.constant 0 : index
    %618 = vector.load %arg5[%c0_208, %c0_209, %c0_210] : memref<2x8x8xf32, #tpu.memory_space<vmem>>, vector<1x8x8xf32>
    %619 = vector.shape_cast %618 : vector<1x8x8xf32> to vector<8x8xf32>
    %c1_211 = arith.constant 1 : index
    %c0_212 = arith.constant 0 : index
    %c0_213 = arith.constant 0 : index
    %620 = vector.load %arg5[%c1_211, %c0_212, %c0_213] : memref<2x8x8xf32, #tpu.memory_space<vmem>>, vector<1x8x8xf32>
    %621 = vector.shape_cast %620 : vector<1x8x8xf32> to vector<8x8xf32>
    %c0_214 = arith.constant 0 : index
    %c0_215 = arith.constant 0 : index
    %c0_216 = arith.constant 0 : index
    %622 = vector.load %arg6[%c0_214, %c0_215, %c0_216] : memref<2x8x8xf32, #tpu.memory_space<vmem>>, vector<1x8x8xf32>
    %623 = vector.shape_cast %622 : vector<1x8x8xf32> to vector<8x8xf32>
    %c1_217 = arith.constant 1 : index
    %c0_218 = arith.constant 0 : index
    %c0_219 = arith.constant 0 : index
    %624 = vector.load %arg6[%c1_217, %c0_218, %c0_219] : memref<2x8x8xf32, #tpu.memory_space<vmem>>, vector<1x8x8xf32>
    %625 = vector.shape_cast %624 : vector<1x8x8xf32> to vector<8x8xf32>
    %c0_220 = arith.constant 0 : index
    %c0_221 = arith.constant 0 : index
    %626 = vector.load %arg14[%c0_220, %c0_221] : memref<8x32xbf16, #tpu.memory_space<vmem>>, vector<8x32xbf16>
    %c0_222 = arith.constant 0 : index
    %c0_223 = arith.constant 0 : index
    %627 = vector.load %arg17[%c0_222, %c0_223] : memref<8x32xbf16, #tpu.memory_space<vmem>>, vector<8x32xbf16>
    %c0_224 = arith.constant 0 : index
    %c0_225 = arith.constant 0 : index
    %628 = vector.load %arg16[%c0_224, %c0_225] : memref<8x32xbf16, #tpu.memory_space<vmem>>, vector<8x32xbf16>
    %c0_226 = arith.constant 0 : index
    %c0_227 = arith.constant 0 : index
    %629 = vector.load %arg18[%c0_226, %c0_227] : memref<1x32xf32, #tpu.memory_space<vmem>>, vector<1x32xf32>
    %c0_228 = arith.constant 0 : index
    %c0_229 = arith.constant 0 : index
    %c0_230 = arith.constant 0 : index
    %630 = vector.load %arg32[%c0_228, %c0_229, %c0_230] : memref<8x8x32xf32, #tpu.memory_space<vmem>>, vector<1x8x32xf32>
    %631 = vector.shape_cast %630 : vector<1x8x32xf32> to vector<8x32xf32>
    %632 = arith.truncf %619 : vector<8x8xf32> to vector<8x8xbf16>
    %cst_231 = arith.constant dense<0.000000e+00> : vector<8x32xf32>
    %633 = tpu.matmul %632, %626, %cst_231 {dimension_numbers = #tpu.dot_dimension_numbers<[1], [0], [0], [1], [0, 0, 1, 1], [], []>} : vector<8x8xbf16>, vector<8x32xbf16>, vector<8x32xf32> -> vector<8x32xf32>
    %634 = arith.addf %631, %633 : vector<8x32xf32>
    %c0_232 = arith.constant 0 : index
    %c0_233 = arith.constant 0 : index
    %c0_234 = arith.constant 0 : index
    %635 = vector.load %arg2[%c0_232, %c0_233, %c0_234] : memref<8x8x1xf32, #tpu.memory_space<vmem>>, vector<1x8x1xf32>
    %636 = vector.shape_cast %635 : vector<1x8x1xf32> to vector<8x1xf32>
    %637 = vector.extract_strided_slice %634 {offsets = [0, 0], sizes = [8, 24], strides = [1, 1]} : vector<8x32xf32> to vector<8x24xf32>
    %638 = arith.negf %637 : vector<8x24xf32>
    %639 = math.exp %638 : vector<8x24xf32>
    %cst_235 = arith.constant 1.000000e+00 : f32
    %640 = vector.broadcast %cst_235 : f32 to vector<8x24xf32>
    %641 = arith.addf %640, %639 : vector<8x24xf32>
    %642 = arith.divf %640, %641 : vector<8x24xf32>
    %643 = vector.extract_strided_slice %642 {offsets = [0, 0], sizes = [8, 8], strides = [1, 1]} : vector<8x24xf32> to vector<8x8xf32>
    %644 = vector.extract_strided_slice %642 {offsets = [0, 8], sizes = [8, 8], strides = [1, 1]} : vector<8x24xf32> to vector<8x8xf32>
    %645 = vector.extract_strided_slice %642 {offsets = [0, 16], sizes = [8, 8], strides = [1, 1]} : vector<8x24xf32> to vector<8x8xf32>
    %646 = arith.mulf %644, %623 : vector<8x8xf32>
    %647 = vector.extract_strided_slice %634 {offsets = [0, 24], sizes = [8, 8], strides = [1, 1]} : vector<8x32xf32> to vector<8x8xf32>
    %648 = math.tanh %647 : vector<8x8xf32>
    %649 = arith.mulf %643, %648 : vector<8x8xf32>
    %650 = arith.addf %646, %649 : vector<8x8xf32>
    %651 = math.tanh %650 : vector<8x8xf32>
    %652 = arith.mulf %645, %651 : vector<8x8xf32>
    %cst_236 = arith.constant 0.000000e+00 : f32
    %653 = vector.broadcast %cst_236 : f32 to vector<8x1xf32>
    %654 = arith.cmpf ogt, %636, %653 : vector<8x1xf32>
    %655 = vector.broadcast %636 : vector<8x1xf32> to vector<8x8xf32>
    %656 = arith.mulf %655, %652 : vector<8x8xf32>
    %657 = vector.shape_cast %654 : vector<8x1xi1> to vector<8x1xi1>
    %658 = vector.broadcast %657 : vector<8x1xi1> to vector<8x8xi1>
    %659 = arith.select %658, %652, %619 : vector<8x8xi1>, vector<8x8xf32>
    %660 = vector.shape_cast %654 : vector<8x1xi1> to vector<8x1xi1>
    %661 = vector.broadcast %660 : vector<8x1xi1> to vector<8x8xi1>
    %662 = arith.select %661, %650, %623 : vector<8x8xi1>, vector<8x8xf32>
    %c1_237 = arith.constant 1 : index
    %c0_238 = arith.constant 0 : index
    %c0_239 = arith.constant 0 : index
    %663 = vector.load %arg32[%c1_237, %c0_238, %c0_239] : memref<8x8x32xf32, #tpu.memory_space<vmem>>, vector<1x8x32xf32>
    %664 = vector.shape_cast %663 : vector<1x8x32xf32> to vector<8x32xf32>
    %665 = arith.truncf %659 : vector<8x8xf32> to vector<8x8xbf16>
    %cst_240 = arith.constant dense<0.000000e+00> : vector<8x32xf32>
    %666 = tpu.matmul %665, %626, %cst_240 {dimension_numbers = #tpu.dot_dimension_numbers<[1], [0], [0], [1], [0, 0, 1, 1], [], []>} : vector<8x8xbf16>, vector<8x32xbf16>, vector<8x32xf32> -> vector<8x32xf32>
    %667 = arith.addf %664, %666 : vector<8x32xf32>
    %c1_241 = arith.constant 1 : index
    %c0_242 = arith.constant 0 : index
    %c0_243 = arith.constant 0 : index
    %668 = vector.load %arg2[%c1_241, %c0_242, %c0_243] : memref<8x8x1xf32, #tpu.memory_space<vmem>>, vector<1x8x1xf32>
    %669 = vector.shape_cast %668 : vector<1x8x1xf32> to vector<8x1xf32>
    %670 = vector.extract_strided_slice %667 {offsets = [0, 0], sizes = [8, 24], strides = [1, 1]} : vector<8x32xf32> to vector<8x24xf32>
    %671 = arith.negf %670 : vector<8x24xf32>
    %672 = math.exp %671 : vector<8x24xf32>
    %cst_244 = arith.constant 1.000000e+00 : f32
    %673 = vector.broadcast %cst_244 : f32 to vector<8x24xf32>
    %674 = arith.addf %673, %672 : vector<8x24xf32>
    %675 = arith.divf %673, %674 : vector<8x24xf32>
    %676 = vector.extract_strided_slice %675 {offsets = [0, 0], sizes = [8, 8], strides = [1, 1]} : vector<8x24xf32> to vector<8x8xf32>
    %677 = vector.extract_strided_slice %675 {offsets = [0, 8], sizes = [8, 8], strides = [1, 1]} : vector<8x24xf32> to vector<8x8xf32>
    %678 = vector.extract_strided_slice %675 {offsets = [0, 16], sizes = [8, 8], strides = [1, 1]} : vector<8x24xf32> to vector<8x8xf32>
    %679 = arith.mulf %677, %662 : vector<8x8xf32>
    %680 = vector.extract_strided_slice %667 {offsets = [0, 24], sizes = [8, 8], strides = [1, 1]} : vector<8x32xf32> to vector<8x8xf32>
    %681 = math.tanh %680 : vector<8x8xf32>
    %682 = arith.mulf %676, %681 : vector<8x8xf32>
    %683 = arith.addf %679, %682 : vector<8x8xf32>
    %684 = math.tanh %683 : vector<8x8xf32>
    %685 = arith.mulf %678, %684 : vector<8x8xf32>
    %cst_245 = arith.constant 0.000000e+00 : f32
    %686 = vector.broadcast %cst_245 : f32 to vector<8x1xf32>
    %687 = arith.cmpf ogt, %669, %686 : vector<8x1xf32>
    %688 = vector.broadcast %669 : vector<8x1xf32> to vector<8x8xf32>
    %689 = arith.mulf %688, %685 : vector<8x8xf32>
    %690 = vector.shape_cast %687 : vector<8x1xi1> to vector<8x1xi1>
    %691 = vector.broadcast %690 : vector<8x1xi1> to vector<8x8xi1>
    %692 = arith.select %691, %685, %659 : vector<8x8xi1>, vector<8x8xf32>
    %693 = vector.shape_cast %687 : vector<8x1xi1> to vector<8x1xi1>
    %694 = vector.broadcast %693 : vector<8x1xi1> to vector<8x8xi1>
    %695 = arith.select %694, %683, %662 : vector<8x8xi1>, vector<8x8xf32>
    %696 = arith.truncf %656 : vector<8x8xf32> to vector<8x8xbf16>
    %cst_246 = arith.constant dense<0.000000e+00> : vector<8x32xf32>
    %697 = tpu.matmul %696, %628, %cst_246 {dimension_numbers = #tpu.dot_dimension_numbers<[1], [0], [0], [1], [0, 0, 1, 1], [], []>} : vector<8x8xbf16>, vector<8x32xbf16>, vector<8x32xf32> -> vector<8x32xf32>
    %698 = arith.truncf %621 : vector<8x8xf32> to vector<8x8xbf16>
    %cst_247 = arith.constant dense<0.000000e+00> : vector<8x32xf32>
    %699 = tpu.matmul %698, %627, %cst_247 {dimension_numbers = #tpu.dot_dimension_numbers<[1], [0], [0], [1], [0, 0, 1, 1], [], []>} : vector<8x8xbf16>, vector<8x32xbf16>, vector<8x32xf32> -> vector<8x32xf32>
    %700 = arith.addf %697, %699 : vector<8x32xf32>
    %701 = vector.broadcast %629 : vector<1x32xf32> to vector<8x32xf32>
    %702 = arith.addf %700, %701 : vector<8x32xf32>
    %c0_248 = arith.constant 0 : index
    %c0_249 = arith.constant 0 : index
    %c0_250 = arith.constant 0 : index
    %703 = vector.load %arg2[%c0_248, %c0_249, %c0_250] : memref<8x8x1xf32, #tpu.memory_space<vmem>>, vector<1x8x1xf32>
    %704 = vector.shape_cast %703 : vector<1x8x1xf32> to vector<8x1xf32>
    %705 = vector.extract_strided_slice %702 {offsets = [0, 0], sizes = [8, 24], strides = [1, 1]} : vector<8x32xf32> to vector<8x24xf32>
    %706 = arith.negf %705 : vector<8x24xf32>
    %707 = math.exp %706 : vector<8x24xf32>
    %cst_251 = arith.constant 1.000000e+00 : f32
    %708 = vector.broadcast %cst_251 : f32 to vector<8x24xf32>
    %709 = arith.addf %708, %707 : vector<8x24xf32>
    %710 = arith.divf %708, %709 : vector<8x24xf32>
    %711 = vector.extract_strided_slice %710 {offsets = [0, 0], sizes = [8, 8], strides = [1, 1]} : vector<8x24xf32> to vector<8x8xf32>
    %712 = vector.extract_strided_slice %710 {offsets = [0, 8], sizes = [8, 8], strides = [1, 1]} : vector<8x24xf32> to vector<8x8xf32>
    %713 = vector.extract_strided_slice %710 {offsets = [0, 16], sizes = [8, 8], strides = [1, 1]} : vector<8x24xf32> to vector<8x8xf32>
    %714 = arith.mulf %712, %625 : vector<8x8xf32>
    %715 = vector.extract_strided_slice %702 {offsets = [0, 24], sizes = [8, 8], strides = [1, 1]} : vector<8x32xf32> to vector<8x8xf32>
    %716 = math.tanh %715 : vector<8x8xf32>
    %717 = arith.mulf %711, %716 : vector<8x8xf32>
    %718 = arith.addf %714, %717 : vector<8x8xf32>
    %719 = math.tanh %718 : vector<8x8xf32>
    %720 = arith.mulf %713, %719 : vector<8x8xf32>
    %cst_252 = arith.constant 0.000000e+00 : f32
    %721 = vector.broadcast %cst_252 : f32 to vector<8x1xf32>
    %722 = arith.cmpf ogt, %704, %721 : vector<8x1xf32>
    %723 = vector.broadcast %704 : vector<8x1xf32> to vector<8x8xf32>
    %724 = arith.mulf %723, %720 : vector<8x8xf32>
    %725 = vector.shape_cast %722 : vector<8x1xi1> to vector<8x1xi1>
    %726 = vector.broadcast %725 : vector<8x1xi1> to vector<8x8xi1>
    %727 = arith.select %726, %720, %621 : vector<8x8xi1>, vector<8x8xf32>
    %728 = vector.shape_cast %722 : vector<8x1xi1> to vector<8x1xi1>
    %729 = vector.broadcast %728 : vector<8x1xi1> to vector<8x8xi1>
    %730 = arith.select %729, %718, %625 : vector<8x8xi1>, vector<8x8xf32>
    %c0_253 = arith.constant 0 : index
    %c0_254 = arith.constant 0 : index
    %c0_255 = arith.constant 0 : index
    %731 = vector.load %arg27[%c0_253, %c0_254, %c0_255] : memref<8x8x8xf32, #tpu.memory_space<vmem>>, vector<1x8x8xf32>
    %732 = vector.shape_cast %731 : vector<1x8x8xf32> to vector<8x8xf32>
    %733 = vector.shape_cast %724 : vector<8x8xf32> to vector<1x8x8xf32>
    tpu.vector_store %arg27[%c0_253, %c0_254, %c0_255], %733 {strides = array<i32>} : memref<8x8x8xf32, #tpu.memory_space<vmem>>, vector<1x8x8xf32>,
    %c2_256 = arith.constant 2 : index
    %c0_257 = arith.constant 0 : index
    %c0_258 = arith.constant 0 : index
    %734 = vector.load %arg32[%c2_256, %c0_257, %c0_258] : memref<8x8x32xf32, #tpu.memory_space<vmem>>, vector<1x8x32xf32>
    %735 = vector.shape_cast %734 : vector<1x8x32xf32> to vector<8x32xf32>
    %736 = arith.truncf %692 : vector<8x8xf32> to vector<8x8xbf16>
    %cst_259 = arith.constant dense<0.000000e+00> : vector<8x32xf32>
    %737 = tpu.matmul %736, %626, %cst_259 {dimension_numbers = #tpu.dot_dimension_numbers<[1], [0], [0], [1], [0, 0, 1, 1], [], []>} : vector<8x8xbf16>, vector<8x32xbf16>, vector<8x32xf32> -> vector<8x32xf32>
    %738 = arith.addf %735, %737 : vector<8x32xf32>
    %c2_260 = arith.constant 2 : index
    %c0_261 = arith.constant 0 : index
    %c0_262 = arith.constant 0 : index
    %739 = vector.load %arg2[%c2_260, %c0_261, %c0_262] : memref<8x8x1xf32, #tpu.memory_space<vmem>>, vector<1x8x1xf32>
    %740 = vector.shape_cast %739 : vector<1x8x1xf32> to vector<8x1xf32>
    %741 = vector.extract_strided_slice %738 {offsets = [0, 0], sizes = [8, 24], strides = [1, 1]} : vector<8x32xf32> to vector<8x24xf32>
    %742 = arith.negf %741 : vector<8x24xf32>
    %743 = math.exp %742 : vector<8x24xf32>
    %cst_263 = arith.constant 1.000000e+00 : f32
    %744 = vector.broadcast %cst_263 : f32 to vector<8x24xf32>
    %745 = arith.addf %744, %743 : vector<8x24xf32>
    %746 = arith.divf %744, %745 : vector<8x24xf32>
    %747 = vector.extract_strided_slice %746 {offsets = [0, 0], sizes = [8, 8], strides = [1, 1]} : vector<8x24xf32> to vector<8x8xf32>
    %748 = vector.extract_strided_slice %746 {offsets = [0, 8], sizes = [8, 8], strides = [1, 1]} : vector<8x24xf32> to vector<8x8xf32>
    %749 = vector.extract_strided_slice %746 {offsets = [0, 16], sizes = [8, 8], strides = [1, 1]} : vector<8x24xf32> to vector<8x8xf32>
    %750 = arith.mulf %748, %695 : vector<8x8xf32>
    %751 = vector.extract_strided_slice %738 {offsets = [0, 24], sizes = [8, 8], strides = [1, 1]} : vector<8x32xf32> to vector<8x8xf32>
    %752 = math.tanh %751 : vector<8x8xf32>
    %753 = arith.mulf %747, %752 : vector<8x8xf32>
    %754 = arith.addf %750, %753 : vector<8x8xf32>
    %755 = math.tanh %754 : vector<8x8xf32>
    %756 = arith.mulf %749, %755 : vector<8x8xf32>
    %cst_264 = arith.constant 0.000000e+00 : f32
    %757 = vector.broadcast %cst_264 : f32 to vector<8x1xf32>
    %758 = arith.cmpf ogt, %740, %757 : vector<8x1xf32>
    %759 = vector.broadcast %740 : vector<8x1xf32> to vector<8x8xf32>
    %760 = arith.mulf %759, %756 : vector<8x8xf32>
    %761 = vector.shape_cast %758 : vector<8x1xi1> to vector<8x1xi1>
    %762 = vector.broadcast %761 : vector<8x1xi1> to vector<8x8xi1>
    %763 = arith.select %762, %756, %692 : vector<8x8xi1>, vector<8x8xf32>
    %764 = vector.shape_cast %758 : vector<8x1xi1> to vector<8x1xi1>
    %765 = vector.broadcast %764 : vector<8x1xi1> to vector<8x8xi1>
    %766 = arith.select %765, %754, %695 : vector<8x8xi1>, vector<8x8xf32>
    %767 = arith.truncf %689 : vector<8x8xf32> to vector<8x8xbf16>
    %cst_265 = arith.constant dense<0.000000e+00> : vector<8x32xf32>
    %768 = tpu.matmul %767, %628, %cst_265 {dimension_numbers = #tpu.dot_dimension_numbers<[1], [0], [0], [1], [0, 0, 1, 1], [], []>} : vector<8x8xbf16>, vector<8x32xbf16>, vector<8x32xf32> -> vector<8x32xf32>
    %769 = arith.truncf %727 : vector<8x8xf32> to vector<8x8xbf16>
    %cst_266 = arith.constant dense<0.000000e+00> : vector<8x32xf32>
    %770 = tpu.matmul %769, %627, %cst_266 {dimension_numbers = #tpu.dot_dimension_numbers<[1], [0], [0], [1], [0, 0, 1, 1], [], []>} : vector<8x8xbf16>, vector<8x32xbf16>, vector<8x32xf32> -> vector<8x32xf32>
    %771 = arith.addf %768, %770 : vector<8x32xf32>
    %772 = vector.broadcast %629 : vector<1x32xf32> to vector<8x32xf32>
    %773 = arith.addf %771, %772 : vector<8x32xf32>
    %c1_267 = arith.constant 1 : index
    %c0_268 = arith.constant 0 : index
    %c0_269 = arith.constant 0 : index
    %774 = vector.load %arg2[%c1_267, %c0_268, %c0_269] : memref<8x8x1xf32, #tpu.memory_space<vmem>>, vector<1x8x1xf32>
    %775 = vector.shape_cast %774 : vector<1x8x1xf32> to vector<8x1xf32>
    %776 = vector.extract_strided_slice %773 {offsets = [0, 0], sizes = [8, 24], strides = [1, 1]} : vector<8x32xf32> to vector<8x24xf32>
    %777 = arith.negf %776 : vector<8x24xf32>
    %778 = math.exp %777 : vector<8x24xf32>
    %cst_270 = arith.constant 1.000000e+00 : f32
    %779 = vector.broadcast %cst_270 : f32 to vector<8x24xf32>
    %780 = arith.addf %779, %778 : vector<8x24xf32>
    %781 = arith.divf %779, %780 : vector<8x24xf32>
    %782 = vector.extract_strided_slice %781 {offsets = [0, 0], sizes = [8, 8], strides = [1, 1]} : vector<8x24xf32> to vector<8x8xf32>
    %783 = vector.extract_strided_slice %781 {offsets = [0, 8], sizes = [8, 8], strides = [1, 1]} : vector<8x24xf32> to vector<8x8xf32>
    %784 = vector.extract_strided_slice %781 {offsets = [0, 16], sizes = [8, 8], strides = [1, 1]} : vector<8x24xf32> to vector<8x8xf32>
    %785 = arith.mulf %783, %730 : vector<8x8xf32>
    %786 = vector.extract_strided_slice %773 {offsets = [0, 24], sizes = [8, 8], strides = [1, 1]} : vector<8x32xf32> to vector<8x8xf32>
    %787 = math.tanh %786 : vector<8x8xf32>
    %788 = arith.mulf %782, %787 : vector<8x8xf32>
    %789 = arith.addf %785, %788 : vector<8x8xf32>
    %790 = math.tanh %789 : vector<8x8xf32>
    %791 = arith.mulf %784, %790 : vector<8x8xf32>
    %cst_271 = arith.constant 0.000000e+00 : f32
    %792 = vector.broadcast %cst_271 : f32 to vector<8x1xf32>
    %793 = arith.cmpf ogt, %775, %792 : vector<8x1xf32>
    %794 = vector.broadcast %775 : vector<8x1xf32> to vector<8x8xf32>
    %795 = arith.mulf %794, %791 : vector<8x8xf32>
    %796 = vector.shape_cast %793 : vector<8x1xi1> to vector<8x1xi1>
    %797 = vector.broadcast %796 : vector<8x1xi1> to vector<8x8xi1>
    %798 = arith.select %797, %791, %727 : vector<8x8xi1>, vector<8x8xf32>
    %799 = vector.shape_cast %793 : vector<8x1xi1> to vector<8x1xi1>
    %800 = vector.broadcast %799 : vector<8x1xi1> to vector<8x8xi1>
    %801 = arith.select %800, %789, %730 : vector<8x8xi1>, vector<8x8xf32>
    %c1_272 = arith.constant 1 : index
    %c0_273 = arith.constant 0 : index
    %c0_274 = arith.constant 0 : index
    %802 = vector.load %arg27[%c1_272, %c0_273, %c0_274] : memref<8x8x8xf32, #tpu.memory_space<vmem>>, vector<1x8x8xf32>
    %803 = vector.shape_cast %802 : vector<1x8x8xf32> to vector<8x8xf32>
    %804 = vector.shape_cast %795 : vector<8x8xf32> to vector<1x8x8xf32>
    tpu.vector_store %arg27[%c1_272, %c0_273, %c0_274], %804 {strides = array<i32>} : memref<8x8x8xf32, #tpu.memory_space<vmem>>, vector<1x8x8xf32>,
    %c3_275 = arith.constant 3 : index
    %c0_276 = arith.constant 0 : index
    %c0_277 = arith.constant 0 : index
    %805 = vector.load %arg32[%c3_275, %c0_276, %c0_277] : memref<8x8x32xf32, #tpu.memory_space<vmem>>, vector<1x8x32xf32>
    %806 = vector.shape_cast %805 : vector<1x8x32xf32> to vector<8x32xf32>
    %807 = arith.truncf %763 : vector<8x8xf32> to vector<8x8xbf16>
    %cst_278 = arith.constant dense<0.000000e+00> : vector<8x32xf32>
    %808 = tpu.matmul %807, %626, %cst_278 {dimension_numbers = #tpu.dot_dimension_numbers<[1], [0], [0], [1], [0, 0, 1, 1], [], []>} : vector<8x8xbf16>, vector<8x32xbf16>, vector<8x32xf32> -> vector<8x32xf32>
    %809 = arith.addf %806, %808 : vector<8x32xf32>
    %c3_279 = arith.constant 3 : index
    %c0_280 = arith.constant 0 : index
    %c0_281 = arith.constant 0 : index
    %810 = vector.load %arg2[%c3_279, %c0_280, %c0_281] : memref<8x8x1xf32, #tpu.memory_space<vmem>>, vector<1x8x1xf32>
    %811 = vector.shape_cast %810 : vector<1x8x1xf32> to vector<8x1xf32>
    %812 = vector.extract_strided_slice %809 {offsets = [0, 0], sizes = [8, 24], strides = [1, 1]} : vector<8x32xf32> to vector<8x24xf32>
    %813 = arith.negf %812 : vector<8x24xf32>
    %814 = math.exp %813 : vector<8x24xf32>
    %cst_282 = arith.constant 1.000000e+00 : f32
    %815 = vector.broadcast %cst_282 : f32 to vector<8x24xf32>
    %816 = arith.addf %815, %814 : vector<8x24xf32>
    %817 = arith.divf %815, %816 : vector<8x24xf32>
    %818 = vector.extract_strided_slice %817 {offsets = [0, 0], sizes = [8, 8], strides = [1, 1]} : vector<8x24xf32> to vector<8x8xf32>
    %819 = vector.extract_strided_slice %817 {offsets = [0, 8], sizes = [8, 8], strides = [1, 1]} : vector<8x24xf32> to vector<8x8xf32>
    %820 = vector.extract_strided_slice %817 {offsets = [0, 16], sizes = [8, 8], strides = [1, 1]} : vector<8x24xf32> to vector<8x8xf32>
    %821 = arith.mulf %819, %766 : vector<8x8xf32>
    %822 = vector.extract_strided_slice %809 {offsets = [0, 24], sizes = [8, 8], strides = [1, 1]} : vector<8x32xf32> to vector<8x8xf32>
    %823 = math.tanh %822 : vector<8x8xf32>
    %824 = arith.mulf %818, %823 : vector<8x8xf32>
    %825 = arith.addf %821, %824 : vector<8x8xf32>
    %826 = math.tanh %825 : vector<8x8xf32>
    %827 = arith.mulf %820, %826 : vector<8x8xf32>
    %cst_283 = arith.constant 0.000000e+00 : f32
    %828 = vector.broadcast %cst_283 : f32 to vector<8x1xf32>
    %829 = arith.cmpf ogt, %811, %828 : vector<8x1xf32>
    %830 = vector.broadcast %811 : vector<8x1xf32> to vector<8x8xf32>
    %831 = arith.mulf %830, %827 : vector<8x8xf32>
    %832 = vector.shape_cast %829 : vector<8x1xi1> to vector<8x1xi1>
    %833 = vector.broadcast %832 : vector<8x1xi1> to vector<8x8xi1>
    %834 = arith.select %833, %827, %763 : vector<8x8xi1>, vector<8x8xf32>
    %835 = vector.shape_cast %829 : vector<8x1xi1> to vector<8x1xi1>
    %836 = vector.broadcast %835 : vector<8x1xi1> to vector<8x8xi1>
    %837 = arith.select %836, %825, %766 : vector<8x8xi1>, vector<8x8xf32>
    %838 = arith.truncf %760 : vector<8x8xf32> to vector<8x8xbf16>
    %cst_284 = arith.constant dense<0.000000e+00> : vector<8x32xf32>
    %839 = tpu.matmul %838, %628, %cst_284 {dimension_numbers = #tpu.dot_dimension_numbers<[1], [0], [0], [1], [0, 0, 1, 1], [], []>} : vector<8x8xbf16>, vector<8x32xbf16>, vector<8x32xf32> -> vector<8x32xf32>
    %840 = arith.truncf %798 : vector<8x8xf32> to vector<8x8xbf16>
    %cst_285 = arith.constant dense<0.000000e+00> : vector<8x32xf32>
    %841 = tpu.matmul %840, %627, %cst_285 {dimension_numbers = #tpu.dot_dimension_numbers<[1], [0], [0], [1], [0, 0, 1, 1], [], []>} : vector<8x8xbf16>, vector<8x32xbf16>, vector<8x32xf32> -> vector<8x32xf32>
    %842 = arith.addf %839, %841 : vector<8x32xf32>
    %843 = vector.broadcast %629 : vector<1x32xf32> to vector<8x32xf32>
    %844 = arith.addf %842, %843 : vector<8x32xf32>
    %c2_286 = arith.constant 2 : index
    %c0_287 = arith.constant 0 : index
    %c0_288 = arith.constant 0 : index
    %845 = vector.load %arg2[%c2_286, %c0_287, %c0_288] : memref<8x8x1xf32, #tpu.memory_space<vmem>>, vector<1x8x1xf32>
    %846 = vector.shape_cast %845 : vector<1x8x1xf32> to vector<8x1xf32>
    %847 = vector.extract_strided_slice %844 {offsets = [0, 0], sizes = [8, 24], strides = [1, 1]} : vector<8x32xf32> to vector<8x24xf32>
    %848 = arith.negf %847 : vector<8x24xf32>
    %849 = math.exp %848 : vector<8x24xf32>
    %cst_289 = arith.constant 1.000000e+00 : f32
    %850 = vector.broadcast %cst_289 : f32 to vector<8x24xf32>
    %851 = arith.addf %850, %849 : vector<8x24xf32>
    %852 = arith.divf %850, %851 : vector<8x24xf32>
    %853 = vector.extract_strided_slice %852 {offsets = [0, 0], sizes = [8, 8], strides = [1, 1]} : vector<8x24xf32> to vector<8x8xf32>
    %854 = vector.extract_strided_slice %852 {offsets = [0, 8], sizes = [8, 8], strides = [1, 1]} : vector<8x24xf32> to vector<8x8xf32>
    %855 = vector.extract_strided_slice %852 {offsets = [0, 16], sizes = [8, 8], strides = [1, 1]} : vector<8x24xf32> to vector<8x8xf32>
    %856 = arith.mulf %854, %801 : vector<8x8xf32>
    %857 = vector.extract_strided_slice %844 {offsets = [0, 24], sizes = [8, 8], strides = [1, 1]} : vector<8x32xf32> to vector<8x8xf32>
    %858 = math.tanh %857 : vector<8x8xf32>
    %859 = arith.mulf %853, %858 : vector<8x8xf32>
    %860 = arith.addf %856, %859 : vector<8x8xf32>
    %861 = math.tanh %860 : vector<8x8xf32>
    %862 = arith.mulf %855, %861 : vector<8x8xf32>
    %cst_290 = arith.constant 0.000000e+00 : f32
    %863 = vector.broadcast %cst_290 : f32 to vector<8x1xf32>
    %864 = arith.cmpf ogt, %846, %863 : vector<8x1xf32>
    %865 = vector.broadcast %846 : vector<8x1xf32> to vector<8x8xf32>
    %866 = arith.mulf %865, %862 : vector<8x8xf32>
    %867 = vector.shape_cast %864 : vector<8x1xi1> to vector<8x1xi1>
    %868 = vector.broadcast %867 : vector<8x1xi1> to vector<8x8xi1>
    %869 = arith.select %868, %862, %798 : vector<8x8xi1>, vector<8x8xf32>
    %870 = vector.shape_cast %864 : vector<8x1xi1> to vector<8x1xi1>
    %871 = vector.broadcast %870 : vector<8x1xi1> to vector<8x8xi1>
    %872 = arith.select %871, %860, %801 : vector<8x8xi1>, vector<8x8xf32>
    %c2_291 = arith.constant 2 : index
    %c0_292 = arith.constant 0 : index
    %c0_293 = arith.constant 0 : index
    %873 = vector.load %arg27[%c2_291, %c0_292, %c0_293] : memref<8x8x8xf32, #tpu.memory_space<vmem>>, vector<1x8x8xf32>
    %874 = vector.shape_cast %873 : vector<1x8x8xf32> to vector<8x8xf32>
    %875 = vector.shape_cast %866 : vector<8x8xf32> to vector<1x8x8xf32>
    tpu.vector_store %arg27[%c2_291, %c0_292, %c0_293], %875 {strides = array<i32>} : memref<8x8x8xf32, #tpu.memory_space<vmem>>, vector<1x8x8xf32>,
    %c4_294 = arith.constant 4 : index
    %c0_295 = arith.constant 0 : index
    %c0_296 = arith.constant 0 : index
    %876 = vector.load %arg32[%c4_294, %c0_295, %c0_296] : memref<8x8x32xf32, #tpu.memory_space<vmem>>, vector<1x8x32xf32>
    %877 = vector.shape_cast %876 : vector<1x8x32xf32> to vector<8x32xf32>
    %878 = arith.truncf %834 : vector<8x8xf32> to vector<8x8xbf16>
    %cst_297 = arith.constant dense<0.000000e+00> : vector<8x32xf32>
    %879 = tpu.matmul %878, %626, %cst_297 {dimension_numbers = #tpu.dot_dimension_numbers<[1], [0], [0], [1], [0, 0, 1, 1], [], []>} : vector<8x8xbf16>, vector<8x32xbf16>, vector<8x32xf32> -> vector<8x32xf32>
    %880 = arith.addf %877, %879 : vector<8x32xf32>
    %c4_298 = arith.constant 4 : index
    %c0_299 = arith.constant 0 : index
    %c0_300 = arith.constant 0 : index
    %881 = vector.load %arg2[%c4_298, %c0_299, %c0_300] : memref<8x8x1xf32, #tpu.memory_space<vmem>>, vector<1x8x1xf32>
    %882 = vector.shape_cast %881 : vector<1x8x1xf32> to vector<8x1xf32>
    %883 = vector.extract_strided_slice %880 {offsets = [0, 0], sizes = [8, 24], strides = [1, 1]} : vector<8x32xf32> to vector<8x24xf32>
    %884 = arith.negf %883 : vector<8x24xf32>
    %885 = math.exp %884 : vector<8x24xf32>
    %cst_301 = arith.constant 1.000000e+00 : f32
    %886 = vector.broadcast %cst_301 : f32 to vector<8x24xf32>
    %887 = arith.addf %886, %885 : vector<8x24xf32>
    %888 = arith.divf %886, %887 : vector<8x24xf32>
    %889 = vector.extract_strided_slice %888 {offsets = [0, 0], sizes = [8, 8], strides = [1, 1]} : vector<8x24xf32> to vector<8x8xf32>
    %890 = vector.extract_strided_slice %888 {offsets = [0, 8], sizes = [8, 8], strides = [1, 1]} : vector<8x24xf32> to vector<8x8xf32>
    %891 = vector.extract_strided_slice %888 {offsets = [0, 16], sizes = [8, 8], strides = [1, 1]} : vector<8x24xf32> to vector<8x8xf32>
    %892 = arith.mulf %890, %837 : vector<8x8xf32>
    %893 = vector.extract_strided_slice %880 {offsets = [0, 24], sizes = [8, 8], strides = [1, 1]} : vector<8x32xf32> to vector<8x8xf32>
    %894 = math.tanh %893 : vector<8x8xf32>
    %895 = arith.mulf %889, %894 : vector<8x8xf32>
    %896 = arith.addf %892, %895 : vector<8x8xf32>
    %897 = math.tanh %896 : vector<8x8xf32>
    %898 = arith.mulf %891, %897 : vector<8x8xf32>
    %cst_302 = arith.constant 0.000000e+00 : f32
    %899 = vector.broadcast %cst_302 : f32 to vector<8x1xf32>
    %900 = arith.cmpf ogt, %882, %899 : vector<8x1xf32>
    %901 = vector.broadcast %882 : vector<8x1xf32> to vector<8x8xf32>
    %902 = arith.mulf %901, %898 : vector<8x8xf32>
    %903 = vector.shape_cast %900 : vector<8x1xi1> to vector<8x1xi1>
    %904 = vector.broadcast %903 : vector<8x1xi1> to vector<8x8xi1>
    %905 = arith.select %904, %898, %834 : vector<8x8xi1>, vector<8x8xf32>
    %906 = vector.shape_cast %900 : vector<8x1xi1> to vector<8x1xi1>
    %907 = vector.broadcast %906 : vector<8x1xi1> to vector<8x8xi1>
    %908 = arith.select %907, %896, %837 : vector<8x8xi1>, vector<8x8xf32>
    %909 = arith.truncf %831 : vector<8x8xf32> to vector<8x8xbf16>
    %cst_303 = arith.constant dense<0.000000e+00> : vector<8x32xf32>
    %910 = tpu.matmul %909, %628, %cst_303 {dimension_numbers = #tpu.dot_dimension_numbers<[1], [0], [0], [1], [0, 0, 1, 1], [], []>} : vector<8x8xbf16>, vector<8x32xbf16>, vector<8x32xf32> -> vector<8x32xf32>
    %911 = arith.truncf %869 : vector<8x8xf32> to vector<8x8xbf16>
    %cst_304 = arith.constant dense<0.000000e+00> : vector<8x32xf32>
    %912 = tpu.matmul %911, %627, %cst_304 {dimension_numbers = #tpu.dot_dimension_numbers<[1], [0], [0], [1], [0, 0, 1, 1], [], []>} : vector<8x8xbf16>, vector<8x32xbf16>, vector<8x32xf32> -> vector<8x32xf32>
    %913 = arith.addf %910, %912 : vector<8x32xf32>
    %914 = vector.broadcast %629 : vector<1x32xf32> to vector<8x32xf32>
    %915 = arith.addf %913, %914 : vector<8x32xf32>
    %c3_305 = arith.constant 3 : index
    %c0_306 = arith.constant 0 : index
    %c0_307 = arith.constant 0 : index
    %916 = vector.load %arg2[%c3_305, %c0_306, %c0_307] : memref<8x8x1xf32, #tpu.memory_space<vmem>>, vector<1x8x1xf32>
    %917 = vector.shape_cast %916 : vector<1x8x1xf32> to vector<8x1xf32>
    %918 = vector.extract_strided_slice %915 {offsets = [0, 0], sizes = [8, 24], strides = [1, 1]} : vector<8x32xf32> to vector<8x24xf32>
    %919 = arith.negf %918 : vector<8x24xf32>
    %920 = math.exp %919 : vector<8x24xf32>
    %cst_308 = arith.constant 1.000000e+00 : f32
    %921 = vector.broadcast %cst_308 : f32 to vector<8x24xf32>
    %922 = arith.addf %921, %920 : vector<8x24xf32>
    %923 = arith.divf %921, %922 : vector<8x24xf32>
    %924 = vector.extract_strided_slice %923 {offsets = [0, 0], sizes = [8, 8], strides = [1, 1]} : vector<8x24xf32> to vector<8x8xf32>
    %925 = vector.extract_strided_slice %923 {offsets = [0, 8], sizes = [8, 8], strides = [1, 1]} : vector<8x24xf32> to vector<8x8xf32>
    %926 = vector.extract_strided_slice %923 {offsets = [0, 16], sizes = [8, 8], strides = [1, 1]} : vector<8x24xf32> to vector<8x8xf32>
    %927 = arith.mulf %925, %872 : vector<8x8xf32>
    %928 = vector.extract_strided_slice %915 {offsets = [0, 24], sizes = [8, 8], strides = [1, 1]} : vector<8x32xf32> to vector<8x8xf32>
    %929 = math.tanh %928 : vector<8x8xf32>
    %930 = arith.mulf %924, %929 : vector<8x8xf32>
    %931 = arith.addf %927, %930 : vector<8x8xf32>
    %932 = math.tanh %931 : vector<8x8xf32>
    %933 = arith.mulf %926, %932 : vector<8x8xf32>
    %cst_309 = arith.constant 0.000000e+00 : f32
    %934 = vector.broadcast %cst_309 : f32 to vector<8x1xf32>
    %935 = arith.cmpf ogt, %917, %934 : vector<8x1xf32>
    %936 = vector.broadcast %917 : vector<8x1xf32> to vector<8x8xf32>
    %937 = arith.mulf %936, %933 : vector<8x8xf32>
    %938 = vector.shape_cast %935 : vector<8x1xi1> to vector<8x1xi1>
    %939 = vector.broadcast %938 : vector<8x1xi1> to vector<8x8xi1>
    %940 = arith.select %939, %933, %869 : vector<8x8xi1>, vector<8x8xf32>
    %941 = vector.shape_cast %935 : vector<8x1xi1> to vector<8x1xi1>
    %942 = vector.broadcast %941 : vector<8x1xi1> to vector<8x8xi1>
    %943 = arith.select %942, %931, %872 : vector<8x8xi1>, vector<8x8xf32>
    %c3_310 = arith.constant 3 : index
    %c0_311 = arith.constant 0 : index
    %c0_312 = arith.constant 0 : index
    %944 = vector.load %arg27[%c3_310, %c0_311, %c0_312] : memref<8x8x8xf32, #tpu.memory_space<vmem>>, vector<1x8x8xf32>
    %945 = vector.shape_cast %944 : vector<1x8x8xf32> to vector<8x8xf32>
    %946 = vector.shape_cast %937 : vector<8x8xf32> to vector<1x8x8xf32>
    tpu.vector_store %arg27[%c3_310, %c0_311, %c0_312], %946 {strides = array<i32>} : memref<8x8x8xf32, #tpu.memory_space<vmem>>, vector<1x8x8xf32>,
    %c5_313 = arith.constant 5 : index
    %c0_314 = arith.constant 0 : index
    %c0_315 = arith.constant 0 : index
    %947 = vector.load %arg32[%c5_313, %c0_314, %c0_315] : memref<8x8x32xf32, #tpu.memory_space<vmem>>, vector<1x8x32xf32>
    %948 = vector.shape_cast %947 : vector<1x8x32xf32> to vector<8x32xf32>
    %949 = arith.truncf %905 : vector<8x8xf32> to vector<8x8xbf16>
    %cst_316 = arith.constant dense<0.000000e+00> : vector<8x32xf32>
    %950 = tpu.matmul %949, %626, %cst_316 {dimension_numbers = #tpu.dot_dimension_numbers<[1], [0], [0], [1], [0, 0, 1, 1], [], []>} : vector<8x8xbf16>, vector<8x32xbf16>, vector<8x32xf32> -> vector<8x32xf32>
    %951 = arith.addf %948, %950 : vector<8x32xf32>
    %c5_317 = arith.constant 5 : index
    %c0_318 = arith.constant 0 : index
    %c0_319 = arith.constant 0 : index
    %952 = vector.load %arg2[%c5_317, %c0_318, %c0_319] : memref<8x8x1xf32, #tpu.memory_space<vmem>>, vector<1x8x1xf32>
    %953 = vector.shape_cast %952 : vector<1x8x1xf32> to vector<8x1xf32>
    %954 = vector.extract_strided_slice %951 {offsets = [0, 0], sizes = [8, 24], strides = [1, 1]} : vector<8x32xf32> to vector<8x24xf32>
    %955 = arith.negf %954 : vector<8x24xf32>
    %956 = math.exp %955 : vector<8x24xf32>
    %cst_320 = arith.constant 1.000000e+00 : f32
    %957 = vector.broadcast %cst_320 : f32 to vector<8x24xf32>
    %958 = arith.addf %957, %956 : vector<8x24xf32>
    %959 = arith.divf %957, %958 : vector<8x24xf32>
    %960 = vector.extract_strided_slice %959 {offsets = [0, 0], sizes = [8, 8], strides = [1, 1]} : vector<8x24xf32> to vector<8x8xf32>
    %961 = vector.extract_strided_slice %959 {offsets = [0, 8], sizes = [8, 8], strides = [1, 1]} : vector<8x24xf32> to vector<8x8xf32>
    %962 = vector.extract_strided_slice %959 {offsets = [0, 16], sizes = [8, 8], strides = [1, 1]} : vector<8x24xf32> to vector<8x8xf32>
    %963 = arith.mulf %961, %908 : vector<8x8xf32>
    %964 = vector.extract_strided_slice %951 {offsets = [0, 24], sizes = [8, 8], strides = [1, 1]} : vector<8x32xf32> to vector<8x8xf32>
    %965 = math.tanh %964 : vector<8x8xf32>
    %966 = arith.mulf %960, %965 : vector<8x8xf32>
    %967 = arith.addf %963, %966 : vector<8x8xf32>
    %968 = math.tanh %967 : vector<8x8xf32>
    %969 = arith.mulf %962, %968 : vector<8x8xf32>
    %cst_321 = arith.constant 0.000000e+00 : f32
    %970 = vector.broadcast %cst_321 : f32 to vector<8x1xf32>
    %971 = arith.cmpf ogt, %953, %970 : vector<8x1xf32>
    %972 = vector.broadcast %953 : vector<8x1xf32> to vector<8x8xf32>
    %973 = arith.mulf %972, %969 : vector<8x8xf32>
    %974 = vector.shape_cast %971 : vector<8x1xi1> to vector<8x1xi1>
    %975 = vector.broadcast %974 : vector<8x1xi1> to vector<8x8xi1>
    %976 = arith.select %975, %969, %905 : vector<8x8xi1>, vector<8x8xf32>
    %977 = vector.shape_cast %971 : vector<8x1xi1> to vector<8x1xi1>
    %978 = vector.broadcast %977 : vector<8x1xi1> to vector<8x8xi1>
    %979 = arith.select %978, %967, %908 : vector<8x8xi1>, vector<8x8xf32>
    %980 = arith.truncf %902 : vector<8x8xf32> to vector<8x8xbf16>
    %cst_322 = arith.constant dense<0.000000e+00> : vector<8x32xf32>
    %981 = tpu.matmul %980, %628, %cst_322 {dimension_numbers = #tpu.dot_dimension_numbers<[1], [0], [0], [1], [0, 0, 1, 1], [], []>} : vector<8x8xbf16>, vector<8x32xbf16>, vector<8x32xf32> -> vector<8x32xf32>
    %982 = arith.truncf %940 : vector<8x8xf32> to vector<8x8xbf16>
    %cst_323 = arith.constant dense<0.000000e+00> : vector<8x32xf32>
    %983 = tpu.matmul %982, %627, %cst_323 {dimension_numbers = #tpu.dot_dimension_numbers<[1], [0], [0], [1], [0, 0, 1, 1], [], []>} : vector<8x8xbf16>, vector<8x32xbf16>, vector<8x32xf32> -> vector<8x32xf32>
    %984 = arith.addf %981, %983 : vector<8x32xf32>
    %985 = vector.broadcast %629 : vector<1x32xf32> to vector<8x32xf32>
    %986 = arith.addf %984, %985 : vector<8x32xf32>
    %c4_324 = arith.constant 4 : index
    %c0_325 = arith.constant 0 : index
    %c0_326 = arith.constant 0 : index
    %987 = vector.load %arg2[%c4_324, %c0_325, %c0_326] : memref<8x8x1xf32, #tpu.memory_space<vmem>>, vector<1x8x1xf32>
    %988 = vector.shape_cast %987 : vector<1x8x1xf32> to vector<8x1xf32>
    %989 = vector.extract_strided_slice %986 {offsets = [0, 0], sizes = [8, 24], strides = [1, 1]} : vector<8x32xf32> to vector<8x24xf32>
    %990 = arith.negf %989 : vector<8x24xf32>
    %991 = math.exp %990 : vector<8x24xf32>
    %cst_327 = arith.constant 1.000000e+00 : f32
    %992 = vector.broadcast %cst_327 : f32 to vector<8x24xf32>
    %993 = arith.addf %992, %991 : vector<8x24xf32>
    %994 = arith.divf %992, %993 : vector<8x24xf32>
    %995 = vector.extract_strided_slice %994 {offsets = [0, 0], sizes = [8, 8], strides = [1, 1]} : vector<8x24xf32> to vector<8x8xf32>
    %996 = vector.extract_strided_slice %994 {offsets = [0, 8], sizes = [8, 8], strides = [1, 1]} : vector<8x24xf32> to vector<8x8xf32>
    %997 = vector.extract_strided_slice %994 {offsets = [0, 16], sizes = [8, 8], strides = [1, 1]} : vector<8x24xf32> to vector<8x8xf32>
    %998 = arith.mulf %996, %943 : vector<8x8xf32>
    %999 = vector.extract_strided_slice %986 {offsets = [0, 24], sizes = [8, 8], strides = [1, 1]} : vector<8x32xf32> to vector<8x8xf32>
    %1000 = math.tanh %999 : vector<8x8xf32>
    %1001 = arith.mulf %995, %1000 : vector<8x8xf32>
    %1002 = arith.addf %998, %1001 : vector<8x8xf32>
    %1003 = math.tanh %1002 : vector<8x8xf32>
    %1004 = arith.mulf %997, %1003 : vector<8x8xf32>
    %cst_328 = arith.constant 0.000000e+00 : f32
    %1005 = vector.broadcast %cst_328 : f32 to vector<8x1xf32>
    %1006 = arith.cmpf ogt, %988, %1005 : vector<8x1xf32>
    %1007 = vector.broadcast %988 : vector<8x1xf32> to vector<8x8xf32>
    %1008 = arith.mulf %1007, %1004 : vector<8x8xf32>
    %1009 = vector.shape_cast %1006 : vector<8x1xi1> to vector<8x1xi1>
    %1010 = vector.broadcast %1009 : vector<8x1xi1> to vector<8x8xi1>
    %1011 = arith.select %1010, %1004, %940 : vector<8x8xi1>, vector<8x8xf32>
    %1012 = vector.shape_cast %1006 : vector<8x1xi1> to vector<8x1xi1>
    %1013 = vector.broadcast %1012 : vector<8x1xi1> to vector<8x8xi1>
    %1014 = arith.select %1013, %1002, %943 : vector<8x8xi1>, vector<8x8xf32>
    %c4_329 = arith.constant 4 : index
    %c0_330 = arith.constant 0 : index
    %c0_331 = arith.constant 0 : index
    %1015 = vector.load %arg27[%c4_329, %c0_330, %c0_331] : memref<8x8x8xf32, #tpu.memory_space<vmem>>, vector<1x8x8xf32>
    %1016 = vector.shape_cast %1015 : vector<1x8x8xf32> to vector<8x8xf32>
    %1017 = vector.shape_cast %1008 : vector<8x8xf32> to vector<1x8x8xf32>
    tpu.vector_store %arg27[%c4_329, %c0_330, %c0_331], %1017 {strides = array<i32>} : memref<8x8x8xf32, #tpu.memory_space<vmem>>, vector<1x8x8xf32>,
    %c6_332 = arith.constant 6 : index
    %c0_333 = arith.constant 0 : index
    %c0_334 = arith.constant 0 : index
    %1018 = vector.load %arg32[%c6_332, %c0_333, %c0_334] : memref<8x8x32xf32, #tpu.memory_space<vmem>>, vector<1x8x32xf32>
    %1019 = vector.shape_cast %1018 : vector<1x8x32xf32> to vector<8x32xf32>
    %1020 = arith.truncf %976 : vector<8x8xf32> to vector<8x8xbf16>
    %cst_335 = arith.constant dense<0.000000e+00> : vector<8x32xf32>
    %1021 = tpu.matmul %1020, %626, %cst_335 {dimension_numbers = #tpu.dot_dimension_numbers<[1], [0], [0], [1], [0, 0, 1, 1], [], []>} : vector<8x8xbf16>, vector<8x32xbf16>, vector<8x32xf32> -> vector<8x32xf32>
    %1022 = arith.addf %1019, %1021 : vector<8x32xf32>
    %c6_336 = arith.constant 6 : index
    %c0_337 = arith.constant 0 : index
    %c0_338 = arith.constant 0 : index
    %1023 = vector.load %arg2[%c6_336, %c0_337, %c0_338] : memref<8x8x1xf32, #tpu.memory_space<vmem>>, vector<1x8x1xf32>
    %1024 = vector.shape_cast %1023 : vector<1x8x1xf32> to vector<8x1xf32>
    %1025 = vector.extract_strided_slice %1022 {offsets = [0, 0], sizes = [8, 24], strides = [1, 1]} : vector<8x32xf32> to vector<8x24xf32>
    %1026 = arith.negf %1025 : vector<8x24xf32>
    %1027 = math.exp %1026 : vector<8x24xf32>
    %cst_339 = arith.constant 1.000000e+00 : f32
    %1028 = vector.broadcast %cst_339 : f32 to vector<8x24xf32>
    %1029 = arith.addf %1028, %1027 : vector<8x24xf32>
    %1030 = arith.divf %1028, %1029 : vector<8x24xf32>
    %1031 = vector.extract_strided_slice %1030 {offsets = [0, 0], sizes = [8, 8], strides = [1, 1]} : vector<8x24xf32> to vector<8x8xf32>
    %1032 = vector.extract_strided_slice %1030 {offsets = [0, 8], sizes = [8, 8], strides = [1, 1]} : vector<8x24xf32> to vector<8x8xf32>
    %1033 = vector.extract_strided_slice %1030 {offsets = [0, 16], sizes = [8, 8], strides = [1, 1]} : vector<8x24xf32> to vector<8x8xf32>
    %1034 = arith.mulf %1032, %979 : vector<8x8xf32>
    %1035 = vector.extract_strided_slice %1022 {offsets = [0, 24], sizes = [8, 8], strides = [1, 1]} : vector<8x32xf32> to vector<8x8xf32>
    %1036 = math.tanh %1035 : vector<8x8xf32>
    %1037 = arith.mulf %1031, %1036 : vector<8x8xf32>
    %1038 = arith.addf %1034, %1037 : vector<8x8xf32>
    %1039 = math.tanh %1038 : vector<8x8xf32>
    %1040 = arith.mulf %1033, %1039 : vector<8x8xf32>
    %cst_340 = arith.constant 0.000000e+00 : f32
    %1041 = vector.broadcast %cst_340 : f32 to vector<8x1xf32>
    %1042 = arith.cmpf ogt, %1024, %1041 : vector<8x1xf32>
    %1043 = vector.broadcast %1024 : vector<8x1xf32> to vector<8x8xf32>
    %1044 = arith.mulf %1043, %1040 : vector<8x8xf32>
    %1045 = vector.shape_cast %1042 : vector<8x1xi1> to vector<8x1xi1>
    %1046 = vector.broadcast %1045 : vector<8x1xi1> to vector<8x8xi1>
    %1047 = arith.select %1046, %1040, %976 : vector<8x8xi1>, vector<8x8xf32>
    %1048 = vector.shape_cast %1042 : vector<8x1xi1> to vector<8x1xi1>
    %1049 = vector.broadcast %1048 : vector<8x1xi1> to vector<8x8xi1>
    %1050 = arith.select %1049, %1038, %979 : vector<8x8xi1>, vector<8x8xf32>
    %1051 = arith.truncf %973 : vector<8x8xf32> to vector<8x8xbf16>
    %cst_341 = arith.constant dense<0.000000e+00> : vector<8x32xf32>
    %1052 = tpu.matmul %1051, %628, %cst_341 {dimension_numbers = #tpu.dot_dimension_numbers<[1], [0], [0], [1], [0, 0, 1, 1], [], []>} : vector<8x8xbf16>, vector<8x32xbf16>, vector<8x32xf32> -> vector<8x32xf32>
    %1053 = arith.truncf %1011 : vector<8x8xf32> to vector<8x8xbf16>
    %cst_342 = arith.constant dense<0.000000e+00> : vector<8x32xf32>
    %1054 = tpu.matmul %1053, %627, %cst_342 {dimension_numbers = #tpu.dot_dimension_numbers<[1], [0], [0], [1], [0, 0, 1, 1], [], []>} : vector<8x8xbf16>, vector<8x32xbf16>, vector<8x32xf32> -> vector<8x32xf32>
    %1055 = arith.addf %1052, %1054 : vector<8x32xf32>
    %1056 = vector.broadcast %629 : vector<1x32xf32> to vector<8x32xf32>
    %1057 = arith.addf %1055, %1056 : vector<8x32xf32>
    %c5_343 = arith.constant 5 : index
    %c0_344 = arith.constant 0 : index
    %c0_345 = arith.constant 0 : index
    %1058 = vector.load %arg2[%c5_343, %c0_344, %c0_345] : memref<8x8x1xf32, #tpu.memory_space<vmem>>, vector<1x8x1xf32>
    %1059 = vector.shape_cast %1058 : vector<1x8x1xf32> to vector<8x1xf32>
    %1060 = vector.extract_strided_slice %1057 {offsets = [0, 0], sizes = [8, 24], strides = [1, 1]} : vector<8x32xf32> to vector<8x24xf32>
    %1061 = arith.negf %1060 : vector<8x24xf32>
    %1062 = math.exp %1061 : vector<8x24xf32>
    %cst_346 = arith.constant 1.000000e+00 : f32
    %1063 = vector.broadcast %cst_346 : f32 to vector<8x24xf32>
    %1064 = arith.addf %1063, %1062 : vector<8x24xf32>
    %1065 = arith.divf %1063, %1064 : vector<8x24xf32>
    %1066 = vector.extract_strided_slice %1065 {offsets = [0, 0], sizes = [8, 8], strides = [1, 1]} : vector<8x24xf32> to vector<8x8xf32>
    %1067 = vector.extract_strided_slice %1065 {offsets = [0, 8], sizes = [8, 8], strides = [1, 1]} : vector<8x24xf32> to vector<8x8xf32>
    %1068 = vector.extract_strided_slice %1065 {offsets = [0, 16], sizes = [8, 8], strides = [1, 1]} : vector<8x24xf32> to vector<8x8xf32>
    %1069 = arith.mulf %1067, %1014 : vector<8x8xf32>
    %1070 = vector.extract_strided_slice %1057 {offsets = [0, 24], sizes = [8, 8], strides = [1, 1]} : vector<8x32xf32> to vector<8x8xf32>
    %1071 = math.tanh %1070 : vector<8x8xf32>
    %1072 = arith.mulf %1066, %1071 : vector<8x8xf32>
    %1073 = arith.addf %1069, %1072 : vector<8x8xf32>
    %1074 = math.tanh %1073 : vector<8x8xf32>
    %1075 = arith.mulf %1068, %1074 : vector<8x8xf32>
    %cst_347 = arith.constant 0.000000e+00 : f32
    %1076 = vector.broadcast %cst_347 : f32 to vector<8x1xf32>
    %1077 = arith.cmpf ogt, %1059, %1076 : vector<8x1xf32>
    %1078 = vector.broadcast %1059 : vector<8x1xf32> to vector<8x8xf32>
    %1079 = arith.mulf %1078, %1075 : vector<8x8xf32>
    %1080 = vector.shape_cast %1077 : vector<8x1xi1> to vector<8x1xi1>
    %1081 = vector.broadcast %1080 : vector<8x1xi1> to vector<8x8xi1>
    %1082 = arith.select %1081, %1075, %1011 : vector<8x8xi1>, vector<8x8xf32>
    %1083 = vector.shape_cast %1077 : vector<8x1xi1> to vector<8x1xi1>
    %1084 = vector.broadcast %1083 : vector<8x1xi1> to vector<8x8xi1>
    %1085 = arith.select %1084, %1073, %1014 : vector<8x8xi1>, vector<8x8xf32>
    %c5_348 = arith.constant 5 : index
    %c0_349 = arith.constant 0 : index
    %c0_350 = arith.constant 0 : index
    %1086 = vector.load %arg27[%c5_348, %c0_349, %c0_350] : memref<8x8x8xf32, #tpu.memory_space<vmem>>, vector<1x8x8xf32>
    %1087 = vector.shape_cast %1086 : vector<1x8x8xf32> to vector<8x8xf32>
    %1088 = vector.shape_cast %1079 : vector<8x8xf32> to vector<1x8x8xf32>
    tpu.vector_store %arg27[%c5_348, %c0_349, %c0_350], %1088 {strides = array<i32>} : memref<8x8x8xf32, #tpu.memory_space<vmem>>, vector<1x8x8xf32>,
    %c7_351 = arith.constant 7 : index
    %c0_352 = arith.constant 0 : index
    %c0_353 = arith.constant 0 : index
    %1089 = vector.load %arg32[%c7_351, %c0_352, %c0_353] : memref<8x8x32xf32, #tpu.memory_space<vmem>>, vector<1x8x32xf32>
    %1090 = vector.shape_cast %1089 : vector<1x8x32xf32> to vector<8x32xf32>
    %1091 = arith.truncf %1047 : vector<8x8xf32> to vector<8x8xbf16>
    %cst_354 = arith.constant dense<0.000000e+00> : vector<8x32xf32>
    %1092 = tpu.matmul %1091, %626, %cst_354 {dimension_numbers = #tpu.dot_dimension_numbers<[1], [0], [0], [1], [0, 0, 1, 1], [], []>} : vector<8x8xbf16>, vector<8x32xbf16>, vector<8x32xf32> -> vector<8x32xf32>
    %1093 = arith.addf %1090, %1092 : vector<8x32xf32>
    %c7_355 = arith.constant 7 : index
    %c0_356 = arith.constant 0 : index
    %c0_357 = arith.constant 0 : index
    %1094 = vector.load %arg2[%c7_355, %c0_356, %c0_357] : memref<8x8x1xf32, #tpu.memory_space<vmem>>, vector<1x8x1xf32>
    %1095 = vector.shape_cast %1094 : vector<1x8x1xf32> to vector<8x1xf32>
    %1096 = vector.extract_strided_slice %1093 {offsets = [0, 0], sizes = [8, 24], strides = [1, 1]} : vector<8x32xf32> to vector<8x24xf32>
    %1097 = arith.negf %1096 : vector<8x24xf32>
    %1098 = math.exp %1097 : vector<8x24xf32>
    %cst_358 = arith.constant 1.000000e+00 : f32
    %1099 = vector.broadcast %cst_358 : f32 to vector<8x24xf32>
    %1100 = arith.addf %1099, %1098 : vector<8x24xf32>
    %1101 = arith.divf %1099, %1100 : vector<8x24xf32>
    %1102 = vector.extract_strided_slice %1101 {offsets = [0, 0], sizes = [8, 8], strides = [1, 1]} : vector<8x24xf32> to vector<8x8xf32>
    %1103 = vector.extract_strided_slice %1101 {offsets = [0, 8], sizes = [8, 8], strides = [1, 1]} : vector<8x24xf32> to vector<8x8xf32>
    %1104 = vector.extract_strided_slice %1101 {offsets = [0, 16], sizes = [8, 8], strides = [1, 1]} : vector<8x24xf32> to vector<8x8xf32>
    %1105 = arith.mulf %1103, %1050 : vector<8x8xf32>
    %1106 = vector.extract_strided_slice %1093 {offsets = [0, 24], sizes = [8, 8], strides = [1, 1]} : vector<8x32xf32> to vector<8x8xf32>
    %1107 = math.tanh %1106 : vector<8x8xf32>
    %1108 = arith.mulf %1102, %1107 : vector<8x8xf32>
    %1109 = arith.addf %1105, %1108 : vector<8x8xf32>
    %1110 = math.tanh %1109 : vector<8x8xf32>
    %1111 = arith.mulf %1104, %1110 : vector<8x8xf32>
    %cst_359 = arith.constant 0.000000e+00 : f32
    %1112 = vector.broadcast %cst_359 : f32 to vector<8x1xf32>
    %1113 = arith.cmpf ogt, %1095, %1112 : vector<8x1xf32>
    %1114 = vector.broadcast %1095 : vector<8x1xf32> to vector<8x8xf32>
    %1115 = arith.mulf %1114, %1111 : vector<8x8xf32>
    %1116 = vector.shape_cast %1113 : vector<8x1xi1> to vector<8x1xi1>
    %1117 = vector.broadcast %1116 : vector<8x1xi1> to vector<8x8xi1>
    %1118 = arith.select %1117, %1111, %1047 : vector<8x8xi1>, vector<8x8xf32>
    %1119 = vector.shape_cast %1113 : vector<8x1xi1> to vector<8x1xi1>
    %1120 = vector.broadcast %1119 : vector<8x1xi1> to vector<8x8xi1>
    %1121 = arith.select %1120, %1109, %1050 : vector<8x8xi1>, vector<8x8xf32>
    %1122 = arith.truncf %1044 : vector<8x8xf32> to vector<8x8xbf16>
    %cst_360 = arith.constant dense<0.000000e+00> : vector<8x32xf32>
    %1123 = tpu.matmul %1122, %628, %cst_360 {dimension_numbers = #tpu.dot_dimension_numbers<[1], [0], [0], [1], [0, 0, 1, 1], [], []>} : vector<8x8xbf16>, vector<8x32xbf16>, vector<8x32xf32> -> vector<8x32xf32>
    %1124 = arith.truncf %1082 : vector<8x8xf32> to vector<8x8xbf16>
    %cst_361 = arith.constant dense<0.000000e+00> : vector<8x32xf32>
    %1125 = tpu.matmul %1124, %627, %cst_361 {dimension_numbers = #tpu.dot_dimension_numbers<[1], [0], [0], [1], [0, 0, 1, 1], [], []>} : vector<8x8xbf16>, vector<8x32xbf16>, vector<8x32xf32> -> vector<8x32xf32>
    %1126 = arith.addf %1123, %1125 : vector<8x32xf32>
    %1127 = vector.broadcast %629 : vector<1x32xf32> to vector<8x32xf32>
    %1128 = arith.addf %1126, %1127 : vector<8x32xf32>
    %c6_362 = arith.constant 6 : index
    %c0_363 = arith.constant 0 : index
    %c0_364 = arith.constant 0 : index
    %1129 = vector.load %arg2[%c6_362, %c0_363, %c0_364] : memref<8x8x1xf32, #tpu.memory_space<vmem>>, vector<1x8x1xf32>
    %1130 = vector.shape_cast %1129 : vector<1x8x1xf32> to vector<8x1xf32>
    %1131 = vector.extract_strided_slice %1128 {offsets = [0, 0], sizes = [8, 24], strides = [1, 1]} : vector<8x32xf32> to vector<8x24xf32>
    %1132 = arith.negf %1131 : vector<8x24xf32>
    %1133 = math.exp %1132 : vector<8x24xf32>
    %cst_365 = arith.constant 1.000000e+00 : f32
    %1134 = vector.broadcast %cst_365 : f32 to vector<8x24xf32>
    %1135 = arith.addf %1134, %1133 : vector<8x24xf32>
    %1136 = arith.divf %1134, %1135 : vector<8x24xf32>
    %1137 = vector.extract_strided_slice %1136 {offsets = [0, 0], sizes = [8, 8], strides = [1, 1]} : vector<8x24xf32> to vector<8x8xf32>
    %1138 = vector.extract_strided_slice %1136 {offsets = [0, 8], sizes = [8, 8], strides = [1, 1]} : vector<8x24xf32> to vector<8x8xf32>
    %1139 = vector.extract_strided_slice %1136 {offsets = [0, 16], sizes = [8, 8], strides = [1, 1]} : vector<8x24xf32> to vector<8x8xf32>
    %1140 = arith.mulf %1138, %1085 : vector<8x8xf32>
    %1141 = vector.extract_strided_slice %1128 {offsets = [0, 24], sizes = [8, 8], strides = [1, 1]} : vector<8x32xf32> to vector<8x8xf32>
    %1142 = math.tanh %1141 : vector<8x8xf32>
    %1143 = arith.mulf %1137, %1142 : vector<8x8xf32>
    %1144 = arith.addf %1140, %1143 : vector<8x8xf32>
    %1145 = math.tanh %1144 : vector<8x8xf32>
    %1146 = arith.mulf %1139, %1145 : vector<8x8xf32>
    %cst_366 = arith.constant 0.000000e+00 : f32
    %1147 = vector.broadcast %cst_366 : f32 to vector<8x1xf32>
    %1148 = arith.cmpf ogt, %1130, %1147 : vector<8x1xf32>
    %1149 = vector.broadcast %1130 : vector<8x1xf32> to vector<8x8xf32>
    %1150 = arith.mulf %1149, %1146 : vector<8x8xf32>
    %1151 = vector.shape_cast %1148 : vector<8x1xi1> to vector<8x1xi1>
    %1152 = vector.broadcast %1151 : vector<8x1xi1> to vector<8x8xi1>
    %1153 = arith.select %1152, %1146, %1082 : vector<8x8xi1>, vector<8x8xf32>
    %1154 = vector.shape_cast %1148 : vector<8x1xi1> to vector<8x1xi1>
    %1155 = vector.broadcast %1154 : vector<8x1xi1> to vector<8x8xi1>
    %1156 = arith.select %1155, %1144, %1085 : vector<8x8xi1>, vector<8x8xf32>
    %c6_367 = arith.constant 6 : index
    %c0_368 = arith.constant 0 : index
    %c0_369 = arith.constant 0 : index
    %1157 = vector.load %arg27[%c6_367, %c0_368, %c0_369] : memref<8x8x8xf32, #tpu.memory_space<vmem>>, vector<1x8x8xf32>
    %1158 = vector.shape_cast %1157 : vector<1x8x8xf32> to vector<8x8xf32>
    %1159 = vector.shape_cast %1150 : vector<8x8xf32> to vector<1x8x8xf32>
    tpu.vector_store %arg27[%c6_367, %c0_368, %c0_369], %1159 {strides = array<i32>} : memref<8x8x8xf32, #tpu.memory_space<vmem>>, vector<1x8x8xf32>,
    %1160 = arith.truncf %1115 : vector<8x8xf32> to vector<8x8xbf16>
    %cst_370 = arith.constant dense<0.000000e+00> : vector<8x32xf32>
    %1161 = tpu.matmul %1160, %628, %cst_370 {dimension_numbers = #tpu.dot_dimension_numbers<[1], [0], [0], [1], [0, 0, 1, 1], [], []>} : vector<8x8xbf16>, vector<8x32xbf16>, vector<8x32xf32> -> vector<8x32xf32>
    %1162 = arith.truncf %1153 : vector<8x8xf32> to vector<8x8xbf16>
    %cst_371 = arith.constant dense<0.000000e+00> : vector<8x32xf32>
    %1163 = tpu.matmul %1162, %627, %cst_371 {dimension_numbers = #tpu.dot_dimension_numbers<[1], [0], [0], [1], [0, 0, 1, 1], [], []>} : vector<8x8xbf16>, vector<8x32xbf16>, vector<8x32xf32> -> vector<8x32xf32>
    %1164 = arith.addf %1161, %1163 : vector<8x32xf32>
    %1165 = vector.broadcast %629 : vector<1x32xf32> to vector<8x32xf32>
    %1166 = arith.addf %1164, %1165 : vector<8x32xf32>
    %c7_372 = arith.constant 7 : index
    %c0_373 = arith.constant 0 : index
    %c0_374 = arith.constant 0 : index
    %1167 = vector.load %arg2[%c7_372, %c0_373, %c0_374] : memref<8x8x1xf32, #tpu.memory_space<vmem>>, vector<1x8x1xf32>
    %1168 = vector.shape_cast %1167 : vector<1x8x1xf32> to vector<8x1xf32>
    %1169 = vector.extract_strided_slice %1166 {offsets = [0, 0], sizes = [8, 24], strides = [1, 1]} : vector<8x32xf32> to vector<8x24xf32>
    %1170 = arith.negf %1169 : vector<8x24xf32>
    %1171 = math.exp %1170 : vector<8x24xf32>
    %cst_375 = arith.constant 1.000000e+00 : f32
    %1172 = vector.broadcast %cst_375 : f32 to vector<8x24xf32>
    %1173 = arith.addf %1172, %1171 : vector<8x24xf32>
    %1174 = arith.divf %1172, %1173 : vector<8x24xf32>
    %1175 = vector.extract_strided_slice %1174 {offsets = [0, 0], sizes = [8, 8], strides = [1, 1]} : vector<8x24xf32> to vector<8x8xf32>
    %1176 = vector.extract_strided_slice %1174 {offsets = [0, 8], sizes = [8, 8], strides = [1, 1]} : vector<8x24xf32> to vector<8x8xf32>
    %1177 = vector.extract_strided_slice %1174 {offsets = [0, 16], sizes = [8, 8], strides = [1, 1]} : vector<8x24xf32> to vector<8x8xf32>
    %1178 = arith.mulf %1176, %1156 : vector<8x8xf32>
    %1179 = vector.extract_strided_slice %1166 {offsets = [0, 24], sizes = [8, 8], strides = [1, 1]} : vector<8x32xf32> to vector<8x8xf32>
    %1180 = math.tanh %1179 : vector<8x8xf32>
    %1181 = arith.mulf %1175, %1180 : vector<8x8xf32>
    %1182 = arith.addf %1178, %1181 : vector<8x8xf32>
    %1183 = math.tanh %1182 : vector<8x8xf32>
    %1184 = arith.mulf %1177, %1183 : vector<8x8xf32>
    %cst_376 = arith.constant 0.000000e+00 : f32
    %1185 = vector.broadcast %cst_376 : f32 to vector<8x1xf32>
    %1186 = arith.cmpf ogt, %1168, %1185 : vector<8x1xf32>
    %1187 = vector.broadcast %1168 : vector<8x1xf32> to vector<8x8xf32>
    %1188 = arith.mulf %1187, %1184 : vector<8x8xf32>
    %1189 = vector.shape_cast %1186 : vector<8x1xi1> to vector<8x1xi1>
    %1190 = vector.broadcast %1189 : vector<8x1xi1> to vector<8x8xi1>
    %1191 = arith.select %1190, %1184, %1153 : vector<8x8xi1>, vector<8x8xf32>
    %1192 = vector.shape_cast %1186 : vector<8x1xi1> to vector<8x1xi1>
    %1193 = vector.broadcast %1192 : vector<8x1xi1> to vector<8x8xi1>
    %1194 = arith.select %1193, %1182, %1156 : vector<8x8xi1>, vector<8x8xf32>
    %c7_377 = arith.constant 7 : index
    %c0_378 = arith.constant 0 : index
    %c0_379 = arith.constant 0 : index
    %1195 = vector.load %arg27[%c7_377, %c0_378, %c0_379] : memref<8x8x8xf32, #tpu.memory_space<vmem>>, vector<1x8x8xf32>
    %1196 = vector.shape_cast %1195 : vector<1x8x8xf32> to vector<8x8xf32>
    %1197 = vector.shape_cast %1188 : vector<8x8xf32> to vector<1x8x8xf32>
    tpu.vector_store %arg27[%c7_377, %c0_378, %c0_379], %1197 {strides = array<i32>} : memref<8x8x8xf32, #tpu.memory_space<vmem>>, vector<1x8x8xf32>,
    %c0_380 = arith.constant 0 : index
    %c0_381 = arith.constant 0 : index
    %c0_382 = arith.constant 0 : index
    %1198 = vector.load %arg28[%c0_380, %c0_381, %c0_382] : memref<2x8x8xf32, #tpu.memory_space<vmem>>, vector<1x8x8xf32>
    %1199 = vector.shape_cast %1198 : vector<1x8x8xf32> to vector<8x8xf32>
    %1200 = vector.shape_cast %1118 : vector<8x8xf32> to vector<1x8x8xf32>
    tpu.vector_store %arg28[%c0_380, %c0_381, %c0_382], %1200 {strides = array<i32>} : memref<2x8x8xf32, #tpu.memory_space<vmem>>, vector<1x8x8xf32>,
    %c0_383 = arith.constant 0 : index
    %c0_384 = arith.constant 0 : index
    %c0_385 = arith.constant 0 : index
    %1201 = vector.load %arg29[%c0_383, %c0_384, %c0_385] : memref<2x8x8xf32, #tpu.memory_space<vmem>>, vector<1x8x8xf32>
    %1202 = vector.shape_cast %1201 : vector<1x8x8xf32> to vector<8x8xf32>
    %1203 = vector.shape_cast %1121 : vector<8x8xf32> to vector<1x8x8xf32>
    tpu.vector_store %arg29[%c0_383, %c0_384, %c0_385], %1203 {strides = array<i32>} : memref<2x8x8xf32, #tpu.memory_space<vmem>>, vector<1x8x8xf32>,
    %c1_386 = arith.constant 1 : index
    %c0_387 = arith.constant 0 : index
    %c0_388 = arith.constant 0 : index
    %1204 = vector.load %arg28[%c1_386, %c0_387, %c0_388] : memref<2x8x8xf32, #tpu.memory_space<vmem>>, vector<1x8x8xf32>
    %1205 = vector.shape_cast %1204 : vector<1x8x8xf32> to vector<8x8xf32>
    %1206 = vector.shape_cast %1191 : vector<8x8xf32> to vector<1x8x8xf32>
    tpu.vector_store %arg28[%c1_386, %c0_387, %c0_388], %1206 {strides = array<i32>} : memref<2x8x8xf32, #tpu.memory_space<vmem>>, vector<1x8x8xf32>,
    %c1_389 = arith.constant 1 : index
    %c0_390 = arith.constant 0 : index
    %c0_391 = arith.constant 0 : index
    %1207 = vector.load %arg29[%c1_389, %c0_390, %c0_391] : memref<2x8x8xf32, #tpu.memory_space<vmem>>, vector<1x8x8xf32>
    %1208 = vector.shape_cast %1207 : vector<1x8x8xf32> to vector<8x8xf32>
    %1209 = vector.shape_cast %1194 : vector<8x8xf32> to vector<1x8x8xf32>
    tpu.vector_store %arg29[%c1_389, %c0_390, %c0_391], %1209 {strides = array<i32>} : memref<2x8x8xf32, #tpu.memory_space<vmem>>, vector<1x8x8xf32>,
    return
  }
  func.func @transform_0(%arg0: i32) -> (i32, i32, i32) {
    %c0_i32 = arith.constant 0 : i32
    %c0_i32_0 = arith.constant 0 : i32
    %c0_i32_1 = arith.constant 0 : i32
    return %c0_i32, %arg0, %c0_i32_0 : i32, i32, i32
  }
  func.func @transform_1(%arg0: i32) -> (i32, i32, i32) {
    %c0_i32 = arith.constant 0 : i32
    %c0_i32_0 = arith.constant 0 : i32
    %c0_i32_1 = arith.constant 0 : i32
    return %c0_i32, %arg0, %c0_i32_0 : i32, i32, i32
  }
  func.func @transform_2(%arg0: i32) -> (i32, i32, i32) {
    %c0_i32 = arith.constant 0 : i32
    %c0_i32_0 = arith.constant 0 : i32
    %c0_i32_1 = arith.constant 0 : i32
    return %c0_i32, %arg0, %c0_i32_0 : i32, i32, i32
  }
  func.func @transform_3(%arg0: i32) -> (i32, i32, i32) {
    %c0_i32 = arith.constant 0 : i32
    %c0_i32_0 = arith.constant 0 : i32
    %c0_i32_1 = arith.constant 0 : i32
    return %c0_i32, %arg0, %c0_i32_0 : i32, i32, i32
  }
  func.func @transform_4(%arg0: i32) -> (i32, i32, i32) {
    %c0_i32 = arith.constant 0 : i32
    %c0_i32_0 = arith.constant 0 : i32
    %c0_i32_1 = arith.constant 0 : i32
    return %c0_i32, %arg0, %c0_i32_0 : i32, i32, i32
  }
  func.func @transform_5(%arg0: i32) -> (i32, i32, i32) {
    %c0_i32 = arith.constant 0 : i32
    %c0_i32_0 = arith.constant 0 : i32
    %c0_i32_1 = arith.constant 0 : i32
    return %c0_i32, %arg0, %c0_i32_0 : i32, i32, i32
  }
  func.func @transform_6(%arg0: i32) -> (i32, i32) {
    %c0_i32 = arith.constant 0 : i32
    %c0_i32_0 = arith.constant 0 : i32
    %c0_i32_1 = arith.constant 0 : i32
    return %c0_i32, %c0_i32_0 : i32, i32
  }
  func.func @transform_7(%arg0: i32) -> (i32, i32) {
    %c0_i32 = arith.constant 0 : i32
    %c0_i32_0 = arith.constant 0 : i32
    %c0_i32_1 = arith.constant 0 : i32
    return %c0_i32, %c0_i32_0 : i32, i32
  }
  func.func @transform_8(%arg0: i32) -> (i32, i32) {
    %c0_i32 = arith.constant 0 : i32
    %c0_i32_0 = arith.constant 0 : i32
    %c0_i32_1 = arith.constant 0 : i32
    return %c0_i32, %c0_i32_0 : i32, i32
  }
  func.func @transform_9(%arg0: i32) -> (i32, i32) {
    %c0_i32 = arith.constant 0 : i32
    %c0_i32_0 = arith.constant 0 : i32
    %c0_i32_1 = arith.constant 0 : i32
    return %c0_i32, %c0_i32_0 : i32, i32
  }
  func.func @transform_10(%arg0: i32) -> (i32, i32) {
    %c0_i32 = arith.constant 0 : i32
    %c0_i32_0 = arith.constant 0 : i32
    %c0_i32_1 = arith.constant 0 : i32
    return %c0_i32, %c0_i32_0 : i32, i32
  }
  func.func @transform_11(%arg0: i32) -> (i32, i32) {
    %c0_i32 = arith.constant 0 : i32
    %c0_i32_0 = arith.constant 0 : i32
    %c0_i32_1 = arith.constant 0 : i32
    return %c0_i32, %c0_i32_0 : i32, i32
  }
  func.func @transform_12(%arg0: i32) -> (i32, i32) {
    %c0_i32 = arith.constant 0 : i32
    %c0_i32_0 = arith.constant 0 : i32
    %c0_i32_1 = arith.constant 0 : i32
    return %c0_i32, %c0_i32_0 : i32, i32
  }
  func.func @transform_13(%arg0: i32) -> (i32, i32) {
    %c0_i32 = arith.constant 0 : i32
    %c0_i32_0 = arith.constant 0 : i32
    %c0_i32_1 = arith.constant 0 : i32
    return %c0_i32, %c0_i32_0 : i32, i32
  }
  func.func @transform_14(%arg0: i32) -> (i32, i32) {
    %c0_i32 = arith.constant 0 : i32
    %c0_i32_0 = arith.constant 0 : i32
    %c0_i32_1 = arith.constant 0 : i32
    return %c0_i32, %c0_i32_0 : i32, i32
  }
  func.func @transform_15(%arg0: i32) -> (i32, i32) {
    %c0_i32 = arith.constant 0 : i32
    %c0_i32_0 = arith.constant 0 : i32
    %c0_i32_1 = arith.constant 0 : i32
    return %c0_i32, %c0_i32_0 : i32, i32
  }
  func.func @transform_16(%arg0: i32) -> (i32, i32) {
    %c0_i32 = arith.constant 0 : i32
    %c0_i32_0 = arith.constant 0 : i32
    %c0_i32_1 = arith.constant 0 : i32
    return %c0_i32, %c0_i32_0 : i32, i32
  }
  func.func @transform_17(%arg0: i32) -> (i32, i32) {
    %c0_i32 = arith.constant 0 : i32
    %c0_i32_0 = arith.constant 0 : i32
    %c0_i32_1 = arith.constant 0 : i32
    return %c0_i32, %c0_i32_0 : i32, i32
  }
  func.func @transform_18(%arg0: i32) -> (i32, i32) {
    %c0_i32 = arith.constant 0 : i32
    %c0_i32_0 = arith.constant 0 : i32
    %c0_i32_1 = arith.constant 0 : i32
    return %c0_i32, %c0_i32_0 : i32, i32
  }
  func.func @transform_19(%arg0: i32) -> (i32, i32) {
    %c0_i32 = arith.constant 0 : i32
    %c0_i32_0 = arith.constant 0 : i32
    %c0_i32_1 = arith.constant 0 : i32
    return %c0_i32, %c0_i32_0 : i32, i32
  }
  func.func @transform_20(%arg0: i32) -> (i32, i32) {
    %c0_i32 = arith.constant 0 : i32
    %c0_i32_0 = arith.constant 0 : i32
    %c0_i32_1 = arith.constant 0 : i32
    return %c0_i32, %c0_i32_0 : i32, i32
  }
  func.func @transform_21(%arg0: i32) -> (i32, i32) {
    %c0_i32 = arith.constant 0 : i32
    %c0_i32_0 = arith.constant 0 : i32
    %c0_i32_1 = arith.constant 0 : i32
    return %c0_i32, %c0_i32_0 : i32, i32
  }
  func.func @transform_22(%arg0: i32) -> (i32, i32) {
    %c0_i32 = arith.constant 0 : i32
    %c0_i32_0 = arith.constant 0 : i32
    %c0_i32_1 = arith.constant 0 : i32
    return %c0_i32, %c0_i32_0 : i32, i32
  }
  func.func @transform_23(%arg0: i32) -> (i32, i32) {
    %c0_i32 = arith.constant 0 : i32
    %c0_i32_0 = arith.constant 0 : i32
    %c0_i32_1 = arith.constant 0 : i32
    return %c0_i32, %c0_i32_0 : i32, i32
  }
  func.func @transform_24(%arg0: i32) -> (i32, i32) {
    %c0_i32 = arith.constant 0 : i32
    %c0_i32_0 = arith.constant 0 : i32
    %c0_i32_1 = arith.constant 0 : i32
    return %c0_i32, %c0_i32_0 : i32, i32
  }
  func.func @transform_25(%arg0: i32) -> (i32, i32) {
    %c0_i32 = arith.constant 0 : i32
    %c0_i32_0 = arith.constant 0 : i32
    %c0_i32_1 = arith.constant 0 : i32
    return %c0_i32, %c0_i32_0 : i32, i32
  }
  func.func @transform_26(%arg0: i32) -> (i32, i32, i32) {
    %c0_i32 = arith.constant 0 : i32
    %c0_i32_0 = arith.constant 0 : i32
    %c0_i32_1 = arith.constant 0 : i32
    return %c0_i32, %arg0, %c0_i32_0 : i32, i32, i32
  }
  func.func @transform_27(%arg0: i32) -> (i32, i32, i32) {
    %c0_i32 = arith.constant 0 : i32
    %c0_i32_0 = arith.constant 0 : i32
    %c0_i32_1 = arith.constant 0 : i32
    return %c0_i32, %arg0, %c0_i32_0 : i32, i32, i32
  }
  func.func @transform_28(%arg0: i32) -> (i32, i32, i32) {
    %c0_i32 = arith.constant 0 : i32
    %c0_i32_0 = arith.constant 0 : i32
    %c0_i32_1 = arith.constant 0 : i32
    return %c0_i32, %arg0, %c0_i32_0 : i32, i32, i32
  }
}

</mosaic_0001>

<bundles_post_ra>
// kernel: tpu_custom_call.1
= control target key start
LH: loop header
LB: loop body
LE: loop exit
PB: predicated region body
PF: predicated region fallthrough
CT: control target
= control target key end

     0   :  { %s8597_s0 = inlined_call_operand.hbm [shape: f32[8,8,8], index: 0, kind: input, shape index: {}]   ;;  %s8598_s1 = inlined_call_operand.hbm [shape: f32[8,8,1], index: 1, kind: input, shape index: {}]   ;;  %s8599_s2 = inlined_call_operand.hbm [shape: f32[2,8,32], index: 2, kind: input, shape index: {}]   ;;  %s8600_s3 = inlined_call_operand.hbm [shape: f32[2,8,32], index: 3, kind: input, shape index: {}]   ;;  %s8601_s4 = inlined_call_operand.hbm [shape: f32[2,8,8], index: 4, kind: input, shape index: {}]   ;;  %s8602_s5 = inlined_call_operand.hbm [shape: f32[2,8,8], index: 5, kind: input, shape index: {}]   ;;  %s8603_s6 = inlined_call_operand.hbm [shape: bf16[8,128], index: 6, kind: input, shape index: {}]   ;;  %s8604_s7 = inlined_call_operand.hbm [shape: bf16[32,128], index: 7, kind: input, shape index: {}]   ;;  %s8605_s8 = inlined_call_operand.hbm [shape: f32[1,128], index: 8, kind: input, shape index: {}]   ;;  %s8606_s9 = inlined_call_operand.hbm [shape: bf16[32,128], index: 9, kind: input, shape index: {}]   ;;  %s8607_s10 = inlined_call_operand.hbm [shape: bf16[32,128], index: 10, kind: input, shape index: {}]   ;;  %s8608_s11 = inlined_call_operand.hbm [shape: f32[1,128], index: 11, kind: input, shape index: {}]   ;;  %s8609_s12 = inlined_call_operand.hbm [shape: bf16[32,32], index: 12, kind: input, shape index: {}]   ;;  %s8610_s13 = inlined_call_operand.hbm [shape: bf16[8,32], index: 13, kind: input, shape index: {}]   ;;  %s8611_s14 = inlined_call_operand.hbm [shape: f32[1,32], index: 14, kind: input, shape index: {}]   ;;  %s8612_s15 = inlined_call_operand.hbm [shape: bf16[8,32], index: 15, kind: input, shape index: {}]   ;;  %s8613_s16 = inlined_call_operand.hbm [shape: bf16[8,32], index: 16, kind: input, shape index: {}]   ;;  %s8614_s17 = inlined_call_operand.hbm [shape: f32[1,32], index: 17, kind: input, shape index: {}]   ;;  %s8615_s18 = inlined_call_operand.hbm [shape: bf16[32,32], index: 18, kind: input, shape index: {}]   ;;  %s8616_s19 = inlined_call_operand.hbm [shape: f32[1,32], index: 19, kind: input, shape index: {}]   ;;  %s8617_s20 = inlined_call_operand.hbm [shape: bf16[32,16], index: 20, kind: input, shape index: {}]   ;;  %s8618_s21 = inlined_call_operand.hbm [shape: f32[1,16], index: 21, kind: input, shape index: {}]   ;;  %s8619_s22 = inlined_call_operand.hbm [shape: bf16[16,32], index: 22, kind: input, shape index: {}]   ;;  %s8620_s23 = inlined_call_operand.hbm [shape: f32[1,32], index: 23, kind: input, shape index: {}]   ;;  %s8621_s24 = inlined_call_operand.hbm [shape: bf16[32,32], index: 24, kind: input, shape index: {}]   ;;  %s8622_s25 = inlined_call_operand.hbm [shape: f32[1,32], index: 25, kind: input, shape index: {}]   ;;  %s8623_s26 = inlined_call_operand.hbm [shape: f32[8,8,8], index: 26, kind: output, shape index: {0}]   ;;  %s8624_s27 = inlined_call_operand.hbm [shape: f32[2,8,8], index: 27, kind: output, shape index: {1}]   ;;  %s8625_s28 = inlined_call_operand.hbm [shape: f32[2,8,8], index: 28, kind: output, shape index: {2}]  }
   0x1   :  { %8646 = sst [smem:[#allocation66_spill]] %s8597_s0 }
   0x2   :  { %8647 = sst [smem:[#allocation67_spill]] %s8598_s1 }
   0x3   :  { %8648 = sst [smem:[#allocation68_spill]] %s8599_s2 }
   0x4   :  { %8649 = sst [smem:[#allocation69_spill]] %s8600_s3 }
   0x5   :  { %8650 = sst [smem:[#allocation70_spill]] %s8601_s4 }
   0x6   :  { %8651 = sst [smem:[#allocation71_spill]] %s8602_s5 }
   0x7   :  { %8652 = sst [smem:[#allocation72_spill]] %s8603_s6 }
   0x8   :  { %8653 = sst [smem:[#allocation73_spill]] %s8604_s7 }
   0x9   :  { %8654 = sst [smem:[#allocation74_spill]] %s8605_s8 }
   0xa   :  { %8655 = sst [smem:[#allocation75_spill]] %s8606_s9 }
   0xb   :  { %8656 = sst [smem:[#allocation76_spill]] %s8607_s10 }
   0xc   :  { %8657 = sst [smem:[#allocation77_spill]] %s8608_s11 }
   0xd   :  { %8658 = sst [smem:[#allocation78_spill]] %s8609_s12 }
   0xe   :  { %8659 = sst [smem:[#allocation79_spill]] %s8623_s26 }
   0xf   :  { %8660 = sst [smem:[#allocation80_spill]] %s8624_s27 }
  0x10   :  { %8661 = sst [smem:[#allocation81_spill]] %s8625_s28 }
  0x11   :  { %34 = vsyncpa [#allocation6], 0 }
  0x12   :  { %35 = vsyncpa [#allocation9], 0 }
  0x13   :  { %36 = vsyncpa [#allocation12], 0 }
  0x14   :  { %37 = vsyncpa [#allocation15], 0 }
  0x15   :  { %38 = vsyncpa [#allocation18], 0 }
  0x16   :  { %39 = vsyncpa [#allocation21], 0 }
  0x17   :  { %40 = vsyncpa [#allocation24], 0 }
  0x18   :  { %41 = vsyncpa [#allocation27], 0 }
  0x19   :  { %42 = vsyncpa [#allocation30], 0 }
  0x1a   :  { %43 = vsyncpa [#allocation33], 0 }
  0x1b   :  { %44 = vsyncpa [#allocation36], 0 }
  0x1c   :  { %45 = vsyncpa [#allocation39], 0 }
  0x1d   :  { %46 = vsyncpa [#allocation42], 0 }
  0x1e   :  { %47 = vsyncpa [#allocation45], 0 }
  0x1f   :  { %48 = vsyncpa [#allocation7], 0 }
  0x20   :  { %49 = vsyncpa [#allocation48], 0  ;;  %s6596_s8 = smov [#allocation8]   ;;  %s6597_s9 = smov [#allocation11]  }
  0x21   :  { %s67_s5 = sshll.u32 %s6596_s8, 4  ;;  %s91_s30 = sshll.u32 %s6597_s9, 4  ;;  %s68_s5 = int_to_ptr.vmem [resolvable:$true] %s67_s5  ;;  %s6782_s30 = int_to_ptr.vmem [resolvable:$true] %s91_s30 }
  0x22   :  { %s8662_s10 = sld [smem:[#allocation67_spill]] }
  0x28   :  { %s5926_s0 = scalar_lea.hbm %s8662_s10, 1024 }
  0x29   :  { %p5927_p0 = scmp.ne.s32.totalorder %s8662_s10, %s5926_s0  ;;  %p5930_p1 = scmp.lt.u32.totalorder %s5926_s0, %s8662_s10 }
  0x2b   :  { %p5932_p2 = pnand %p5930_p1, %p5927_p0 }
  0x2d   :  { %5935 = shalt.err (!%p5932_p2)
}
  0x2e   :  { %s5936_s12 = scalar_lea.vmem %s68_s5, 1024  ;;  %p5941_p4 = scmp.lt.s32.totalorder %s68_s5, %s68_s5 }
  0x2f   :  { %p5937_p3 = scmp.ne.s32.totalorder %s68_s5, %s5936_s12  ;;  %p5942_p5 = scmp.lt.s32.totalorder %s5936_s12, %s5936_s12 }
  0x31   :  { %p5943_p6 = por %p5942_p5, %p5941_p4 }
  0x33   :  { %p5944_p7 = pnand %p5943_p6, %p5937_p3 }
  0x35   :  { %5947 = shalt.err (!%p5944_p7)
}
  0x36   :  { %s8642_s1 = smov 128   ;;  %s8644_s4 = smov 8  }
  0x37   :  { %73 = dma.hbm_to_vmem [thread:$0]  %s8662_s10, 1024, %s68_s5, [#allocation9], %s8642_s1, %s8642_s1, %s8644_s4  }
  0x38   :  { %s8663_s0 = sld [smem:[#allocation69_spill]] }
  0x3e   :  { %s5948_s11 = scalar_lea.hbm %s8663_s0, 256 }
  0x3f   :  { %p5949_p8 = scmp.ne.s32.totalorder %s8663_s0, %s5948_s11  ;;  %p5952_p9 = scmp.lt.u32.totalorder %s5948_s11, %s8663_s0 }
  0x41   :  { %p5954_p10 = pnand %p5952_p9, %p5949_p8 }
  0x43   :  { %5957 = shalt.err (!%p5954_p10)
}
  0x44   :  { %s5958_s28 = scalar_lea.vmem %s6782_s30, 256  ;;  %p5963_p12 = scmp.lt.s32.totalorder %s6782_s30, %s6782_s30 }
  0x45   :  { %p5959_p11 = scmp.ne.s32.totalorder %s6782_s30, %s5958_s28  ;;  %p5964_p13 = scmp.lt.s32.totalorder %s5958_s28, %s5958_s28 }
  0x47   :  { %p5965_p0 = por %p5964_p13, %p5963_p12 }
  0x49   :  { %p5966_p1 = pnand %p5965_p0, %p5959_p11 }
  0x4b   :  { %5969 = shalt.err (!%p5966_p1)
}
  0x4c   :  { %97 = dma.hbm_to_vmem [thread:$0]  %s8663_s0, 256, %s6782_s30, [#allocation12], %s8642_s1, %s8642_s1, %s8644_s4  }
  0x4d   :  { %s6600_s8 = smov [#allocation14]   ;;  %s6601_s3 = smov [#allocation17]  }
  0x4e   :  { %s115_s9 = sshll.u32 %s6600_s8, 4  ;;  %s137_s6 = sshll.u32 %s6601_s3, 4  ;;  %s116_s9 = int_to_ptr.vmem [resolvable:$true] %s115_s9  ;;  %s6819_s6 = int_to_ptr.vmem [resolvable:$true] %s137_s6 }
  0x4f   :  { %s8664_s29 = sld [smem:[#allocation71_spill]] }
  0x55   :  { %s5970_s2 = scalar_lea.hbm %s8664_s29, 256 }
  0x56   :  { %p5971_p2 = scmp.ne.s32.totalorder %s8664_s29, %s5970_s2  ;;  %p5974_p3 = scmp.lt.u32.totalorder %s5970_s2, %s8664_s29 }
  0x58   :  { %p5976_p4 = pnand %p5974_p3, %p5971_p2 }
  0x5a   :  { %5979 = shalt.err (!%p5976_p4)
}
  0x5b   :  { %s5980_s30 = scalar_lea.vmem %s116_s9, 256  ;;  %p5985_p6 = scmp.lt.s32.totalorder %s116_s9, %s116_s9 }
  0x5c   :  { %p5981_p5 = scmp.ne.s32.totalorder %s116_s9, %s5980_s30  ;;  %p5986_p7 = scmp.lt.s32.totalorder %s5980_s30, %s5980_s30 }
  0x5e   :  { %p5987_p8 = por %p5986_p7, %p5985_p6 }
  0x60   :  { %p5988_p9 = pnand %p5987_p8, %p5981_p5 }
  0x62   :  { %5991 = shalt.err (!%p5988_p9)
}
  0x63   :  { %121 = dma.hbm_to_vmem [thread:$0]  %s8664_s29, 256, %s116_s9, [#allocation15], %s8642_s1, %s8642_s1, %s8644_s4  }
  0x64   :  { %s8665_s26 = sld [smem:[#allocation73_spill]] }
  0x6a   :  { %s5992_s27 = scalar_lea.hbm %s8665_s26, 256 }
  0x6b   :  { %p5993_p10 = scmp.ne.s32.totalorder %s8665_s26, %s5992_s27  ;;  %p5996_p11 = scmp.lt.u32.totalorder %s5992_s27, %s8665_s26 }
  0x6d   :  { %p5998_p12 = pnand %p5996_p11, %p5993_p10 }
  0x6f   :  { %6001 = shalt.err (!%p5998_p12)
}
  0x70   :  { %s6002_s7 = scalar_lea.vmem %s6819_s6, 256  ;;  %p6007_p0 = scmp.lt.s32.totalorder %s6819_s6, %s6819_s6 }
  0x71   :  { %p6003_p13 = scmp.ne.s32.totalorder %s6819_s6, %s6002_s7  ;;  %p6008_p1 = scmp.lt.s32.totalorder %s6002_s7, %s6002_s7 }
  0x73   :  { %p6009_p2 = por %p6008_p1, %p6007_p0 }
  0x75   :  { %p6010_p3 = pnand %p6009_p2, %p6003_p13 }
  0x77   :  { %6013 = shalt.err (!%p6010_p3)
}
  0x78   :  { %s6602_s9 = smov 64   ;;  %s6603_s29 = smov 4  }
  0x79   :  { %143 = dma.hbm_to_vmem [thread:$0]  %s8665_s26, 256, %s6819_s6, [#allocation18], %s6602_s9, %s6602_s9, %s6603_s29  }
  0x7a   :  { %s6604_s0 = smov [#allocation20]   ;;  %s6605_s10 = smov [#allocation23]  }
  0x7b   :  { %s159_s5 = sshll.u32 %s6604_s0, 4  ;;  %s184_s8 = sshll.u32 %s6605_s10, 4  ;;  %s160_s5 = int_to_ptr.vmem [resolvable:$true] %s159_s5  ;;  %s185_s8 = int_to_ptr.vmem [resolvable:$true] %s184_s8 }
  0x7c   :  { %s8666_s11 = sld [smem:[#allocation75_spill]] }
  0x82   :  { %s6014_s28 = scalar_lea.hbm %s8666_s11, 256 }
  0x83   :  { %p6015_p4 = scmp.ne.s32.totalorder %s8666_s11, %s6014_s28  ;;  %p6018_p5 = scmp.lt.u32.totalorder %s6014_s28, %s8666_s11 }
  0x85   :  { %p6020_p6 = pnand %p6018_p5, %p6015_p4 }
  0x87   :  { %6023 = shalt.err (!%p6020_p6)
}
  0x88   :  { %s6024_s6 = scalar_lea.vmem %s160_s5, 256  ;;  %p6029_p8 = scmp.lt.s32.totalorder %s160_s5, %s160_s5 }
  0x89   :  { %p6025_p7 = scmp.ne.s32.totalorder %s160_s5, %s6024_s6  ;;  %p6030_p9 = scmp.lt.s32.totalorder %s6024_s6, %s6024_s6 }
  0x8b   :  { %p6031_p10 = por %p6030_p9, %p6029_p8 }
  0x8d   :  { %p6032_p11 = pnand %p6031_p10, %p6025_p7 }
  0x8f   :  { %6035 = shalt.err (!%p6032_p11)
}
  0x90   :  { %165 = dma.hbm_to_vmem [thread:$0]  %s8666_s11, 256, %s160_s5, [#allocation21], %s6602_s9, %s6602_s9, %s6603_s29  }
  0x91   :  { %s8667_s1 = sld [smem:[#allocation77_spill]] }
  0x97   :  { %s6036_s4 = scalar_lea.hbm %s8667_s1, 16 }
  0x98   :  { %p6037_p12 = scmp.ne.s32.totalorder %s8667_s1, %s6036_s4  ;;  %p6040_p13 = scmp.lt.u32.totalorder %s6036_s4, %s8667_s1 }
  0x9a   :  { %p6042_p0 = pnand %p6040_p13, %p6037_p12 }
  0x9c   :  { %6045 = shalt.err (!%p6042_p0)
}
  0x9d   :  { %s6046_s2 = scalar_lea.vmem %s185_s8, 16  ;;  %s6050_s7 = scalar_lea.vmem %s185_s8, 32 }
  0x9e   :  { %p6047_p1 = scmp.ne.s32.totalorder %s185_s8, %s6046_s2  ;;  %p6051_p2 = scmp.lt.s32.totalorder %s185_s8, %s185_s8 }
  0x9f   :  { %p6052_p3 = scmp.lt.s32.totalorder %s6050_s7, %s6046_s2 }
  0xa1   :  { %p6053_p4 = por %p6052_p3, %p6051_p2 }
  0xa3   :  { %p6054_p5 = pnand %p6053_p4, %p6047_p1 }
  0xa5   :  { %6057 = shalt.err (!%p6054_p5)
}
  0xa6   :  { %187 = dma.hbm_to_vmem [thread:$0]  %s8667_s1, 16, %s185_s8, [#allocation24]  }
  0xa7   :  { %s6606_s6 = smov [#allocation26]   ;;  %s6607_s12 = smov [#allocation29]  }
  0xa8   :  { %s206_s26 = sshll.u32 %s6606_s6, 4  ;;  %s226_s30 = sshll.u32 %s6607_s12, 4  ;;  %s207_s26 = int_to_ptr.vmem [resolvable:$true] %s206_s26  ;;  %s227_s30 = int_to_ptr.vmem [resolvable:$true] %s226_s30 }
  0xa9   :  { %s6058_s10 = scalar_lea.hbm %s8610_s13, 64 }
  0xaa   :  { %p6059_p6 = scmp.ne.s32.totalorder %s8610_s13, %s6058_s10  ;;  %p6062_p7 = scmp.lt.u32.totalorder %s6058_s10, %s8610_s13 }
  0xac   :  { %p6064_p8 = pnand %p6062_p7, %p6059_p6 }
  0xae   :  { %6067 = shalt.err (!%p6064_p8)
}
  0xaf   :  { %s6068_s8 = scalar_lea.vmem %s207_s26, 64  ;;  %p6073_p10 = scmp.lt.s32.totalorder %s207_s26, %s207_s26 }
  0xb0   :  { %p6069_p9 = scmp.ne.s32.totalorder %s207_s26, %s6068_s8  ;;  %p6074_p11 = scmp.lt.s32.totalorder %s6068_s8, %s6068_s8 }
  0xb2   :  { %p6075_p12 = por %p6074_p11, %p6073_p10 }
  0xb4   :  { %p6076_p13 = pnand %p6075_p12, %p6069_p9 }
  0xb6   :  { %6079 = shalt.err (!%p6076_p13)
}
  0xb7   :  { %209 = dma.hbm_to_vmem [thread:$0]  %s8610_s13, 64, %s207_s26, [#allocation27]  }
  0xb8   :  { %s6080_s6 = scalar_lea.hbm %s8612_s15, 64 }
  0xb9   :  { %p6081_p0 = scmp.ne.s32.totalorder %s8612_s15, %s6080_s6  ;;  %p6084_p1 = scmp.lt.u32.totalorder %s6080_s6, %s8612_s15 }
  0xbb   :  { %p6086_p2 = pnand %p6084_p1, %p6081_p0 }
  0xbd   :  { %6089 = shalt.err (!%p6086_p2)
}
  0xbe   :  { %s6090_s27 = scalar_lea.vmem %s227_s30, 64  ;;  %p6095_p4 = scmp.lt.s32.totalorder %s227_s30, %s227_s30 }
  0xbf   :  { %p6091_p3 = scmp.ne.s32.totalorder %s227_s30, %s6090_s27  ;;  %p6096_p5 = scmp.lt.s32.totalorder %s6090_s27, %s6090_s27 }
  0xc1   :  { %p6097_p6 = por %p6096_p5, %p6095_p4 }
  0xc3   :  { %p6098_p7 = pnand %p6097_p6, %p6091_p3 }
  0xc5   :  { %6101 = shalt.err (!%p6098_p7)
}
  0xc6   :  { %229 = dma.hbm_to_vmem [thread:$0]  %s8612_s15, 64, %s227_s30, [#allocation30]  }
  0xc7   :  { %s6608_s3 = smov [#allocation32]   ;;  %s6609_s2 = smov [#allocation35]  }
  0xc8   :  { %s246_s28 = sshll.u32 %s6608_s3, 4  ;;  %s268_s8 = sshll.u32 %s6609_s2, 4  ;;  %s247_s28 = int_to_ptr.vmem [resolvable:$true] %s246_s28  ;;  %s269_s8 = int_to_ptr.vmem [resolvable:$true] %s268_s8 }
  0xc9   :  { %s6102_s5 = scalar_lea.hbm %s8614_s17, 16 }
  0xca   :  { %p6103_p8 = scmp.ne.s32.totalorder %s8614_s17, %s6102_s5  ;;  %p6106_p9 = scmp.lt.u32.totalorder %s6102_s5, %s8614_s17 }
  0xcc   :  { %p6108_p10 = pnand %p6106_p9, %p6103_p8 }
  0xce   :  { %6111 = shalt.err (!%p6108_p10)
}
  0xcf   :  { %s6112_s15 = scalar_lea.vmem %s247_s28, 16  ;;  %s6116_s30 = scalar_lea.vmem %s247_s28, 32 }
  0xd0   :  { %p6113_p11 = scmp.ne.s32.totalorder %s247_s28, %s6112_s15  ;;  %p6117_p12 = scmp.lt.s32.totalorder %s247_s28, %s247_s28 }
  0xd1   :  { %p6118_p13 = scmp.lt.s32.totalorder %s6116_s30, %s6112_s15 }
  0xd3   :  { %p6119_p0 = por %p6118_p13, %p6117_p12 }
  0xd5   :  { %p6120_p1 = pnand %p6119_p0, %p6113_p11 }
  0xd7   :  { %6123 = shalt.err (!%p6120_p1)
}
  0xd8   :  { %249 = dma.hbm_to_vmem [thread:$0]  %s8614_s17, 16, %s247_s28, [#allocation33]  }
  0xd9   :  { %s6124_s26 = scalar_lea.hbm %s8616_s19, 16 }
  0xda   :  { %p6125_p2 = scmp.ne.s32.totalorder %s8616_s19, %s6124_s26  ;;  %p6128_p3 = scmp.lt.u32.totalorder %s6124_s26, %s8616_s19 }
  0xdc   :  { %p6130_p4 = pnand %p6128_p3, %p6125_p2 }
  0xde   :  { %6133 = shalt.err (!%p6130_p4)
}
  0xdf   :  { %s6134_s5 = scalar_lea.vmem %s269_s8, 16  ;;  %s6138_s11 = scalar_lea.vmem %s269_s8, 32 }
  0xe0   :  { %p6135_p5 = scmp.ne.s32.totalorder %s269_s8, %s6134_s5  ;;  %p6139_p6 = scmp.lt.s32.totalorder %s269_s8, %s269_s8 }
  0xe1   :  { %p6140_p7 = scmp.lt.s32.totalorder %s6138_s11, %s6134_s5 }
  0xe3   :  { %p6141_p8 = por %p6140_p7, %p6139_p6 }
  0xe5   :  { %p6142_p9 = pnand %p6141_p8, %p6135_p5 }
  0xe7   :  { %6145 = shalt.err (!%p6142_p9)
}
  0xe8   :  { %271 = dma.hbm_to_vmem [thread:$0]  %s8616_s19, 16, %s269_s8, [#allocation36]  }
  0xe9   :  { %s6610_s6 = smov [#allocation38]   ;;  %s6611_s0 = smov [#allocation41]  }
  0xea   :  { %s290_s12 = sshll.u32 %s6610_s6, 4  ;;  %s312_s15 = sshll.u32 %s6611_s0, 4  ;;  %s291_s12 = int_to_ptr.vmem [resolvable:$true] %s290_s12  ;;  %s313_s15 = int_to_ptr.vmem [resolvable:$true] %s312_s15 }
  0xeb   :  { %s6146_s10 = scalar_lea.hbm %s8618_s21, 16 }
  0xec   :  { %p6147_p10 = scmp.ne.s32.totalorder %s8618_s21, %s6146_s10  ;;  %p6150_p11 = scmp.lt.u32.totalorder %s6146_s10, %s8618_s21 }
  0xee   :  { %p6152_p12 = pnand %p6150_p11, %p6147_p10 }
  0xf0   :  { %6155 = shalt.err (!%p6152_p12)
}
  0xf1   :  { %s6156_s19 = scalar_lea.vmem %s291_s12, 16  ;;  %s6160_s8 = scalar_lea.vmem %s291_s12, 32 }
  0xf2   :  { %p6157_p13 = scmp.ne.s32.totalorder %s291_s12, %s6156_s19  ;;  %p6161_p0 = scmp.lt.s32.totalorder %s291_s12, %s291_s12 }
  0xf3   :  { %p6162_p1 = scmp.lt.s32.totalorder %s6160_s8, %s6156_s19 }
  0xf5   :  { %p6163_p2 = por %p6162_p1, %p6161_p0 }
  0xf7   :  { %p6164_p3 = pnand %p6163_p2, %p6157_p13 }
  0xf9   :  { %6167 = shalt.err (!%p6164_p3)
}
  0xfa   :  { %293 = dma.hbm_to_vmem [thread:$0]  %s8618_s21, 16, %s291_s12, [#allocation39]  }
  0xfb   :  { %s6168_s11 = scalar_lea.hbm %s8620_s23, 16 }
  0xfc   :  { %p6169_p4 = scmp.ne.s32.totalorder %s8620_s23, %s6168_s11  ;;  %p6172_p5 = scmp.lt.u32.totalorder %s6168_s11, %s8620_s23 }
  0xfe   :  { %p6174_p6 = pnand %p6172_p5, %p6169_p4 }
 0x100   :  { %6177 = shalt.err (!%p6174_p6)
}
 0x101   :  { %s6178_s30 = scalar_lea.vmem %s313_s15, 16  ;;  %s6182_s4 = scalar_lea.vmem %s313_s15, 32 }
 0x102   :  { %p6179_p7 = scmp.ne.s32.totalorder %s313_s15, %s6178_s30  ;;  %p6183_p8 = scmp.lt.s32.totalorder %s313_s15, %s313_s15 }
 0x103   :  { %p6184_p9 = scmp.lt.s32.totalorder %s6182_s4, %s6178_s30 }
 0x105   :  { %p6185_p10 = por %p6184_p9, %p6183_p8 }
 0x107   :  { %p6186_p11 = pnand %p6185_p10, %p6179_p7 }
 0x109   :  { %6189 = shalt.err (!%p6186_p11)
}
 0x10a   :  { %315 = dma.hbm_to_vmem [thread:$0]  %s8620_s23, 16, %s313_s15, [#allocation42]  }
 0x10b   :  { %s6612_s10 = smov [#allocation5]   ;;  %s6613_s13 = smov [#allocation10]  }
 0x10c   :  { %s55_s27 = sshll.u32 %s6612_s10, 4  ;;  %s79_s26 = sshll.u32 %s6613_s13, 4  ;;  %s56_s27 = int_to_ptr.vmem [resolvable:$true] %s55_s27  ;;  %s6955_s26 = int_to_ptr.vmem [resolvable:$true] %s79_s26 }
 0x10d   :  { %s8668_s8 = sld [smem:[#allocation66_spill]] }
 0x113   :  { %s6190_s2 = scalar_lea.hbm %s8668_s8, 1024 }
 0x114   :  { %p6191_p12 = scmp.ne.s32.totalorder %s8668_s8, %s6190_s2  ;;  %p6194_p13 = scmp.lt.u32.totalorder %s6190_s2, %s8668_s8 }
 0x116   :  { %p6196_p0 = pnand %p6194_p13, %p6191_p12 }
 0x118   :  { %6199 = shalt.err (!%p6196_p0)
}
 0x119   :  { %s6200_s23 = scalar_lea.vmem %s56_s27, 1024  ;;  %p6205_p2 = scmp.lt.s32.totalorder %s56_s27, %s56_s27 }
 0x11a   :  { %p6201_p1 = scmp.ne.s32.totalorder %s56_s27, %s6200_s23  ;;  %p6206_p3 = scmp.lt.s32.totalorder %s6200_s23, %s6200_s23 }
 0x11c   :  { %p6207_p4 = por %p6206_p3, %p6205_p2 }
 0x11e   :  { %p6208_p5 = pnand %p6207_p4, %p6201_p1 }
 0x120   :  { %6211 = shalt.err (!%p6208_p5)
}
 0x121   :  { %s8669_s15 = smov 8   ;;  %s8670_s17 = smov 128  }
 0x122   :  { %61 = dma.hbm_to_vmem [thread:$0]  %s8668_s8, 1024, %s56_s27, [#allocation6], %s8670_s17, %s8670_s17, %s8669_s15  }
 0x123   :  { %s8671_s4 = sld [smem:[#allocation68_spill]] }
 0x129   :  { %s6212_s21 = scalar_lea.hbm %s8671_s4, 256 }
 0x12a   :  { %p6213_p6 = scmp.ne.s32.totalorder %s8671_s4, %s6212_s21  ;;  %p6216_p7 = scmp.lt.u32.totalorder %s6212_s21, %s8671_s4 }
 0x12c   :  { %p6218_p8 = pnand %p6216_p7, %p6213_p6 }
 0x12e   :  { %6221 = shalt.err (!%p6218_p8)
}
 0x12f   :  { %s6222_s19 = scalar_lea.vmem %s6955_s26, 256  ;;  %p6227_p10 = scmp.lt.s32.totalorder %s6955_s26, %s6955_s26 }
 0x130   :  { %p6223_p9 = scmp.ne.s32.totalorder %s6955_s26, %s6222_s19  ;;  %p6228_p11 = scmp.lt.s32.totalorder %s6222_s19, %s6222_s19 }
 0x132   :  { %p6229_p12 = por %p6228_p11, %p6227_p10 }
 0x134   :  { %p6230_p13 = pnand %p6229_p12, %p6223_p9 }
 0x136   :  { %6233 = shalt.err (!%p6230_p13)
}
 0x137   :  { %85 = dma.hbm_to_vmem [thread:$0]  %s8671_s4, 256, %s6955_s26, [#allocation9], %s8670_s17, %s8670_s17, %s8669_s15  }
 0x138   :  { %s6614_s2 = smov [#allocation13]   ;;  %s6615_s7 = smov [#allocation16]  }
 0x139   :  { %s103_s1 = sshll.u32 %s6614_s2, 4  ;;  %s128_s5 = sshll.u32 %s6615_s7, 4  ;;  %s104_s1 = int_to_ptr.vmem [resolvable:$true] %s103_s1  ;;  %s129_s5 = int_to_ptr.vmem [resolvable:$true] %s128_s5 }
 0x13a   :  { %s8672_s28 = sld [smem:[#allocation70_spill]] }
 0x140   :  { %s6234_s6 = scalar_lea.hbm %s8672_s28, 256 }
 0x141   :  { %p6235_p0 = scmp.ne.s32.totalorder %s8672_s28, %s6234_s6  ;;  %p6238_p1 = scmp.lt.u32.totalorder %s6234_s6, %s8672_s28 }
 0x143   :  { %p6240_p2 = pnand %p6238_p1, %p6235_p0 }
 0x145   :  { %6243 = shalt.err (!%p6240_p2)
}
 0x146   :  { %s6244_s26 = scalar_lea.vmem %s104_s1, 256  ;;  %p6249_p4 = scmp.lt.s32.totalorder %s104_s1, %s104_s1 }
 0x147   :  { %p6245_p3 = scmp.ne.s32.totalorder %s104_s1, %s6244_s26  ;;  %p6250_p5 = scmp.lt.s32.totalorder %s6244_s26, %s6244_s26 }
 0x149   :  { %p6251_p6 = por %p6250_p5, %p6249_p4 }
 0x14b   :  { %p6252_p7 = pnand %p6251_p6, %p6245_p3 }
 0x14d   :  { %6255 = shalt.err (!%p6252_p7)
}
 0x14e   :  { %109 = dma.hbm_to_vmem [thread:$0]  %s8672_s28, 256, %s104_s1, [#allocation12], %s8670_s17, %s8670_s17, %s8669_s15  }
 0x14f   :  { %s8673_s19 = sld [smem:[#allocation72_spill]] }
 0x155   :  { %s6256_s27 = scalar_lea.hbm %s8673_s19, 64 }
 0x156   :  { %p6257_p8 = scmp.ne.s32.totalorder %s8673_s19, %s6256_s27  ;;  %p6260_p9 = scmp.lt.u32.totalorder %s6256_s27, %s8673_s19 }
 0x158   :  { %p6262_p10 = pnand %p6260_p9, %p6257_p8 }
 0x15a   :  { %6265 = shalt.err (!%p6262_p10)
}
 0x15b   :  { %s6266_s23 = scalar_lea.vmem %s129_s5, 64  ;;  %p6271_p12 = scmp.lt.s32.totalorder %s129_s5, %s129_s5 }
 0x15c   :  { %p6267_p11 = scmp.ne.s32.totalorder %s129_s5, %s6266_s23  ;;  %p6272_p13 = scmp.lt.s32.totalorder %s6266_s23, %s6266_s23 }
 0x15e   :  { %p6273_p0 = por %p6272_p13, %p6271_p12 }
 0x160   :  { %p6274_p1 = pnand %p6273_p0, %p6267_p11 }
 0x162   :  { %6277 = shalt.err (!%p6274_p1)
}
 0x163   :  { %131 = dma.hbm_to_vmem [thread:$0]  %s8673_s19, 64, %s129_s5, [#allocation15]  }
 0x164   :  { %s6616_s6 = smov [#allocation19]   ;;  %s6617_s30 = smov [#allocation22]  }
 0x165   :  { %s150_s0 = sshll.u32 %s6616_s6, 4  ;;  %s171_s21 = sshll.u32 %s6617_s30, 4  ;;  %s151_s0 = int_to_ptr.vmem [resolvable:$true] %s150_s0  ;;  %s7019_s21 = int_to_ptr.vmem [resolvable:$true] %s171_s21 }
 0x166   :  { %s8674_s4 = sld [smem:[#allocation74_spill]] }
 0x16c   :  { %s6278_s10 = scalar_lea.hbm %s8674_s4, 16 }
 0x16d   :  { %p6279_p2 = scmp.ne.s32.totalorder %s8674_s4, %s6278_s10  ;;  %p6282_p3 = scmp.lt.u32.totalorder %s6278_s10, %s8674_s4 }
 0x16f   :  { %p6284_p4 = pnand %p6282_p3, %p6279_p2 }
 0x171   :  { %6287 = shalt.err (!%p6284_p4)
}
 0x172   :  { %s6288_s5 = scalar_lea.vmem %s151_s0, 16  ;;  %s6292_s19 = scalar_lea.vmem %s151_s0, 32 }
 0x173   :  { %p6289_p5 = scmp.ne.s32.totalorder %s151_s0, %s6288_s5  ;;  %p6293_p6 = scmp.lt.s32.totalorder %s151_s0, %s151_s0 }
 0x174   :  { %p6294_p7 = scmp.lt.s32.totalorder %s6292_s19, %s6288_s5 }
 0x176   :  { %p6295_p8 = por %p6294_p7, %p6293_p6 }
 0x178   :  { %p6296_p9 = pnand %p6295_p8, %p6289_p5 }
 0x17a   :  { %6299 = shalt.err (!%p6296_p9)
}
 0x17b   :  { %153 = dma.hbm_to_vmem [thread:$0]  %s8674_s4, 16, %s151_s0, [#allocation18]  }
 0x17c   :  { %s8675_s1 = sld [smem:[#allocation76_spill]] }
 0x182   :  { %s6300_s28 = scalar_lea.hbm %s8675_s1, 256 }
 0x183   :  { %p6301_p10 = scmp.ne.s32.totalorder %s8675_s1, %s6300_s28  ;;  %p6304_p11 = scmp.lt.u32.totalorder %s6300_s28, %s8675_s1 }
 0x185   :  { %p6306_p12 = pnand %p6304_p11, %p6301_p10 }
 0x187   :  { %6309 = shalt.err (!%p6306_p12)
}
 0x188   :  { %s6310_s10 = scalar_lea.vmem %s7019_s21, 256  ;;  %p6315_p0 = scmp.lt.s32.totalorder %s7019_s21, %s7019_s21 }
 0x189   :  { %p6311_p13 = scmp.ne.s32.totalorder %s7019_s21, %s6310_s10  ;;  %p6316_p1 = scmp.lt.s32.totalorder %s6310_s10, %s6310_s10 }
 0x18b   :  { %p6317_p2 = por %p6316_p1, %p6315_p0 }
 0x18d   :  { %p6318_p3 = pnand %p6317_p2, %p6311_p13 }
 0x18f   :  { %6321 = shalt.err (!%p6318_p3)
}
 0x190   :  { %177 = dma.hbm_to_vmem [thread:$0]  %s8675_s1, 256, %s7019_s21, [#allocation21], %s6602_s9, %s6602_s9, %s6603_s29  }
 0x191   :  { %s6618_s13 = smov [#allocation25]   ;;  %s6619_s27 = smov [#allocation28]  }
 0x192   :  { %s193_s3 = sshll.u32 %s6618_s13, 4  ;;  %s216_s8 = sshll.u32 %s6619_s27, 4  ;;  %s194_s3 = int_to_ptr.vmem [resolvable:$true] %s193_s3  ;;  %s217_s8 = int_to_ptr.vmem [resolvable:$true] %s216_s8 }
 0x193   :  { %s8676_s2 = sld [smem:[#allocation78_spill]] }
 0x199   :  { %s6322_s7 = scalar_lea.hbm %s8676_s2, 256 }
 0x19a   :  { %p6323_p4 = scmp.ne.s32.totalorder %s8676_s2, %s6322_s7  ;;  %p6326_p5 = scmp.lt.u32.totalorder %s6322_s7, %s8676_s2 }
 0x19c   :  { %p6328_p6 = pnand %p6326_p5, %p6323_p4 }
 0x19e   :  { %6331 = shalt.err (!%p6328_p6)
}
 0x19f   :  { %s6332_s21 = scalar_lea.vmem %s194_s3, 256  ;;  %p6337_p8 = scmp.lt.s32.totalorder %s194_s3, %s194_s3 }
 0x1a0   :  { %p6333_p7 = scmp.ne.s32.totalorder %s194_s3, %s6332_s21  ;;  %p6338_p9 = scmp.lt.s32.totalorder %s6332_s21, %s6332_s21 }
 0x1a2   :  { %p6339_p10 = por %p6338_p9, %p6337_p8 }
 0x1a4   :  { %p6340_p11 = pnand %p6339_p10, %p6333_p7 }
 0x1a6   :  { %6343 = shalt.err (!%p6340_p11)
}
 0x1a7   :  { %199 = dma.hbm_to_vmem [thread:$0]  %s8676_s2, 256, %s194_s3, [#allocation24], %s6602_s9, %s6602_s9, %s6603_s29  }
 0x1a8   :  { %s6344_s10 = scalar_lea.hbm %s8611_s14, 16 }
 0x1a9   :  { %p6345_p12 = scmp.ne.s32.totalorder %s8611_s14, %s6344_s10  ;;  %p6348_p13 = scmp.lt.u32.totalorder %s6344_s10, %s8611_s14 }
 0x1ab   :  { %p6350_p0 = pnand %p6348_p13, %p6345_p12 }
 0x1ad   :  { %6353 = shalt.err (!%p6350_p0)
}
 0x1ae   :  { %s6354_s5 = scalar_lea.vmem %s217_s8, 16  ;;  %s6358_s19 = scalar_lea.vmem %s217_s8, 32 }
 0x1af   :  { %p6355_p1 = scmp.ne.s32.totalorder %s217_s8, %s6354_s5  ;;  %p6359_p2 = scmp.lt.s32.totalorder %s217_s8, %s217_s8 }
 0x1b0   :  { %p6360_p3 = scmp.lt.s32.totalorder %s6358_s19, %s6354_s5 }
 0x1b2   :  { %p6361_p4 = por %p6360_p3, %p6359_p2 }
 0x1b4   :  { %p6362_p5 = pnand %p6361_p4, %p6355_p1 }
 0x1b6   :  { %6365 = shalt.err (!%p6362_p5)
}
 0x1b7   :  { %219 = dma.hbm_to_vmem [thread:$0]  %s8611_s14, 16, %s217_s8, [#allocation27]  }
 0x1b8   :  { %s6620_s7 = smov [#allocation31]   ;;  %s6621_s23 = smov [#allocation34]  }
 0x1b9   :  { %s236_s11 = sshll.u32 %s6620_s7, 4  ;;  %s255_s28 = sshll.u32 %s6621_s23, 4  ;;  %s237_s11 = int_to_ptr.vmem [resolvable:$true] %s236_s11  ;;  %s7080_s28 = int_to_ptr.vmem [resolvable:$true] %s255_s28 }
 0x1ba   :  { %s6366_s1 = scalar_lea.hbm %s8613_s16, 64 }
 0x1bb   :  { %p6367_p6 = scmp.ne.s32.totalorder %s8613_s16, %s6366_s1  ;;  %p6370_p7 = scmp.lt.u32.totalorder %s6366_s1, %s8613_s16 }
 0x1bd   :  { %p6372_p8 = pnand %p6370_p7, %p6367_p6 }
 0x1bf   :  { %6375 = shalt.err (!%p6372_p8)
}
 0x1c0   :  { %s6376_s14 = scalar_lea.vmem %s237_s11, 64  ;;  %p6381_p10 = scmp.lt.s32.totalorder %s237_s11, %s237_s11 }
 0x1c1   :  { %p6377_p9 = scmp.ne.s32.totalorder %s237_s11, %s6376_s14  ;;  %p6382_p11 = scmp.lt.s32.totalorder %s6376_s14, %s6376_s14 }
 0x1c3   :  { %p6383_p12 = por %p6382_p11, %p6381_p10 }
 0x1c5   :  { %p6384_p13 = pnand %p6383_p12, %p6377_p9 }
 0x1c7   :  { %6387 = shalt.err (!%p6384_p13)
}
 0x1c8   :  { %239 = dma.hbm_to_vmem [thread:$0]  %s8613_s16, 64, %s237_s11, [#allocation30]  }
 0x1c9   :  { %s6388_s27 = scalar_lea.hbm %s8615_s18, 256 }
 0x1ca   :  { %p6389_p0 = scmp.ne.s32.totalorder %s8615_s18, %s6388_s27  ;;  %p6392_p1 = scmp.lt.u32.totalorder %s6388_s27, %s8615_s18 }
 0x1cc   :  { %p6394_p2 = pnand %p6392_p1, %p6389_p0 }
 0x1ce   :  { %6397 = shalt.err (!%p6394_p2)
}
 0x1cf   :  { %s6398_s7 = scalar_lea.vmem %s7080_s28, 256  ;;  %p6403_p4 = scmp.lt.s32.totalorder %s7080_s28, %s7080_s28 }
 0x1d0   :  { %p6399_p3 = scmp.ne.s32.totalorder %s7080_s28, %s6398_s7  ;;  %p6404_p5 = scmp.lt.s32.totalorder %s6398_s7, %s6398_s7 }
 0x1d2   :  { %p6405_p6 = por %p6404_p5, %p6403_p4 }
 0x1d4   :  { %p6406_p7 = pnand %p6405_p6, %p6399_p3 }
 0x1d6   :  { %6409 = shalt.err (!%p6406_p7)
}
 0x1d7   :  { %261 = dma.hbm_to_vmem [thread:$0]  %s8615_s18, 256, %s7080_s28, [#allocation33], %s6602_s9, %s6602_s9, %s6603_s29  }
 0x1d8   :  { %s6622_s23 = smov [#allocation37]   ;;  %s6623_s21 = smov [#allocation40]  }
 0x1d9   :  { %s277_s6 = sshll.u32 %s6622_s23, 4  ;;  %s299_s1 = sshll.u32 %s6623_s21, 4  ;;  %s278_s6 = int_to_ptr.vmem [resolvable:$true] %s277_s6  ;;  %s7114_s1 = int_to_ptr.vmem [resolvable:$true] %s299_s1 }
 0x1da   :  { %s6410_s26 = scalar_lea.hbm %s8617_s20, 256 }
 0x1db   :  { %p6411_p8 = scmp.ne.s32.totalorder %s8617_s20, %s6410_s26  ;;  %p6414_p9 = scmp.lt.u32.totalorder %s6410_s26, %s8617_s20 }
 0x1dd   :  { %p6416_p10 = pnand %p6414_p9, %p6411_p8 }
 0x1df   :  { %6419 = shalt.err (!%p6416_p10)
}
 0x1e0   :  { %s6420_s18 = scalar_lea.vmem %s278_s6, 256  ;;  %p6425_p12 = scmp.lt.s32.totalorder %s278_s6, %s278_s6 }
 0x1e1   :  { %p6421_p11 = scmp.ne.s32.totalorder %s278_s6, %s6420_s18  ;;  %p6426_p13 = scmp.lt.s32.totalorder %s6420_s18, %s6420_s18 }
 0x1e3   :  { %p6427_p0 = por %p6426_p13, %p6425_p12 }
 0x1e5   :  { %p6428_p1 = pnand %p6427_p0, %p6421_p11 }
 0x1e7   :  { %6431 = shalt.err (!%p6428_p1)
}
 0x1e8   :  { %283 = dma.hbm_to_vmem [thread:$0]  %s8617_s20, 256, %s278_s6, [#allocation36], %s6602_s9, %s6602_s9, %s6603_s29  }
 0x1e9   :  { %s6432_s5 = scalar_lea.hbm %s8619_s22, 128 }
 0x1ea   :  { %p6433_p2 = scmp.ne.s32.totalorder %s8619_s22, %s6432_s5  ;;  %p6436_p3 = scmp.lt.u32.totalorder %s6432_s5, %s8619_s22 }
 0x1ec   :  { %p6438_p4 = pnand %p6436_p3, %p6433_p2 }
 0x1ee   :  { %6441 = shalt.err (!%p6438_p4)
}
 0x1ef   :  { %s6442_s16 = scalar_lea.vmem %s7114_s1, 128  ;;  %p6447_p6 = scmp.lt.s32.totalorder %s7114_s1, %s7114_s1 }
 0x1f0   :  { %p6443_p5 = scmp.ne.s32.totalorder %s7114_s1, %s6442_s16  ;;  %p6448_p7 = scmp.lt.s32.totalorder %s6442_s16, %s6442_s16 }
 0x1f2   :  { %p6449_p8 = por %p6448_p7, %p6447_p6 }
 0x1f4   :  { %p6450_p9 = pnand %p6449_p8, %p6443_p5 }
 0x1f6   :  { %6453 = shalt.err (!%p6450_p9)
}
 0x1f7   :  { %305 = dma.hbm_to_vmem [thread:$0]  %s8619_s22, 128, %s7114_s1, [#allocation39], %s6602_s9, %s6602_s9, %s6603_s29  }
 0x1f8   :  { %s6624_s23 = smov [#allocation43]   ;;  %s6625_s21 = smov [#allocation44]  }
 0x1f9   :  { %s321_s6 = sshll.u32 %s6624_s23, 4  ;;  %s334_s30 = sshll.u32 %s6625_s21, 4  ;;  %s322_s6 = int_to_ptr.vmem [resolvable:$true] %s321_s6  ;;  %s335_s30 = int_to_ptr.vmem [resolvable:$true] %s334_s30 }
 0x1fa   :  { %s6454_s10 = scalar_lea.hbm %s8621_s24, 256 }
 0x1fb   :  { %p6455_p10 = scmp.ne.s32.totalorder %s8621_s24, %s6454_s10  ;;  %p6458_p11 = scmp.lt.u32.totalorder %s6454_s10, %s8621_s24 }
 0x1fd   :  { %p6460_p12 = pnand %p6458_p11, %p6455_p10 }
 0x1ff   :  { %6463 = shalt.err (!%p6460_p12)
}
 0x200   :  { %s6464_s22 = scalar_lea.vmem %s322_s6, 256  ;;  %p6469_p0 = scmp.lt.s32.totalorder %s322_s6, %s322_s6 }
 0x201   :  { %p6465_p13 = scmp.ne.s32.totalorder %s322_s6, %s6464_s22  ;;  %p6470_p1 = scmp.lt.s32.totalorder %s6464_s22, %s6464_s22 }
 0x203   :  { %p6471_p2 = por %p6470_p1, %p6469_p0 }
 0x205   :  { %p6472_p3 = pnand %p6471_p2, %p6465_p13 }
 0x207   :  { %6475 = shalt.err (!%p6472_p3)
}
 0x208   :  { %327 = dma.hbm_to_vmem [thread:$0]  %s8621_s24, 256, %s322_s6, [#allocation42], %s6602_s9, %s6602_s9, %s6603_s29  }
 0x209   :  { %s6476_s27 = scalar_lea.hbm %s8622_s25, 16 }
 0x20a   :  { %p6477_p4 = scmp.ne.s32.totalorder %s8622_s25, %s6476_s27  ;;  %p6480_p5 = scmp.lt.u32.totalorder %s6476_s27, %s8622_s25 }
 0x20c   :  { %p6482_p6 = pnand %p6480_p5, %p6477_p4 }
 0x20e   :  { %6485 = shalt.err (!%p6482_p6)
}
 0x20f   :  { %s6486_s7 = scalar_lea.vmem %s335_s30, 16  ;;  %s6490_s16 = scalar_lea.vmem %s335_s30, 32 }
 0x210   :  { %p6487_p7 = scmp.ne.s32.totalorder %s335_s30, %s6486_s7  ;;  %p6491_p8 = scmp.lt.s32.totalorder %s335_s30, %s335_s30 }
 0x211   :  { %p6492_p9 = scmp.lt.s32.totalorder %s6490_s16, %s6486_s7 }
 0x213   :  { %p6493_p10 = por %p6492_p9, %p6491_p8 }
 0x215   :  { %p6494_p11 = pnand %p6493_p10, %p6487_p7 }
 0x217   :  { %6497 = shalt.err (!%p6494_p11)
}
 0x218   :  { %337 = dma.hbm_to_vmem [thread:$0]  %s8622_s25, 16, %s335_s30, [#allocation45]  }
 0x219   :  { %6564 = dma.done.wait [#allocation6], 1024  }
 0x21a   :  { %6565 = vsyncadd [#allocation6], 4294966272 }
 0x21b   :  { %6566 = dma.done.wait [#allocation9], 1280  }
 0x21c   :  { %6567 = vsyncadd [#allocation9], 4294966016 }
 0x21d   :  { %6568 = dma.done.wait [#allocation12], 512  }
 0x21e   :  { %6569 = vsyncadd [#allocation12], 4294966784 }
 0x21f   :  { %6570 = dma.done.wait [#allocation15], 320  }
 0x220   :  { %6571 = vsyncadd [#allocation15], 4294966976 }
 0x221   :  { %6572 = dma.done.wait [#allocation18], 272  }
 0x222   :  { %6573 = vsyncadd [#allocation18], 4294967024 }
 0x223   :  { %6574 = dma.done.wait [#allocation21], 512  }
 0x224   :  { %6575 = vsyncadd [#allocation21], 4294966784 }
 0x225   :  { %6576 = dma.done.wait [#allocation24], 272  }
 0x226   :  { %6577 = vsyncadd [#allocation24], 4294967024 }
 0x227   :  { %6578 = dma.done.wait [#allocation27], 80  }
 0x228   :  { %6579 = vsyncadd [#allocation27], 4294967216 }
 0x229   :  { %6580 = dma.done.wait [#allocation30], 128  }
 0x22a   :  { %6581 = vsyncadd [#allocation30], 4294967168 }
 0x22b   :  { %6582 = dma.done.wait [#allocation33], 272  }
 0x22c   :  { %6583 = vsyncadd [#allocation33], 4294967024 }
 0x22d   :  { %6584 = dma.done.wait [#allocation36], 272  }
 0x22e   :  { %6585 = vsyncadd [#allocation36], 4294967024 }
 0x22f   :  { %6586 = dma.done.wait [#allocation39], 144  }
 0x230   :  { %6587 = vsyncadd [#allocation39], 4294967152 }
 0x231   :  { %6588 = dma.done.wait [#allocation42], 272  }
 0x232   :  { %6589 = vsyncadd [#allocation42], 4294967024 }
 0x233   :  { %6590 = dma.done.wait [#allocation45], 16  }
 0x234   :  { %6591 = vsyncadd [#allocation45], 4294967280  ;;  %v6626_v0 = vmov 0.0   ;;  %vm6627_vm0 = vmmov 0   ;;  %vm450_vm1 = vcmask 1043456   ;;  %v7183_v3 = vld [vmem:[#allocation17] sm:$0xff]  }
 0x235   :  { %5204 = vmatprep.subr.bf16.mxu1 %v6626_v0  ;;  %5208 = vmatprep.mubr.msk.bf16.mxu1 %vm6627_vm0, %v6626_v0  ;;  %v429_v1 = vld [vmem:[#allocation16] sm:$0xf]  ;;  %v418_v5 = vld [vmem:[#allocation5 + $0x8] sm:$0xff]  ;;  %vm437_vm2 = vcmask 64512   ;;  %v419_v6 = vld [vmem:[#allocation5 + $0x10] sm:$0xff]  ;;  %vm560_vm3 = vcmask 261120  }
 0x236   :  { %5598 = vmatprep.subr.msk.bf16.mxu0 %vm450_vm1, %v429_v1  ;;  %v452_v2 = vsel %vm450_vm1, %v429_v1, 0  ;;  %v417_v4 = vld [vmem:[#allocation5] sm:$0xff]  ;;  %5205 = vmatpush3.bf16.msra.mxu1 %v7183_v3  ;;  %v420_v7 = vld [vmem:[#allocation5 + $0x18] sm:$0xff]  ;;  %v7188_v10 = vld [vmem:[#allocation17 + $0x8] sm:$0xff]   ;;  %v6628_v24 = vmov 0   ;;  %s6629_s25 = smov 32  }
 0x237   :  { %5195 = vmatpush3.bf16.msra.mxu0 %v452_v2  ;;  %v425_v8 = vpack.c.bf16 %v418_v5, %v417_v4  ;;  %v426_v9 = vpack.c.bf16 %v420_v7, %v419_v6  ;;  %5206 = vmatprep.subr.bf16.mxu1 %v6626_v0  ;;  %v527_v11 = vld [vmem:[#allocation10] sm:$0xff]  ;;  %v7201_v13 = vld [vmem:[#allocation19] ss:$0 sm:$0xff]  ;;  %v422_v41 = vld [vmem:[#allocation5 + $0x28] sm:$0xff]  ;;  %s6631_s20 = smov 16   ;;  %s6632_s11 = smov 112  }
 0x238   :  { %5220 = vmatprep.subr.bf16.mxu0 %v6626_v0  ;;  %v547_v12 = vpack.c.bf16 %v527_v11, %v527_v11  ;;  %5640 = vset.pattern.permute.xlu1 %v6628_v24  ;;  %v530_v26 = vld [vmem:[#allocation11] sm:$0xff]  ;;  %v605_v30 = vld [vmem:[#allocation8] sm:$0xff]  ;;  %v424_v44 = vld [vmem:[#allocation5 + $0x38] sm:$0xff]  ;;  %s6633_s23 = smov 120   ;;  %s6634_s6 = smov [#allocation47]  }
 0x239   :  { %5196 = vmatprep.mubr.msk.bf16.mxu0 %vm437_vm2, %v425_v8  ;;  %5641 = vset.pattern.permute.xlu0 %v6628_v24  ;;  %vm634_vm4 = vcmp.gt.f32.partialorder %v605_v30, 0.0  ;;  %v421_v40 = vld [vmem:[#allocation5 + $0x20] sm:$0xff]  ;;  %v423_v43 = vld [vmem:[#allocation5 + $0x30] sm:$0xff]  ;;  %v7238_v51 = vld [vmem:[#allocation10 + $0x8] sm:$0xff]  ;;  %s4869_s21 = sshll.u32 %s6634_s6, 4  ;;  %s6635_s30 = smov [#allocation46]   ;;  %s4870_s21 = int_to_ptr.vmem [resolvable:$true] %s4869_s21 }
 0x23a   :  { %5197 = vmatmul.mubr.msk.bf16.vlgmr.msra.gmra.mrb[0].mxu0 %vm437_vm2, %v426_v9  ;;  %5207 = vmatpush3.bf16.msra.mxu1 %v7188_v10  ;;  %v641_v34 = vsel %vm634_vm4, 1, %v6628_v24  ;;  %v427_v42 = vpack.c.bf16 %v422_v41, %v421_v40  ;;  %v428_v45 = vpack.c.bf16 %v424_v44, %v423_v43  ;;  %v7225_v46 = vld [vmem:[#allocation22] sm:$0xff]   ;;  %v7231_v48 = vld [vmem:[#allocation22 + $0x8] sm:$0xff]   ;;  %v743_v53 = vpack.c.bf16 %v7238_v51, %v7238_v51  ;;  %v7261_v59 = vld [vmem:[#allocation20] sm:$0xff]   ;;  %s4857_s12 = sshll.u32 %s6635_s30, 4  ;;  %s6498_s26 = scalar_lea.vmem %s4870_s21, 256  ;;  %s4858_s12 = int_to_ptr.vmem [resolvable:$true] %s4857_s12 }
 0x23b   :  { %5212 = vmatprep.subr.bf16.mxu1 %v6626_v0  ;;  %5221 = vmatpush3.bf16.msra.mxu0 %v7225_v46  ;;  %v7265_v61 = vld [vmem:[#allocation20 + $0x8] sm:$0xff]   ;;  %p6499_p12 = scmp.ne.s32.totalorder %s4870_s21, %s6498_s26  ;;  %p6503_p13 = scmp.lt.s32.totalorder %s4870_s21, %s4870_s21 }
 0x23c   :  { %5200 = vmatprep.mubr.msk.bf16.mxu0 %vm437_vm2, %v427_v42  ;;  %5222 = vmatprep.subr.bf16.mxu0 %v6626_v0  ;;  %p6504_p0 = scmp.lt.s32.totalorder %s6498_s26, %s6498_s26 }
 0x23d   :  { %5209 = vmatmul.mubr.msk.bf16.vlgmr.msra.gmra.mrb[0].mxu1 %vm560_vm3, %v547_v12 }
 0x23e   :  { %5213 = vmatpush3.bf16.msra.mxu1 %v7183_v3  ;;  %5216 = vmatprep.mubr.msk.bf16.mxu1 %vm6627_vm0, %v6626_v0  ;;  %p6505_p1 = por %p6504_p0, %p6503_p13 }
 0x23f   :  { %5214 = vmatprep.subr.bf16.mxu1 %v6626_v0  ;;  %5223 = vmatpush3.bf16.msra.mxu0 %v7231_v48 }
 0x240   :  { %5236 = vmatprep.subr.bf16.mxu0 %v6626_v0  ;;  %p6506_p2 = pnand %p6505_p1, %p6499_p12 }
 0x242   :  { %5215 = vmatpush3.bf16.msra.mxu1 %v7188_v10  ;;  %5201 = vmatmul.mubr.msk.bf16.gmra.mrb[4].mxu0 %vm437_vm2, %v428_v45 }
 0x243   :  { %5228 = vmatprep.subr.bf16.mxu1 %v6626_v0  ;;  %5224 = vmatprep.mubr.msk.bf16.mxu0 %vm6627_vm0, %v6626_v0 }
 0x24a   :  { %5225 = vmatmul.mubr.msk.bf16.vlgmr.msra.gmra.mrb[8].mxu0 %vm560_vm3, %v743_v53 }
 0x24b   :  { %5237 = vmatpush3.bf16.msra.mxu0 %v7183_v3  ;;  %5240 = vmatprep.mubr.msk.bf16.mxu0 %vm6627_vm0, %v6626_v0 }
 0x24c   :  { %5238 = vmatprep.subr.bf16.mxu0 %v6626_v0 }
 0x24f   :  { %5239 = vmatpush3.bf16.msra.mxu0 %v7188_v10 }
 0x250   :  { %5252 = vmatprep.subr.bf16.mxu0 %v6626_v0 }
 0x30d   :  { %v7203_v14 = vpop.f32.mrb[0].mxu0 }
 0x30e   :  { %v488_v15 = vpop.f32.mrb[1].mxu0 }
 0x30f   :  { %v489_v16 = vadd.f32 %v7201_v13, %v488_v15  ;;  %v7206_v17 = vpop.f32.mrb[2].mxu0 }
 0x310   :  { %v7208_v18 = vpop.f32.mrb[3].mxu0  ;;  %v598_v19 = vpop.f32.mrb[0].mxu1 }
 0x311   :  { %v604_v20 = vadd.f32 %v598_v19, %v489_v16  ;;  %v5210_v21 = vpop.f32.mrb[1].mxu1  ;;  %v492_v9 = vadd.f32 %v7201_v13, %v7208_v18 }
 0x312   :  { %v601_v22 = vpop.f32.mrb[2].mxu1 }
 0x313   :  { %5657 = vtanh.f32 %v604_v20  ;;  %v5211_v23 = vpop.f32.mrb[3].mxu1  ;;  %v4921_v27 = vmul.f32 -1.442695, %v604_v20  ;;  %v7289_v20 = vld [vmem:[#allocation23] ss:$0 sm:$0xff] }
 0x315   :  { %5659 = vpow2.f32 %v4921_v27  ;;  %v7279_v63 = vpop.f32.mrb[4].mxu0 }
 0x316   :  { %v7281_v1 = vpop.f32.mrb[5].mxu0 }
 0x317   :  { %v7283_v2 = vpop.f32.mrb[6].mxu0 }
 0x318   :  { %v7285_v4 = vpop.f32.mrb[7].mxu0 }
 0x31d   :  { %v5658_v25 = vpop.eup %5657  ;;  %v793_v5 = vpop.f32.mrb[8].mxu0 }
 0x31e   :  { %619 = vrot.lane.b32.xlu0 %v5658_v25, %s6629_s25  ;;  %v5226_v6 = vpop.f32.mrb[9].mxu0 }
 0x31f   :  { %v5660_v28 = vpop.eup %5659  ;;  %v796_v7 = vpop.f32.mrb[10].mxu0 }
 0x320   :  { %v609_v29 = vadd.f32 1.0, %v5660_v28  ;;  %v5227_v8 = vpop.f32.mrb[11].mxu0 }
 0x322   :  { %613 = vrot.lane.b32.xlu0 %v530_v26, %s6629_s25  ;;  %5661 = vrcp.f32 %v609_v29  ;;  %v703_v29 = vld [vmem:[#allocation8 + $0x8] sm:$0xff] }
 0x323   :  { %vm728_vm6 = vcmp.gt.f32.partialorder %v703_v29, 0.0 }
 0x32c   :  { %v5662_v31 = vpop.eup %5661 }
 0x390   :  { %v620_v32 = vpop.permute.xlu0 %619 }
 0x391   :  { %v622_v33 = vmul.f32 %v5662_v31, %v620_v32 }
 0x393   :  { %624 = vrot.lane.b32.xlu1 %v622_v33, %s6629_s25 }
 0x394   :  { %v7216_v35 = vpop.permute.xlu0 %613 }
 0x395   :  { %v616_v36 = vmul.f32 %v5662_v31, %v7216_v35 }
 0x397   :  { %643 = vperm.xlu1 %5640, %v641_v34  }
 0x39b   :  { %637 = vperm.xlu1 %5640, %v605_v30   ;;  %v532_v30 = vld [vmem:[#allocation11 + $0x8] sm:$0xff] }
 0x405   :  { %v625_v37 = vpop.permute.xlu1 %624 }
 0x406   :  { %v7219_v38 = vadd.f32 %v625_v37, %v616_v36 }
 0x408   :  { %5663 = vtanh.f32 %v7219_v38 }
 0x412   :  { %v5664_v39 = vpop.eup %5663 }
 0x413   :  { %630 = vrot.lane.b32.xlu0 %v5664_v39, %s6629_s25 }
 0x416   :  { %v7227_v47 = vpop.permute.xlu1 %643 }
 0x417   :  { %647 = vrot.lane.b32.xlu0 %v527_v11, %s6602_s9  ;;  %vm645_vm5 = vcmp.eq.s32.totalorder %v7227_v47, 1 }
 0x41a   :  { %v7236_v50 = vpop.permute.xlu1 %637 }
 0x485   :  { %v631_v49 = vpop.permute.xlu0 %630 }
 0x486   :  { %v633_v52 = vmul.f32 %v5662_v31, %v631_v49  ;;  %v7296_v31 = vsel %vm728_vm6, 1, %v6628_v24  ;;  %v7305_v49 = vsel %vm645_vm5, %v7219_v38, %v7216_v35 }
 0x488   :  { %v640_v54 = vmul.f32 %v7236_v50, %v633_v52 }
 0x489   :  { %v648_v55 = vpop.permute.xlu0 %647 }
 0x48a   :  { %v7249_v56 = vsel %vm645_vm5, %v633_v52, %v648_v55  ;;  %v742_v57 = vpack.c.bf16 %v640_v54, %v640_v54 }
 0x48b   :  { %v654_v58 = vpack.c.bf16 %v7249_v56, %v7249_v56 }
 0x48c   :  { %800 = vrot.lane.b32.xlu0 %v742_v57, %s6602_s9 }
 0x48d   :  { %656 = vrot.lane.b32.xlu1 %v654_v58, %s6602_s9 }
 0x4fe   :  { %v801_v62 = vpop.permute.xlu0 %800 }
 0x4ff   :  { %v657_v60 = vpop.permute.xlu1 %656 }
 0x500   :  { %5217 = vmatmul.mubr.msk.bf16.vlgmr.msra.gmra.mrb[4].mxu1 %vm560_vm3, %v657_v60 }
 0x501   :  { %5229 = vmatpush3.bf16.msra.mxu1 %v7261_v59  ;;  %5232 = vmatprep.mubr.msk.bf16.mxu1 %vm6627_vm0, %v6626_v0 }
 0x502   :  { %5230 = vmatprep.subr.bf16.mxu1 %v6626_v0 }
 0x505   :  { %5231 = vmatpush3.bf16.msra.mxu1 %v7265_v61 }
 0x506   :  { %5244 = vmatprep.subr.bf16.mxu1 %v6626_v0 }
 0x508   :  { %5233 = vmatmul.mubr.msk.bf16.vlgmr.msra.gmra.mrb[8].mxu1 %vm560_vm3, %v801_v62 }
 0x509   :  { %5245 = vmatpush3.bf16.msra.mxu1 %v7225_v46  ;;  %5248 = vmatprep.mubr.msk.bf16.mxu1 %vm6627_vm0, %v6626_v0 }
 0x50a   :  { %5246 = vmatprep.subr.bf16.mxu1 %v6626_v0 }
 0x50d   :  { %5247 = vmatpush3.bf16.msra.mxu1 %v7231_v48 }
 0x50e   :  { %5260 = vmatprep.subr.bf16.mxu1 %v6626_v0 }
 0x5d3   :  { %v695_v11 = vpop.f32.mrb[4].mxu1 }
 0x5d4   :  { %v701_v12 = vadd.f32 %v695_v11, %v492_v9  ;;  %v5218_v15 = vpop.f32.mrb[5].mxu1 }
 0x5d5   :  { %v698_v16 = vpop.f32.mrb[6].mxu1 }
 0x5d6   :  { %5665 = vtanh.f32 %v701_v12  ;;  %v5219_v19 = vpop.f32.mrb[7].mxu1  ;;  %v4923_v32 = vmul.f32 -1.442695, %v701_v12 }
 0x5db   :  { %v851_v21 = vpop.f32.mrb[8].mxu1 }
 0x5dc   :  { %v852_v22 = vadd.f32 %v851_v21, %v793_v5  ;;  %v5234_v23 = vpop.f32.mrb[9].mxu1 }
 0x5dd   :  { %v854_v25 = vpop.f32.mrb[10].mxu1 }
 0x5de   :  { %v863_v26 = vadd.f32 %v7289_v20, %v852_v22  ;;  %v5235_v27 = vpop.f32.mrb[11].mxu1  ;;  %v497_v25 = vadd.f32 %v7203_v14, %v7201_v13 }
 0x5e0   :  { %v5666_v28 = vpop.eup %5665  ;;  %5667 = vtanh.f32 %v863_v26  ;;  %v4931_v33 = vmul.f32 -1.442695, %v863_v26 }
 0x5e1   :  { %713 = vrot.lane.b32.xlu1 %v5666_v28, %s6629_s25  ;;  %5669 = vpow2.f32 %v4923_v32 }
 0x5e2   :  { %5671 = vpow2.f32 %v4931_v33 }
 0x5ea   :  { %v5668_v18 = vpop.eup %5667 }
 0x5eb   :  { %877 = vrot.lane.b32.xlu0 %v5668_v18, %s6629_s25  ;;  %v5670_v34 = vpop.eup %5669 }
 0x5ec   :  { %v707_v36 = vadd.f32 1.0, %v5670_v34  ;;  %v5672_v37 = vpop.eup %5671 }
 0x5ed   :  { %v867_v39 = vadd.f32 1.0, %v5672_v37 }
 0x5ee   :  { %5673 = vrcp.f32 %v707_v36 }
 0x5ef   :  { %871 = vrot.lane.b32.xlu0 %v532_v30, %s6629_s25  ;;  %5675 = vrcp.f32 %v867_v39 }
 0x5f3   :  { %737 = vperm.xlu0 %5641, %v7296_v31  }
 0x5f8   :  { %v5674_v40 = vpop.eup %5673 }
 0x5f9   :  { %v5676_v43 = vpop.eup %5675  ;;  %v710_v52 = vmul.f32 %v5674_v40, %v7305_v49 }
 0x653   :  { %v714_v41 = vpop.permute.xlu1 %713 }
 0x654   :  { %v716_v42 = vmul.f32 %v5674_v40, %v714_v41 }
 0x656   :  { %718 = vrot.lane.b32.xlu1 %v716_v42, %s6629_s25 }
 0x65d   :  { %v878_v44 = vpop.permute.xlu0 %877 }
 0x65e   :  { %v880_v45 = vmul.f32 %v5676_v43, %v878_v44 }
 0x660   :  { %882 = vrot.lane.b32.xlu1 %v880_v45, %s6629_s25 }
 0x661   :  { %v7311_v55 = vpop.permute.xlu0 %871 }
 0x662   :  { %v874_v57 = vmul.f32 %v5676_v43, %v7311_v55 }
 0x672   :  { %v7321_v38 = vpop.permute.xlu0 %737 }
 0x673   :  { %vm739_vm7 = vcmp.eq.s32.totalorder %v7321_v38, 1 }
 0x6c8   :  { %v719_v53 = vpop.permute.xlu1 %718 }
 0x6c9   :  { %v7308_v54 = vadd.f32 %v719_v53, %v710_v52 }
 0x6cb   :  { %5677 = vtanh.f32 %v7308_v54 }
 0x6d2   :  { %v883_v58 = vpop.permute.xlu1 %882 }
 0x6d3   :  { %v7314_v60 = vadd.f32 %v883_v58, %v874_v57  ;;  %v955_v57 = vld [vmem:[#allocation8 + $0x10] sm:$0xff] }
 0x6d4   :  { %vm980_vm8 = vcmp.gt.f32.partialorder %v955_v57, 0.0 }
 0x6d5   :  { %v5678_v62 = vpop.eup %5677  ;;  %5679 = vtanh.f32 %v7314_v60 }
 0x6d6   :  { %724 = vrot.lane.b32.xlu1 %v5678_v62, %s6629_s25 }
 0x6da   :  { %731 = vperm.xlu1 %5640, %v703_v29  }
 0x6de   :  { %894 = vrot.lane.b32.xlu1 %v7238_v51, %s6602_s9 }
 0x6df   :  { %v5680_v35 = vpop.eup %5679 }
 0x6e0   :  { %888 = vrot.lane.b32.xlu0 %v5680_v35, %s6629_s25 }
 0x748   :  { %v725_v5 = vpop.permute.xlu1 %724 }
 0x749   :  { %v727_v6 = vmul.f32 %v5674_v40, %v725_v5 }
 0x74b   :  { %v7327_v7 = vsel %vm739_vm7, %v727_v6, %v7249_v56 }
 0x74c   :  { %v906_v8 = vpack.c.bf16 %v7327_v7, %v7327_v7 }
 0x74e   :  { %908 = vrot.lane.b32.xlu0 %v906_v8, %s6602_s9 }
 0x752   :  { %v889_v51 = vpop.permute.xlu0 %888 }
 0x753   :  { %v7332_v12 = vmul.f32 %v5676_v43, %v889_v51 }
 0x759   :  { %v732_v9 = vpop.permute.xlu1 %731 }
 0x75a   :  { %v734_v11 = vmul.f32 %v732_v9, %v727_v6  ;;  %v7371_v6 = vsel %vm980_vm8, 1, %v6628_v24 }
 0x75c   :  { %v994_v15 = vpack.c.bf16 %v734_v11, %v734_v11 }
 0x75d   :  { %v895_v16 = vpop.permute.xlu1 %894 }
 0x75e   :  { %v7337_v19 = vsel %vm645_vm5, %v7332_v12, %v895_v16  ;;  %1043 = vrot.lane.b32.xlu0 %v994_v15, %s6602_s9  ;;  %v7379_v15 = vsel %vm739_vm7, %v7308_v54, %v7305_v49 }
 0x75f   :  { %v995_v56 = vpack.c.bf16 %v7337_v19, %v7337_v19 }
 0x761   :  { %997 = vrot.lane.b32.xlu1 %v995_v56, %s6602_s9 }
 0x7c0   :  { %v909_v21 = vpop.permute.xlu0 %908 }
 0x7c1   :  { %5241 = vmatmul.mubr.msk.bf16.vlgmr.msra.gmra.mrb[12].mxu0 %vm560_vm3, %v909_v21 }
 0x7c2   :  { %5253 = vmatpush3.bf16.msra.mxu0 %v7261_v59  ;;  %5256 = vmatprep.mubr.msk.bf16.mxu0 %vm6627_vm0, %v6626_v0 }
 0x7c3   :  { %5254 = vmatprep.subr.bf16.mxu0 %v6626_v0 }
 0x7c6   :  { %5255 = vmatpush3.bf16.msra.mxu0 %v7265_v61 }
 0x7c7   :  { %5268 = vmatprep.subr.bf16.mxu0 %v6626_v0 }
 0x7d0   :  { %v1044_v22 = vpop.permute.xlu0 %1043 }
 0x7d1   :  { %5257 = vmatmul.mubr.msk.bf16.vlgmr.msra.gmra.mrb[16].mxu0 %vm560_vm3, %v1044_v22 }
 0x7d2   :  { %5269 = vmatpush3.bf16.msra.mxu0 %v7225_v46  ;;  %5272 = vmatprep.mubr.msk.bf16.mxu0 %vm6627_vm0, %v6626_v0 }
 0x7d3   :  { %v998_v23 = vpop.permute.xlu1 %997  ;;  %5270 = vmatprep.subr.bf16.mxu0 %v6626_v0 }
 0x7d4   :  { %5249 = vmatmul.mubr.msk.bf16.vlgmr.msra.gmra.mrb[12].mxu1 %vm560_vm3, %v998_v23  ;;  %v7391_v23 = vsel %vm645_vm5, %v7314_v60, %v7311_v55 }
 0x7d5   :  { %5261 = vmatpush3.bf16.msra.mxu1 %v7183_v3  ;;  %5264 = vmatprep.mubr.msk.bf16.mxu1 %vm6627_vm0, %v6626_v0 }
 0x7d6   :  { %5262 = vmatprep.subr.bf16.mxu1 %v6626_v0  ;;  %5271 = vmatpush3.bf16.msra.mxu0 %v7231_v48 }
 0x7d7   :  { %5284 = vmatprep.subr.bf16.mxu0 %v6626_v0 }
 0x7d9   :  { %5263 = vmatpush3.bf16.msra.mxu1 %v7188_v10 }
 0x7da   :  { %5276 = vmatprep.subr.bf16.mxu1 %v6626_v0 }
 0x894   :  { %v947_v26 = vpop.f32.mrb[12].mxu0 }
 0x895   :  { %v953_v27 = vadd.f32 %v947_v26, %v497_v25  ;;  %v5242_v28 = vpop.f32.mrb[13].mxu0 }
 0x896   :  { %v950_v18 = vpop.f32.mrb[14].mxu0 }
 0x897   :  { %5681 = vtanh.f32 %v953_v27  ;;  %v5243_v29 = vpop.f32.mrb[15].mxu0  ;;  %v4933_v44 = vmul.f32 -1.442695, %v953_v27 }
 0x8a1   :  { %v5682_v30 = vpop.eup %5681 }
 0x8a2   :  { %965 = vrot.lane.b32.xlu1 %v5682_v30, %s6629_s25 }
 0x8a4   :  { %v1082_v32 = vpop.f32.mrb[16].mxu0 }
 0x8a5   :  { %v5258_v33 = vpop.f32.mrb[17].mxu0 }
 0x8a6   :  { %v1085_v34 = vpop.f32.mrb[18].mxu0 }
 0x8a7   :  { %v1036_v36 = vpop.f32.mrb[12].mxu1  ;;  %v5259_v37 = vpop.f32.mrb[19].mxu0 }
 0x8a8   :  { %v1083_v39 = vadd.f32 %v1082_v32, %v1036_v36  ;;  %v5250_v40 = vpop.f32.mrb[13].mxu1  ;;  %v500_v37 = vadd.f32 %v7206_v17, %v7201_v13 }
 0x8a9   :  { %v1039_v41 = vpop.f32.mrb[14].mxu1 }
 0x8aa   :  { %v1088_v42 = vadd.f32 %v7289_v20, %v1083_v39  ;;  %v5251_v14 = vpop.f32.mrb[15].mxu1 }
 0x8ac   :  { %5683 = vtanh.f32 %v1088_v42  ;;  %v4936_v53 = vmul.f32 -1.442695, %v1088_v42 }
 0x8ad   :  { %5685 = vpow2.f32 %v4933_v44 }
 0x8b6   :  { %v5684_v43 = vpop.eup %5683 }
 0x8b7   :  { %1099 = vrot.lane.b32.xlu0 %v5684_v43, %s6629_s25  ;;  %v5686_v45 = vpop.eup %5685 }
 0x8b8   :  { %v959_v52 = vadd.f32 1.0, %v5686_v45 }
 0x8ba   :  { %5687 = vrcp.f32 %v959_v52 }
 0x8bb   :  { %5689 = vpow2.f32 %v4936_v53 }
 0x8c4   :  { %v5688_v58 = vpop.eup %5687 }
 0x8c5   :  { %v5690_v5 = vpop.eup %5689  ;;  %v962_v16 = vmul.f32 %v5688_v58, %v7379_v15 }
 0x8c6   :  { %v1093_v8 = vadd.f32 1.0, %v5690_v5 }
 0x8c8   :  { %5691 = vrcp.f32 %v1093_v8 }
 0x8d2   :  { %v5692_v51 = vpop.eup %5691 }
 0x8d3   :  { %v1096_v49 = vmul.f32 %v5692_v51, %v7391_v23 }
 0x914   :  { %v966_v62 = vpop.permute.xlu1 %965 }
 0x915   :  { %v968_v35 = vmul.f32 %v5688_v58, %v966_v62 }
 0x917   :  { %970 = vrot.lane.b32.xlu1 %v968_v35, %s6629_s25 }
 0x91b   :  { %989 = vperm.xlu1 %5640, %v7371_v6  }
 0x91f   :  { %983 = vperm.xlu1 %5640, %v955_v57  }
 0x929   :  { %v1100_v9 = vpop.permute.xlu0 %1099 }
 0x92a   :  { %v1102_v11 = vmul.f32 %v5692_v51, %v1100_v9 }
 0x92c   :  { %1104 = vrot.lane.b32.xlu0 %v1102_v11, %s6629_s25 }
 0x989   :  { %v971_v56 = vpop.permute.xlu1 %970 }
 0x98a   :  { %v7382_v21 = vadd.f32 %v971_v56, %v962_v16  ;;  %v7450_v56 = vld [vmem:[#allocation8 + $0x18] sm:$0xff] }
 0x98b   :  { %vm1210_vm11 = vcmp.gt.f32.partialorder %v7450_v56, 0.0 }
 0x98c   :  { %5693 = vtanh.f32 %v7382_v21 }
 0x996   :  { %v5694_v22 = vpop.eup %5693 }
 0x997   :  { %976 = vrot.lane.b32.xlu0 %v5694_v22, %s6629_s25 }
 0x99a   :  { %v7398_v26 = vpop.permute.xlu1 %989 }
 0x99b   :  { %1123 = vperm.xlu0 %5641, %v7296_v31   ;;  %vm991_vm9 = vcmp.eq.s32.totalorder %v7398_v26, 1 }
 0x99e   :  { %v1105_v54 = vpop.permute.xlu0 %1104  ;;  %v984_v28 = vpop.permute.xlu1 %983 }
 0x99f   :  { %v7394_v38 = vadd.f32 %v1105_v54, %v1096_v49 }
 0x9a1   :  { %5695 = vtanh.f32 %v7394_v38 }
 0x9ab   :  { %v5696_v25 = vpop.eup %5695 }
 0x9ac   :  { %1110 = vrot.lane.b32.xlu1 %v5696_v25, %s6629_s25  ;;  %v7455_v25 = vsel %vm1210_vm11, 1, %v6628_v24 }
 0xa09   :  { %v977_v27 = vpop.permute.xlu0 %976 }
 0xa0a   :  { %v979_v31 = vmul.f32 %v5688_v58, %v977_v27 }
 0xa0c   :  { %v7404_v47 = vsel %vm991_vm9, %v979_v31, %v7327_v7  ;;  %v986_v60 = vmul.f32 %v984_v28, %v979_v31 }
 0xa0d   :  { %v1136_v55 = vpack.c.bf16 %v7404_v47, %v7404_v47 }
 0xa0e   :  { %v1224_v18 = vpack.c.bf16 %v986_v60, %v986_v60 }
 0xa0f   :  { %1138 = vrot.lane.b32.xlu0 %v1136_v55, %s6602_s9 }
 0xa13   :  { %1273 = vrot.lane.b32.xlu0 %v1224_v18, %s6602_s9  ;;  %v7464_v18 = vsel %vm991_vm9, %v7382_v21, %v7379_v15 }
 0xa1a   :  { %v7410_v29 = vpop.permute.xlu0 %1123 }
 0xa1b   :  { %vm1125_vm10 = vcmp.eq.s32.totalorder %v7410_v29, 1 }
 0xa1e   :  { %v1111_v30 = vpop.permute.xlu1 %1110 }
 0xa1f   :  { %v7412_v32 = vmul.f32 %v5692_v51, %v1111_v30 }
 0xa21   :  { %v7419_v7 = vsel %vm1125_vm10, %v7412_v32, %v7337_v19 }
 0xa22   :  { %v1225_v33 = vpack.c.bf16 %v7419_v7, %v7419_v7 }
 0xa24   :  { %1227 = vrot.lane.b32.xlu1 %v1225_v33, %s6602_s9 }
 0xa81   :  { %v1139_v34 = vpop.permute.xlu0 %1138 }
 0xa82   :  { %5265 = vmatmul.mubr.msk.bf16.vlgmr.msra.gmra.mrb[16].mxu1 %vm560_vm3, %v1139_v34 }
 0xa83   :  { %5277 = vmatpush3.bf16.msra.mxu1 %v7261_v59  ;;  %5280 = vmatprep.mubr.msk.bf16.mxu1 %vm6627_vm0, %v6626_v0 }
 0xa84   :  { %5278 = vmatprep.subr.bf16.mxu1 %v6626_v0 }
 0xa85   :  { %v1274_v19 = vpop.permute.xlu0 %1273 }
 0xa87   :  { %5279 = vmatpush3.bf16.msra.mxu1 %v7265_v61 }
 0xa88   :  { %5292 = vmatprep.subr.bf16.mxu1 %v6626_v0 }
 0xa8a   :  { %5281 = vmatmul.mubr.msk.bf16.vlgmr.msra.gmra.mrb[20].mxu1 %vm560_vm3, %v1274_v19 }
 0xa8b   :  { %5293 = vmatpush3.bf16.msra.mxu1 %v7225_v46  ;;  %5296 = vmatprep.mubr.msk.bf16.mxu1 %vm6627_vm0, %v6626_v0 }
 0xa8c   :  { %5294 = vmatprep.subr.bf16.mxu1 %v6626_v0 }
 0xa8f   :  { %5295 = vmatpush3.bf16.msra.mxu1 %v7231_v48 }
 0xa90   :  { %5308 = vmatprep.subr.bf16.mxu1 %v6626_v0 }
 0xa96   :  { %v1228_v36 = vpop.permute.xlu1 %1227 }
 0xa97   :  { %5273 = vmatmul.mubr.msk.bf16.vlgmr.msra.gmra.mrb[20].mxu0 %vm560_vm3, %v1228_v36  ;;  %v7476_v36 = vsel %vm1125_vm10, %v7394_v38, %v7391_v23 }
 0xa98   :  { %5285 = vmatpush3.bf16.msra.mxu0 %v7183_v3  ;;  %5288 = vmatprep.mubr.msk.bf16.mxu0 %vm6627_vm0, %v6626_v0 }
 0xa99   :  { %5286 = vmatprep.subr.bf16.mxu0 %v6626_v0 }
 0xa9c   :  { %5287 = vmatpush3.bf16.msra.mxu0 %v7188_v10 }
 0xa9d   :  { %5300 = vmatprep.subr.bf16.mxu0 %v6626_v0 }
 0xb55   :  { %v1177_v39 = vpop.f32.mrb[16].mxu1 }
 0xb56   :  { %v1183_v40 = vadd.f32 %v1177_v39, %v500_v37  ;;  %v5266_v41 = vpop.f32.mrb[17].mxu1 }
 0xb57   :  { %v1180_v42 = vpop.f32.mrb[18].mxu1 }
 0xb58   :  { %5697 = vtanh.f32 %v1183_v40  ;;  %v5267_v14 = vpop.f32.mrb[19].mxu1  ;;  %v4938_v51 = vmul.f32 -1.442695, %v1183_v40 }
 0xb5d   :  { %v1312_v43 = vpop.f32.mrb[20].mxu1 }
 0xb5e   :  { %v5282_v44 = vpop.f32.mrb[21].mxu1 }
 0xb5f   :  { %v1315_v45 = vpop.f32.mrb[22].mxu1 }
 0xb60   :  { %v5283_v52 = vpop.f32.mrb[23].mxu1 }
 0xb62   :  { %v5698_v53 = vpop.eup %5697 }
 0xb63   :  { %1195 = vrot.lane.b32.xlu1 %v5698_v53, %s6629_s25 }
 0xb6a   :  { %v1266_v57 = vpop.f32.mrb[20].mxu0 }
 0xb6b   :  { %v1313_v58 = vadd.f32 %v1312_v43, %v1266_v57  ;;  %v5274_v62 = vpop.f32.mrb[21].mxu0  ;;  %v505_v57 = vadd.f32 %v7201_v13, %v7281_v1 }
 0xb6c   :  { %v1269_v35 = vpop.f32.mrb[22].mxu0 }
 0xb6d   :  { %v1318_v5 = vadd.f32 %v7289_v20, %v1313_v58  ;;  %v5275_v17 = vpop.f32.mrb[23].mxu0 }
 0xb6f   :  { %5699 = vtanh.f32 %v1318_v5  ;;  %v4941_v16 = vmul.f32 -1.442695, %v1318_v5 }
 0xb70   :  { %5701 = vpow2.f32 %v4938_v51 }
 0xb79   :  { %v5700_v8 = vpop.eup %5699 }
 0xb7a   :  { %1329 = vrot.lane.b32.xlu0 %v5700_v8, %s6629_s25  ;;  %v5702_v9 = vpop.eup %5701 }
 0xb7b   :  { %v1189_v11 = vadd.f32 1.0, %v5702_v9 }
 0xb7d   :  { %5703 = vrcp.f32 %v1189_v11 }
 0xb7e   :  { %5705 = vpow2.f32 %v4941_v16 }
 0xb87   :  { %v5704_v22 = vpop.eup %5703 }
 0xb88   :  { %v5706_v27 = vpop.eup %5705  ;;  %v1192_v30 = vmul.f32 %v5704_v22, %v7464_v18 }
 0xb89   :  { %v1323_v31 = vadd.f32 1.0, %v5706_v27 }
 0xb8b   :  { %5707 = vrcp.f32 %v1323_v31 }
 0xb95   :  { %v5708_v28 = vpop.eup %5707 }
 0xb96   :  { %v1326_v15 = vmul.f32 %v5708_v28, %v7476_v36 }
 0xbd5   :  { %v1196_v49 = vpop.permute.xlu1 %1195 }
 0xbd6   :  { %v1198_v54 = vmul.f32 %v5704_v22, %v1196_v49 }
 0xbd8   :  { %1200 = vrot.lane.b32.xlu1 %v1198_v54, %s6629_s25 }
 0xbdc   :  { %1219 = vperm.xlu1 %5640, %v7455_v25  }
 0xbe0   :  { %1213 = vperm.xlu1 %5640, %v7450_v56  }
 0xbec   :  { %v1330_v55 = vpop.permute.xlu0 %1329 }
 0xbed   :  { %v1332_v60 = vmul.f32 %v5708_v28, %v1330_v55 }
 0xbef   :  { %1334 = vrot.lane.b32.xlu0 %v1332_v60, %s6629_s25 }
 0xc4a   :  { %v1201_v33 = vpop.permute.xlu1 %1200 }
 0xc4b   :  { %v7467_v34 = vadd.f32 %v1201_v33, %v1192_v30  ;;  %v7535_v30 = vld [vmem:[#allocation8 + $0x20] sm:$0xff] }
 0xc4c   :  { %vm1440_vm14 = vcmp.gt.f32.partialorder %v7535_v30, 0.0 }
 0xc4d   :  { %5709 = vtanh.f32 %v7467_v34 }
 0xc57   :  { %v5710_v19 = vpop.eup %5709 }
 0xc58   :  { %1206 = vrot.lane.b32.xlu0 %v5710_v19, %s6629_s25 }
 0xc5b   :  { %v7483_v39 = vpop.permute.xlu1 %1219 }
 0xc5c   :  { %1353 = vperm.xlu0 %5641, %v7371_v6   ;;  %vm1221_vm12 = vcmp.eq.s32.totalorder %v7483_v39, 1 }
 0xc5f   :  { %v1214_v41 = vpop.permute.xlu1 %1213 }
 0xc61   :  { %v1335_v21 = vpop.permute.xlu0 %1334 }
 0xc62   :  { %v7479_v26 = vadd.f32 %v1335_v21, %v1326_v15  ;;  %v7540_v21 = vsel %vm1440_vm14, 1, %v6628_v24 }
 0xc64   :  { %5711 = vtanh.f32 %v7479_v26 }
 0xc6e   :  { %v5712_v37 = vpop.eup %5711 }
 0xc6f   :  { %1340 = vrot.lane.b32.xlu1 %v5712_v37, %s6629_s25 }
 0xcca   :  { %v1207_v40 = vpop.permute.xlu0 %1206 }
 0xccb   :  { %v1209_v6 = vmul.f32 %v5704_v22, %v1207_v40 }
 0xccd   :  { %v7489_v23 = vsel %vm1221_vm12, %v1209_v6, %v7404_v47  ;;  %v1216_v29 = vmul.f32 %v1214_v41, %v1209_v6 }
 0xcce   :  { %v1366_v38 = vpack.c.bf16 %v7489_v23, %v7489_v23 }
 0xccf   :  { %v1454_v42 = vpack.c.bf16 %v1216_v29, %v1216_v29  ;;  %v7549_v29 = vsel %vm1221_vm12, %v7467_v34, %v7464_v18 }
 0xcd0   :  { %1368 = vrot.lane.b32.xlu0 %v1366_v38, %s6602_s9 }
 0xcd4   :  { %1503 = vrot.lane.b32.xlu0 %v1454_v42, %s6602_s9 }
 0xcdb   :  { %v7495_v14 = vpop.permute.xlu0 %1353 }
 0xcdc   :  { %vm1355_vm13 = vcmp.eq.s32.totalorder %v7495_v14, 1 }
 0xce1   :  { %v1341_v43 = vpop.permute.xlu1 %1340 }
 0xce2   :  { %v7497_v44 = vmul.f32 %v5708_v28, %v1341_v43 }
 0xce4   :  { %v7504_v47 = vsel %vm1355_vm13, %v7497_v44, %v7419_v7 }
 0xce5   :  { %v1455_v45 = vpack.c.bf16 %v7504_v47, %v7504_v47 }
 0xce7   :  { %1457 = vrot.lane.b32.xlu1 %v1455_v45, %s6602_s9 }
 0xd42   :  { %v1369_v52 = vpop.permute.xlu0 %1368 }
 0xd43   :  { %5289 = vmatmul.mubr.msk.bf16.vlgmr.msra.gmra.mrb[24].mxu0 %vm560_vm3, %v1369_v52 }
 0xd44   :  { %5301 = vmatpush3.bf16.msra.mxu0 %v7261_v59  ;;  %5304 = vmatprep.mubr.msk.bf16.mxu0 %vm6627_vm0, %v6626_v0 }
 0xd45   :  { %5302 = vmatprep.subr.bf16.mxu0 %v6626_v0 }
 0xd46   :  { %v1504_v7 = vpop.permute.xlu0 %1503 }
 0xd48   :  { %5303 = vmatpush3.bf16.msra.mxu0 %v7265_v61 }
 0xd49   :  { %5316 = vmatprep.subr.bf16.mxu0 %v6626_v0 }
 0xd4b   :  { %5305 = vmatmul.mubr.msk.bf16.vlgmr.msra.gmra.mrb[28].mxu0 %vm560_vm3, %v1504_v7  ;;  %v7561_v7 = vsel %vm1355_vm13, %v7479_v26, %v7476_v36  ;;  %vm2667_vm13 = vcmask 130048  }
 0xd4c   :  { %5317 = vmatpush3.bf16.msra.mxu0 %v7225_v46  ;;  %5320 = vmatprep.mubr.msk.bf16.mxu0 %vm6627_vm0, %v6626_v0 }
 0xd4d   :  { %5318 = vmatprep.subr.bf16.mxu0 %v6626_v0 }
 0xd50   :  { %5319 = vmatpush3.bf16.msra.mxu0 %v7231_v48 }
 0xd51   :  { %5332 = vmatprep.subr.bf16.mxu0 %v6626_v0 }
 0xd59   :  { %v1458_v53 = vpop.permute.xlu1 %1457 }
 0xd5a   :  { %5297 = vmatmul.mubr.msk.bf16.vlgmr.msra.gmra.mrb[24].mxu1 %vm560_vm3, %v1458_v53 }
 0xd5b   :  { %5309 = vmatpush3.bf16.msra.mxu1 %v7183_v3  ;;  %5312 = vmatprep.mubr.msk.bf16.mxu1 %vm6627_vm0, %v6626_v0 }
 0xd5c   :  { %5310 = vmatprep.subr.bf16.mxu1 %v6626_v0 }
 0xd5f   :  { %5311 = vmatpush3.bf16.msra.mxu1 %v7188_v10 }
 0xd60   :  { %5324 = vmatprep.subr.bf16.mxu1 %v6626_v0 }
 0xe16   :  { %v1407_v58 = vpop.f32.mrb[24].mxu0 }
 0xe17   :  { %v1413_v62 = vadd.f32 %v1407_v58, %v505_v57  ;;  %v5290_v35 = vpop.f32.mrb[25].mxu0 }
 0xe18   :  { %v1410_v5 = vpop.f32.mrb[26].mxu0 }
 0xe19   :  { %5713 = vtanh.f32 %v1413_v62  ;;  %v5291_v17 = vpop.f32.mrb[27].mxu0  ;;  %v4943_v31 = vmul.f32 -1.442695, %v1413_v62 }
 0xe1e   :  { %v1542_v8 = vpop.f32.mrb[28].mxu0 }
 0xe1f   :  { %v5306_v3 = vpop.f32.mrb[29].mxu0 }
 0xe20   :  { %v1545_v51 = vpop.f32.mrb[30].mxu0 }
 0xe21   :  { %v5307_v9 = vpop.f32.mrb[31].mxu0 }
 0xe23   :  { %v5714_v11 = vpop.eup %5713 }
 0xe24   :  { %1425 = vrot.lane.b32.xlu1 %v5714_v11, %s6629_s25  ;;  %v7609_v11 = vld [vmem:[#allocation17] sm:$0xff]  }
 0xe2d   :  { %v1496_v16 = vpop.f32.mrb[24].mxu1 }
 0xe2e   :  { %v1543_v10 = vadd.f32 %v1542_v8, %v1496_v16  ;;  %v5298_v22 = vpop.f32.mrb[25].mxu1 }
 0xe2f   :  { %v1499_v49 = vpop.f32.mrb[26].mxu1 }
 0xe30   :  { %v1548_v54 = vadd.f32 %v7289_v20, %v1543_v10  ;;  %v5299_v1 = vpop.f32.mrb[27].mxu1 }
 0xe32   :  { %5715 = vtanh.f32 %v1548_v54  ;;  %v4946_v60 = vmul.f32 -1.442695, %v1548_v54 }
 0xe33   :  { %5717 = vpow2.f32 %v4943_v31 }
 0xe3c   :  { %v5716_v27 = vpop.eup %5715 }
 0xe3d   :  { %1559 = vrot.lane.b32.xlu0 %v5716_v27, %s6629_s25  ;;  %v5718_v28 = vpop.eup %5717 }
 0xe3e   :  { %v1419_v55 = vadd.f32 1.0, %v5718_v28 }
 0xe40   :  { %5719 = vrcp.f32 %v1419_v55 }
 0xe41   :  { %5721 = vpow2.f32 %v4946_v60 }
 0xe4a   :  { %v5720_v33 = vpop.eup %5719 }
 0xe4b   :  { %v5722_v37 = vpop.eup %5721  ;;  %v1422_v42 = vmul.f32 %v5720_v33, %v7549_v29 }
 0xe4c   :  { %v1553_v40 = vadd.f32 1.0, %v5722_v37 }
 0xe4e   :  { %5723 = vrcp.f32 %v1553_v40 }
 0xe58   :  { %v5724_v6 = vpop.eup %5723 }
 0xe59   :  { %v1556_v18 = vmul.f32 %v5724_v6, %v7561_v7 }
 0xe96   :  { %v1426_v19 = vpop.permute.xlu1 %1425 }
 0xe97   :  { %v1428_v15 = vmul.f32 %v5720_v33, %v1426_v19 }
 0xe99   :  { %1430 = vrot.lane.b32.xlu1 %v1428_v15, %s6629_s25 }
 0xe9d   :  { %1449 = vperm.xlu1 %5640, %v7540_v21  }
 0xea1   :  { %1443 = vperm.xlu1 %5640, %v7535_v30  }
 0xeaf   :  { %v1560_v41 = vpop.permute.xlu0 %1559 }
 0xeb0   :  { %v1562_v38 = vmul.f32 %v5724_v6, %v1560_v41 }
 0xeb2   :  { %1564 = vrot.lane.b32.xlu0 %v1562_v38, %s6629_s25 }
 0xf0b   :  { %v1431_v43 = vpop.permute.xlu1 %1430 }
 0xf0c   :  { %v7552_v45 = vadd.f32 %v1431_v43, %v1422_v42  ;;  %v7624_v42 = vld [vmem:[#allocation8 + $0x28] sm:$0xff] }
 0xf0d   :  { %vm1670_vm5 = vcmp.gt.f32.partialorder %v7624_v42, 0.0 }
 0xf0e   :  { %5725 = vtanh.f32 %v7552_v45 }
 0xf18   :  { %v5726_v52 = vpop.eup %5725 }
 0xf19   :  { %1436 = vrot.lane.b32.xlu0 %v5726_v52, %s6629_s25 }
 0xf1c   :  { %v7568_v57 = vpop.permute.xlu1 %1449 }
 0xf1d   :  { %1583 = vperm.xlu0 %5641, %v7455_v25   ;;  %vm1451_vm15 = vcmp.eq.s32.totalorder %v7568_v57, 1 }
 0xf20   :  { %v1444_v62 = vpop.permute.xlu1 %1443 }
 0xf24   :  { %v1565_v34 = vpop.permute.xlu0 %1564 }
 0xf25   :  { %v7564_v39 = vadd.f32 %v1565_v34, %v1556_v18  ;;  %v7629_v34 = vsel %vm1670_vm5, 1, %v6628_v24 }
 0xf27   :  { %5727 = vtanh.f32 %v7564_v39 }
 0xf31   :  { %v5728_v53 = vpop.eup %5727 }
 0xf32   :  { %1570 = vrot.lane.b32.xlu1 %v5728_v53, %s6629_s25 }
 0xf8b   :  { %v1437_v58 = vpop.permute.xlu0 %1436 }
 0xf8c   :  { %v1439_v25 = vmul.f32 %v5720_v33, %v1437_v58 }
 0xf8e   :  { %v7574_v36 = vsel %vm1451_vm15, %v1439_v25, %v7489_v23  ;;  %v1446_v14 = vmul.f32 %v1444_v62, %v1439_v25 }
 0xf8f   :  { %v1596_v26 = vpack.c.bf16 %v7574_v36, %v7574_v36 }
 0xf90   :  { %v1684_v35 = vpack.c.bf16 %v1446_v14, %v1446_v14  ;;  %v7638_v14 = vsel %vm1451_vm15, %v7552_v45, %v7549_v29 }
 0xf91   :  { %1598 = vrot.lane.b32.xlu0 %v1596_v26, %s6602_s9 }
 0xf95   :  { %1733 = vrot.lane.b32.xlu0 %v1684_v35, %s6602_s9 }
 0xf9c   :  { %v7580_v5 = vpop.permute.xlu0 %1583 }
 0xf9d   :  { %vm1585_vm4 = vcmp.eq.s32.totalorder %v7580_v5, 1 }
 0xfa4   :  { %v1571_v17 = vpop.permute.xlu1 %1570 }
 0xfa5   :  { %v7582_v8 = vmul.f32 %v5724_v6, %v1571_v17 }
 0xfa7   :  { %v7589_v23 = vsel %vm1585_vm4, %v7582_v8, %v7504_v47 }
 0xfa8   :  { %v1685_v3 = vpack.c.bf16 %v7589_v23, %v7589_v23 }
 0xfaa   :  { %1687 = vrot.lane.b32.xlu1 %v1685_v3, %s6602_s9 }
0x1003   :  { %v1599_v51 = vpop.permute.xlu0 %1598 }
0x1004   :  { %5313 = vmatmul.mubr.msk.bf16.vlgmr.msra.gmra.mrb[28].mxu1 %vm560_vm3, %v1599_v51 }
0x1005   :  { %5325 = vmatpush3.bf16.msra.mxu1 %v7261_v59  ;;  %5328 = vmatprep.mubr.msk.bf16.mxu1 %vm6627_vm0, %v6626_v0 }
0x1006   :  { %5326 = vmatprep.subr.bf16.mxu1 %v6626_v0 }
0x1007   :  { %v1734_v47 = vpop.permute.xlu0 %1733 }
0x1009   :  { %5327 = vmatpush3.bf16.msra.mxu1 %v7265_v61 }
0x100a   :  { %5340 = vmatprep.subr.bf16.mxu1 %v6626_v0 }
0x100c   :  { %5329 = vmatmul.mubr.msk.bf16.vlgmr.msra.gmra.mrb[32].mxu1 %vm560_vm3, %v1734_v47  ;;  %v7650_v47 = vsel %vm1585_vm4, %v7564_v39, %v7561_v7 }
0x100d   :  { %5341 = vmatpush3.bf16.msra.mxu1 %v7225_v46  ;;  %5344 = vmatprep.mubr.msk.bf16.mxu1 %vm6627_vm0, %v6626_v0  ;;  %v7615_v46 = vld [vmem:[#allocation17 + $0x8] sm:$0xff]  }
0x100e   :  { %5342 = vmatprep.subr.bf16.mxu1 %v6626_v0 }
0x1011   :  { %5343 = vmatpush3.bf16.msra.mxu1 %v7231_v48  ;;  %v508_v48 = vadd.f32 %v7201_v13, %v7285_v4 }
0x1012   :  { %5356 = vmatprep.subr.bf16.mxu1 %v6626_v0 }
0x101c   :  { %v1688_v9 = vpop.permute.xlu1 %1687 }
0x101d   :  { %5321 = vmatmul.mubr.msk.bf16.vlgmr.msra.gmra.mrb[32].mxu0 %vm560_vm3, %v1688_v9 }
0x101e   :  { %5333 = vmatpush3.bf16.msra.mxu0 %v7609_v11  ;;  %5336 = vmatprep.mubr.msk.bf16.mxu0 %vm6627_vm0, %v6626_v0 }
0x101f   :  { %5334 = vmatprep.subr.bf16.mxu0 %v6626_v0 }
0x1022   :  { %5335 = vmatpush3.bf16.msra.mxu0 %v7615_v46 }
0x1023   :  { %5348 = vmatprep.subr.bf16.mxu0 %v6626_v0 }
0x10d7   :  { %v1637_v16 = vpop.f32.mrb[28].mxu1 }
0x10d8   :  { %v1643_v10 = vadd.f32 %v1637_v16, %v508_v48  ;;  %v5314_v22 = vpop.f32.mrb[29].mxu1 }
0x10d9   :  { %v1640_v49 = vpop.f32.mrb[30].mxu1 }
0x10da   :  { %5729 = vtanh.f32 %v1643_v10  ;;  %v5315_v54 = vpop.f32.mrb[31].mxu1  ;;  %v4948_v40 = vmul.f32 -1.442695, %v1643_v10 }
0x10df   :  { %v1772_v1 = vpop.f32.mrb[32].mxu1 }
0x10e0   :  { %v5330_v27 = vpop.f32.mrb[33].mxu1 }
0x10e1   :  { %v1775_v31 = vpop.f32.mrb[34].mxu1 }
0x10e2   :  { %v5331_v28 = vpop.f32.mrb[35].mxu1 }
0x10e3   :  { %v7691_v28 = vld [vmem:[#allocation22] sm:$0xff]  }
0x10e4   :  { %v5730_v55 = vpop.eup %5729 }
0x10e5   :  { %1655 = vrot.lane.b32.xlu1 %v5730_v55, %s6629_s25  ;;  %v7708_v55 = vld [vmem:[#allocation19] ss:$0 sm:$0xff] }
0x10f0   :  { %v1726_v60 = vpop.f32.mrb[32].mxu0 }
0x10f1   :  { %v1773_v33 = vadd.f32 %v1772_v1, %v1726_v60  ;;  %v5322_v19 = vpop.f32.mrb[33].mxu0  ;;  %v513_v60 = vadd.f32 %v7708_v55, %v7279_v63 }
0x10f2   :  { %v1729_v15 = vpop.f32.mrb[34].mxu0 }
0x10f3   :  { %v1778_v37 = vadd.f32 %v7289_v20, %v1773_v33  ;;  %v5323_v13 = vpop.f32.mrb[35].mxu0 }
0x10f5   :  { %5731 = vtanh.f32 %v1778_v37  ;;  %v4951_v38 = vmul.f32 -1.442695, %v1778_v37 }
0x10f6   :  { %5733 = vpow2.f32 %v4948_v40 }
0x10ff   :  { %v5732_v4 = vpop.eup %5731 }
0x1100   :  { %1789 = vrot.lane.b32.xlu0 %v5732_v4, %s6629_s25  ;;  %v5734_v6 = vpop.eup %5733 }
0x1101   :  { %v1649_v41 = vadd.f32 1.0, %v5734_v6 }
0x1103   :  { %5735 = vrcp.f32 %v1649_v41 }
0x1104   :  { %5737 = vpow2.f32 %v4951_v38 }
0x110d   :  { %v5736_v43 = vpop.eup %5735 }
0x110e   :  { %v5738_v53 = vpop.eup %5737  ;;  %v1652_v35 = vmul.f32 %v5736_v43, %v7638_v14 }
0x110f   :  { %v1783_v58 = vadd.f32 1.0, %v5738_v53 }
0x1111   :  { %5739 = vrcp.f32 %v1783_v58 }
0x111b   :  { %v5740_v25 = vpop.eup %5739 }
0x111c   :  { %v1786_v29 = vmul.f32 %v5740_v25, %v7650_v47 }
0x1157   :  { %v1656_v52 = vpop.permute.xlu1 %1655 }
0x1158   :  { %v1658_v18 = vmul.f32 %v5736_v43, %v1656_v52 }
0x115a   :  { %1660 = vrot.lane.b32.xlu1 %v1658_v18, %s6629_s25 }
0x115e   :  { %1679 = vperm.xlu1 %5640, %v7629_v34  }
0x1162   :  { %1673 = vperm.xlu1 %5640, %v7624_v42  }
0x1172   :  { %v1790_v62 = vpop.permute.xlu0 %1789 }
0x1173   :  { %v1792_v26 = vmul.f32 %v5740_v25, %v1790_v62 }
0x1175   :  { %1794 = vrot.lane.b32.xlu0 %v1792_v26, %s6629_s25 }
0x11cc   :  { %v1661_v17 = vpop.permute.xlu1 %1660 }
0x11cd   :  { %v7641_v3 = vadd.f32 %v1661_v17, %v1652_v35  ;;  %v7715_v35 = vld [vmem:[#allocation8 + $0x30] sm:$0xff] }
0x11ce   :  { %vm1900_vm8 = vcmp.gt.f32.partialorder %v7715_v35, 0.0 }
0x11cf   :  { %5741 = vtanh.f32 %v7641_v3 }
0x11d9   :  { %v5742_v51 = vpop.eup %5741 }
0x11da   :  { %1666 = vrot.lane.b32.xlu0 %v5742_v51, %s6629_s25 }
0x11dd   :  { %v7657_v48 = vpop.permute.xlu1 %1679 }
0x11de   :  { %1813 = vperm.xlu0 %5641, %v7540_v21   ;;  %vm1681_vm6 = vcmp.eq.s32.totalorder %v7657_v48, 1 }
0x11e1   :  { %v1674_v10 = vpop.permute.xlu1 %1673 }
0x11e7   :  { %v1795_v45 = vpop.permute.xlu0 %1794 }
0x11e8   :  { %v7653_v57 = vadd.f32 %v1795_v45, %v1786_v29 }
0x11ea   :  { %5743 = vtanh.f32 %v7653_v57 }
0x11f4   :  { %v5744_v9 = vpop.eup %5743 }
0x11f5   :  { %1800 = vrot.lane.b32.xlu1 %v5744_v9, %s6629_s25 }
0x124c   :  { %v1667_v16 = vpop.permute.xlu0 %1666 }
0x124d   :  { %v1669_v21 = vmul.f32 %v5736_v43, %v1667_v16 }
0x124f   :  { %v7663_v7 = vsel %vm1681_vm6, %v1669_v21, %v7574_v36  ;;  %v1676_v5 = vmul.f32 %v1674_v10, %v1669_v21 }
0x1250   :  { %v1826_v39 = vpack.c.bf16 %v7663_v7, %v7663_v7 }
0x1251   :  { %v1914_v22 = vpack.c.bf16 %v1676_v5, %v1676_v5 }
0x1252   :  { %1828 = vrot.lane.b32.xlu0 %v1826_v39, %s6602_s9  ;;  %v7729_v39 = vsel %vm1681_vm6, %v7641_v3, %v7638_v14 }
0x1256   :  { %1963 = vrot.lane.b32.xlu0 %v1914_v22, %s6602_s9 }
0x125d   :  { %v7669_v49 = vpop.permute.xlu0 %1813 }
0x125e   :  { %vm1815_vm7 = vcmp.eq.s32.totalorder %v7669_v49, 1 }
0x1267   :  { %v1801_v54 = vpop.permute.xlu1 %1800 }
0x1268   :  { %v7671_v1 = vmul.f32 %v5740_v25, %v1801_v54 }
0x126a   :  { %v7678_v36 = vsel %vm1815_vm7, %v7671_v1, %v7589_v23 }
0x126b   :  { %v1915_v27 = vpack.c.bf16 %v7678_v36, %v7678_v36 }
0x126d   :  { %1917 = vrot.lane.b32.xlu1 %v1915_v27, %s6602_s9 }
0x12c4   :  { %v1829_v31 = vpop.permute.xlu0 %1828 }
0x12c5   :  { %5337 = vmatmul.mubr.msk.bf16.vlgmr.msra.gmra.mrb[36].mxu0 %vm560_vm3, %v1829_v31  ;;  %v7741_v31 = vsel %vm1815_vm7, %v7653_v57, %v7650_v47 }
0x12c6   :  { %5349 = vmatpush3.bf16.msra.mxu0 %v7261_v59  ;;  %5352 = vmatprep.mubr.msk.bf16.mxu0 %vm6627_vm0, %v6626_v0  ;;  %v7697_v59 = vld [vmem:[#allocation22 + $0x8] sm:$0xff]  }
0x12c7   :  { %5350 = vmatprep.subr.bf16.mxu0 %v6626_v0 }
0x12c8   :  { %v1964_v23 = vpop.permute.xlu0 %1963 }
0x12ca   :  { %5351 = vmatpush3.bf16.msra.mxu0 %v7265_v61 }
0x12cb   :  { %5364 = vmatprep.subr.bf16.mxu0 %v6626_v0 }
0x12cd   :  { %5353 = vmatmul.mubr.msk.bf16.vlgmr.msra.gmra.mrb[40].mxu0 %vm560_vm3, %v1964_v23 }
0x12ce   :  { %5365 = vmatpush3.bf16.msra.mxu0 %v7691_v28  ;;  %5368 = vmatprep.mubr.msk.bf16.mxu0 %vm6627_vm0, %v6626_v0 }
0x12cf   :  { %5366 = vmatprep.subr.bf16.mxu0 %v6626_v0 }
0x12d2   :  { %5367 = vmatpush3.bf16.msra.mxu0 %v7697_v59 }
0x12d3   :  { %5380 = vmatprep.subr.bf16.mxu0 %v6626_v0 }
0x12df   :  { %v1918_v61 = vpop.permute.xlu1 %1917 }
0x12e0   :  { %5345 = vmatmul.mubr.msk.bf16.vlgmr.msra.gmra.mrb[36].mxu1 %vm560_vm3, %v1918_v61 }
0x12e1   :  { %5357 = vmatpush3.bf16.msra.mxu1 %v7609_v11  ;;  %5360 = vmatprep.mubr.msk.bf16.mxu1 %vm6627_vm0, %v6626_v0 }
0x12e2   :  { %5358 = vmatprep.subr.bf16.mxu1 %v6626_v0 }
0x12e5   :  { %5359 = vmatpush3.bf16.msra.mxu1 %v7615_v46 }
0x12e6   :  { %5372 = vmatprep.subr.bf16.mxu1 %v6626_v0 }
0x1398   :  { %v1867_v33 = vpop.f32.mrb[36].mxu0 }
0x1399   :  { %v1873_v19 = vadd.f32 %v1867_v33, %v513_v60  ;;  %v5338_v15 = vpop.f32.mrb[37].mxu0 }
0x139a   :  { %v1870_v37 = vpop.f32.mrb[38].mxu0 }
0x139b   :  { %5745 = vtanh.f32 %v1873_v19  ;;  %v5339_v11 = vpop.f32.mrb[39].mxu0  ;;  %v4953_v58 = vmul.f32 -1.442695, %v1873_v19 }
0x13a0   :  { %v2002_v13 = vpop.f32.mrb[40].mxu0 }
0x13a1   :  { %v5354_v4 = vpop.f32.mrb[41].mxu0 }
0x13a2   :  { %v2005_v40 = vpop.f32.mrb[42].mxu0 }
0x13a3   :  { %v5355_v6 = vpop.f32.mrb[43].mxu0  ;;  %v5918_v40 = vld [vmem:[#allocation20] sm:$0xff]  }
0x13a4   :  { %v5919_v6 = vld [vmem:[#allocation20 + $0x8] sm:$0xff]  }
0x13a5   :  { %v5746_v41 = vpop.eup %5745 }
0x13a6   :  { %1885 = vrot.lane.b32.xlu1 %v5746_v41, %s6629_s25 }
0x13b3   :  { %v1956_v46 = vpop.f32.mrb[36].mxu1 }
0x13b4   :  { %v2003_v38 = vadd.f32 %v2002_v13, %v1956_v46  ;;  %v5346_v43 = vpop.f32.mrb[37].mxu1  ;;  %v516_v46 = vadd.f32 %v7708_v55, %v7283_v2 }
0x13b5   :  { %v1959_v52 = vpop.f32.mrb[38].mxu1 }
0x13b6   :  { %v2008_v18 = vadd.f32 %v7289_v20, %v2003_v38  ;;  %v5347_v63 = vpop.f32.mrb[39].mxu1  ;;  %v7720_v20 = vsel %vm1900_vm8, 1, %v6628_v24 }
0x13b8   :  { %5747 = vtanh.f32 %v2008_v18  ;;  %v4956_v26 = vmul.f32 -1.442695, %v2008_v18 }
0x13b9   :  { %5749 = vpow2.f32 %v4953_v58 }
0x13c2   :  { %v5748_v53 = vpop.eup %5747 }
0x13c3   :  { %2019 = vrot.lane.b32.xlu0 %v5748_v53, %s6629_s25  ;;  %v5750_v25 = vpop.eup %5749 }
0x13c4   :  { %v1879_v62 = vadd.f32 1.0, %v5750_v25 }
0x13c6   :  { %5751 = vrcp.f32 %v1879_v62 }
0x13c7   :  { %5753 = vpow2.f32 %v4956_v26 }
0x13d0   :  { %v5752_v17 = vpop.eup %5751 }
0x13d1   :  { %v5754_v45 = vpop.eup %5753  ;;  %v1882_v5 = vmul.f32 %v5752_v17, %v7729_v39 }
0x13d2   :  { %v2013_v9 = vadd.f32 1.0, %v5754_v45 }
0x13d4   :  { %5755 = vrcp.f32 %v2013_v9 }
0x13de   :  { %v5756_v16 = vpop.eup %5755 }
0x13df   :  { %v2016_v14 = vmul.f32 %v5756_v16, %v7741_v31 }
0x1418   :  { %v1886_v51 = vpop.permute.xlu1 %1885 }
0x1419   :  { %v1888_v29 = vmul.f32 %v5752_v17, %v1886_v51 }
0x141b   :  { %1890 = vrot.lane.b32.xlu1 %v1888_v29, %s6629_s25  ;;  %v7788_v29 = vld [vmem:[#allocation23] ss:$0 sm:$0xff] }
0x141f   :  { %1909 = vperm.xlu1 %5640, %v7720_v20  }
0x1423   :  { %1903 = vperm.xlu1 %5640, %v7715_v35  }
0x1435   :  { %v2020_v21 = vpop.permute.xlu0 %2019 }
0x1436   :  { %v2022_v10 = vmul.f32 %v5756_v16, %v2020_v21 }
0x1438   :  { %2024 = vrot.lane.b32.xlu0 %v2022_v10, %s6629_s25 }
0x148d   :  { %v1891_v22 = vpop.permute.xlu1 %1890 }
0x148e   :  { %v7732_v54 = vadd.f32 %v1891_v22, %v1882_v5 }
0x1490   :  { %5757 = vtanh.f32 %v7732_v54 }
0x149a   :  { %v5758_v27 = vpop.eup %5757 }
0x149b   :  { %1896 = vrot.lane.b32.xlu0 %v5758_v27, %s6629_s25 }
0x149e   :  { %v7748_v61 = vpop.permute.xlu1 %1909 }
0x149f   :  { %2043 = vperm.xlu0 %5641, %v7629_v34   ;;  %vm1911_vm9 = vcmp.eq.s32.totalorder %v7748_v61, 1 }
0x14a2   :  { %v1904_v33 = vpop.permute.xlu1 %1903 }
0x14aa   :  { %v2025_v3 = vpop.permute.xlu0 %2024 }
0x14ab   :  { %v7744_v48 = vadd.f32 %v2025_v3, %v2016_v14  ;;  %v7793_v14 = vld [vmem:[#allocation8 + $0x38] sm:$0xff] }
0x14ad   :  { %5759 = vtanh.f32 %v7744_v48 }
0x14b7   :  { %v5760_v23 = vpop.eup %5759 }
0x14b8   :  { %2030 = vrot.lane.b32.xlu1 %v5760_v23, %s6629_s25 }
0x150d   :  { %v1897_v60 = vpop.permute.xlu0 %1896 }
0x150e   :  { %v1899_v34 = vmul.f32 %v5752_v17, %v1897_v60 }
0x1510   :  { %v1912_v47 = vsel %vm1911_vm9, %v1899_v34, %v7663_v7  ;;  %v1906_v49 = vmul.f32 %v1904_v33, %v1899_v34 }
0x1511   :  { %v2056_v57 = vpack.c.bf16 %v1912_v47, %v1912_v47  ;;  %v1913_v47 = vsel %vm1911_vm9, %v7732_v54, %v7729_v39 }
0x1512   :  { %v2136_v19 = vpack.c.bf16 %v1906_v49, %v1906_v49 }
0x1513   :  { %2058 = vrot.lane.b32.xlu0 %v2056_v57, %s6602_s9 }
0x1517   :  { %2185 = vrot.lane.b32.xlu0 %v2136_v19, %s6602_s9 }
0x151e   :  { %v7756_v15 = vpop.permute.xlu0 %2043 }
0x151f   :  { %vm2045_vm10 = vcmp.eq.s32.totalorder %v7756_v15, 1  ;;  %v5921_v15 = vld [vmem:[#allocation8 + $0x10] sm:$0xff] }
0x152a   :  { %v2031_v37 = vpop.permute.xlu1 %2030 }
0x152b   :  { %v7758_v11 = vmul.f32 %v5756_v16, %v2031_v37 }
0x152d   :  { %v7765_v13 = vsel %vm2045_vm10, %v7758_v11, %v7678_v36 }
0x152e   :  { %v2137_v7 = vpack.c.bf16 %v7765_v13, %v7765_v13 }
0x1530   :  { %2139 = vrot.lane.b32.xlu1 %v2137_v7, %s6602_s9  ;;  %v7807_v7 = vsel %vm2045_vm10, %v7744_v48, %v7741_v31  ;;  %v892_v31 = vmul.f32 %v7332_v12, %v7236_v50 }
0x1585   :  { %v2059_v4 = vpop.permute.xlu0 %2058 }
0x1586   :  { %5361 = vmatmul.mubr.msk.bf16.vlgmr.msra.gmra.mrb[40].mxu1 %vm560_vm3, %v2059_v4 }
0x1587   :  { %5373 = vmatpush3.bf16.msra.mxu1 %v5918_v40  ;;  %5376 = vmatprep.mubr.msk.bf16.mxu1 %vm6627_vm0, %v6626_v0 }
0x1588   :  { %5374 = vmatprep.subr.bf16.mxu1 %v6626_v0 }
0x1589   :  { %v2186_v36 = vpop.permute.xlu0 %2185 }
0x158b   :  { %5375 = vmatpush3.bf16.msra.mxu1 %v5919_v6 }
0x158c   :  { %5388 = vmatprep.subr.bf16.mxu1 %v6626_v0 }
0x158e   :  { %5377 = vmatmul.mubr.msk.bf16.vlgmr.msra.gmra.mrb[44].mxu1 %vm560_vm3, %v2186_v36 }
0x158f   :  { %5389 = vmatpush3.bf16.msra.mxu1 %v5918_v40  ;;  %5392 = vmatprep.mubr.msk.bf16.mxu1 %vm6627_vm0, %v6626_v0 }
0x1590   :  { %5390 = vmatprep.subr.bf16.mxu1 %v6626_v0 }
0x1593   :  { %5391 = vmatpush3.bf16.msra.mxu1 %v5919_v6 }
0x15a2   :  { %v2140_v41 = vpop.permute.xlu1 %2139 }
0x15a3   :  { %5369 = vmatmul.mubr.msk.bf16.vlgmr.msra.gmra.mrb[44].mxu0 %vm560_vm3, %v2140_v41 }
0x15a4   :  { %5381 = vmatpush3.bf16.msra.mxu0 %v7691_v28  ;;  %5384 = vmatprep.mubr.msk.bf16.mxu0 %vm6627_vm0, %v6626_v0 }
0x15a5   :  { %5382 = vmatprep.subr.bf16.mxu0 %v6626_v0 }
0x15a8   :  { %5383 = vmatpush3.bf16.msra.mxu0 %v7697_v59 }
0x1659   :  { %v2097_v38 = vpop.f32.mrb[40].mxu1 }
0x165a   :  { %v2103_v43 = vadd.f32 %v2097_v38, %v516_v46  ;;  %v5362_v52 = vpop.f32.mrb[41].mxu1 }
0x165b   :  { %v2100_v18 = vpop.f32.mrb[42].mxu1 }
0x165c   :  { %5761 = vtanh.f32 %v2103_v43  ;;  %v5363_v63 = vpop.f32.mrb[43].mxu1  ;;  %v4958_v9 = vmul.f32 -1.442695, %v2103_v43  ;;  %v5922_v18 = vld [vmem:[#allocation8 + $0x8] sm:$0xff] }
0x1661   :  { %v2224_v53 = vpop.f32.mrb[44].mxu1 }
0x1662   :  { %v5378_v58 = vpop.f32.mrb[45].mxu1 }
0x1663   :  { %v2227_v25 = vpop.f32.mrb[46].mxu1 }
0x1664   :  { %v5379_v28 = vpop.f32.mrb[47].mxu1  ;;  %v5649_v25 = vld [vmem:[#allocation34 + $0x8] sm:$0xff]  }
0x1666   :  { %v5762_v62 = vpop.eup %5761 }
0x1667   :  { %2115 = vrot.lane.b32.xlu1 %v5762_v62, %s6629_s25 }
0x1676   :  { %v2178_v26 = vpop.f32.mrb[44].mxu0 }
0x1677   :  { %v2225_v17 = vadd.f32 %v2224_v53, %v2178_v26  ;;  %v5370_v51 = vpop.f32.mrb[45].mxu0 }
0x1678   :  { %v2181_v59 = vpop.f32.mrb[46].mxu0 }
0x1679   :  { %v2230_v2 = vadd.f32 %v7788_v29, %v2225_v17  ;;  %v5371_v55 = vpop.f32.mrb[47].mxu0 }
0x167b   :  { %5763 = vtanh.f32 %v2230_v2  ;;  %v4961_v5 = vmul.f32 -1.442695, %v2230_v2 }
0x167c   :  { %5765 = vpow2.f32 %v4958_v9 }
0x1685   :  { %v5764_v45 = vpop.eup %5763 }
0x1686   :  { %2241 = vrot.lane.b32.xlu0 %v5764_v45, %s6629_s25  ;;  %v5766_v16 = vpop.eup %5765 }
0x1687   :  { %v2109_v21 = vadd.f32 1.0, %v5766_v16 }
0x1689   :  { %5767 = vrcp.f32 %v2109_v21 }
0x168a   :  { %5769 = vpow2.f32 %v4961_v5 }
0x1693   :  { %v5768_v10 = vpop.eup %5767 }
0x1694   :  { %v5770_v3 = vpop.eup %5769  ;;  %v2112_v57 = vmul.f32 %v5768_v10, %v1913_v47 }
0x1695   :  { %v2235_v23 = vadd.f32 1.0, %v5770_v3 }
0x1697   :  { %5771 = vrcp.f32 %v2235_v23 }
0x16a1   :  { %v5772_v60 = vpop.eup %5771 }
0x16d9   :  { %v2116_v22 = vpop.permute.xlu1 %2115 }
0x16da   :  { %v2118_v27 = vmul.f32 %v5768_v10, %v2116_v22 }
0x16dc   :  { %2120 = vrot.lane.b32.xlu1 %v2118_v27, %s6629_s25 }
0x16e0   :  { %2132 = vperm.xlu1 %5640, %v7793_v14  }
0x16f8   :  { %v2242_v34 = vpop.permute.xlu0 %2241 }
0x16f9   :  { %v2244_v33 = vmul.f32 %v5772_v60, %v2242_v34 }
0x16fb   :  { %2246 = vrot.lane.b32.xlu0 %v2244_v33, %s6629_s25 }
0x16ff   :  { %2265 = vperm.xlu0 %5641, %v7720_v20   ;;  %v2238_v20 = vmul.f32 %v5772_v60, %v7807_v7 }
0x174e   :  { %v2121_v49 = vpop.permute.xlu1 %2120 }
0x174f   :  { %v2123_v19 = vadd.f32 %v2121_v49, %v2112_v57 }
0x1751   :  { %5773 = vtanh.f32 %v2123_v19  ;;  %v5650_v19 = vld [vmem:[#allocation37] sm:$0xff]  }
0x1752   :  { %5408 = vmatprep.subr.bf16.mxu1 %v5650_v19 }
0x175b   :  { %v5774_v37 = vpop.eup %5773 }
0x175c   :  { %2126 = vrot.lane.b32.xlu1 %v5774_v37, %s6629_s25  ;;  %v5651_v37 = vld [vmem:[#allocation37 + $0x8] sm:$0xff]  }
0x175f   :  { %v2133_v54 = vpop.permute.xlu1 %2132 }
0x176d   :  { %v2247_v4 = vpop.permute.xlu0 %2246 }
0x176e   :  { %v7810_v40 = vadd.f32 %v2247_v4, %v2238_v20 }
0x1770   :  { %5775 = vtanh.f32 %v7810_v40 }
0x177a   :  { %v5776_v39 = vpop.eup %5775 }
0x177b   :  { %2252 = vrot.lane.b32.xlu0 %v5776_v39, %s6629_s25 }
0x177e   :  { %v7818_v48 = vpop.permute.xlu0 %2265 }
0x177f   :  { %vm2267_vm11 = vcmp.eq.s32.totalorder %v7818_v48, 1 }
0x17ce   :  { %v2127_v61 = vpop.permute.xlu1 %2126 }
0x17cf   :  { %v2129_v6 = vmul.f32 %v5768_v10, %v2127_v61 }
0x17d1   :  { %v2135_v36 = vmul.f32 %v2133_v54, %v2129_v6  ;;  %v7851_v6 = vld [vmem:[#allocation35] ss:$0 sm:$0xff] }
0x17d3   :  { %v2276_v41 = vpack.c.bf16 %v2135_v36, %v2135_v36 }
0x17d5   :  { %2325 = vrot.lane.b32.xlu0 %v2276_v41, %s6602_s9 }
0x17d9   :  { %1347 = vperm.xlu0 %5641, %v5921_v15  }
0x17dd   :  { %900 = vrot.lane.b32.xlu0 %v892_v31, %s6602_s9 }
0x17ed   :  { %v2253_v46 = vpop.permute.xlu0 %2252 }
0x17ee   :  { %v7820_v38 = vmul.f32 %v5772_v60, %v2253_v46 }
0x17f0   :  { %v2268_v43 = vsel %vm2267_vm11, %v7820_v38, %v7765_v13  ;;  %v5648_v13 = vld [vmem:[#allocation34] sm:$0xff]  }
0x17f1   :  { %v2277_v52 = vpack.c.bf16 %v2268_v43, %v2268_v43  ;;  %5396 = vmatprep.subr.bf16.mxu0 %v5648_v13 }
0x17f3   :  { %2279 = vrot.lane.b32.xlu1 %v2277_v52, %s6602_s9 }
0x17f7   :  { %1117 = vperm.xlu1 %5640, %v5922_v18  }
0x17fb   :  { %1577 = vperm.xlu1 %5640, %v7450_v56  }
0x1847   :  { %v2326_v50 = vpop.permute.xlu0 %2325 }
0x1848   :  { %5393 = vmatmul.mubr.msk.bf16.vlgmr.msra.gmra.mrb[48].mxu1 %vm560_vm3, %v2326_v50 }
0x1849   :  { %5409 = vmatpush3.bf16.msra.mxu1 %v5650_v19 }
0x184a   :  { %5410 = vmatprep.subr.bf16.mxu1 %v5651_v37 }
0x184d   :  { %5411 = vmatpush3.bf16.msra.mxu1 %v5651_v37 }
0x1858   :  { %v1348_v12 = vpop.permute.xlu0 %1347 }
0x1859   :  { %v1350_v63 = vmul.f32 %v1348_v12, %v7497_v44 }
0x185b   :  { %1359 = vrot.lane.b32.xlu0 %v1350_v63, %s6602_s9 }
0x185c   :  { %v901_v53 = vpop.permute.xlu0 %900 }
0x185d   :  { %903 = vst.msk [vmem:[#allocation3] sm:$0xff] %vm560_vm3, %v901_v53 }
0x1864   :  { %v2408_v59 = vld [vmem:[#allocation3] sm:$0xff] }
0x1865   :  { %v2280_v58 = vpop.permute.xlu1 %2279 }
0x1866   :  { %5385 = vmatmul.mubr.msk.bf16.vlgmr.msra.gmra.mrb[48].mxu0 %vm560_vm3, %v2280_v58 }
0x1867   :  { %5397 = vmatpush3.bf16.msra.mxu0 %v5648_v13 }
0x1868   :  { %5398 = vmatprep.subr.bf16.mxu0 %v5649_v25 }
0x186b   :  { %5399 = vmatpush3.bf16.msra.mxu0 %v5649_v25 }
0x1876   :  { %v1118_v56 = vpop.permute.xlu1 %1117 }
0x1877   :  { %v1120_v28 = vmul.f32 %v1118_v56, %v7412_v32  ;;  %v2416_v32 = vmax.f32 %v2408_v59, 0.0 }
0x1879   :  { %1129 = vrot.lane.b32.xlu1 %v1120_v28, %s6602_s9 }
0x187a   :  { %v1578_v44 = vpop.permute.xlu1 %1577 }
0x187b   :  { %v1580_v62 = vmul.f32 %v1578_v44, %v7582_v8 }
0x187d   :  { %1589 = vrot.lane.b32.xlu1 %v1580_v62, %s6602_s9 }
0x18cd   :  { %v1360_v26 = vpop.permute.xlu0 %1359 }
0x18ce   :  { %1363 = vst.msk [vmem:[#allocation3 + $0x10] sm:$0xff] %vm560_vm3, %v1360_v26 }
0x18d5   :  { %v2410_v45 = vld [vmem:[#allocation3 + $0x10] sm:$0xff] }
0x18d6   :  { %v2418_v8 = vmax.f32 %v2410_v45, 0.0 }
0x18eb   :  { %v1130_v17 = vpop.permute.xlu1 %1129 }
0x18ec   :  { %1133 = vst.msk [vmem:[#allocation3 + $0x8] sm:$0xff] %vm560_vm3, %v1130_v17 }
0x18ef   :  { %v1590_v51 = vpop.permute.xlu1 %1589 }
0x18f0   :  { %1593 = vst.msk [vmem:[#allocation3 + $0x18] sm:$0xff] %vm560_vm3, %v1590_v51 }
0x18f3   :  { %v2409_v2 = vld [vmem:[#allocation3 + $0x8] sm:$0xff] }
0x18f4   :  { %v2417_v55 = vmax.f32 %v2409_v2, 0.0 }
0x18f6   :  { %v2424_v9 = vpack.c.bf16 %v2417_v55, %v2416_v32 }
0x18f7   :  { %v2411_v16 = vld [vmem:[#allocation3 + $0x18] sm:$0xff] }
0x18f8   :  { %5400 = vmatprep.mubr.msk.bf16.mxu0 %vm560_vm3, %v2424_v9  ;;  %v2419_v21 = vmax.f32 %v2411_v16, 0.0 }
0x18fa   :  { %v2425_v10 = vpack.c.bf16 %v2419_v21, %v2418_v8 }
0x18fc   :  { %5401 = vmatmul.mubr.msk.bf16.vlgmr.msra.gmra.mrb[52].mxu0 %vm560_vm3, %v2425_v10 }
0x191b   :  { %v2364_v5 = vpop.f32.mrb[48].mxu1 }
0x191c   :  { %v5394_v22 = vpop.f32.mrb[49].mxu1 }
0x191d   :  { %v2367_v27 = vpop.f32.mrb[50].mxu1 }
0x191e   :  { %v5395_v3 = vpop.f32.mrb[51].mxu1 }
0x191f   :  { %v3036_v3 = vld [vmem:[#allocation8] sm:$0xff] }
0x1920   :  { %vm3065_vm12 = vcmp.gt.f32.partialorder %v3036_v3, 0.0 }
0x1939   :  { %v2318_v23 = vpop.f32.mrb[48].mxu0 }
0x193a   :  { %v2365_v60 = vadd.f32 %v2364_v5, %v2318_v23  ;;  %v5386_v34 = vpop.f32.mrb[49].mxu0 }
0x193b   :  { %v2321_v33 = vpop.f32.mrb[50].mxu0 }
0x193c   :  { %v2370_v47 = vadd.f32 %v7788_v29, %v2365_v60  ;;  %v5387_v57 = vpop.f32.mrb[51].mxu0  ;;  %v5652_v60 = vld [vmem:[#allocation40] sm:$0xff]   ;;  %v2980_v33 = vld [vmem:[#allocation14] sm:$0xff] }
0x193d   :  { %5420 = vmatprep.subr.bf16.mxu0 %v5652_v60 }
0x193e   :  { %5777 = vtanh.f32 %v2370_v47  ;;  %v4964_v20 = vmul.f32 -1.442695, %v2370_v47  ;;  %5421 = vmatpush3.bf16.msra.mxu0 %v5652_v60  ;;  %v3072_v47 = vsel %vm3065_vm12, 1, %v6628_v24 }
0x1940   :  { %5779 = vpow2.f32 %v4964_v20 }
0x1948   :  { %v5778_v49 = vpop.eup %5777 }
0x1949   :  { %2381 = vrot.lane.b32.xlu0 %v5778_v49, %s6629_s25 }
0x194a   :  { %v5780_v4 = vpop.eup %5779 }
0x194b   :  { %v2375_v39 = vadd.f32 1.0, %v5780_v4 }
0x194d   :  { %1807 = vperm.xlu0 %5641, %v7535_v30   ;;  %5781 = vrcp.f32 %v2375_v39 }
0x1951   :  { %2259 = vperm.xlu0 %5641, %v7715_v35  }
0x1957   :  { %v5782_v29 = vpop.eup %5781 }
0x19bb   :  { %v2382_v54 = vpop.permute.xlu0 %2381 }
0x19bc   :  { %v2384_v61 = vmul.f32 %v5782_v29, %v2382_v54 }
0x19be   :  { %2386 = vrot.lane.b32.xlu1 %v2384_v61, %s6629_s25 }
0x19c2   :  { %2037 = vperm.xlu1 %5640, %v7624_v42  }
0x19c6   :  { %2398 = vperm.xlu1 %5640, %v7793_v14  }
0x19cc   :  { %v1808_v30 = vpop.permute.xlu0 %1807 }
0x19cd   :  { %v1810_v35 = vmul.f32 %v1808_v30, %v7671_v1 }
0x19cf   :  { %v5402_v36 = vpop.f32.mrb[52].mxu0  ;;  %1819 = vrot.lane.b32.xlu1 %v1810_v35, %s6602_s9  ;;  %v5653_v35 = vld [vmem:[#allocation43] sm:$0xff]  }
0x19d0   :  { %v2506_v41 = vadd.f32 %v5402_v36, %v7851_v6  ;;  %v2497_v15 = vpop.f32.mrb[53].mxu0  ;;  %v2260_v31 = vpop.permute.xlu0 %2259  ;;  %5430 = vmatprep.subr.bf16.mxu1 %v5653_v35  ;;  %v5654_v36 = vld [vmem:[#allocation43 + $0x8] sm:$0xff]  }
0x19d1   :  { %v2498_v46 = vadd.f32 %v7851_v6, %v2497_v15  ;;  %v2262_v43 = vmul.f32 %v2260_v31, %v7820_v38  ;;  %v5403_v52 = vpop.f32.mrb[54].mxu0  ;;  %v2269_v38 = vsel %vm2267_vm11, %v7810_v40, %v7807_v7  ;;  %v7871_v7 = vld [vmem:[#allocation38] ss:$0 sm:$0xff] }
0x19d2   :  { %v2509_v42 = vadd.f32 %v5403_v52, %v7851_v6  ;;  %v2500_v14 = vpop.f32.mrb[55].mxu0  ;;  %v2530_v1 = vmax.f32 %v2506_v41, 0.0  ;;  %v2378_v13 = vmul.f32 %v5782_v29, %v2269_v38 }
0x19d3   :  { %v2501_v18 = vadd.f32 %v7851_v6, %v2500_v14  ;;  %2271 = vrot.lane.b32.xlu1 %v2262_v43, %s6602_s9  ;;  %v2528_v12 = vmax.f32 %v2498_v46, 0.0 }
0x19d4   :  { %v2531_v50 = vmax.f32 %v2509_v42, 0.0 }
0x19d5   :  { %v2529_v63 = vmax.f32 %v2501_v18, 0.0 }
0x19d6   :  { %v2537_v53 = vpack.c.bf16 %v2531_v50, %v2530_v1 }
0x19d7   :  { %v2536_v58 = vpack.c.bf16 %v2529_v63, %v2528_v12  ;;  %v7891_v63 = vld [vmem:[#allocation41] ss:$0 sm:$0xff] }
0x19d9   :  { %5412 = vmatprep.mubr.msk.bf16.mxu1 %vm560_vm3, %v2536_v58 }
0x19da   :  { %5413 = vmatmul.mubr.msk.bf16.vlgmr.msra.gmra.mrb[52].mxu1 %vm560_vm3, %v2537_v53 }
0x19db   :  { %5431 = vmatpush3.bf16.msra.mxu1 %v5653_v35 }
0x19dc   :  { %5432 = vmatprep.subr.bf16.mxu1 %v5654_v36 }
0x19df   :  { %5433 = vmatpush3.bf16.msra.mxu1 %v5654_v36 }
0x19e0   :  { %5454 = vmatprep.subr.bf16.mxu1 %v6626_v0 }
0x1a30   :  { %v2387_v25 = vpop.permute.xlu1 %2386 }
0x1a31   :  { %v2389_v56 = vadd.f32 %v2387_v25, %v2378_v13 }
0x1a33   :  { %5783 = vtanh.f32 %v2389_v56 }
0x1a3d   :  { %v5784_v28 = vpop.eup %5783 }
0x1a3e   :  { %2392 = vrot.lane.b32.xlu0 %v5784_v28, %s6629_s25 }
0x1a41   :  { %v2038_v44 = vpop.permute.xlu1 %2037 }
0x1a42   :  { %v2040_v62 = vmul.f32 %v2038_v44, %v7758_v11 }
0x1a44   :  { %2049 = vrot.lane.b32.xlu0 %v2040_v62, %s6602_s9 }
0x1a45   :  { %v2399_v26 = vpop.permute.xlu1 %2398 }
0x1a49   :  { %v1820_v17 = vpop.permute.xlu1 %1819 }
0x1a4a   :  { %1823 = vst.msk [vmem:[#allocation3 + $0x20] sm:$0xff] %vm560_vm3, %v1820_v17 }
0x1a4d   :  { %v2272_v51 = vpop.permute.xlu1 %2271 }
0x1a4e   :  { %2275 = vst.msk [vmem:[#allocation3 + $0x30] sm:$0xff] %vm560_vm3, %v2272_v51  ;;  %v2983_v51 = vld [vmem:[#allocation26] sm:$0xf] }
0x1a51   :  { %v2412_v57 = vld [vmem:[#allocation3 + $0x20] sm:$0xff] }
0x1a52   :  { %v2420_v19 = vmax.f32 %v2412_v57, 0.0 }
0x1a55   :  { %v2414_v39 = vld [vmem:[#allocation3 + $0x30] sm:$0xff] }
0x1a56   :  { %v2422_v54 = vmax.f32 %v2414_v39, 0.0 }
0x1aad   :  { %v5414_v40 = vpop.f32.mrb[52].mxu1 }
0x1aae   :  { %v2618_v48 = vadd.f32 %v5414_v40, %v7871_v7  ;;  %v2609_v59 = vpop.f32.mrb[53].mxu1 }
0x1aaf   :  { %v2610_v2 = vadd.f32 %v7871_v7, %v2609_v59  ;;  %v5415_v32 = vpop.f32.mrb[54].mxu1 }
0x1ab0   :  { %v2621_v11 = vadd.f32 %v5415_v32, %v7871_v7  ;;  %v2393_v55 = vpop.permute.xlu0 %2392  ;;  %v2612_v45 = vpop.f32.mrb[55].mxu1  ;;  %v2642_v8 = vmax.f32 %v2618_v48, 0.0  ;;  %v7900_v32 = vsel %vm450_vm1, %v2983_v51, 0  ;;  %v7942_v51 = vld [vmem:[#allocation13] sm:$0xff] }
0x1ab1   :  { %v2395_v9 = vmul.f32 %v5782_v29, %v2393_v55  ;;  %v2613_v16 = vadd.f32 %v7871_v7, %v2612_v45  ;;  %v2640_v10 = vmax.f32 %v2610_v2, 0.0  ;;  %v5656_v55 = vld [vmem:[#allocation25 + $0x8] sm:$0xff]  }
0x1ab2   :  { %v2643_v21 = vmax.f32 %v2621_v11, 0.0  ;;  %v5655_v11 = vld [vmem:[#allocation25] sm:$0xff]  }
0x1ab3   :  { %v2401_v5 = vmul.f32 %v2399_v26, %v2395_v9  ;;  %v2641_v22 = vmax.f32 %v2613_v16, 0.0  ;;  %5442 = vmatprep.subr.bf16.mxu0 %v5655_v11 }
0x1ab4   :  { %v2649_v27 = vpack.c.bf16 %v2643_v21, %v2642_v8 }
0x1ab5   :  { %v2648_v23 = vpack.c.bf16 %v2641_v22, %v2640_v10  ;;  %2403 = vrot.lane.b32.xlu0 %v2401_v5, %s6602_s9  ;;  %s6630_s9 = smov 104  }
0x1ab6   :  { %v2050_v34 = vpop.permute.xlu0 %2049 }
0x1ab7   :  { %2053 = vst.msk [vmem:[#allocation3 + $0x28] sm:$0xff] %vm560_vm3, %v2050_v34  ;;  %v7911_v34 = vld [vmem:[#allocation44] ss:$0 sm:$0xff] }
0x1ab9   :  { %3044 = vrot.lane.b32.xlu0 %v2980_v33, %s8669_s15 }
0x1abd   :  { %3074 = vperm.xlu0 %5641, %v3072_v47  }
0x1abe   :  { %v2413_v49 = vld [vmem:[#allocation3 + $0x28] sm:$0xff] }
0x1abf   :  { %v2421_v37 = vmax.f32 %v2413_v49, 0.0 }
0x1ac1   :  { %3068 = vperm.xlu0 %5641, %v3036_v3   ;;  %v2426_v20 = vpack.c.bf16 %v2421_v37, %v2420_v19 }
0x1ac3   :  { %5404 = vmatprep.mubr.msk.bf16.mxu0 %vm560_vm3, %v2426_v20 }
0x1b27   :  { %v2404_v4 = vpop.permute.xlu0 %2403 }
0x1b28   :  { %2407 = vst.msk [vmem:[#allocation3 + $0x38] sm:$0xff] %vm560_vm3, %v2404_v4 }
0x1b2f   :  { %v2415_v29 = vld [vmem:[#allocation3 + $0x38] sm:$0xff] }
0x1b30   :  { %v2423_v61 = vmax.f32 %v2415_v29, 0.0 }
0x1b32   :  { %v2427_v30 = vpack.c.bf16 %v2423_v61, %v2422_v54  ;;  %v2984_v61 = vld [vmem:[#allocation31] sm:$0xf] }
0x1b34   :  { %5405 = vmatmul.mubr.msk.bf16.gmra.mrb[56].mxu0 %vm560_vm3, %v2427_v30 }
0x1b35   :  { %5422 = vmatprep.mubr.msk.bf16.mxu0 %vm2667_vm13, %v2648_v23 }
0x1b3c   :  { %5423 = vmatmul.mubr.msk.bf16.vlgmr.msra.gmra.mrb[60].mxu0 %vm2667_vm13, %v2649_v27 }
0x1b3d   :  { %5443 = vmatpush3.bf16.msra.mxu0 %v5655_v11 }
0x1b3e   :  { %5444 = vmatprep.subr.bf16.mxu0 %v5656_v55 }
0x1b41   :  { %5445 = vmatpush3.bf16.msra.mxu0 %v5656_v55 }
0x1b42   :  { %5466 = vmatprep.subr.bf16.mxu0 %v6626_v0 }
0x1c07   :  { %v5406_v41 = vpop.f32.mrb[56].mxu0 }
0x1c08   :  { %v2522_v15 = vadd.f32 %v5406_v41, %v7851_v6  ;;  %v2513_v31 = vpop.f32.mrb[57].mxu0 }
0x1c09   :  { %v2514_v46 = vadd.f32 %v7851_v6, %v2513_v31  ;;  %v5407_v43 = vpop.f32.mrb[58].mxu0 }
0x1c0a   :  { %v2525_v52 = vadd.f32 %v5407_v43, %v7851_v6  ;;  %v2516_v42 = vpop.f32.mrb[59].mxu0  ;;  %v2534_v18 = vmax.f32 %v2522_v15, 0.0  ;;  %v7920_v15 = vsel %vm450_vm1, %v2984_v61, 0 }
0x1c0b   :  { %v2517_v14 = vadd.f32 %v7851_v6, %v2516_v42  ;;  %v2532_v50 = vmax.f32 %v2514_v46, 0.0 }
0x1c0c   :  { %v2535_v1 = vmax.f32 %v2525_v52, 0.0 }
0x1c0d   :  { %v2533_v12 = vmax.f32 %v2517_v14, 0.0 }
0x1c0e   :  { %v2539_v53 = vpack.c.bf16 %v2535_v1, %v2534_v18 }
0x1c0f   :  { %v2538_v58 = vpack.c.bf16 %v2533_v12, %v2532_v50  ;;  %v5424_v38 = vpop.f32.mrb[60].mxu0 }
0x1c10   :  { %v2723_v13 = vadd.f32 %v5424_v38, %v7891_v63  ;;  %v2714_v25 = vpop.f32.mrb[61].mxu0  ;;  %v7930_v38 = vld [vmem:[#allocation28] ss:$0 sm:$0xff] }
0x1c11   :  { %v2715_v56 = vadd.f32 %v7891_v63, %v2714_v25  ;;  %5416 = vmatprep.mubr.msk.bf16.mxu1 %vm560_vm3, %v2538_v58  ;;  %v5425_v28 = vpop.f32.mrb[62].mxu0 }
0x1c12   :  { %v2726_v44 = vadd.f32 %v5425_v28, %v7891_v63  ;;  %5417 = vmatmul.mubr.msk.bf16.gmra.mrb[56].mxu1 %vm560_vm3, %v2539_v53  ;;  %v2717_v6 = vpop.f32.mrb[63].mxu0  ;;  %v2747_v26 = vmax.f32 %v2723_v13, 0.0 }
0x1c13   :  { %v2718_v62 = vadd.f32 %v7891_v63, %v2717_v6  ;;  %v2745_v40 = vmax.f32 %v2715_v56, 0.0 }
0x1c14   :  { %v2748_v17 = vmax.f32 %v2726_v44, 0.0 }
0x1c15   :  { %v2746_v48 = vmax.f32 %v2718_v62, 0.0 }
0x1c16   :  { %v2754_v59 = vpack.c.bf16 %v2748_v17, %v2747_v26 }
0x1c17   :  { %v2753_v2 = vpack.c.bf16 %v2746_v48, %v2745_v40  ;;  %v2988_v40 = vpack.c.bf16 %v7942_v51, %v7942_v51 }
0x1c19   :  { %5434 = vmatprep.mubr.msk.bf16.mxu1 %vm560_vm3, %v2753_v2 }
0x1c1a   :  { %5435 = vmatmul.mubr.msk.bf16.vlgmr.msra.gmra.mrb[60].mxu1 %vm560_vm3, %v2754_v59 }
0x1c1b   :  { %5455 = vmatpush3.bf16.msra.mxu1 %v7900_v32 }
0x1c1c   :  { %5460 = vmatprep.subr.bf16.mxu1 %v6626_v0 }
0x1ce5   :  { %v5418_v45 = vpop.f32.mrb[56].mxu1 }
0x1ce6   :  { %v2634_v9 = vadd.f32 %v5418_v45, %v7871_v7  ;;  %v2625_v16 = vpop.f32.mrb[57].mxu1 }
0x1ce7   :  { %v2626_v8 = vadd.f32 %v7871_v7, %v2625_v16  ;;  %v5419_v21 = vpop.f32.mrb[58].mxu1 }
0x1ce8   :  { %v2637_v10 = vadd.f32 %v5419_v21, %v7871_v7  ;;  %v2628_v5 = vpop.f32.mrb[59].mxu1  ;;  %v2646_v27 = vmax.f32 %v2634_v9, 0.0 }
0x1ce9   :  { %v2629_v22 = vadd.f32 %v7871_v7, %v2628_v5  ;;  %v2644_v23 = vmax.f32 %v2626_v8, 0.0 }
0x1cea   :  { %v2647_v3 = vmax.f32 %v2637_v10, 0.0 }
0x1ceb   :  { %v2645_v60 = vmax.f32 %v2629_v22, 0.0 }
0x1cec   :  { %v2651_v33 = vpack.c.bf16 %v2647_v3, %v2646_v27 }
0x1ced   :  { %v2650_v47 = vpack.c.bf16 %v2645_v60, %v2644_v23  ;;  %v5436_v57 = vpop.f32.mrb[60].mxu1 }
0x1cee   :  { %v2835_v49 = vadd.f32 %v5436_v57, %v7911_v34  ;;  %v2826_v19 = vpop.f32.mrb[61].mxu1 }
0x1cef   :  { %v2827_v37 = vadd.f32 %v7911_v34, %v2826_v19  ;;  %5426 = vmatprep.mubr.msk.bf16.mxu0 %vm2667_vm13, %v2650_v47  ;;  %v5437_v20 = vpop.f32.mrb[62].mxu1 }
0x1cf0   :  { %v2838_v4 = vadd.f32 %v5437_v20, %v7911_v34  ;;  %5427 = vmatmul.mubr.msk.bf16.gmra.mrb[64].mxu0 %vm2667_vm13, %v2651_v33  ;;  %v2829_v7 = vpop.f32.mrb[63].mxu1  ;;  %v2859_v29 = vmax.f32 %v2835_v49, 0.0 }
0x1cf1   :  { %v2830_v39 = vadd.f32 %v7911_v34, %v2829_v7  ;;  %v2857_v30 = vmax.f32 %v2827_v37, 0.0 }
0x1cf2   :  { %v2860_v54 = vmax.f32 %v2838_v4, 0.0 }
0x1cf3   :  { %v2858_v35 = vmax.f32 %v2830_v39, 0.0 }
0x1cf4   :  { %v2866_v36 = vpack.c.bf16 %v2860_v54, %v2859_v29 }
0x1cf5   :  { %v2865_v41 = vpack.c.bf16 %v2858_v35, %v2857_v30 }
0x1cf7   :  { %5446 = vmatprep.mubr.msk.bf16.mxu0 %vm560_vm3, %v2865_v41 }
0x1cf8   :  { %5447 = vmatmul.mubr.msk.bf16.vlgmr.msra.gmra.mrb[68].mxu0 %vm560_vm3, %v2866_v36 }
0x1cf9   :  { %5467 = vmatpush3.bf16.msra.mxu0 %v7920_v15 }
0x1cfa   :  { %5478 = vmatprep.subr.bf16.mxu0 %v6626_v0 }
0x1dc3   :  { %v5428_v31 = vpop.f32.mrb[64].mxu0 }
0x1dc4   :  { %v2739_v46 = vadd.f32 %v5428_v31, %v7891_v63  ;;  %v2730_v43 = vpop.f32.mrb[65].mxu0  ;;  %v7971_v31 = vpop.permute.xlu0 %3044 }
0x1dc5   :  { %v2731_v52 = vadd.f32 %v7891_v63, %v2730_v43  ;;  %v5429_v42 = vpop.f32.mrb[66].mxu0 }
0x1dc6   :  { %v2742_v14 = vadd.f32 %v5429_v42, %v7891_v63  ;;  %v2733_v18 = vpop.f32.mrb[67].mxu0  ;;  %v2751_v50 = vmax.f32 %v2739_v46, 0.0 }
0x1dc7   :  { %v2734_v1 = vadd.f32 %v7891_v63, %v2733_v18  ;;  %v2749_v53 = vmax.f32 %v2731_v52, 0.0  ;;  %v2979_v18 = vld [vmem:[#allocation13 + $0x8] sm:$0xff] }
0x1dc8   :  { %v2752_v12 = vmax.f32 %v2742_v14, 0.0  ;;  %v7980_v14 = vpop.permute.xlu0 %3074 }
0x1dc9   :  { %v2750_v58 = vmax.f32 %v2734_v1, 0.0  ;;  %v3173_v1 = vpack.c.bf16 %v2979_v18, %v2979_v18 }
0x1dca   :  { %v2756_v13 = vpack.c.bf16 %v2752_v12, %v2751_v50 }
0x1dcb   :  { %v2755_v25 = vpack.c.bf16 %v2750_v58, %v2749_v53  ;;  %v5448_v56 = vpop.f32.mrb[68].mxu0 }
0x1dcc   :  { %v2947_v28 = vadd.f32 %v5448_v56, %v7930_v38  ;;  %v2938_v44 = vpop.f32.mrb[69].mxu0  ;;  %v7987_v53 = vpop.permute.xlu0 %3068 }
0x1dcd   :  { %v2939_v6 = vadd.f32 %v7930_v38, %v2938_v44  ;;  %5438 = vmatprep.mubr.msk.bf16.mxu1 %vm560_vm3, %v2755_v25  ;;  %v5449_v62 = vpop.f32.mrb[70].mxu0 }
0x1dce   :  { %2971 = vst.msk [vmem:[#allocation4 + $0x10] sm:$0xff] %vm560_vm3, %v2947_v28  ;;  %v2950_v63 = vadd.f32 %v5449_v62, %v7930_v38  ;;  %5439 = vmatmul.mubr.msk.bf16.gmra.mrb[64].mxu1 %vm560_vm3, %v2756_v13  ;;  %v2941_v26 = vpop.f32.mrb[71].mxu0  ;;  %v2985_v28 = vld [vmem:[#allocation29] sm:$0xf] }
0x1dcf   :  { %2969 = vst.msk [vmem:[#allocation4] sm:$0xff] %vm560_vm3, %v2939_v6  ;;  %v2942_v17 = vadd.f32 %v7930_v38, %v2941_v26  ;;  %5456 = vmatprep.mubr.msk.bf16.mxu1 %vm6627_vm0, %v6626_v0  ;;  %v8000_v44 = vsel %vm450_vm1, %v2985_v28, 0 }
0x1dd0   :  { %2972 = vst.msk [vmem:[#allocation4 + $0x18] sm:$0xff] %vm560_vm3, %v2950_v63 }
0x1dd1   :  { %2970 = vst.msk [vmem:[#allocation4 + $0x8] sm:$0xff] %vm560_vm3, %v2942_v17 }
0x1dd6   :  { %5457 = vmatmul.mubr.msk.bf16.vlgmr.msra.gmra.mrb[68].mxu1 %vm437_vm2, %v2988_v40  ;;  %v2987_v3 = vld [vmem:[#allocation4] sm:$0xff] }
0x1dd7   :  { %5461 = vmatpush3.bf16.msra.mxu1 %v7900_v32  ;;  %5462 = vmatprep.mubr.msk.bf16.mxu1 %vm6627_vm0, %v6626_v0 }
0x1dd8   :  { %5472 = vmatprep.subr.bf16.mxu1 %v6626_v0  ;;  %v3084_v40 = vld [vmem:[#allocation4 + $0x8] sm:$0xff] }
0x1ea1   :  { %v5440_v48 = vpop.f32.mrb[64].mxu1 }
0x1ea2   :  { %v2851_v59 = vadd.f32 %v5440_v48, %v7911_v34  ;;  %v2842_v2 = vpop.f32.mrb[65].mxu1 }
0x1ea3   :  { %v2843_v11 = vadd.f32 %v7911_v34, %v2842_v2  ;;  %v5441_v55 = vpop.f32.mrb[66].mxu1 }
0x1ea4   :  { %v2854_v45 = vadd.f32 %v5441_v55, %v7911_v34  ;;  %v2845_v9 = vpop.f32.mrb[67].mxu1  ;;  %v2863_v8 = vmax.f32 %v2851_v59, 0.0 }
0x1ea5   :  { %v2846_v16 = vadd.f32 %v7911_v34, %v2845_v9  ;;  %v2861_v10 = vmax.f32 %v2843_v11, 0.0 }
0x1ea6   :  { %v2864_v21 = vmax.f32 %v2854_v45, 0.0  ;;  %v8012_v45 = vld [vmem:[#allocation32] ss:$0 sm:$0xff] }
0x1ea7   :  { %v2862_v5 = vmax.f32 %v2846_v16, 0.0 }
0x1ea8   :  { %v2868_v22 = vpack.c.bf16 %v2864_v21, %v2863_v8 }
0x1ea9   :  { %v2867_v27 = vpack.c.bf16 %v2862_v5, %v2861_v10  ;;  %v3029_v23 = vpop.f32.mrb[68].mxu1 }
0x1eaa   :  { %v3035_v60 = vadd.f32 %v3029_v23, %v2987_v3  ;;  %v5458_v33 = vpop.f32.mrb[69].mxu1  ;;  %v3133_v3 = vld [vmem:[#allocation8 + $0x8] sm:$0xff]  ;;  %v2982_v23 = vld [vmem:[#allocation14 + $0x8] sm:$0xff] }
0x1eab   :  { %5450 = vmatprep.mubr.msk.bf16.mxu0 %vm560_vm3, %v2867_v27  ;;  %v3032_v47 = vpop.f32.mrb[70].mxu1  ;;  %vm3158_vm1 = vcmp.gt.f32.partialorder %v3133_v3, 0.0 }
0x1eac   :  { %5785 = vtanh.f32 %v3035_v60  ;;  %5451 = vmatmul.mubr.msk.bf16.gmra.mrb[72].mxu0 %vm560_vm3, %v2868_v22  ;;  %v5459_v57 = vpop.f32.mrb[71].mxu1  ;;  %v5000_v49 = vmul.f32 -1.442695, %v3035_v60  ;;  %v8019_v60 = vsel %vm3158_vm1, 1, %v6628_v24 }
0x1ead   :  { %5468 = vmatprep.mubr.msk.bf16.mxu0 %vm6627_vm0, %v6626_v0 }
0x1eae   :  { %5787 = vpow2.f32 %v5000_v49 }
0x1eb4   :  { %5469 = vmatmul.mubr.msk.bf16.vlgmr.msra.gmra.mrb[76].mxu0 %vm437_vm2, %v3173_v1 }
0x1eb5   :  { %5479 = vmatpush3.bf16.msra.mxu0 %v7900_v32  ;;  %5480 = vmatprep.mubr.msk.bf16.mxu0 %vm6627_vm0, %v6626_v0 }
0x1eb6   :  { %v5786_v34 = vpop.eup %5785  ;;  %5490 = vmatprep.subr.bf16.mxu0 %v6626_v0 }
0x1eb7   :  { %3050 = vrot.lane.b32.xlu1 %v5786_v34, %s6630_s9 }
0x1eb8   :  { %v5788_v19 = vpop.eup %5787 }
0x1eb9   :  { %v3040_v37 = vadd.f32 1.0, %v5788_v19 }
0x1ebb   :  { %5789 = vrcp.f32 %v3040_v37 }
0x1ec5   :  { %v5790_v20 = vpop.eup %5789 }
0x1ec6   :  { %v3047_v46 = vmul.f32 %v5790_v20, %v7971_v31 }
0x1f29   :  { %v3051_v4 = vpop.permute.xlu1 %3050 }
0x1f2a   :  { %v3053_v7 = vmul.f32 %v5790_v20, %v3051_v4 }
0x1f2c   :  { %3055 = vrot.lane.b32.xlu1 %v3053_v7, %s8669_s15 }
0x1f7f   :  { %v5452_v39 = vpop.f32.mrb[72].mxu0 }
0x1f80   :  { %v2963_v29 = vadd.f32 %v5452_v39, %v7930_v38  ;;  %v2954_v54 = vpop.f32.mrb[73].mxu0 }
0x1f81   :  { %v2955_v61 = vadd.f32 %v7930_v38, %v2954_v54  ;;  %v5453_v30 = vpop.f32.mrb[74].mxu0 }
0x1f82   :  { %2975 = vst.msk [vmem:[#allocation4 + $0x30] sm:$0xff] %vm560_vm3, %v2963_v29  ;;  %v2966_v35 = vadd.f32 %v5453_v30, %v7930_v38  ;;  %v2957_v36 = vpop.f32.mrb[75].mxu0 }
0x1f83   :  { %2973 = vst.msk [vmem:[#allocation4 + $0x20] sm:$0xff] %vm560_vm3, %v2955_v61  ;;  %v2958_v41 = vadd.f32 %v7930_v38, %v2957_v36 }
0x1f84   :  { %2976 = vst.msk [vmem:[#allocation4 + $0x38] sm:$0xff] %vm560_vm3, %v2966_v35 }
0x1f85   :  { %2974 = vst.msk [vmem:[#allocation4 + $0x28] sm:$0xff] %vm560_vm3, %v2958_v41  ;;  %vm3076_vm3 = vcmp.eq.s32.totalorder %v7980_v14, 1 }
0x1f87   :  { %v3214_v63 = vpop.f32.mrb[76].mxu0 }
0x1f88   :  { %v5470_v26 = vpop.f32.mrb[77].mxu0 }
0x1f89   :  { %v3217_v17 = vpop.f32.mrb[78].mxu0 }
0x1f9e   :  { %v3056_v43 = vpop.permute.xlu1 %3055 }
0x1f9f   :  { %v7974_v52 = vadd.f32 %v3056_v43, %v3047_v46 }
0x1fa1   :  { %5791 = vtanh.f32 %v7974_v52  ;;  %v8029_v54 = vsel %vm3076_vm3, %v7974_v52, %v7971_v31 }
0x1fab   :  { %v5792_v42 = vpop.eup %5791 }
0x1fac   :  { %3061 = vrot.lane.b32.xlu1 %v5792_v42, %s8669_s15 }
0x1fb0   :  { %3078 = vrot.lane.b32.xlu1 %v7942_v51, %s6631_s20  ;;  %v5471_v51 = vpop.f32.mrb[79].mxu0 }
0x1fb1   :  { %v3317_v51 = vld [vmem:[#allocation4 + $0x10] sm:$0xff] }
0x201e   :  { %v3062_v50 = vpop.permute.xlu1 %3061 }
0x201f   :  { %v3064_v12 = vmul.f32 %v5790_v20, %v3062_v50 }
0x2021   :  { %v3071_v58 = vmul.f32 %v7987_v53, %v3064_v12 }
0x2022   :  { %v3079_v38 = vpop.permute.xlu1 %3078 }
0x2023   :  { %v3172_v13 = vpack.c.bf16 %v3071_v58, %v3071_v58  ;;  %v7993_v25 = vsel %vm3076_vm3, %v3064_v12, %v3079_v38 }
0x2024   :  { %v3085_v56 = vpack.c.bf16 %v7993_v25, %v7993_v25 }
0x2025   :  { %3221 = vrot.lane.b32.xlu1 %v3172_v13, %s6632_s11 }
0x2026   :  { %3087 = vrot.lane.b32.xlu0 %v3085_v56, %s6632_s11 }
0x2097   :  { %v3222_v62 = vpop.permute.xlu1 %3221 }
0x2098   :  { %v3088_v6 = vpop.permute.xlu0 %3087 }
0x2099   :  { %5463 = vmatmul.mubr.msk.bf16.vlgmr.msra.gmra.mrb[72].mxu1 %vm437_vm2, %v3088_v6 }
0x209a   :  { %5473 = vmatpush3.bf16.msra.mxu1 %v8000_v44  ;;  %5474 = vmatprep.mubr.msk.bf16.mxu1 %vm6627_vm0, %v6626_v0 }
0x209b   :  { %5484 = vmatprep.subr.bf16.mxu1 %v6626_v0 }
0x20a1   :  { %5475 = vmatmul.mubr.msk.bf16.vlgmr.msra.gmra.mrb[76].mxu1 %vm437_vm2, %v3222_v62 }
0x20a2   :  { %5485 = vmatpush3.bf16.msra.mxu1 %v7920_v15  ;;  %5486 = vmatprep.mubr.msk.bf16.mxu1 %vm6627_vm0, %v6626_v0 }
0x20a3   :  { %5496 = vmatprep.subr.bf16.mxu1 %v6626_v0 }
0x216c   :  { %v3126_v48 = vpop.f32.mrb[72].mxu1 }
0x216d   :  { %v3132_v59 = vadd.f32 %v3126_v48, %v3084_v40  ;;  %v5464_v2 = vpop.f32.mrb[73].mxu1 }
0x216e   :  { %v3129_v11 = vpop.f32.mrb[74].mxu1 }
0x216f   :  { %5793 = vtanh.f32 %v3132_v59  ;;  %v5465_v55 = vpop.f32.mrb[75].mxu1  ;;  %v5002_v33 = vmul.f32 -1.442695, %v3132_v59 }
0x2174   :  { %v3263_v9 = vpop.f32.mrb[76].mxu1 }
0x2175   :  { %v3264_v16 = vadd.f32 %v3263_v9, %v3214_v63  ;;  %v5476_v8 = vpop.f32.mrb[77].mxu1 }
0x2176   :  { %v3266_v21 = vpop.f32.mrb[78].mxu1 }
0x2177   :  { %v3275_v10 = vadd.f32 %v8012_v45, %v3264_v16  ;;  %v5477_v5 = vpop.f32.mrb[79].mxu1 }
0x2179   :  { %v5794_v22 = vpop.eup %5793  ;;  %5795 = vtanh.f32 %v3275_v10  ;;  %v5006_v47 = vmul.f32 -1.442695, %v3275_v10 }
0x217a   :  { %3143 = vrot.lane.b32.xlu0 %v5794_v22, %s6630_s9  ;;  %5797 = vpow2.f32 %v5002_v33 }
0x217b   :  { %5799 = vpow2.f32 %v5006_v47 }
0x2183   :  { %v5796_v27 = vpop.eup %5795 }
0x2184   :  { %3289 = vrot.lane.b32.xlu1 %v5796_v27, %s6630_s9  ;;  %v5798_v57 = vpop.eup %5797 }
0x2185   :  { %v3137_v34 = vadd.f32 1.0, %v5798_v57  ;;  %v5800_v49 = vpop.eup %5799 }
0x2186   :  { %v3279_v19 = vadd.f32 1.0, %v5800_v49 }
0x2187   :  { %5801 = vrcp.f32 %v3137_v34 }
0x2188   :  { %3283 = vrot.lane.b32.xlu1 %v2982_v23, %s8669_s15  ;;  %5803 = vrcp.f32 %v3279_v19 }
0x218c   :  { %3167 = vperm.xlu1 %5640, %v8019_v60  }
0x2190   :  { %3161 = vperm.xlu1 %5640, %v3133_v3  }
0x2191   :  { %v5802_v37 = vpop.eup %5801 }
0x2192   :  { %v5804_v7 = vpop.eup %5803  ;;  %v3140_v61 = vmul.f32 %v5802_v37, %v8029_v54 }
0x2194   :  { %3306 = vrot.lane.b32.xlu1 %v2979_v18, %s6631_s20 }
0x21ec   :  { %v3144_v20 = vpop.permute.xlu0 %3143 }
0x21ed   :  { %v3146_v4 = vmul.f32 %v5802_v37, %v3144_v20  ;;  %v3366_v20 = vld [vmem:[#allocation8 + $0x10] sm:$0xff] }
0x21ee   :  { %vm3391_vm15 = vcmp.gt.f32.partialorder %v3366_v20, 0.0 }
0x21ef   :  { %3148 = vrot.lane.b32.xlu0 %v3146_v4, %s8669_s15 }
0x21f6   :  { %v3290_v39 = vpop.permute.xlu1 %3289 }
0x21f7   :  { %v3292_v29 = vmul.f32 %v5804_v7, %v3290_v39 }
0x21f9   :  { %3294 = vrot.lane.b32.xlu0 %v3292_v29, %s8669_s15  ;;  %v8085_v29 = vsel %vm3391_vm15, 1, %v6628_v24 }
0x21fa   :  { %v8035_v36 = vpop.permute.xlu1 %3283 }
0x21fb   :  { %v3286_v41 = vmul.f32 %v5804_v7, %v8035_v36 }
0x220b   :  { %v8043_v52 = vpop.permute.xlu1 %3167 }
0x220c   :  { %vm3169_vm14 = vcmp.eq.s32.totalorder %v8043_v52, 1 }
0x220f   :  { %v3162_v50 = vpop.permute.xlu1 %3161 }
0x2213   :  { %v3307_v28 = vpop.permute.xlu1 %3306 }
0x2261   :  { %v3149_v30 = vpop.permute.xlu0 %3148 }
0x2262   :  { %v8032_v35 = vadd.f32 %v3149_v30, %v3140_v61 }
0x2264   :  { %5805 = vtanh.f32 %v8032_v35 }
0x226b   :  { %v3295_v46 = vpop.permute.xlu0 %3294 }
0x226c   :  { %v8038_v43 = vadd.f32 %v3295_v46, %v3286_v41  ;;  %v8093_v46 = vsel %vm3169_vm14, %v8032_v35, %v8029_v54 }
0x226e   :  { %v5806_v42 = vpop.eup %5805  ;;  %5807 = vtanh.f32 %v8038_v43 }
0x226f   :  { %3154 = vrot.lane.b32.xlu0 %v5806_v42, %s8669_s15 }
0x2278   :  { %v5808_v31 = vpop.eup %5807 }
0x2279   :  { %3300 = vrot.lane.b32.xlu0 %v5808_v31, %s8669_s15 }
0x22e1   :  { %v3155_v18 = vpop.permute.xlu0 %3154 }
0x22e2   :  { %v3157_v1 = vmul.f32 %v5802_v37, %v3155_v18 }
0x22e4   :  { %v8049_v12 = vsel %vm3169_vm14, %v3157_v1, %v7993_v25  ;;  %v3164_v58 = vmul.f32 %v3162_v50, %v3157_v1  ;;  %v8103_v1 = vsel %vm3076_vm3, %v8038_v43, %v8035_v36 }
0x22e5   :  { %v3318_v38 = vpack.c.bf16 %v8049_v12, %v8049_v12 }
0x22e6   :  { %v3405_v13 = vpack.c.bf16 %v3164_v58, %v3164_v58 }
0x22e7   :  { %3320 = vrot.lane.b32.xlu0 %v3318_v38, %s6632_s11 }
0x22eb   :  { %3454 = vrot.lane.b32.xlu0 %v3405_v13, %s6632_s11  ;;  %v3301_v56 = vpop.permute.xlu0 %3300 }
0x22ec   :  { %v8055_v6 = vmul.f32 %v5804_v7, %v3301_v56 }
0x22ee   :  { %v8060_v62 = vsel %vm3076_vm3, %v8055_v6, %v3307_v28 }
0x22ef   :  { %v3406_v25 = vpack.c.bf16 %v8060_v62, %v8060_v62 }
0x22f1   :  { %3408 = vrot.lane.b32.xlu1 %v3406_v25, %s6632_s11 }
0x2359   :  { %v3321_v63 = vpop.permute.xlu0 %3320 }
0x235a   :  { %5481 = vmatmul.mubr.msk.bf16.vlgmr.msra.gmra.mrb[80].mxu0 %vm437_vm2, %v3321_v63 }
0x235b   :  { %5491 = vmatpush3.bf16.msra.mxu0 %v8000_v44  ;;  %5492 = vmatprep.mubr.msk.bf16.mxu0 %vm6627_vm0, %v6626_v0 }
0x235c   :  { %5502 = vmatprep.subr.bf16.mxu0 %v6626_v0 }
0x235d   :  { %v3455_v26 = vpop.permute.xlu0 %3454 }
0x2362   :  { %5493 = vmatmul.mubr.msk.bf16.vlgmr.msra.gmra.mrb[84].mxu0 %vm437_vm2, %v3455_v26 }
0x2363   :  { %v3409_v17 = vpop.permute.xlu1 %3408  ;;  %5503 = vmatpush3.bf16.msra.mxu0 %v7920_v15  ;;  %5504 = vmatprep.mubr.msk.bf16.mxu0 %vm6627_vm0, %v6626_v0 }
0x2364   :  { %5487 = vmatmul.mubr.msk.bf16.vlgmr.msra.gmra.mrb[80].mxu1 %vm437_vm2, %v3409_v17  ;;  %5514 = vmatprep.subr.bf16.mxu0 %v6626_v0 }
0x2365   :  { %5497 = vmatpush3.bf16.msra.mxu1 %v7900_v32  ;;  %5498 = vmatprep.mubr.msk.bf16.mxu1 %vm6627_vm0, %v6626_v0 }
0x2366   :  { %5508 = vmatprep.subr.bf16.mxu1 %v6626_v0 }
0x242d   :  { %v3359_v40 = vpop.f32.mrb[80].mxu0 }
0x242e   :  { %v3365_v48 = vadd.f32 %v3359_v40, %v3317_v51  ;;  %v5482_v59 = vpop.f32.mrb[81].mxu0 }
0x242f   :  { %v3362_v2 = vpop.f32.mrb[82].mxu0 }
0x2430   :  { %5809 = vtanh.f32 %v3365_v48  ;;  %v5483_v11 = vpop.f32.mrb[83].mxu0  ;;  %v5008_v47 = vmul.f32 -1.442695, %v3365_v48  ;;  %v3546_v48 = vld [vmem:[#allocation4 + $0x18] sm:$0xff] }
0x2435   :  { %v3493_v55 = vpop.f32.mrb[84].mxu0 }
0x2436   :  { %v5494_v9 = vpop.f32.mrb[85].mxu0 }
0x2437   :  { %v3447_v16 = vpop.f32.mrb[80].mxu1  ;;  %v3496_v8 = vpop.f32.mrb[86].mxu0 }
0x2438   :  { %v3494_v21 = vadd.f32 %v3493_v55, %v3447_v16  ;;  %v5488_v10 = vpop.f32.mrb[81].mxu1  ;;  %v5495_v5 = vpop.f32.mrb[87].mxu0 }
0x2439   :  { %v3450_v22 = vpop.f32.mrb[82].mxu1 }
0x243a   :  { %v5810_v27 = vpop.eup %5809  ;;  %v3499_v3 = vadd.f32 %v8012_v45, %v3494_v21  ;;  %v5489_v23 = vpop.f32.mrb[83].mxu1 }
0x243b   :  { %3376 = vrot.lane.b32.xlu1 %v5810_v27, %s6630_s9 }
0x243c   :  { %5811 = vtanh.f32 %v3499_v3  ;;  %v5011_v57 = vmul.f32 -1.442695, %v3499_v3 }
0x243d   :  { %5813 = vpow2.f32 %v5008_v47 }
0x243e   :  { %5815 = vpow2.f32 %v5011_v57 }
0x2446   :  { %v5812_v33 = vpop.eup %5811 }
0x2447   :  { %3510 = vrot.lane.b32.xlu0 %v5812_v33, %s6630_s9  ;;  %v5814_v34 = vpop.eup %5813 }
0x2448   :  { %v3370_v49 = vadd.f32 1.0, %v5814_v34  ;;  %v5816_v19 = vpop.eup %5815 }
0x2449   :  { %v3504_v37 = vadd.f32 1.0, %v5816_v19 }
0x244a   :  { %5817 = vrcp.f32 %v3370_v49 }
0x244b   :  { %5819 = vrcp.f32 %v3504_v37 }
0x2454   :  { %v5818_v4 = vpop.eup %5817 }
0x2455   :  { %v5820_v61 = vpop.eup %5819  ;;  %v3373_v42 = vmul.f32 %v5818_v4, %v8093_v46 }
0x2456   :  { %v3507_v50 = vmul.f32 %v5820_v61, %v8103_v1 }
0x24ad   :  { %v3377_v7 = vpop.permute.xlu1 %3376 }
0x24ae   :  { %v3379_v39 = vmul.f32 %v5818_v4, %v3377_v7 }
0x24b0   :  { %3381 = vrot.lane.b32.xlu1 %v3379_v39, %s8669_s15 }
0x24b4   :  { %3400 = vperm.xlu1 %5640, %v8085_v29  }
0x24b8   :  { %3394 = vperm.xlu1 %5640, %v3366_v20   ;;  %v8156_v20 = vld [vmem:[#allocation8 + $0x18] sm:$0xff] }
0x24b9   :  { %v3511_v30 = vpop.permute.xlu0 %3510  ;;  %vm3620_vm6 = vcmp.gt.f32.partialorder %v8156_v20, 0.0 }
0x24ba   :  { %v3513_v41 = vmul.f32 %v5820_v61, %v3511_v30 }
0x24bc   :  { %3515 = vrot.lane.b32.xlu0 %v3513_v41, %s8669_s15  ;;  %v8161_v41 = vsel %vm3620_vm6, 1, %v6628_v24 }
0x2522   :  { %v3382_v31 = vpop.permute.xlu1 %3381 }
0x2523   :  { %v8096_v18 = vadd.f32 %v3382_v31, %v3373_v42 }
0x2525   :  { %5821 = vtanh.f32 %v8096_v18 }
0x252e   :  { %v3516_v58 = vpop.permute.xlu0 %3515 }
0x252f   :  { %v5822_v38 = vpop.eup %5821  ;;  %v8106_v52 = vadd.f32 %v3516_v58, %v3507_v50 }
0x2530   :  { %3387 = vrot.lane.b32.xlu0 %v5822_v38, %s8669_s15 }
0x2531   :  { %5823 = vtanh.f32 %v8106_v52 }
0x2533   :  { %v8112_v35 = vpop.permute.xlu1 %3400 }
0x2534   :  { %3534 = vperm.xlu0 %5641, %v8019_v60   ;;  %vm3402_vm4 = vcmp.eq.s32.totalorder %v8112_v35, 1 }
0x2535   :  { %v8170_v58 = vsel %vm3402_vm4, %v8096_v18, %v8093_v46 }
0x2537   :  { %v3395_v43 = vpop.permute.xlu1 %3394 }
0x253b   :  { %v5824_v54 = vpop.eup %5823 }
0x253c   :  { %3521 = vrot.lane.b32.xlu1 %v5824_v54, %s8669_s15 }
0x25a2   :  { %v3388_v14 = vpop.permute.xlu0 %3387 }
0x25a3   :  { %v3390_v36 = vmul.f32 %v5818_v4, %v3388_v14 }
0x25a5   :  { %v8118_v13 = vsel %vm3402_vm4, %v3390_v36, %v8049_v12  ;;  %v3397_v56 = vmul.f32 %v3395_v43, %v3390_v36 }
0x25a6   :  { %v3547_v28 = vpack.c.bf16 %v8118_v13, %v8118_v13 }
0x25a7   :  { %v3634_v60 = vpack.c.bf16 %v3397_v56, %v3397_v56 }
0x25a8   :  { %3549 = vrot.lane.b32.xlu0 %v3547_v28, %s6632_s11 }
0x25ac   :  { %3683 = vrot.lane.b32.xlu0 %v3634_v60, %s6632_s11 }
0x25ae   :  { %v3522_v25 = vpop.permute.xlu1 %3521 }
0x25af   :  { %v8124_v63 = vmul.f32 %v5820_v61, %v3522_v25 }
0x25b3   :  { %v8126_v26 = vpop.permute.xlu0 %3534 }
0x25b4   :  { %vm3536_vm5 = vcmp.eq.s32.totalorder %v8126_v26, 1 }
0x25b5   :  { %v8133_v12 = vsel %vm3536_vm5, %v8124_v63, %v8060_v62  ;;  %v8181_v43 = vsel %vm3536_vm5, %v8106_v52, %v8103_v1 }
0x25b6   :  { %v3635_v17 = vpack.c.bf16 %v8133_v12, %v8133_v12 }
0x25b8   :  { %3637 = vrot.lane.b32.xlu1 %v3635_v17, %s6632_s11 }
0x261a   :  { %v3550_v51 = vpop.permute.xlu0 %3549 }
0x261b   :  { %5499 = vmatmul.mubr.msk.bf16.vlgmr.msra.gmra.mrb[84].mxu1 %vm437_vm2, %v3550_v51 }
0x261c   :  { %5509 = vmatpush3.bf16.msra.mxu1 %v8000_v44  ;;  %5510 = vmatprep.mubr.msk.bf16.mxu1 %vm6627_vm0, %v6626_v0 }
0x261d   :  { %5520 = vmatprep.subr.bf16.mxu1 %v6626_v0 }
0x261e   :  { %v3684_v40 = vpop.permute.xlu0 %3683 }
0x2623   :  { %5511 = vmatmul.mubr.msk.bf16.vlgmr.msra.gmra.mrb[88].mxu1 %vm437_vm2, %v3684_v40 }
0x2624   :  { %5521 = vmatpush3.bf16.msra.mxu1 %v7920_v15  ;;  %5522 = vmatprep.mubr.msk.bf16.mxu1 %vm6627_vm0, %v6626_v0 }
0x2625   :  { %5532 = vmatprep.subr.bf16.mxu1 %v6626_v0 }
0x262a   :  { %v3638_v62 = vpop.permute.xlu1 %3637 }
0x262b   :  { %5505 = vmatmul.mubr.msk.bf16.vlgmr.msra.gmra.mrb[88].mxu0 %vm437_vm2, %v3638_v62 }
0x262c   :  { %5515 = vmatpush3.bf16.msra.mxu0 %v7900_v32  ;;  %5516 = vmatprep.mubr.msk.bf16.mxu0 %vm6627_vm0, %v6626_v0 }
0x262d   :  { %5526 = vmatprep.subr.bf16.mxu0 %v6626_v0 }
0x26ee   :  { %v3588_v59 = vpop.f32.mrb[84].mxu1 }
0x26ef   :  { %v3594_v2 = vadd.f32 %v3588_v59, %v3546_v48  ;;  %v5500_v11 = vpop.f32.mrb[85].mxu1 }
0x26f0   :  { %v3591_v55 = vpop.f32.mrb[86].mxu1  ;;  %v3775_v11 = vld [vmem:[#allocation4 + $0x20] sm:$0xff] }
0x26f1   :  { %5825 = vtanh.f32 %v3594_v2  ;;  %v5501_v9 = vpop.f32.mrb[87].mxu1  ;;  %v5013_v34 = vmul.f32 -1.442695, %v3594_v2 }
0x26f6   :  { %v3722_v16 = vpop.f32.mrb[88].mxu1 }
0x26f7   :  { %v5512_v8 = vpop.f32.mrb[89].mxu1 }
0x26f8   :  { %v3725_v21 = vpop.f32.mrb[90].mxu1 }
0x26f9   :  { %v5513_v10 = vpop.f32.mrb[91].mxu1 }
0x26fb   :  { %v5826_v5 = vpop.eup %5825 }
0x26fc   :  { %3605 = vrot.lane.b32.xlu1 %v5826_v5, %s6630_s9 }
0x26fe   :  { %v3676_v22 = vpop.f32.mrb[88].mxu0 }
0x26ff   :  { %v3723_v27 = vadd.f32 %v3722_v16, %v3676_v22  ;;  %v5506_v3 = vpop.f32.mrb[89].mxu0 }
0x2700   :  { %v3679_v23 = vpop.f32.mrb[90].mxu0 }
0x2701   :  { %v3728_v33 = vadd.f32 %v8012_v45, %v3723_v27  ;;  %v5507_v47 = vpop.f32.mrb[91].mxu0 }
0x2703   :  { %5827 = vtanh.f32 %v3728_v33  ;;  %v5016_v37 = vmul.f32 -1.442695, %v3728_v33 }
0x2704   :  { %5829 = vpow2.f32 %v5013_v34 }
0x270d   :  { %v5828_v57 = vpop.eup %5827 }
0x270e   :  { %3739 = vrot.lane.b32.xlu0 %v5828_v57, %s6630_s9  ;;  %v5830_v49 = vpop.eup %5829 }
0x270f   :  { %v3599_v19 = vadd.f32 1.0, %v5830_v49 }
0x2711   :  { %5831 = vrcp.f32 %v3599_v19 }
0x2712   :  { %5833 = vpow2.f32 %v5016_v37 }
0x271b   :  { %v5832_v4 = vpop.eup %5831 }
0x271c   :  { %v5834_v39 = vpop.eup %5833  ;;  %v3602_v38 = vmul.f32 %v5832_v4, %v8170_v58 }
0x271d   :  { %v3733_v30 = vadd.f32 1.0, %v5834_v39 }
0x271f   :  { %5835 = vrcp.f32 %v3733_v30 }
0x2729   :  { %v5836_v42 = vpop.eup %5835 }
0x272a   :  { %v3736_v35 = vmul.f32 %v5836_v42, %v8181_v43 }
0x276e   :  { %v3606_v7 = vpop.permute.xlu1 %3605 }
0x276f   :  { %v3608_v61 = vmul.f32 %v5832_v4, %v3606_v7 }
0x2771   :  { %3610 = vrot.lane.b32.xlu1 %v3608_v61, %s8669_s15  ;;  %v8233_v61 = vld [vmem:[#allocation8 + $0x20] sm:$0xff] }
0x2772   :  { %vm3849_vm9 = vcmp.gt.f32.partialorder %v8233_v61, 0.0 }
0x2775   :  { %3629 = vperm.xlu1 %5640, %v8161_v41  }
0x2779   :  { %3623 = vperm.xlu1 %5640, %v8156_v20  }
0x2780   :  { %v3740_v31 = vpop.permute.xlu0 %3739 }
0x2781   :  { %v3742_v50 = vmul.f32 %v5836_v42, %v3740_v31 }
0x2783   :  { %3744 = vrot.lane.b32.xlu0 %v3742_v50, %s8669_s15 }
0x27e3   :  { %v3611_v54 = vpop.permute.xlu1 %3610 }
0x27e4   :  { %v8173_v14 = vadd.f32 %v3611_v54, %v3602_v38  ;;  %v8238_v38 = vsel %vm3849_vm9, 1, %v6628_v24 }
0x27e6   :  { %5837 = vtanh.f32 %v8173_v14 }
0x27f0   :  { %v5838_v36 = vpop.eup %5837 }
0x27f1   :  { %3616 = vrot.lane.b32.xlu0 %v5838_v36, %s8669_s15 }
0x27f4   :  { %v8189_v28 = vpop.permute.xlu1 %3629 }
0x27f5   :  { %3763 = vperm.xlu0 %5641, %v8085_v29   ;;  %v3745_v46 = vpop.permute.xlu0 %3744  ;;  %vm3631_vm7 = vcmp.eq.s32.totalorder %v8189_v28, 1 }
0x27f6   :  { %v8185_v18 = vadd.f32 %v3745_v46, %v3736_v35 }
0x27f8   :  { %5839 = vtanh.f32 %v8185_v18  ;;  %v3624_v1 = vpop.permute.xlu1 %3623 }
0x2802   :  { %v5840_v56 = vpop.eup %5839 }
0x2803   :  { %3750 = vrot.lane.b32.xlu1 %v5840_v56, %s8669_s15  ;;  %v8247_v56 = vsel %vm3631_vm7, %v8173_v14, %v8170_v58 }
0x2863   :  { %v3617_v60 = vpop.permute.xlu0 %3616 }
0x2864   :  { %v3619_v25 = vmul.f32 %v5832_v4, %v3617_v60 }
0x2866   :  { %v8195_v52 = vsel %vm3631_vm7, %v3619_v25, %v8118_v13  ;;  %v3626_v29 = vmul.f32 %v3624_v1, %v3619_v25 }
0x2867   :  { %v3776_v26 = vpack.c.bf16 %v8195_v52, %v8195_v52 }
0x2868   :  { %v3863_v17 = vpack.c.bf16 %v3626_v29, %v3626_v29 }
0x2869   :  { %3778 = vrot.lane.b32.xlu0 %v3776_v26, %s6632_s11 }
0x286d   :  { %3912 = vrot.lane.b32.xlu0 %v3863_v17, %s6632_s11 }
0x2874   :  { %v8201_v51 = vpop.permute.xlu0 %3763 }
0x2875   :  { %v3751_v40 = vpop.permute.xlu1 %3750  ;;  %vm3765_vm8 = vcmp.eq.s32.totalorder %v8201_v51, 1 }
0x2876   :  { %v8203_v62 = vmul.f32 %v5836_v42, %v3751_v40  ;;  %v8258_v26 = vsel %vm3765_vm8, %v8185_v18, %v8181_v43 }
0x2878   :  { %v8210_v13 = vsel %vm3765_vm8, %v8203_v62, %v8133_v12 }
0x2879   :  { %v3864_v48 = vpack.c.bf16 %v8210_v13, %v8210_v13 }
0x287b   :  { %3866 = vrot.lane.b32.xlu1 %v3864_v48, %s6632_s11 }
0x28db   :  { %v3779_v59 = vpop.permute.xlu0 %3778 }
0x28dc   :  { %5517 = vmatmul.mubr.msk.bf16.vlgmr.msra.gmra.mrb[92].mxu0 %vm437_vm2, %v3779_v59 }
0x28dd   :  { %5527 = vmatpush3.bf16.msra.mxu0 %v8000_v44  ;;  %5528 = vmatprep.mubr.msk.bf16.mxu0 %vm6627_vm0, %v6626_v0 }
0x28de   :  { %5538 = vmatprep.subr.bf16.mxu0 %v6626_v0 }
0x28df   :  { %v3913_v2 = vpop.permute.xlu0 %3912 }
0x28e4   :  { %5529 = vmatmul.mubr.msk.bf16.vlgmr.msra.gmra.mrb[96].mxu0 %vm437_vm2, %v3913_v2 }
0x28e5   :  { %5539 = vmatpush3.bf16.msra.mxu0 %v7920_v15  ;;  %5540 = vmatprep.mubr.msk.bf16.mxu0 %vm6627_vm0, %v6626_v0 }
0x28e6   :  { %5550 = vmatprep.subr.bf16.mxu0 %v6626_v0 }
0x28ed   :  { %v3867_v12 = vpop.permute.xlu1 %3866 }
0x28ee   :  { %5523 = vmatmul.mubr.msk.bf16.vlgmr.msra.gmra.mrb[92].mxu1 %vm437_vm2, %v3867_v12 }
0x28ef   :  { %5533 = vmatpush3.bf16.msra.mxu1 %v7900_v32  ;;  %5534 = vmatprep.mubr.msk.bf16.mxu1 %vm6627_vm0, %v6626_v0 }
0x28f0   :  { %5544 = vmatprep.subr.bf16.mxu1 %v6626_v0 }
0x29af   :  { %v3817_v55 = vpop.f32.mrb[92].mxu0 }
0x29b0   :  { %v3823_v9 = vadd.f32 %v3817_v55, %v3775_v11  ;;  %v5518_v16 = vpop.f32.mrb[93].mxu0 }
0x29b1   :  { %v3820_v8 = vpop.f32.mrb[94].mxu0 }
0x29b2   :  { %5841 = vtanh.f32 %v3823_v9  ;;  %v5519_v21 = vpop.f32.mrb[95].mxu0  ;;  %v5018_v37 = vmul.f32 -1.442695, %v3823_v9 }
0x29b3   :  { %v4004_v21 = vld [vmem:[#allocation4 + $0x28] sm:$0xff] }
0x29b7   :  { %v3951_v10 = vpop.f32.mrb[96].mxu0 }
0x29b8   :  { %v5530_v5 = vpop.f32.mrb[97].mxu0 }
0x29b9   :  { %v3954_v22 = vpop.f32.mrb[98].mxu0 }
0x29ba   :  { %v5531_v27 = vpop.f32.mrb[99].mxu0 }
0x29bc   :  { %v5842_v3 = vpop.eup %5841 }
0x29bd   :  { %3834 = vrot.lane.b32.xlu1 %v5842_v3, %s6630_s9 }
0x29c1   :  { %v3905_v23 = vpop.f32.mrb[92].mxu1 }
0x29c2   :  { %v3952_v33 = vadd.f32 %v3951_v10, %v3905_v23  ;;  %v5524_v47 = vpop.f32.mrb[93].mxu1 }
0x29c3   :  { %v3908_v57 = vpop.f32.mrb[94].mxu1 }
0x29c4   :  { %v3957_v34 = vadd.f32 %v8012_v45, %v3952_v33  ;;  %v5525_v49 = vpop.f32.mrb[95].mxu1 }
0x29c6   :  { %5843 = vtanh.f32 %v3957_v34  ;;  %v5021_v39 = vmul.f32 -1.442695, %v3957_v34 }
0x29c7   :  { %5845 = vpow2.f32 %v5018_v37 }
0x29d0   :  { %v5844_v19 = vpop.eup %5843 }
0x29d1   :  { %3968 = vrot.lane.b32.xlu0 %v5844_v19, %s6630_s9  ;;  %v5846_v4 = vpop.eup %5845 }
0x29d2   :  { %v3828_v7 = vadd.f32 1.0, %v5846_v4 }
0x29d4   :  { %5847 = vrcp.f32 %v3828_v7 }
0x29d5   :  { %5849 = vpow2.f32 %v5021_v39 }
0x29de   :  { %v5848_v30 = vpop.eup %5847 }
0x29df   :  { %v5850_v50 = vpop.eup %5849  ;;  %v3831_v60 = vmul.f32 %v5848_v30, %v8247_v56 }
0x29e0   :  { %v3962_v54 = vadd.f32 1.0, %v5850_v50 }
0x29e2   :  { %5851 = vrcp.f32 %v3962_v54 }
0x29ec   :  { %v5852_v36 = vpop.eup %5851 }
0x29ed   :  { %v3965_v58 = vmul.f32 %v5852_v36, %v8258_v26 }
0x2a2f   :  { %v3835_v42 = vpop.permute.xlu1 %3834 }
0x2a30   :  { %v3837_v31 = vmul.f32 %v5848_v30, %v3835_v42 }
0x2a32   :  { %3839 = vrot.lane.b32.xlu1 %v3837_v31, %s8669_s15 }
0x2a36   :  { %3858 = vperm.xlu1 %5640, %v8238_v38  }
0x2a3a   :  { %3852 = vperm.xlu1 %5640, %v8233_v61  }
0x2a43   :  { %v3969_v35 = vpop.permute.xlu0 %3968 }
0x2a44   :  { %v3971_v46 = vmul.f32 %v5852_v36, %v3969_v35 }
0x2a46   :  { %3973 = vrot.lane.b32.xlu0 %v3971_v46, %s8669_s15 }
0x2aa4   :  { %v3840_v25 = vpop.permute.xlu1 %3839 }
0x2aa5   :  { %v8250_v1 = vadd.f32 %v3840_v25, %v3831_v60 }
0x2aa7   :  { %5853 = vtanh.f32 %v8250_v1 }
0x2ab1   :  { %v5854_v29 = vpop.eup %5853 }
0x2ab2   :  { %3845 = vrot.lane.b32.xlu0 %v5854_v29, %s8669_s15 }
0x2ab5   :  { %v8266_v40 = vpop.permute.xlu1 %3858 }
0x2ab6   :  { %3992 = vperm.xlu0 %5641, %v8161_v41   ;;  %vm3860_vm10 = vcmp.eq.s32.totalorder %v8266_v40, 1 }
0x2ab8   :  { %v3974_v14 = vpop.permute.xlu0 %3973 }
0x2ab9   :  { %v8262_v28 = vadd.f32 %v3974_v14, %v3965_v58  ;;  %v3853_v43 = vpop.permute.xlu1 %3852 }
0x2abb   :  { %5855 = vtanh.f32 %v8262_v28 }
0x2ac5   :  { %v5856_v17 = vpop.eup %5855 }
0x2ac6   :  { %3979 = vrot.lane.b32.xlu1 %v5856_v17, %s8669_s15 }
0x2b24   :  { %v3846_v48 = vpop.permute.xlu0 %3845 }
0x2b25   :  { %v3848_v59 = vmul.f32 %v5848_v30, %v3846_v48 }
0x2b27   :  { %v8272_v41 = vsel %vm3860_vm10, %v3848_v59, %v8195_v52  ;;  %v3855_v18 = vmul.f32 %v3853_v43, %v3848_v59  ;;  %v8324_v59 = vsel %vm3860_vm10, %v8250_v1, %v8247_v56 }
0x2b28   :  { %v4005_v51 = vpack.c.bf16 %v8272_v41, %v8272_v41 }
0x2b29   :  { %v4092_v2 = vpack.c.bf16 %v3855_v18, %v3855_v18 }
0x2b2a   :  { %4007 = vrot.lane.b32.xlu0 %v4005_v51, %s6632_s11 }
0x2b2e   :  { %4141 = vrot.lane.b32.xlu0 %v4092_v2, %s6632_s11 }
0x2b35   :  { %v8278_v12 = vpop.permute.xlu0 %3992 }
0x2b36   :  { %vm3994_vm11 = vcmp.eq.s32.totalorder %v8278_v12, 1 }
0x2b38   :  { %v3980_v11 = vpop.permute.xlu1 %3979 }
0x2b39   :  { %v8280_v55 = vmul.f32 %v5852_v36, %v3980_v11  ;;  %v8310_v36 = vld [vmem:[#allocation8 + $0x28] sm:$0xff]  ;;  %v8336_v11 = vsel %vm3994_vm11, %v8262_v28, %v8258_v26 }
0x2b3a   :  { %vm4078_vm12 = vcmp.gt.f32.partialorder %v8310_v36, 0.0 }
0x2b3b   :  { %v8287_v52 = vsel %vm3994_vm11, %v8280_v55, %v8210_v13  ;;  %v8315_v25 = vsel %vm4078_vm12, 1, %v6628_v24 }
0x2b3c   :  { %v4093_v9 = vpack.c.bf16 %v8287_v52, %v8287_v52 }
0x2b3e   :  { %4095 = vrot.lane.b32.xlu1 %v4093_v9, %s6632_s11 }
0x2b9c   :  { %v4008_v16 = vpop.permute.xlu0 %4007 }
0x2b9d   :  { %5535 = vmatmul.mubr.msk.bf16.vlgmr.msra.gmra.mrb[96].mxu1 %vm437_vm2, %v4008_v16 }
0x2b9e   :  { %5545 = vmatpush3.bf16.msra.mxu1 %v8000_v44  ;;  %5546 = vmatprep.mubr.msk.bf16.mxu1 %vm6627_vm0, %v6626_v0 }
0x2b9f   :  { %5556 = vmatprep.subr.bf16.mxu1 %v6626_v0 }
0x2ba0   :  { %v4142_v8 = vpop.permute.xlu0 %4141 }
0x2ba5   :  { %5547 = vmatmul.mubr.msk.bf16.vlgmr.msra.gmra.mrb[100].mxu1 %vm437_vm2, %v4142_v8 }
0x2ba6   :  { %5557 = vmatpush3.bf16.msra.mxu1 %v7920_v15  ;;  %5558 = vmatprep.mubr.msk.bf16.mxu1 %vm6627_vm0, %v6626_v0 }
0x2ba7   :  { %5568 = vmatprep.subr.bf16.mxu1 %v6626_v0 }
0x2bb0   :  { %v4096_v13 = vpop.permute.xlu1 %4095 }
0x2bb1   :  { %5541 = vmatmul.mubr.msk.bf16.vlgmr.msra.gmra.mrb[100].mxu0 %vm437_vm2, %v4096_v13 }
0x2bb2   :  { %5551 = vmatpush3.bf16.msra.mxu0 %v7900_v32  ;;  %5552 = vmatprep.mubr.msk.bf16.mxu0 %vm6627_vm0, %v6626_v0 }
0x2bb3   :  { %5562 = vmatprep.subr.bf16.mxu0 %v6626_v0 }
0x2c70   :  { %v4046_v10 = vpop.f32.mrb[96].mxu1 }
0x2c71   :  { %v4052_v5 = vadd.f32 %v4046_v10, %v4004_v21  ;;  %v5536_v22 = vpop.f32.mrb[97].mxu1 }
0x2c72   :  { %v4049_v27 = vpop.f32.mrb[98].mxu1 }
0x2c73   :  { %5857 = vtanh.f32 %v4052_v5  ;;  %v5537_v3 = vpop.f32.mrb[99].mxu1  ;;  %v5023_v42 = vmul.f32 -1.442695, %v4052_v5 }
0x2c78   :  { %v4180_v23 = vpop.f32.mrb[100].mxu1 }
0x2c79   :  { %v5548_v33 = vpop.f32.mrb[101].mxu1 }
0x2c7a   :  { %v4183_v47 = vpop.f32.mrb[102].mxu1  ;;  %v4233_v33 = vld [vmem:[#allocation4 + $0x30] sm:$0xff] }
0x2c7b   :  { %v5549_v57 = vpop.f32.mrb[103].mxu1 }
0x2c7d   :  { %v5858_v34 = vpop.eup %5857 }
0x2c7e   :  { %4063 = vrot.lane.b32.xlu1 %v5858_v34, %s6630_s9 }
0x2c84   :  { %v4134_v49 = vpop.f32.mrb[100].mxu0 }
0x2c85   :  { %v4181_v19 = vadd.f32 %v4180_v23, %v4134_v49  ;;  %v5542_v37 = vpop.f32.mrb[101].mxu0 }
0x2c86   :  { %v4137_v4 = vpop.f32.mrb[102].mxu0 }
0x2c87   :  { %v4186_v7 = vadd.f32 %v8012_v45, %v4181_v19  ;;  %v5543_v39 = vpop.f32.mrb[103].mxu0 }
0x2c89   :  { %5859 = vtanh.f32 %v4186_v7  ;;  %v5026_v54 = vmul.f32 -1.442695, %v4186_v7 }
0x2c8a   :  { %5861 = vpow2.f32 %v5023_v42 }
0x2c93   :  { %v5860_v30 = vpop.eup %5859 }
0x2c94   :  { %4197 = vrot.lane.b32.xlu0 %v5860_v30, %s6630_s9  ;;  %v5862_v31 = vpop.eup %5861 }
0x2c95   :  { %v4057_v50 = vadd.f32 1.0, %v5862_v31 }
0x2c97   :  { %5863 = vrcp.f32 %v4057_v50 }
0x2c98   :  { %5865 = vpow2.f32 %v5026_v54 }
0x2ca1   :  { %v5864_v35 = vpop.eup %5863 }
0x2ca2   :  { %v5866_v29 = vpop.eup %5865  ;;  %v4060_v43 = vmul.f32 %v5864_v35, %v8324_v59 }
0x2ca3   :  { %v4191_v58 = vadd.f32 1.0, %v5866_v29 }
0x2ca5   :  { %5867 = vrcp.f32 %v4191_v58 }
0x2caf   :  { %v5868_v14 = vpop.eup %5867 }
0x2cb0   :  { %v4194_v56 = vmul.f32 %v5868_v14, %v8336_v11 }
0x2cf0   :  { %v4064_v46 = vpop.permute.xlu1 %4063 }
0x2cf1   :  { %v4066_v60 = vmul.f32 %v5864_v35, %v4064_v46 }
0x2cf3   :  { %4068 = vrot.lane.b32.xlu1 %v4066_v60, %s8669_s15 }
0x2cf7   :  { %4087 = vperm.xlu1 %5640, %v8315_v25  }
0x2cfb   :  { %4081 = vperm.xlu1 %5640, %v8310_v36  }
0x2d06   :  { %v4198_v17 = vpop.permute.xlu0 %4197 }
0x2d07   :  { %v4200_v48 = vmul.f32 %v5868_v14, %v4198_v17  ;;  %v8387_v17 = vld [vmem:[#allocation8 + $0x30] sm:$0xff] }
0x2d08   :  { %vm4307_vm1 = vcmp.gt.f32.partialorder %v8387_v17, 0.0 }
0x2d09   :  { %4202 = vrot.lane.b32.xlu0 %v4200_v48, %s8669_s15 }
0x2d65   :  { %v4069_v18 = vpop.permute.xlu1 %4068 }
0x2d66   :  { %v8327_v51 = vadd.f32 %v4069_v18, %v4060_v43 }
0x2d68   :  { %5869 = vtanh.f32 %v8327_v51 }
0x2d72   :  { %v5870_v2 = vpop.eup %5869 }
0x2d73   :  { %4074 = vrot.lane.b32.xlu0 %v5870_v2, %s8669_s15 }
0x2d76   :  { %v8343_v16 = vpop.permute.xlu1 %4087 }
0x2d77   :  { %4221 = vperm.xlu0 %5641, %v8238_v38   ;;  %vm4089_vm13 = vcmp.eq.s32.totalorder %v8343_v16, 1 }
0x2d7a   :  { %v4082_v13 = vpop.permute.xlu1 %4081 }
0x2d7b   :  { %v4203_v1 = vpop.permute.xlu0 %4202 }
0x2d7c   :  { %v8339_v40 = vadd.f32 %v4203_v1, %v4194_v56 }
0x2d7e   :  { %5871 = vtanh.f32 %v8339_v40 }
0x2d88   :  { %v5872_v9 = vpop.eup %5871 }
0x2d89   :  { %4208 = vrot.lane.b32.xlu1 %v5872_v9, %s8669_s15 }
0x2de5   :  { %v4075_v8 = vpop.permute.xlu0 %4074 }
0x2de6   :  { %v4077_v38 = vmul.f32 %v5864_v35, %v4075_v8 }
0x2de8   :  { %v8349_v26 = vsel %vm4089_vm13, %v4077_v38, %v8272_v41  ;;  %v4084_v28 = vmul.f32 %v4082_v13, %v4077_v38  ;;  %v8401_v38 = vsel %vm4089_vm13, %v8327_v51, %v8324_v59 }
0x2de9   :  { %v4234_v12 = vpack.c.bf16 %v8349_v26, %v8349_v26 }
0x2dea   :  { %v4321_v21 = vpack.c.bf16 %v4084_v28, %v4084_v28 }
0x2deb   :  { %4236 = vrot.lane.b32.xlu0 %v4234_v12, %s6632_s11 }
0x2def   :  { %4370 = vrot.lane.b32.xlu0 %v4321_v21, %s6632_s11 }
0x2df6   :  { %v8355_v10 = vpop.permute.xlu0 %4221 }
0x2df7   :  { %vm4223_vm3 = vcmp.eq.s32.totalorder %v8355_v10, 1 }
0x2dfb   :  { %v4209_v5 = vpop.permute.xlu1 %4208 }
0x2dfc   :  { %v8357_v22 = vmul.f32 %v5868_v14, %v4209_v5  ;;  %v8413_v5 = vsel %vm4223_vm3, %v8339_v40, %v8336_v11 }
0x2dfe   :  { %v8364_v41 = vsel %vm4223_vm3, %v8357_v22, %v8287_v52 }
0x2dff   :  { %v4322_v27 = vpack.c.bf16 %v8364_v41, %v8364_v41 }
0x2e01   :  { %4324 = vrot.lane.b32.xlu1 %v4322_v27, %s6632_s11 }
0x2e5d   :  { %v4237_v3 = vpop.permute.xlu0 %4236 }
0x2e5e   :  { %5553 = vmatmul.mubr.msk.bf16.vlgmr.msra.gmra.mrb[104].mxu0 %vm437_vm2, %v4237_v3 }
0x2e5f   :  { %5563 = vmatpush3.bf16.msra.mxu0 %v8000_v44  ;;  %5564 = vmatprep.mubr.msk.bf16.mxu0 %vm6627_vm0, %v6626_v0 }
0x2e60   :  { %5574 = vmatprep.subr.bf16.mxu0 %v6626_v0 }
0x2e61   :  { %v4371_v23 = vpop.permute.xlu0 %4370 }
0x2e66   :  { %5565 = vmatmul.mubr.msk.bf16.vlgmr.msra.gmra.mrb[108].mxu0 %vm437_vm2, %v4371_v23 }
0x2e67   :  { %5575 = vmatpush3.bf16.msra.mxu0 %v7920_v15  ;;  %5576 = vmatprep.mubr.msk.bf16.mxu0 %vm6627_vm0, %v6626_v0 }
0x2e68   :  { %5586 = vmatprep.subr.bf16.mxu0 %v6626_v0 }
0x2e73   :  { %v4325_v52 = vpop.permute.xlu1 %4324 }
0x2e74   :  { %5559 = vmatmul.mubr.msk.bf16.vlgmr.msra.gmra.mrb[104].mxu1 %vm437_vm2, %v4325_v52 }
0x2e75   :  { %5569 = vmatpush3.bf16.msra.mxu1 %v7900_v32  ;;  %5570 = vmatprep.mubr.msk.bf16.mxu1 %vm6627_vm0, %v6626_v0 }
0x2e76   :  { %5580 = vmatprep.subr.bf16.mxu1 %v6626_v0 }
0x2f31   :  { %v4275_v47 = vpop.f32.mrb[104].mxu0 }
0x2f32   :  { %v4281_v57 = vadd.f32 %v4275_v47, %v4233_v33  ;;  %v5554_v34 = vpop.f32.mrb[105].mxu0 }
0x2f33   :  { %v4278_v49 = vpop.f32.mrb[106].mxu0 }
0x2f34   :  { %5873 = vtanh.f32 %v4281_v57  ;;  %v5555_v19 = vpop.f32.mrb[107].mxu0  ;;  %v5028_v60 = vmul.f32 -1.442695, %v4281_v57 }
0x2f39   :  { %v4409_v37 = vpop.f32.mrb[108].mxu0 }
0x2f3a   :  { %v5566_v4 = vpop.f32.mrb[109].mxu0 }
0x2f3b   :  { %v4412_v7 = vpop.f32.mrb[110].mxu0  ;;  %v4462_v4 = vld [vmem:[#allocation4 + $0x38] sm:$0xff] }
0x2f3c   :  { %v5567_v39 = vpop.f32.mrb[111].mxu0 }
0x2f3e   :  { %v5874_v30 = vpop.eup %5873 }
0x2f3f   :  { %4292 = vrot.lane.b32.xlu1 %v5874_v30, %s6630_s9 }
0x2f47   :  { %v4363_v32 = vpop.f32.mrb[104].mxu1 }
0x2f48   :  { %v4410_v42 = vadd.f32 %v4409_v37, %v4363_v32  ;;  %v5560_v31 = vpop.f32.mrb[105].mxu1 }
0x2f49   :  { %v4366_v50 = vpop.f32.mrb[106].mxu1 }
0x2f4a   :  { %v4415_v54 = vadd.f32 %v8012_v45, %v4410_v42  ;;  %v5561_v35 = vpop.f32.mrb[107].mxu1  ;;  %v8392_v45 = vsel %vm4307_vm1, 1, %v6628_v24 }
0x2f4c   :  { %5875 = vtanh.f32 %v4415_v54  ;;  %v5031_v14 = vmul.f32 -1.442695, %v4415_v54 }
0x2f4d   :  { %5877 = vpow2.f32 %v5028_v60 }
0x2f56   :  { %v5876_v46 = vpop.eup %5875 }
0x2f57   :  { %4426 = vrot.lane.b32.xlu0 %v5876_v46, %s6630_s9  ;;  %v5878_v29 = vpop.eup %5877 }
0x2f58   :  { %v4286_v58 = vadd.f32 1.0, %v5878_v29 }
0x2f5a   :  { %5879 = vrcp.f32 %v4286_v58  ;;  %v8460_v58 = vld [vmem:[#allocation32] ss:$0 sm:$0xff] }
0x2f5b   :  { %5881 = vpow2.f32 %v5031_v14 }
0x2f64   :  { %v5880_v48 = vpop.eup %5879 }
0x2f65   :  { %v5882_v2 = vpop.eup %5881  ;;  %v4289_v13 = vmul.f32 %v5880_v48, %v8401_v38 }
0x2f66   :  { %v4420_v56 = vadd.f32 1.0, %v5882_v2 }
0x2f68   :  { %5883 = vrcp.f32 %v4420_v56 }
0x2f72   :  { %v5884_v1 = vpop.eup %5883 }
0x2f73   :  { %v4423_v59 = vmul.f32 %v5884_v1, %v8413_v5 }
0x2fb1   :  { %v4293_v43 = vpop.permute.xlu1 %4292 }
0x2fb2   :  { %v4295_v18 = vmul.f32 %v5880_v48, %v4293_v43 }
0x2fb4   :  { %4297 = vrot.lane.b32.xlu1 %v4295_v18, %s8669_s15 }
0x2fb8   :  { %4316 = vperm.xlu1 %5640, %v8392_v45  }
0x2fbc   :  { %4310 = vperm.xlu1 %5640, %v8387_v17  }
0x2fc9   :  { %v4427_v9 = vpop.permute.xlu0 %4426 }
0x2fca   :  { %v4429_v8 = vmul.f32 %v5884_v1, %v4427_v9 }
0x2fcc   :  { %4431 = vrot.lane.b32.xlu0 %v4429_v8, %s8669_s15 }
0x3026   :  { %v4298_v28 = vpop.permute.xlu1 %4297 }
0x3027   :  { %v8404_v12 = vadd.f32 %v4298_v28, %v4289_v13  ;;  %v4511_v13 = vld [vmem:[#allocation8 + $0x38] sm:$0xff] }
0x3028   :  { %vm4536_vm4 = vcmp.gt.f32.partialorder %v4511_v13, 0.0 }
0x3029   :  { %5885 = vtanh.f32 %v8404_v12 }
0x3033   :  { %v5886_v21 = vpop.eup %5885 }
0x3034   :  { %4303 = vrot.lane.b32.xlu0 %v5886_v21, %s8669_s15 }
0x3037   :  { %v8420_v3 = vpop.permute.xlu1 %4316 }
0x3038   :  { %4450 = vperm.xlu0 %5641, %v8315_v25   ;;  %vm4318_vm14 = vcmp.eq.s32.totalorder %v8420_v3, 1 }
0x303b   :  { %v4311_v52 = vpop.permute.xlu1 %4310 }
0x303e   :  { %v4432_v51 = vpop.permute.xlu0 %4431 }
0x303f   :  { %v8416_v16 = vadd.f32 %v4432_v51, %v4423_v59 }
0x3041   :  { %5887 = vtanh.f32 %v8416_v16 }
0x304b   :  { %v5888_v27 = vpop.eup %5887 }
0x304c   :  { %4437 = vrot.lane.b32.xlu1 %v5888_v27, %s8669_s15 }
0x30a6   :  { %v4304_v23 = vpop.permute.xlu0 %4303 }
0x30a7   :  { %v4306_v25 = vmul.f32 %v5880_v48, %v4304_v23  ;;  %v8471_v23 = vsel %vm4318_vm14, %v8404_v12, %v8401_v38 }
0x30a9   :  { %v8426_v11 = vsel %vm4318_vm14, %v4306_v25, %v8349_v26  ;;  %v4313_v40 = vmul.f32 %v4311_v52, %v4306_v25 }
0x30aa   :  { %v4463_v10 = vpack.c.bf16 %v8426_v11, %v8426_v11 }
0x30ab   :  { %v4550_v33 = vpack.c.bf16 %v4313_v40, %v4313_v40 }
0x30ac   :  { %4465 = vrot.lane.b32.xlu0 %v4463_v10, %s6632_s11 }
0x30b0   :  { %4599 = vrot.lane.b32.xlu0 %v4550_v33, %s6632_s11 }
0x30b7   :  { %v8432_v47 = vpop.permute.xlu0 %4450 }
0x30b8   :  { %vm4452_vm15 = vcmp.eq.s32.totalorder %v8432_v47, 1 }
0x30be   :  { %v4438_v57 = vpop.permute.xlu1 %4437 }
0x30bf   :  { %v8434_v34 = vmul.f32 %v5884_v1, %v4438_v57 }
0x30c1   :  { %v8441_v26 = vsel %vm4452_vm15, %v8434_v34, %v8364_v41 }
0x30c2   :  { %v4551_v49 = vpack.c.bf16 %v8441_v26, %v8441_v26 }
0x30c4   :  { %4553 = vrot.lane.b32.xlu1 %v4551_v49, %s6632_s11 }
0x311e   :  { %v4466_v19 = vpop.permute.xlu0 %4465 }
0x311f   :  { %5571 = vmatmul.mubr.msk.bf16.vlgmr.msra.gmra.mrb[108].mxu1 %vm437_vm2, %v4466_v19 }
0x3120   :  { %5581 = vmatpush3.bf16.msra.mxu1 %v8000_v44  ;;  %5582 = vmatprep.mubr.msk.bf16.mxu1 %vm6627_vm0, %v6626_v0 }
0x3121   :  { %5592 = vmatprep.subr.bf16.mxu1 %v6626_v0 }
0x3122   :  { %v4600_v37 = vpop.permute.xlu0 %4599 }
0x3127   :  { %5583 = vmatmul.mubr.msk.bf16.vlgmr.msra.gmra.mrb[112].mxu1 %vm437_vm2, %v4600_v37 }
0x3128   :  { %5593 = vmatpush3.bf16.msra.mxu1 %v8000_v44  ;;  %5594 = vmatprep.mubr.msk.bf16.mxu1 %vm6627_vm0, %v6626_v0 }
0x3136   :  { %v4554_v41 = vpop.permute.xlu1 %4553 }
0x3137   :  { %5577 = vmatmul.mubr.msk.bf16.vlgmr.msra.gmra.mrb[112].mxu0 %vm437_vm2, %v4554_v41 }
0x3138   :  { %5587 = vmatpush3.bf16.msra.mxu0 %v7920_v15  ;;  %5588 = vmatprep.mubr.msk.bf16.mxu0 %vm6627_vm0, %v6626_v0 }
0x31f2   :  { %v4504_v7 = vpop.f32.mrb[108].mxu1 }
0x31f3   :  { %v4510_v39 = vadd.f32 %v4504_v7, %v4462_v4  ;;  %v5572_v30 = vpop.f32.mrb[109].mxu1 }
0x31f4   :  { %v4507_v32 = vpop.f32.mrb[110].mxu1 }
0x31f5   :  { %5889 = vtanh.f32 %v4510_v39  ;;  %v5573_v42 = vpop.f32.mrb[111].mxu1  ;;  %v5033_v43 = vmul.f32 -1.442695, %v4510_v39 }
0x31fa   :  { %v4638_v31 = vpop.f32.mrb[112].mxu1 }
0x31fb   :  { %v5584_v44 = vpop.f32.mrb[113].mxu1 }
0x31fc   :  { %v4641_v50 = vpop.f32.mrb[114].mxu1 }
0x31fd   :  { %v5585_v54 = vpop.f32.mrb[115].mxu1 }
0x31ff   :  { %v5890_v35 = vpop.eup %5889 }
0x3200   :  { %4521 = vrot.lane.b32.xlu1 %v5890_v35, %s6630_s9 }
0x320a   :  { %v4592_v46 = vpop.f32.mrb[112].mxu0 }
0x320b   :  { %v4639_v60 = vadd.f32 %v4638_v31, %v4592_v46  ;;  %v5578_v15 = vpop.f32.mrb[113].mxu0 }
0x320c   :  { %v4595_v29 = vpop.f32.mrb[114].mxu0 }
0x320d   :  { %v4644_v0 = vadd.f32 %v8460_v58, %v4639_v60  ;;  %v5579_v14 = vpop.f32.mrb[115].mxu0  ;;  %v4543_v29 = vsel %vm4536_vm4, 1, %v6628_v24  ;;  %v5925_v24 = vld [vmem:[#allocation8 + $0x10] sm:$0xff] }
0x320f   :  { %5891 = vtanh.f32 %v4644_v0  ;;  %v5036_v56 = vmul.f32 -1.442695, %v4644_v0  ;;  %v5924_v0 = vld [vmem:[#allocation8 + $0x8] sm:$0xff] }
0x3210   :  { %5893 = vpow2.f32 %v5033_v43 }
0x3219   :  { %v5892_v48 = vpop.eup %5891 }
0x321a   :  { %4655 = vrot.lane.b32.xlu0 %v5892_v48, %s6630_s9  ;;  %v5894_v18 = vpop.eup %5893 }
0x321b   :  { %v4515_v2 = vadd.f32 1.0, %v5894_v18 }
0x321d   :  { %5895 = vrcp.f32 %v4515_v2 }
0x321e   :  { %5897 = vpow2.f32 %v5036_v56 }
0x3227   :  { %v5896_v1 = vpop.eup %5895 }
0x3228   :  { %v5898_v28 = vpop.eup %5897  ;;  %v4518_v25 = vmul.f32 %v5896_v1, %v8471_v23 }
0x3229   :  { %v4649_v21 = vadd.f32 1.0, %v5898_v28 }
0x322b   :  { %5899 = vrcp.f32 %v4649_v21 }
0x3235   :  { %v5900_v59 = vpop.eup %5899 }
0x3272   :  { %v4522_v9 = vpop.permute.xlu1 %4521 }
0x3273   :  { %v4524_v8 = vmul.f32 %v5896_v1, %v4522_v9 }
0x3275   :  { %4526 = vrot.lane.b32.xlu1 %v4524_v8, %s8669_s15 }
0x3279   :  { %4539 = vperm.xlu1 %5640, %v4511_v13  }
0x328c   :  { %v4656_v51 = vpop.permute.xlu0 %4655 }
0x328d   :  { %v4658_v27 = vmul.f32 %v5900_v59, %v4656_v51 }
0x328f   :  { %4660 = vrot.lane.b32.xlu0 %v4658_v27, %s8669_s15 }
0x3293   :  { %4679 = vperm.xlu0 %5641, %v8392_v45   ;;  %v8482_v45 = vsel %vm4452_vm15, %v8416_v16, %v8413_v5 }
0x3294   :  { %v4652_v3 = vmul.f32 %v5900_v59, %v8482_v45 }
0x32e7   :  { %v4527_v52 = vpop.permute.xlu1 %4526 }
0x32e8   :  { %v8474_v40 = vadd.f32 %v4527_v52, %v4518_v25 }
0x32ea   :  { %5901 = vtanh.f32 %v8474_v40 }
0x32f4   :  { %v5902_v10 = vpop.eup %5901 }
0x32f5   :  { %4532 = vrot.lane.b32.xlu1 %v5902_v10, %s8669_s15 }
0x32f8   :  { %v4540_v57 = vpop.permute.xlu1 %4539 }
0x3301   :  { %v4661_v38 = vpop.permute.xlu0 %4660 }
0x3302   :  { %v8485_v12 = vadd.f32 %v4661_v38, %v4652_v3 }
0x3304   :  { %5903 = vtanh.f32 %v8485_v12 }
0x330e   :  { %v5904_v33 = vpop.eup %5903 }
0x330f   :  { %4666 = vrot.lane.b32.xlu0 %v5904_v33, %s8669_s15 }
0x3312   :  { %v4680_v47 = vpop.permute.xlu0 %4679 }
0x3313   :  { %vm4681_vm0 = vcmp.eq.s32.totalorder %v4680_v47, 1 }
0x3314   :  { %v4683_v9 = vsel %vm4681_vm0, %v8485_v12, %v8482_v45 }
0x3367   :  { %v4533_v49 = vpop.permute.xlu1 %4532 }
0x3368   :  { %v4535_v19 = vmul.f32 %v5896_v1, %v4533_v49 }
0x336a   :  { %v4542_v37 = vmul.f32 %v4540_v57, %v4535_v19 }
0x336c   :  { %v4690_v41 = vpack.c.bf16 %v4542_v37, %v4542_v37 }
0x336e   :  { %4739 = vrot.lane.b32.xlu0 %v4690_v41, %s6632_s11 }
0x3381   :  { %v4667_v5 = vpop.permute.xlu0 %4666 }
0x3382   :  { %v8490_v16 = vmul.f32 %v5900_v59, %v4667_v5 }
0x3384   :  { %v8495_v4 = vsel %vm4681_vm0, %v8490_v16, %v8441_v26 }
0x3385   :  { %v4691_v7 = vpack.c.bf16 %v8495_v4, %v8495_v4 }
0x3387   :  { %4693 = vrot.lane.b32.xlu1 %v4691_v7, %s6632_s11 }
0x33e0   :  { %v4740_v39 = vpop.permute.xlu0 %4739 }
0x33e1   :  { %5595 = vmatmul.mubr.msk.bf16.vlgmr.msra.gmra.mrb[116].mxu1 %vm437_vm2, %v4740_v39 }
0x33f9   :  { %v4694_v30 = vpop.permute.xlu1 %4693 }
0x33fa   :  { %5589 = vmatmul.mubr.msk.bf16.vlgmr.msra.gmra.mrb[116].mxu0 %vm437_vm2, %v4694_v30 }
0x34b4   :  { %v4778_v32 = vpop.f32.mrb[116].mxu1 }
0x34b5   :  { %v5596_v42 = vpop.f32.mrb[117].mxu1 }
0x34b6   :  { %v4781_v31 = vpop.f32.mrb[118].mxu1 }
0x34b7   :  { %v5597_v44 = vpop.f32.mrb[119].mxu1 }
0x34cd   :  { %v4732_v50 = vpop.f32.mrb[116].mxu0 }
0x34ce   :  { %v4779_v54 = vadd.f32 %v4778_v32, %v4732_v50  ;;  %v5590_v35 = vpop.f32.mrb[117].mxu0 }
0x34cf   :  { %v4735_v26 = vpop.f32.mrb[118].mxu0 }
0x34d0   :  { %v4784_v46 = vadd.f32 %v8460_v58, %v4779_v54  ;;  %v5591_v60 = vpop.f32.mrb[119].mxu0 }
0x34d2   :  { %5905 = vtanh.f32 %v4784_v46  ;;  %v5039_v14 = vmul.f32 -1.442695, %v4784_v46 }
0x34d4   :  { %5907 = vpow2.f32 %v5039_v14 }
0x34dc   :  { %v5906_v15 = vpop.eup %5905 }
0x34dd   :  { %4795 = vrot.lane.b32.xlu1 %v5906_v15, %s6630_s9 }
0x34de   :  { %v5908_v48 = vpop.eup %5907 }
0x34df   :  { %v4789_v58 = vadd.f32 1.0, %v5908_v48 }
0x34e1   :  { %4545 = vperm.xlu1 %5640, %v4543_v29   ;;  %5909 = vrcp.f32 %v4789_v58 }
0x34e5   :  { %3528 = vperm.xlu1 %5640, %v5924_v0  }
0x34e9   :  { %3986 = vperm.xlu1 %5640, %v8156_v20  }
0x34eb   :  { %v5910_v43 = vpop.eup %5909 }
0x34ed   :  { %4444 = vperm.xlu1 %5640, %v8310_v36   ;;  %v3304_v36 = vmul.f32 %v8055_v6, %v7987_v53 }
0x34f1   :  { %4813 = vperm.xlu1 %5640, %v4511_v13  }
0x354f   :  { %v4796_v18 = vpop.permute.xlu1 %4795 }
0x3550   :  { %v4798_v2 = vmul.f32 %v5910_v43, %v4796_v18 }
0x3552   :  { %4800 = vrot.lane.b32.xlu0 %v4798_v2, %s8669_s15 }
0x3556   :  { %4819 = vperm.xlu0 %5641, %v4543_v29  }
0x355a   :  { %3757 = vperm.xlu0 %5641, %v5925_v24  }
0x355e   :  { %4215 = vperm.xlu0 %5641, %v8233_v61   ;;  %v4792_v61 = vmul.f32 %v5910_v43, %v4683_v9 }
0x3560   :  { %v4546_v56 = vpop.permute.xlu1 %4545 }
0x3561   :  { %vm4547_vm5 = vcmp.eq.s32.totalorder %v4546_v56, 1 }
0x3562   :  { %v4548_v20 = vsel %vm4547_vm5, %v4535_v19, %v8426_v11  ;;  %4673 = vperm.xlu0 %5641, %v8387_v17  }
0x3563   :  { %4831 = vrot.lane.b32.xlu1 %v4548_v20, %s6632_s11 }
0x3564   :  { %v3529_v1 = vpop.permute.xlu1 %3528 }
0x3565   :  { %v3531_v59 = vmul.f32 %v3529_v1, %v8124_v63 }
0x3567   :  { %3312 = vrot.lane.b32.xlu1 %v3304_v36, %s6632_s11 }
0x3568   :  { %v3987_v13 = vpop.permute.xlu1 %3986 }
0x3569   :  { %v3989_v27 = vmul.f32 %v3987_v13, %v8280_v55 }
0x356c   :  { %v4445_v11 = vpop.permute.xlu1 %4444 }
0x356d   :  { %v4447_v63 = vmul.f32 %v4445_v11, %v8434_v34 }
0x3570   :  { %v4814_v17 = vpop.permute.xlu1 %4813 }
0x35c4   :  { %v4801_v8 = vpop.permute.xlu0 %4800 }
0x35c5   :  { %v4803_v28 = vadd.f32 %v4801_v8, %v4792_v61 }
0x35c7   :  { %5911 = vtanh.f32 %v4803_v28 }
0x35d1   :  { %v5912_v21 = vpop.eup %5911 }
0x35d2   :  { %4806 = vrot.lane.b32.xlu0 %v5912_v21, %s8669_s15 }
0x35d5   :  { %v4832_v53 = vpop.permute.xlu1 %4831  ;;  %v4820_v6 = vpop.permute.xlu0 %4819 }
0x35d6   :  { %4834 = vst.msk [vmem:[#allocation47] sm:$0xff] %vm437_vm2, %v4832_v53  ;;  %vm4821_vm6 = vcmp.eq.s32.totalorder %v4820_v6, 1  ;;  %3540 = vrot.lane.b32.xlu0 %v3531_v59, %s6632_s11 }
0x35d7   :  { %v4823_v51 = vsel %vm4821_vm6, %v4803_v28, %v4683_v9 }
0x35d9   :  { %v3313_v25 = vpop.permute.xlu1 %3312  ;;  %v3758_v52 = vpop.permute.xlu0 %3757 }
0x35da   :  { %3315 = vst.msk [vmem:[#allocation46] sm:$0xff] %vm437_vm2, %v3313_v25  ;;  %v3760_v10 = vmul.f32 %v3758_v52, %v8203_v62  ;;  %3998 = vrot.lane.b32.xlu0 %v3989_v27, %s6632_s11  ;;  %v4549_v62 = vsel %vm4547_vm5, %v8474_v40, %v8471_v23 }
0x35dc   :  { %3769 = vrot.lane.b32.xlu1 %v3760_v10, %s6632_s11 }
0x35dd   :  { %v4216_v45 = vpop.permute.xlu0 %4215 }
0x35de   :  { %v4218_v3 = vmul.f32 %v4216_v45, %v8357_v22  ;;  %4456 = vrot.lane.b32.xlu0 %v4447_v63, %s6632_s11 }
0x35e0   :  { %4227 = vrot.lane.b32.xlu1 %v4218_v3, %s6632_s11 }
0x35e1   :  { %v4674_v55 = vpop.permute.xlu0 %4673 }
0x35e2   :  { %v4676_v38 = vmul.f32 %v4674_v55, %v8490_v16 }
0x35e4   :  { %4685 = vrot.lane.b32.xlu1 %v4676_v38, %s6632_s11 }
0x35e8   :  { %4836 = vrot.lane.b32.xlu1 %v4549_v62, %s6633_s23 }
0x3644   :  { %v4807_v34 = vpop.permute.xlu0 %4806 }
0x3645   :  { %v4809_v12 = vmul.f32 %v5910_v43, %v4807_v34 }
0x3647   :  { %v4822_v22 = vsel %vm4821_vm6, %v4809_v12, %v8495_v4  ;;  %v4816_v57 = vmul.f32 %v4814_v17, %v4809_v12 }
0x3648   :  { %4841 = vrot.lane.b32.xlu0 %v4822_v22, %s6632_s11  ;;  %v3541_v33 = vpop.permute.xlu0 %3540 }
0x3649   :  { %3544 = vst.msk [vmem:[#allocation46 + $0x8] sm:$0xff] %vm437_vm2, %v3541_v33 }
0x364c   :  { %4825 = vrot.lane.b32.xlu0 %v4816_v57, %s6632_s11  ;;  %v3999_v49 = vpop.permute.xlu0 %3998 }
0x364d   :  { %4002 = vst.msk [vmem:[#allocation46 + $0x18] sm:$0xff] %vm437_vm2, %v3999_v49 }
0x364e   :  { %v3770_v19 = vpop.permute.xlu1 %3769 }
0x364f   :  { %3773 = vst.msk [vmem:[#allocation46 + $0x10] sm:$0xff] %vm437_vm2, %v3770_v19 }
0x3650   :  { %4847 = vrot.lane.b32.xlu0 %v4823_v51, %s6633_s23  ;;  %v4457_v23 = vpop.permute.xlu0 %4456 }
0x3651   :  { %4460 = vst.msk [vmem:[#allocation46 + $0x28] sm:$0xff] %vm437_vm2, %v4457_v23 }
0x3652   :  { %v4228_v40 = vpop.permute.xlu1 %4227 }
0x3653   :  { %4231 = vst.msk [vmem:[#allocation46 + $0x20] sm:$0xff] %vm437_vm2, %v4228_v40 }
0x3656   :  { %v4686_v37 = vpop.permute.xlu1 %4685 }
0x3657   :  { %4689 = vst.msk [vmem:[#allocation46 + $0x30] sm:$0xff] %vm437_vm2, %v4686_v37 }
0x365a   :  { %v4837_v41 = vpop.permute.xlu1 %4836 }
0x365b   :  { %4839 = vst.msk [vmem:[#allocation49] sm:$0xff] %vm437_vm2, %v4837_v41 }
0x36ba   :  { %v4842_v47 = vpop.permute.xlu0 %4841 }
0x36bb   :  { %4845 = vst.msk [vmem:[#allocation47 + $0x8] sm:$0xff] %vm437_vm2, %v4842_v47 }
0x36bc   :  { %6509 = shalt.err (!%p6506_p2)
}
0x36bd   :  { %s8677_s8 = sld [smem:[#allocation80_spill]] }
0x36c3   :  { %s6510_s0 = scalar_lea.hbm %s8677_s8, 256 }
0x36c4   :  { %p6511_p3 = scmp.ne.s32.totalorder %s8677_s8, %s6510_s0  ;;  %p6514_p4 = scmp.lt.u32.totalorder %s6510_s0, %s8677_s8 }
0x36c6   :  { %p6516_p5 = pnand %p6514_p4, %p6511_p3 }
0x36c8   :  { %6519 = shalt.err (!%p6516_p5)
}
0x36c9   :  { %4875 = dma.vmem_to_hbm [thread:$0]  %s4870_s21, 256, %s8677_s8, [#allocation48], %s8670_s17, %s8670_s17, %s8669_s15   ;;  %v4826_v5 = vpop.permute.xlu0 %4825 }
0x36ca   :  { %s6636_s27 = smov [#allocation49]   ;;  %4829 = vst.msk [vmem:[#allocation46 + $0x38] sm:$0xff] %vm437_vm2, %v4826_v5  ;;  %s6520_s19 = scalar_lea.vmem %s4858_s12, 1024 }
0x36cb   :  { %s4881_s5 = sshll.u32 %s6636_s27, 4  ;;  %p6521_p6 = scmp.ne.s32.totalorder %s4858_s12, %s6520_s19  ;;  %s4882_s5 = int_to_ptr.vmem [resolvable:$true] %s4881_s5 }
0x36cc   :  { %p6525_p7 = scmp.lt.s32.totalorder %s4858_s12, %s4858_s12  ;;  %p6526_p8 = scmp.lt.s32.totalorder %s6520_s19, %s6520_s19 }
0x36ce   :  { %p6527_p9 = por %p6526_p8, %p6525_p7 }
0x36d0   :  { %p6528_p10 = pnand %p6527_p9, %p6521_p6 }
0x36d2   :  { %6531 = shalt.err (!%p6528_p10)
}
0x36d3   :  { %s8678_s7 = sld [smem:[#allocation79_spill]] }
0x36d9   :  { %s6532_s16 = scalar_lea.hbm %s8678_s7, 1024 }
0x36da   :  { %p6533_p11 = scmp.ne.s32.totalorder %s8678_s7, %s6532_s16  ;;  %p6536_p12 = scmp.lt.u32.totalorder %s6532_s16, %s8678_s7 }
0x36dc   :  { %p6538_p13 = pnand %p6536_p12, %p6533_p11 }
0x36de   :  { %6541 = shalt.err (!%p6538_p13)
}
0x36df   :  { %4863 = dma.vmem_to_hbm [thread:$0]  %s4858_s12, 1024, %s8678_s7, [#allocation7], %s8670_s17, %s8670_s17, %s8669_s15   ;;  %v4848_v16 = vpop.permute.xlu0 %4847 }
0x36e0   :  { %4851 = vst.msk [vmem:[#allocation49 + $0x8] sm:$0xff] %vm437_vm2, %v4848_v16  ;;  %s6542_s23 = scalar_lea.vmem %s4882_s5, 256  ;;  %p6547_p1 = scmp.lt.s32.totalorder %s4882_s5, %s4882_s5 }
0x36e1   :  { %p6543_p0 = scmp.ne.s32.totalorder %s4882_s5, %s6542_s23  ;;  %p6548_p2 = scmp.lt.s32.totalorder %s6542_s23, %s6542_s23 }
0x36e3   :  { %p6549_p3 = por %p6548_p2, %p6547_p1 }
0x36e5   :  { %p6550_p4 = pnand %p6549_p3, %p6543_p0 }
0x36e7   :  { %6553 = shalt.err (!%p6550_p4)
}
0x36e8   :  { %s8679_s30 = sld [smem:[#allocation81_spill]] }
0x36ee   :  { %s6554_s26 = scalar_lea.hbm %s8679_s30, 256 }
0x36ef   :  { %p6555_p5 = scmp.ne.s32.totalorder %s8679_s30, %s6554_s26  ;;  %p6558_p6 = scmp.lt.u32.totalorder %s6554_s26, %s8679_s30 }
0x36f1   :  { %p6560_p7 = pnand %p6558_p6, %p6555_p5 }
0x36f3   :  { %6563 = shalt.err (!%p6560_p7)
}
0x36f4   :  { %4887 = dma.vmem_to_hbm [thread:$0]  %s4882_s5, 256, %s8679_s30, [#allocation48], %s8670_s17, %s8670_s17, %s8669_s15  }
0x36f5   :  { %6592 = dma.done.wait [#allocation7], 1024  }
0x36f6   :  { %6593 = vsyncadd [#allocation7], 4294966272 }
0x36f7   :  { %6594 = dma.done.wait [#allocation48], 512  }
0x36f8   :  { %6595 = vsyncadd [#allocation48], 4294966784 }
0x36f9   :  { %4897 = vsyncpa [#allocation6], 1 }
0x36fa   :  { %4898 = vsyncpa [#allocation9], 1 }
0x36fb   :  { %4899 = vsyncpa [#allocation12], 1 }
0x36fc   :  { %4900 = vsyncpa [#allocation15], 1 }
0x36fd   :  { %4901 = vsyncpa [#allocation18], 1 }
0x36fe   :  { %4902 = vsyncpa [#allocation21], 1 }
0x36ff   :  { %4903 = vsyncpa [#allocation24], 1 }
0x3700   :  { %4904 = vsyncpa [#allocation27], 1 }
0x3701   :  { %4905 = vsyncpa [#allocation30], 1 }
0x3702   :  { %4906 = vsyncpa [#allocation33], 1 }
0x3703   :  { %4907 = vsyncpa [#allocation36], 1 }
0x3704   :  { %4908 = vsyncpa [#allocation39], 1 }
0x3705   :  { %4909 = vsyncpa [#allocation42], 1 }
0x3706   :  { %4910 = vsyncpa [#allocation45], 1 }
0x3707   :  { %4911 = vsyncpa [#allocation7], 1 }
0x3708   :  { %4912 = vsyncpa [#allocation48], 1 }

</bundles_post_ra>
